<compile_context>
chip_gen: v6e
topology: v6e:2x2x1
jax: 0.10.0
libtpu: 0.0.40
codegen_flags: <defaults>
</compile_context>

<pallas_src>
import functools

import numpy as np
import jax
import jax.numpy as jnp
from jax.experimental import pallas as pl
from jax.experimental.pallas import tpu as pltpu

THETA = 0.7
BN_EPS = 1e-5


def _round_up(v, m):
    return ((v + m - 1) // m) * m


@functools.lru_cache(maxsize=None)
def _vmem_limit_bytes():
    """Generation-aware scoped-VMEM limit (review item 4)."""
    cap = None
    try:
        cap = int(getattr(pltpu.get_tpu_info(), "vmem_capacity_bytes", 0)) or None
    except Exception:
        cap = None
    if cap is None:
        cap = 64 * 1024 * 1024          # conservative: v7x per-TensorCore VMEM
    cap = min(cap, 128 * 1024 * 1024)   # per-core VMEM is at most 128 MiB
    # Leave headroom for compiler-internal scratch / pipeline buffers.
    return int(min(max(cap - 8 * 1024 * 1024, 48 * 1024 * 1024),
                   100 * 1024 * 1024))


# ----------------------------------------------------------------------------
# Pallas kernel: fused (input BN-apply + ReLU) -> CDC conv -> (stats, optional
# output ReLU).  One grid step handles one batch element.
#
# Shift order: s = 3*r + c with (r, c) the (row, col) offset into the
# reflect-padded input, i.e.
#   (0,0)=conv_lt (0,1)=conv_lm (0,2)=conv_ld
#   (1,0)=conv_mt (1,1)=conv    (1,2)=conv_md
#   (2,0)=conv_rt (2,1)=conv_mr (2,2)=conv_rd
# ----------------------------------------------------------------------------
def _cdc_conv_kernel(xr_ref, w_ref, isc_ref, ish_ref,      # inputs
                     o_ref, sum_ref, sq_ref,               # outputs
                     g_ref,                                # scratch
                     *, H, W, Ck, Cp, apply_in_act, apply_out_relu):
    """Refs:
      xr_ref : (1, H+2, W+2, Ck) bf16   reflect-padded input block
      w_ref  : (3, 3, 9*Ck, Cp)  bf16   [r, kh, (c,kw,cin), cout] packed
                                        weights (theta folded into centre tap)
      isc_ref, ish_ref : (1, Ck) f32    fused input affine (prev layer's BN)
      o_ref  : (1, H, W, Cp)     bf16   raw conv output (pre-BN)
      sum_ref, sq_ref : (1, Cp)  f32    per-channel sum / sum-of-squares
      g_ref  : (3, H+2, W, 9*Ck) bf16   im2col slabs (one per row-shift r)
    """
    # ---- Stage 1: previous layer's BatchNorm affine + ReLU, fused on input.
    x = xr_ref[0]
    if apply_in_act:
        xf = x.astype(jnp.float32) * isc_ref[0] + ish_ref[0]
        x = jnp.maximum(xf, 0.0).astype(jnp.bfloat16)

    K9 = 9 * Ck

    # ---- Stage 2: im2col slab build.  For row-shift r the slab holds, for
    # every padded output row p (p = 1..H) and output column j, the 9 (c, kw)
    # input pixels packed along the lane dim:
    #   g[r, p, j, (3c+kw)*Ck : +Ck] =
    #       [1<=p<=H] * [1<=j+kw<=W] * x[r+p-1, c+j+kw-1, :]
    # Rows p=0 and p=H+1 are explicit zero rows, so every kh window in Stage 3
    # covers all H output rows with the per-shift zero padding already baked
    # into the data (no per-tap output-row masking / accumulator RMW).
    zero_row = jnp.zeros((1, W, K9), jnp.bfloat16)
    zero_col = jnp.zeros((H, 1, Ck), jnp.bfloat16)
    for r in range(3):
        g_ref[r, 0:1] = zero_row
        g_ref[r, H + 1:H + 2] = zero_row
        for c in range(3):
            for kw in range(3):
                lo = (3 * c + kw) * Ck        # lane-aligned (Ck % 128 == 0)
                d = c + kw                    # x column at output col j: j+d-1
                if 1 <= d <= 3:
                    # Full-width, aligned copy (21 of the 27 cases).
                    g_ref[r, 1:H + 1, :, lo:lo + Ck] = \
                        x[r:r + H, d - 1:d - 1 + W, :]
                elif d == 0:                  # (c, kw) == (0, 0)
                    g_ref[r, 1:H + 1, 1:W, lo:lo + Ck] = x[r:r + H, 0:W - 1, :]
                else:                         # d == 4, (c, kw) == (2, 2)
                    g_ref[r, 1:H + 1, 0:W - 1, lo:lo + Ck] = \
                        x[r:r + H, 3:W + 2, :]
                # kw-dependent zero padding along W (one masked column).
                if kw == 0:
                    g_ref[r, 1:H + 1, 0:1, lo:lo + Ck] = zero_col
                elif kw == 2:
                    g_ref[r, 1:H + 1, W - 1:W, lo:lo + Ck] = zero_col

    # ---- Stage 3: 9 MXU matmuls (3 row-shifts x 3 kernel rows), K = 9*Ck
    # each, summed as one f32 value chain.  No accumulator scratch, no
    # zero-init, no per-tap read-modify-write passes.
    y = None
    for r in range(3):
        for kh in range(3):
            lhs = g_ref[r, kh:kh + H].reshape(H * W, K9)
            part = jnp.dot(lhs, w_ref[r, kh],
                           preferred_element_type=jnp.float32)
            y = part if y is None else y + part

    # ---- Stage 4: BatchNorm statistics of the raw output + store.
    sum_ref[0] = jnp.sum(y, axis=0)
    sq_ref[0] = jnp.sum(y * y, axis=0)
    if apply_out_relu:
        y = jnp.maximum(y, 0.0)
    o_ref[0] = y.reshape(H, W, Cp).astype(o_ref.dtype)


# ----------------------------------------------------------------------------
# Wrappers
# ----------------------------------------------------------------------------
def cdc_conv(x, w9, theta=THETA, in_scale=None, in_shift=None, out_relu=False):
    """Fused CDC conv layer.

    x  : (B, H, W, Ca)  input (Ca may include zero pad channels)
    w9 : (9, 3, 3, Cin_l, Cout_l) logical weights, shift order s = 3*r + c
    in_scale/in_shift : optional (Ca,) f32 per-channel affine (the previous
        layer's BatchNorm), applied with ReLU to the input inside the kernel.
    Returns (raw_out (B,H,W,Cp) bf16, ch_sum (Cp,) f32, ch_sumsq (Cp,) f32).
    """
    B, H, W, Ca = x.shape
    _, _, _, Cin_l, Cout_l = w9.shape
    assert Ca >= Cin_l
    Ck = _round_up(Ca, 128)          # lane-padded contraction channels
    Cp = _round_up(Cout_l, 128)      # lane-padded output channels
    K9 = 9 * Ck

    # Exact theta fold into the centre tap, then pad Cin -> Ck, Cout -> Cp.
    w_eff = w9.at[:, 1, 1, :, :].add(-theta * w9.sum(axis=(1, 2)))
    w_eff = jnp.pad(w_eff, ((0, 0), (0, 0), (0, 0),
                            (0, Ck - Cin_l), (0, Cp - Cout_l)))
    # Pack to [r, kh, (c, kw, cin), cout]  (matches the slab lane layout).
    w6 = w_eff.reshape(3, 3, 3, 3, Ck, Cp)                 # [r, c, kh, kw, ...]
    wp = jnp.transpose(w6, (0, 2, 1, 3, 4, 5)).reshape(3, 3, K9, Cp)
    wp = wp.astype(jnp.bfloat16)

    # Channel-pad the input to Ck, then reflect-pad spatially (XLA glue).
    xc = x.astype(jnp.bfloat16)
    if Ca < Ck:
        xc = jnp.pad(xc, ((0, 0), (0, 0), (0, 0), (0, Ck - Ca)))
    xr = jnp.pad(xc, ((0, 0), (1, 1), (1, 1), (0, 0)), mode="reflect")

    apply_in_act = in_scale is not None
    if apply_in_act:
        isc = jnp.pad(in_scale.reshape(-1).astype(jnp.float32),
                      (0, Ck - in_scale.shape[-1]))
        ish = jnp.pad(in_shift.reshape(-1).astype(jnp.float32),
                      (0, Ck - in_shift.shape[-1]))
    else:
        isc = jnp.zeros((Ck,), jnp.float32)
        ish = jnp.zeros((Ck,), jnp.float32)
    isc = isc.reshape(1, Ck)
    ish = ish.reshape(1, Ck)

    kern = functools.partial(_cdc_conv_kernel, H=H, W=W, Ck=Ck, Cp=Cp,
                             apply_in_act=apply_in_act,
                             apply_out_relu=out_relu)
    out, csum, csq = pl.pallas_call(
        kern,
        out_shape=(jax.ShapeDtypeStruct((B, H, W, Cp), jnp.bfloat16),
                   jax.ShapeDtypeStruct((B, Cp), jnp.float32),
                   jax.ShapeDtypeStruct((B, Cp), jnp.float32)),
        grid_spec=pltpu.PrefetchScalarGridSpec(
            num_scalar_prefetch=0,
            grid=(B,),
            in_specs=[
                pl.BlockSpec((1, H + 2, W + 2, Ck), lambda b: (b, 0, 0, 0)),
                # Whole packed weight tensor, constant index -> DMA'd once.
                pl.BlockSpec((3, 3, K9, Cp), lambda b: (0, 0, 0, 0)),
                pl.BlockSpec((1, Ck), lambda b: (0, 0)),
                pl.BlockSpec((1, Ck), lambda b: (0, 0)),
            ],
            out_specs=[
                pl.BlockSpec((1, H, W, Cp), lambda b: (b, 0, 0, 0)),
                pl.BlockSpec((1, Cp), lambda b: (b, 0)),
                pl.BlockSpec((1, Cp), lambda b: (b, 0)),
            ],
            scratch_shapes=[
                pltpu.VMEM((3, H + 2, W, K9), jnp.bfloat16),
            ]),
        compiler_params=pltpu.CompilerParams(
            dimension_semantics=("parallel",),
            vmem_limit_bytes=_vmem_limit_bytes()),
    )(xr, wp, isc, ish)
    return out, csum.sum(axis=0), csq.sum(axis=0)


def bn_scale_shift(ch_sum, ch_sumsq, gamma, beta, out, eps=BN_EPS):
    """BatchNorm2d folded to per-channel scale/shift.

    Uses training-mode batch statistics (biased variance), matching a freshly
    constructed PyTorch module run in its default train() state; pad channels
    get scale = shift = 0 (gamma/beta padded with 0)."""
    B, H, W, Cp = out.shape
    n = B * H * W
    mean = ch_sum / n
    var = jnp.maximum(ch_sumsq / n - mean * mean, 0.0)
    gamma_p = jnp.pad(gamma.astype(jnp.float32), (0, Cp - gamma.shape[0]))
    beta_p = jnp.pad(beta.astype(jnp.float32), (0, Cp - beta.shape[0]))
    scale = gamma_p * jax.lax.rsqrt(var + eps)
    shift = beta_p - mean * scale
    return scale, shift


def maxpool_3x3_s2_p1(x):
    # MaxPool2d(kernel_size=3, stride=2, padding=1) on NHWC.
    return jax.lax.reduce_window(
        x, -jnp.inf, jax.lax.max,
        window_dimensions=(1, 3, 3, 1),
        window_strides=(1, 2, 2, 1),
        padding=((0, 0), (1, 1), (1, 1), (0, 0)))


def upsample_bilinear_32(x):
    # nn.Upsample(size=(32, 32), mode='bilinear', align_corners=False).
    B, _, _, C = x.shape
    return jax.image.resize(x, (B, 32, 32, C), method="bilinear")


# ----------------------------------------------------------------------------
# Pure-jnp reference of the CDC conv (used only for a tiny self-check).
# ----------------------------------------------------------------------------
def cdc_conv_reference(x, w9, theta=THETA):
    B, H, W, Cin = x.shape
    xr = jnp.pad(x, ((0, 0), (1, 1), (1, 1), (0, 0)), mode="reflect")
    wsum = w9.sum(axis=(1, 2))
    out = jnp.zeros((B, H, W, w9.shape[-1]), jnp.float32)
    for s in range(9):
        r, c = s // 3, s % 3
        v = xr[:, r:r + H, c:c + W, :]
        vp = jnp.pad(v, ((0, 0), (1, 1), (1, 1), (0, 0)))
        for kh in range(3):
            for kw in range(3):
                out = out + jnp.einsum("bhwc,cd->bhwd",
                                       vp[:, kh:kh + H, kw:kw + W, :],
                                       w9[s, kh, kw])
        out = out - theta * jnp.einsum("bhwc,cd->bhwd", v, wsum[s])
    return out


# ----------------------------------------------------------------------------
# Parameters (deterministic synthetic init; logical shapes follow the module)
# ----------------------------------------------------------------------------
def init_params(key):
    def conv9(k, cin, cout):
        std = 1.0 / np.sqrt(9.0 * cin)
        return std * jax.random.normal(k, (9, 3, 3, cin, cout), jnp.float32)

    keys = iter(jax.random.split(key, 16))
    p = {}
    p["conv1"] = {"w": conv9(next(keys), 3, 64),
                  "gamma": jnp.ones(64), "beta": jnp.zeros(64)}

    def block(cin, k):
        ks = jax.random.split(k, 3)
        dims = [(cin, 128), (128, 196), (196, 128)]
        return [{"w": conv9(ks[i], a, b),
                 "gamma": jnp.ones(b), "beta": jnp.zeros(b)}
                for i, (a, b) in enumerate(dims)]

    p["block1"] = block(64, next(keys))
    p["block2"] = block(128, next(keys))
    p["block3"] = block(128, next(keys))
    p["lastconv1"] = {"w": conv9(next(keys), 128 * 3, 128),
                      "gamma": jnp.ones(128), "beta": jnp.zeros(128)}
    p["lastconv2"] = {"w": conv9(next(keys), 128, 64),
                      "gamma": jnp.ones(64), "beta": jnp.zeros(64)}
    p["lastconv3"] = {"w": conv9(next(keys), 64, 1)}
    return p


# ----------------------------------------------------------------------------
# CDCN forward
# ----------------------------------------------------------------------------
def cdcn_forward(params, x_nchw, theta=THETA):
    x = jnp.transpose(x_nchw, (0, 2, 3, 1)).astype(jnp.float32)   # -> NHWC

    # conv1; its BatchNorm + ReLU is fused into the next conv's input stage.
    o, cs, cq = cdc_conv(x, params["conv1"]["w"], theta=theta)
    sc, sh = bn_scale_shift(cs, cq, params["conv1"]["gamma"],
                            params["conv1"]["beta"], o)

    def run_block(h, in_sc, in_sh, plist):
        # h: previous layer's raw conv output (bf16) with its BN passed as
        # (in_sc, in_sh), or an already-activated pooled tensor (in_sc=None).
        for p in plist:
            h, cs, cq = cdc_conv(h, p["w"], theta=theta,
                                 in_scale=in_sc, in_shift=in_sh)
            in_sc, in_sh = bn_scale_shift(cs, cq, p["gamma"], p["beta"], h)
        # Materialize the final BN+ReLU only for the non-conv consumer
        # (maxpool); XLA fuses this elementwise op into the reduce_window.
        a = jnp.maximum(h.astype(jnp.float32) * in_sc + in_sh, 0.0)
        return maxpool_3x3_s2_p1(a)

    xb1 = run_block(o, sc, sh, params["block1"])          # (B, 16, 16, 128)
    xb2 = run_block(xb1, None, None, params["block2"])    # (B,  8,  8, 128)
    xb3 = run_block(xb2, None, None, params["block3"])    # (B,  4,  4, 128)

    xcat = jnp.concatenate([upsample_bilinear_32(xb1),
                            upsample_bilinear_32(xb2),
                            upsample_bilinear_32(xb3)], axis=-1)  # (B,32,32,384)

    o, cs, cq = cdc_conv(xcat, params["lastconv1"]["w"], theta=theta)
    sc, sh = bn_scale_shift(cs, cq, params["lastconv1"]["gamma"],
                            params["lastconv1"]["beta"], o)
    o, cs, cq = cdc_conv(o, params["lastconv2"]["w"], theta=theta,
                         in_scale=sc, in_shift=sh)
    sc, sh = bn_scale_shift(cs, cq, params["lastconv2"]["gamma"],
                            params["lastconv2"]["beta"], o)
    # lastconv3: ReLU but no BatchNorm.  Cout=1 is padded to 128 lanes inside
    # the kernel (lane-dense stores) and sliced here; ReLU is fused in-kernel,
    # so no extra identity affine pass.
    o, _, _ = cdc_conv(o, params["lastconv3"]["w"], theta=theta,
                       in_scale=sc, in_shift=sh, out_relu=True)
    map_x = o[..., 0].astype(jnp.float32)

    x_block1 = jnp.transpose(xb1, (0, 3, 1, 2))           # back to NCHW
    x_block2 = jnp.transpose(xb2, (0, 3, 1, 2))
    return map_x, x_block1, x_block2


if __name__ == "__main__":
    key = jax.random.PRNGKey(0)
    kp, kx, kc1, kc2 = jax.random.split(key, 4)

    # --- tiny numerical self-check of the fused CDC conv kernel -------------
    xt = jax.random.normal(kc1, (1, 8, 8, 3), jnp.float32)
    wt = 0.2 * jax.random.normal(kc2, (9, 3, 3, 3, 5), jnp.float32)
    # Round operands to bf16 so both paths see identical inputs.
    xt = xt.astype(jnp.bfloat16).astype(jnp.float32)
    wt = wt.astype(jnp.bfloat16).astype(jnp.float32)
    got, _, _ = jax.jit(cdc_conv)(xt, wt)
    got = got[..., :5].astype(jnp.float32)
    ref = jax.jit(cdc_conv_reference)(xt, wt)
    err = float(jnp.max(jnp.abs(got - ref)))
    tol = 5e-2 + 5e-2 * float(jnp.max(jnp.abs(ref)))
    assert err <= tol, f"CDC conv mismatch: max abs err {err} > tol {tol}"

    # --- full CDCN forward ---------------------------------------------------
    params = init_params(kp)
    x = jax.random.normal(kx, (2, 3, 32, 32), jnp.float32)   # NCHW, PyTorch-style

    fwd = jax.jit(cdcn_forward)
    map_x, xb1, xb2 = fwd(params, x)
    jax.block_until_ready((map_x, xb1, xb2))

    assert map_x.shape == (2, 32, 32), map_x.shape
    assert xb1.shape == (2, 128, 16, 16), xb1.shape
    assert xb2.shape == (2, 128, 8, 8), xb2.shape
    assert bool(jnp.all(jnp.isfinite(map_x)))
    print("KERNEL_OK")
</pallas_src>

<mosaic_0001>
module attributes {stable_mosaic.version = 11 : i64} {
  func.func @_cdc_conv_kernel(%arg0: i32, %arg1: memref<1x10x10x128xbf16, #tpu.memory_space<vmem>>, %arg2: memref<3x3x1152x128xbf16, #tpu.memory_space<vmem>>, %arg3: memref<1x128xf32, #tpu.memory_space<vmem>>, %arg4: memref<1x128xf32, #tpu.memory_space<vmem>>, %arg5: memref<1x8x8x128xbf16, #tpu.memory_space<vmem>>, %arg6: memref<1x128xf32, #tpu.memory_space<vmem>>, %arg7: memref<1x128xf32, #tpu.memory_space<vmem>>, %arg8: memref<3x10x8x1152xbf16, #tpu.memory_space<vmem>>) attributes {dimension_semantics = [#tpu.dimension_semantics<parallel>], iteration_bounds = array<i64: 1>, scalar_prefetch = 0 : i64, scratch_operands = 1 : i64, tpu.core_type = #tpu.core_type<tc>, window_params = [{transform_indices = @transform_0, window_bounds = array<i64: 1, 10, 10, 128>}, {pipeline_mode = #tpu.pipeline_mode<synchronous>, transform_indices = @transform_1, window_bounds = array<i64: 3, 3, 1152, 128>}, {pipeline_mode = #tpu.pipeline_mode<synchronous>, transform_indices = @transform_2, window_bounds = array<i64: 1, 128>}, {pipeline_mode = #tpu.pipeline_mode<synchronous>, transform_indices = @transform_3, window_bounds = array<i64: 1, 128>}, {transform_indices = @transform_4, window_bounds = array<i64: 1, 8, 8, 128>}, {transform_indices = @transform_5, window_bounds = array<i64: 1, 128>}, {transform_indices = @transform_6, window_bounds = array<i64: 1, 128>}]} {
    %c0 = arith.constant 0 : index
    %c0_0 = arith.constant 0 : index
    %c0_1 = arith.constant 0 : index
    %c0_2 = arith.constant 0 : index
    %0 = vector.load %arg1[%c0, %c0_0, %c0_1, %c0_2] : memref<1x10x10x128xbf16, #tpu.memory_space<vmem>>, vector<1x10x10x128xbf16>
    %1 = vector.shape_cast %0 : vector<1x10x10x128xbf16> to vector<10x10x128xbf16>
    %cst = arith.constant 0.000000e+00 : bf16
    %2 = vector.broadcast %cst : bf16 to vector<1x8x1152xbf16>
    %cst_3 = arith.constant 0.000000e+00 : bf16
    %3 = vector.broadcast %cst_3 : bf16 to vector<8x1x128xbf16>
    %c0_4 = arith.constant 0 : index
    %c0_5 = arith.constant 0 : index
    %c0_6 = arith.constant 0 : index
    %c0_7 = arith.constant 0 : index
    %4 = vector.load %arg8[%c0_4, %c0_5, %c0_6, %c0_7] : memref<3x10x8x1152xbf16, #tpu.memory_space<vmem>>, vector<1x1x8x1152xbf16>
    %5 = vector.shape_cast %4 : vector<1x1x8x1152xbf16> to vector<1x8x1152xbf16>
    %6 = vector.shape_cast %2 : vector<1x8x1152xbf16> to vector<1x1x8x1152xbf16>
    tpu.vector_store %arg8[%c0_4, %c0_5, %c0_6, %c0_7], %6 {strides = array<i32>} : memref<3x10x8x1152xbf16, #tpu.memory_space<vmem>>, vector<1x1x8x1152xbf16>,
    %c0_8 = arith.constant 0 : index
    %c9 = arith.constant 9 : index
    %c0_9 = arith.constant 0 : index
    %c0_10 = arith.constant 0 : index
    %7 = vector.load %arg8[%c0_8, %c9, %c0_9, %c0_10] : memref<3x10x8x1152xbf16, #tpu.memory_space<vmem>>, vector<1x1x8x1152xbf16>
    %8 = vector.shape_cast %7 : vector<1x1x8x1152xbf16> to vector<1x8x1152xbf16>
    %9 = vector.shape_cast %2 : vector<1x8x1152xbf16> to vector<1x1x8x1152xbf16>
    tpu.vector_store %arg8[%c0_8, %c9, %c0_9, %c0_10], %9 {strides = array<i32>} : memref<3x10x8x1152xbf16, #tpu.memory_space<vmem>>, vector<1x1x8x1152xbf16>,
    %10 = vector.extract_strided_slice %1 {offsets = [0, 0, 0], sizes = [8, 7, 128], strides = [1, 1, 1]} : vector<10x10x128xbf16> to vector<8x7x128xbf16>
    %c0_11 = arith.constant 0 : index
    %c1 = arith.constant 1 : index
    %c1_12 = arith.constant 1 : index
    %c0_13 = arith.constant 0 : index
    %11 = vector.load %arg8[%c0_11, %c1, %c1_12, %c0_13] : memref<3x10x8x1152xbf16, #tpu.memory_space<vmem>>, vector<1x8x7x128xbf16>
    %12 = vector.shape_cast %11 : vector<1x8x7x128xbf16> to vector<8x7x128xbf16>
    %13 = vector.shape_cast %10 : vector<8x7x128xbf16> to vector<1x8x7x128xbf16>
    tpu.vector_store %arg8[%c0_11, %c1, %c1_12, %c0_13], %13 {strides = array<i32>} : memref<3x10x8x1152xbf16, #tpu.memory_space<vmem>>, vector<1x8x7x128xbf16>,
    %c0_14 = arith.constant 0 : index
    %c1_15 = arith.constant 1 : index
    %c0_16 = arith.constant 0 : index
    %c0_17 = arith.constant 0 : index
    %14 = vector.load %arg8[%c0_14, %c1_15, %c0_16, %c0_17] : memref<3x10x8x1152xbf16, #tpu.memory_space<vmem>>, vector<1x8x1x128xbf16>
    %15 = vector.shape_cast %14 : vector<1x8x1x128xbf16> to vector<8x1x128xbf16>
    %16 = vector.shape_cast %3 : vector<8x1x128xbf16> to vector<1x8x1x128xbf16>
    tpu.vector_store %arg8[%c0_14, %c1_15, %c0_16, %c0_17], %16 {strides = array<i32>} : memref<3x10x8x1152xbf16, #tpu.memory_space<vmem>>, vector<1x8x1x128xbf16>,
    %17 = vector.extract_strided_slice %1 {offsets = [0, 0, 0], sizes = [8, 8, 128], strides = [1, 1, 1]} : vector<10x10x128xbf16> to vector<8x8x128xbf16>
    %c0_18 = arith.constant 0 : index
    %c1_19 = arith.constant 1 : index
    %c0_20 = arith.constant 0 : index
    %c128 = arith.constant 128 : index
    %18 = vector.load %arg8[%c0_18, %c1_19, %c0_20, %c128] : memref<3x10x8x1152xbf16, #tpu.memory_space<vmem>>, vector<1x8x8x128xbf16>
    %19 = vector.shape_cast %18 : vector<1x8x8x128xbf16> to vector<8x8x128xbf16>
    %20 = vector.shape_cast %17 : vector<8x8x128xbf16> to vector<1x8x8x128xbf16>
    tpu.vector_store %arg8[%c0_18, %c1_19, %c0_20, %c128], %20 {strides = array<i32>} : memref<3x10x8x1152xbf16, #tpu.memory_space<vmem>>, vector<1x8x8x128xbf16>,
    %21 = vector.extract_strided_slice %1 {offsets = [0, 1, 0], sizes = [8, 8, 128], strides = [1, 1, 1]} : vector<10x10x128xbf16> to vector<8x8x128xbf16>
    %c0_21 = arith.constant 0 : index
    %c1_22 = arith.constant 1 : index
    %c0_23 = arith.constant 0 : index
    %c256 = arith.constant 256 : index
    %22 = vector.load %arg8[%c0_21, %c1_22, %c0_23, %c256] : memref<3x10x8x1152xbf16, #tpu.memory_space<vmem>>, vector<1x8x8x128xbf16>
    %23 = vector.shape_cast %22 : vector<1x8x8x128xbf16> to vector<8x8x128xbf16>
    %24 = vector.shape_cast %21 : vector<8x8x128xbf16> to vector<1x8x8x128xbf16>
    tpu.vector_store %arg8[%c0_21, %c1_22, %c0_23, %c256], %24 {strides = array<i32>} : memref<3x10x8x1152xbf16, #tpu.memory_space<vmem>>, vector<1x8x8x128xbf16>,
    %c0_24 = arith.constant 0 : index
    %c1_25 = arith.constant 1 : index
    %c7 = arith.constant 7 : index
    %c256_26 = arith.constant 256 : index
    %25 = vector.load %arg8[%c0_24, %c1_25, %c7, %c256_26] : memref<3x10x8x1152xbf16, #tpu.memory_space<vmem>>, vector<1x8x1x128xbf16>
    %26 = vector.shape_cast %25 : vector<1x8x1x128xbf16> to vector<8x1x128xbf16>
    %27 = vector.shape_cast %3 : vector<8x1x128xbf16> to vector<1x8x1x128xbf16>
    tpu.vector_store %arg8[%c0_24, %c1_25, %c7, %c256_26], %27 {strides = array<i32>} : memref<3x10x8x1152xbf16, #tpu.memory_space<vmem>>, vector<1x8x1x128xbf16>,
    %28 = vector.extract_strided_slice %1 {offsets = [0, 0, 0], sizes = [8, 8, 128], strides = [1, 1, 1]} : vector<10x10x128xbf16> to vector<8x8x128xbf16>
    %c0_27 = arith.constant 0 : index
    %c1_28 = arith.constant 1 : index
    %c0_29 = arith.constant 0 : index
    %c384 = arith.constant 384 : index
    %29 = vector.load %arg8[%c0_27, %c1_28, %c0_29, %c384] : memref<3x10x8x1152xbf16, #tpu.memory_space<vmem>>, vector<1x8x8x128xbf16>
    %30 = vector.shape_cast %29 : vector<1x8x8x128xbf16> to vector<8x8x128xbf16>
    %31 = vector.shape_cast %28 : vector<8x8x128xbf16> to vector<1x8x8x128xbf16>
    tpu.vector_store %arg8[%c0_27, %c1_28, %c0_29, %c384], %31 {strides = array<i32>} : memref<3x10x8x1152xbf16, #tpu.memory_space<vmem>>, vector<1x8x8x128xbf16>,
    %c0_30 = arith.constant 0 : index
    %c1_31 = arith.constant 1 : index
    %c0_32 = arith.constant 0 : index
    %c384_33 = arith.constant 384 : index
    %32 = vector.load %arg8[%c0_30, %c1_31, %c0_32, %c384_33] : memref<3x10x8x1152xbf16, #tpu.memory_space<vmem>>, vector<1x8x1x128xbf16>
    %33 = vector.shape_cast %32 : vector<1x8x1x128xbf16> to vector<8x1x128xbf16>
    %34 = vector.shape_cast %3 : vector<8x1x128xbf16> to vector<1x8x1x128xbf16>
    tpu.vector_store %arg8[%c0_30, %c1_31, %c0_32, %c384_33], %34 {strides = array<i32>} : memref<3x10x8x1152xbf16, #tpu.memory_space<vmem>>, vector<1x8x1x128xbf16>,
    %35 = vector.extract_strided_slice %1 {offsets = [0, 1, 0], sizes = [8, 8, 128], strides = [1, 1, 1]} : vector<10x10x128xbf16> to vector<8x8x128xbf16>
    %c0_34 = arith.constant 0 : index
    %c1_35 = arith.constant 1 : index
    %c0_36 = arith.constant 0 : index
    %c512 = arith.constant 512 : index
    %36 = vector.load %arg8[%c0_34, %c1_35, %c0_36, %c512] : memref<3x10x8x1152xbf16, #tpu.memory_space<vmem>>, vector<1x8x8x128xbf16>
    %37 = vector.shape_cast %36 : vector<1x8x8x128xbf16> to vector<8x8x128xbf16>
    %38 = vector.shape_cast %35 : vector<8x8x128xbf16> to vector<1x8x8x128xbf16>
    tpu.vector_store %arg8[%c0_34, %c1_35, %c0_36, %c512], %38 {strides = array<i32>} : memref<3x10x8x1152xbf16, #tpu.memory_space<vmem>>, vector<1x8x8x128xbf16>,
    %39 = vector.extract_strided_slice %1 {offsets = [0, 2, 0], sizes = [8, 8, 128], strides = [1, 1, 1]} : vector<10x10x128xbf16> to vector<8x8x128xbf16>
    %c0_37 = arith.constant 0 : index
    %c1_38 = arith.constant 1 : index
    %c0_39 = arith.constant 0 : index
    %c640 = arith.constant 640 : index
    %40 = vector.load %arg8[%c0_37, %c1_38, %c0_39, %c640] : memref<3x10x8x1152xbf16, #tpu.memory_space<vmem>>, vector<1x8x8x128xbf16>
    %41 = vector.shape_cast %40 : vector<1x8x8x128xbf16> to vector<8x8x128xbf16>
    %42 = vector.shape_cast %39 : vector<8x8x128xbf16> to vector<1x8x8x128xbf16>
    tpu.vector_store %arg8[%c0_37, %c1_38, %c0_39, %c640], %42 {strides = array<i32>} : memref<3x10x8x1152xbf16, #tpu.memory_space<vmem>>, vector<1x8x8x128xbf16>,
    %c0_40 = arith.constant 0 : index
    %c1_41 = arith.constant 1 : index
    %c7_42 = arith.constant 7 : index
    %c640_43 = arith.constant 640 : index
    %43 = vector.load %arg8[%c0_40, %c1_41, %c7_42, %c640_43] : memref<3x10x8x1152xbf16, #tpu.memory_space<vmem>>, vector<1x8x1x128xbf16>
    %44 = vector.shape_cast %43 : vector<1x8x1x128xbf16> to vector<8x1x128xbf16>
    %45 = vector.shape_cast %3 : vector<8x1x128xbf16> to vector<1x8x1x128xbf16>
    tpu.vector_store %arg8[%c0_40, %c1_41, %c7_42, %c640_43], %45 {strides = array<i32>} : memref<3x10x8x1152xbf16, #tpu.memory_space<vmem>>, vector<1x8x1x128xbf16>,
    %46 = vector.extract_strided_slice %1 {offsets = [0, 1, 0], sizes = [8, 8, 128], strides = [1, 1, 1]} : vector<10x10x128xbf16> to vector<8x8x128xbf16>
    %c0_44 = arith.constant 0 : index
    %c1_45 = arith.constant 1 : index
    %c0_46 = arith.constant 0 : index
    %c768 = arith.constant 768 : index
    %47 = vector.load %arg8[%c0_44, %c1_45, %c0_46, %c768] : memref<3x10x8x1152xbf16, #tpu.memory_space<vmem>>, vector<1x8x8x128xbf16>
    %48 = vector.shape_cast %47 : vector<1x8x8x128xbf16> to vector<8x8x128xbf16>
    %49 = vector.shape_cast %46 : vector<8x8x128xbf16> to vector<1x8x8x128xbf16>
    tpu.vector_store %arg8[%c0_44, %c1_45, %c0_46, %c768], %49 {strides = array<i32>} : memref<3x10x8x1152xbf16, #tpu.memory_space<vmem>>, vector<1x8x8x128xbf16>,
    %c0_47 = arith.constant 0 : index
    %c1_48 = arith.constant 1 : index
    %c0_49 = arith.constant 0 : index
    %c768_50 = arith.constant 768 : index
    %50 = vector.load %arg8[%c0_47, %c1_48, %c0_49, %c768_50] : memref<3x10x8x1152xbf16, #tpu.memory_space<vmem>>, vector<1x8x1x128xbf16>
    %51 = vector.shape_cast %50 : vector<1x8x1x128xbf16> to vector<8x1x128xbf16>
    %52 = vector.shape_cast %3 : vector<8x1x128xbf16> to vector<1x8x1x128xbf16>
    tpu.vector_store %arg8[%c0_47, %c1_48, %c0_49, %c768_50], %52 {strides = array<i32>} : memref<3x10x8x1152xbf16, #tpu.memory_space<vmem>>, vector<1x8x1x128xbf16>,
    %53 = vector.extract_strided_slice %1 {offsets = [0, 2, 0], sizes = [8, 8, 128], strides = [1, 1, 1]} : vector<10x10x128xbf16> to vector<8x8x128xbf16>
    %c0_51 = arith.constant 0 : index
    %c1_52 = arith.constant 1 : index
    %c0_53 = arith.constant 0 : index
    %c896 = arith.constant 896 : index
    %54 = vector.load %arg8[%c0_51, %c1_52, %c0_53, %c896] : memref<3x10x8x1152xbf16, #tpu.memory_space<vmem>>, vector<1x8x8x128xbf16>
    %55 = vector.shape_cast %54 : vector<1x8x8x128xbf16> to vector<8x8x128xbf16>
    %56 = vector.shape_cast %53 : vector<8x8x128xbf16> to vector<1x8x8x128xbf16>
    tpu.vector_store %arg8[%c0_51, %c1_52, %c0_53, %c896], %56 {strides = array<i32>} : memref<3x10x8x1152xbf16, #tpu.memory_space<vmem>>, vector<1x8x8x128xbf16>,
    %57 = vector.extract_strided_slice %1 {offsets = [0, 3, 0], sizes = [8, 7, 128], strides = [1, 1, 1]} : vector<10x10x128xbf16> to vector<8x7x128xbf16>
    %c0_54 = arith.constant 0 : index
    %c1_55 = arith.constant 1 : index
    %c0_56 = arith.constant 0 : index
    %c1024 = arith.constant 1024 : index
    %58 = vector.load %arg8[%c0_54, %c1_55, %c0_56, %c1024] : memref<3x10x8x1152xbf16, #tpu.memory_space<vmem>>, vector<1x8x7x128xbf16>
    %59 = vector.shape_cast %58 : vector<1x8x7x128xbf16> to vector<8x7x128xbf16>
    %60 = vector.shape_cast %57 : vector<8x7x128xbf16> to vector<1x8x7x128xbf16>
    tpu.vector_store %arg8[%c0_54, %c1_55, %c0_56, %c1024], %60 {strides = array<i32>} : memref<3x10x8x1152xbf16, #tpu.memory_space<vmem>>, vector<1x8x7x128xbf16>,
    %c0_57 = arith.constant 0 : index
    %c1_58 = arith.constant 1 : index
    %c7_59 = arith.constant 7 : index
    %c1024_60 = arith.constant 1024 : index
    %61 = vector.load %arg8[%c0_57, %c1_58, %c7_59, %c1024_60] : memref<3x10x8x1152xbf16, #tpu.memory_space<vmem>>, vector<1x8x1x128xbf16>
    %62 = vector.shape_cast %61 : vector<1x8x1x128xbf16> to vector<8x1x128xbf16>
    %63 = vector.shape_cast %3 : vector<8x1x128xbf16> to vector<1x8x1x128xbf16>
    tpu.vector_store %arg8[%c0_57, %c1_58, %c7_59, %c1024_60], %63 {strides = array<i32>} : memref<3x10x8x1152xbf16, #tpu.memory_space<vmem>>, vector<1x8x1x128xbf16>,
    %c1_61 = arith.constant 1 : index
    %c0_62 = arith.constant 0 : index
    %c0_63 = arith.constant 0 : index
    %c0_64 = arith.constant 0 : index
    %64 = vector.load %arg8[%c1_61, %c0_62, %c0_63, %c0_64] : memref<3x10x8x1152xbf16, #tpu.memory_space<vmem>>, vector<1x1x8x1152xbf16>
    %65 = vector.shape_cast %64 : vector<1x1x8x1152xbf16> to vector<1x8x1152xbf16>
    %66 = vector.shape_cast %2 : vector<1x8x1152xbf16> to vector<1x1x8x1152xbf16>
    tpu.vector_store %arg8[%c1_61, %c0_62, %c0_63, %c0_64], %66 {strides = array<i32>} : memref<3x10x8x1152xbf16, #tpu.memory_space<vmem>>, vector<1x1x8x1152xbf16>,
    %c1_65 = arith.constant 1 : index
    %c9_66 = arith.constant 9 : index
    %c0_67 = arith.constant 0 : index
    %c0_68 = arith.constant 0 : index
    %67 = vector.load %arg8[%c1_65, %c9_66, %c0_67, %c0_68] : memref<3x10x8x1152xbf16, #tpu.memory_space<vmem>>, vector<1x1x8x1152xbf16>
    %68 = vector.shape_cast %67 : vector<1x1x8x1152xbf16> to vector<1x8x1152xbf16>
    %69 = vector.shape_cast %2 : vector<1x8x1152xbf16> to vector<1x1x8x1152xbf16>
    tpu.vector_store %arg8[%c1_65, %c9_66, %c0_67, %c0_68], %69 {strides = array<i32>} : memref<3x10x8x1152xbf16, #tpu.memory_space<vmem>>, vector<1x1x8x1152xbf16>,
    %70 = vector.extract_strided_slice %1 {offsets = [1, 0, 0], sizes = [8, 7, 128], strides = [1, 1, 1]} : vector<10x10x128xbf16> to vector<8x7x128xbf16>
    %c1_69 = arith.constant 1 : index
    %c1_70 = arith.constant 1 : index
    %c1_71 = arith.constant 1 : index
    %c0_72 = arith.constant 0 : index
    %71 = vector.load %arg8[%c1_69, %c1_70, %c1_71, %c0_72] : memref<3x10x8x1152xbf16, #tpu.memory_space<vmem>>, vector<1x8x7x128xbf16>
    %72 = vector.shape_cast %71 : vector<1x8x7x128xbf16> to vector<8x7x128xbf16>
    %73 = vector.shape_cast %70 : vector<8x7x128xbf16> to vector<1x8x7x128xbf16>
    tpu.vector_store %arg8[%c1_69, %c1_70, %c1_71, %c0_72], %73 {strides = array<i32>} : memref<3x10x8x1152xbf16, #tpu.memory_space<vmem>>, vector<1x8x7x128xbf16>,
    %c1_73 = arith.constant 1 : index
    %c1_74 = arith.constant 1 : index
    %c0_75 = arith.constant 0 : index
    %c0_76 = arith.constant 0 : index
    %74 = vector.load %arg8[%c1_73, %c1_74, %c0_75, %c0_76] : memref<3x10x8x1152xbf16, #tpu.memory_space<vmem>>, vector<1x8x1x128xbf16>
    %75 = vector.shape_cast %74 : vector<1x8x1x128xbf16> to vector<8x1x128xbf16>
    %76 = vector.shape_cast %3 : vector<8x1x128xbf16> to vector<1x8x1x128xbf16>
    tpu.vector_store %arg8[%c1_73, %c1_74, %c0_75, %c0_76], %76 {strides = array<i32>} : memref<3x10x8x1152xbf16, #tpu.memory_space<vmem>>, vector<1x8x1x128xbf16>,
    %77 = vector.extract_strided_slice %1 {offsets = [1, 0, 0], sizes = [8, 8, 128], strides = [1, 1, 1]} : vector<10x10x128xbf16> to vector<8x8x128xbf16>
    %c1_77 = arith.constant 1 : index
    %c1_78 = arith.constant 1 : index
    %c0_79 = arith.constant 0 : index
    %c128_80 = arith.constant 128 : index
    %78 = vector.load %arg8[%c1_77, %c1_78, %c0_79, %c128_80] : memref<3x10x8x1152xbf16, #tpu.memory_space<vmem>>, vector<1x8x8x128xbf16>
    %79 = vector.shape_cast %78 : vector<1x8x8x128xbf16> to vector<8x8x128xbf16>
    %80 = vector.shape_cast %77 : vector<8x8x128xbf16> to vector<1x8x8x128xbf16>
    tpu.vector_store %arg8[%c1_77, %c1_78, %c0_79, %c128_80], %80 {strides = array<i32>} : memref<3x10x8x1152xbf16, #tpu.memory_space<vmem>>, vector<1x8x8x128xbf16>,
    %81 = vector.extract_strided_slice %1 {offsets = [1, 1, 0], sizes = [8, 8, 128], strides = [1, 1, 1]} : vector<10x10x128xbf16> to vector<8x8x128xbf16>
    %c1_81 = arith.constant 1 : index
    %c1_82 = arith.constant 1 : index
    %c0_83 = arith.constant 0 : index
    %c256_84 = arith.constant 256 : index
    %82 = vector.load %arg8[%c1_81, %c1_82, %c0_83, %c256_84] : memref<3x10x8x1152xbf16, #tpu.memory_space<vmem>>, vector<1x8x8x128xbf16>
    %83 = vector.shape_cast %82 : vector<1x8x8x128xbf16> to vector<8x8x128xbf16>
    %84 = vector.shape_cast %81 : vector<8x8x128xbf16> to vector<1x8x8x128xbf16>
    tpu.vector_store %arg8[%c1_81, %c1_82, %c0_83, %c256_84], %84 {strides = array<i32>} : memref<3x10x8x1152xbf16, #tpu.memory_space<vmem>>, vector<1x8x8x128xbf16>,
    %c1_85 = arith.constant 1 : index
    %c1_86 = arith.constant 1 : index
    %c7_87 = arith.constant 7 : index
    %c256_88 = arith.constant 256 : index
    %85 = vector.load %arg8[%c1_85, %c1_86, %c7_87, %c256_88] : memref<3x10x8x1152xbf16, #tpu.memory_space<vmem>>, vector<1x8x1x128xbf16>
    %86 = vector.shape_cast %85 : vector<1x8x1x128xbf16> to vector<8x1x128xbf16>
    %87 = vector.shape_cast %3 : vector<8x1x128xbf16> to vector<1x8x1x128xbf16>
    tpu.vector_store %arg8[%c1_85, %c1_86, %c7_87, %c256_88], %87 {strides = array<i32>} : memref<3x10x8x1152xbf16, #tpu.memory_space<vmem>>, vector<1x8x1x128xbf16>,
    %88 = vector.extract_strided_slice %1 {offsets = [1, 0, 0], sizes = [8, 8, 128], strides = [1, 1, 1]} : vector<10x10x128xbf16> to vector<8x8x128xbf16>
    %c1_89 = arith.constant 1 : index
    %c1_90 = arith.constant 1 : index
    %c0_91 = arith.constant 0 : index
    %c384_92 = arith.constant 384 : index
    %89 = vector.load %arg8[%c1_89, %c1_90, %c0_91, %c384_92] : memref<3x10x8x1152xbf16, #tpu.memory_space<vmem>>, vector<1x8x8x128xbf16>
    %90 = vector.shape_cast %89 : vector<1x8x8x128xbf16> to vector<8x8x128xbf16>
    %91 = vector.shape_cast %88 : vector<8x8x128xbf16> to vector<1x8x8x128xbf16>
    tpu.vector_store %arg8[%c1_89, %c1_90, %c0_91, %c384_92], %91 {strides = array<i32>} : memref<3x10x8x1152xbf16, #tpu.memory_space<vmem>>, vector<1x8x8x128xbf16>,
    %c1_93 = arith.constant 1 : index
    %c1_94 = arith.constant 1 : index
    %c0_95 = arith.constant 0 : index
    %c384_96 = arith.constant 384 : index
    %92 = vector.load %arg8[%c1_93, %c1_94, %c0_95, %c384_96] : memref<3x10x8x1152xbf16, #tpu.memory_space<vmem>>, vector<1x8x1x128xbf16>
    %93 = vector.shape_cast %92 : vector<1x8x1x128xbf16> to vector<8x1x128xbf16>
    %94 = vector.shape_cast %3 : vector<8x1x128xbf16> to vector<1x8x1x128xbf16>
    tpu.vector_store %arg8[%c1_93, %c1_94, %c0_95, %c384_96], %94 {strides = array<i32>} : memref<3x10x8x1152xbf16, #tpu.memory_space<vmem>>, vector<1x8x1x128xbf16>,
    %95 = vector.extract_strided_slice %1 {offsets = [1, 1, 0], sizes = [8, 8, 128], strides = [1, 1, 1]} : vector<10x10x128xbf16> to vector<8x8x128xbf16>
    %c1_97 = arith.constant 1 : index
    %c1_98 = arith.constant 1 : index
    %c0_99 = arith.constant 0 : index
    %c512_100 = arith.constant 512 : index
    %96 = vector.load %arg8[%c1_97, %c1_98, %c0_99, %c512_100] : memref<3x10x8x1152xbf16, #tpu.memory_space<vmem>>, vector<1x8x8x128xbf16>
    %97 = vector.shape_cast %96 : vector<1x8x8x128xbf16> to vector<8x8x128xbf16>
    %98 = vector.shape_cast %95 : vector<8x8x128xbf16> to vector<1x8x8x128xbf16>
    tpu.vector_store %arg8[%c1_97, %c1_98, %c0_99, %c512_100], %98 {strides = array<i32>} : memref<3x10x8x1152xbf16, #tpu.memory_space<vmem>>, vector<1x8x8x128xbf16>,
    %99 = vector.extract_strided_slice %1 {offsets = [1, 2, 0], sizes = [8, 8, 128], strides = [1, 1, 1]} : vector<10x10x128xbf16> to vector<8x8x128xbf16>
    %c1_101 = arith.constant 1 : index
    %c1_102 = arith.constant 1 : index
    %c0_103 = arith.constant 0 : index
    %c640_104 = arith.constant 640 : index
    %100 = vector.load %arg8[%c1_101, %c1_102, %c0_103, %c640_104] : memref<3x10x8x1152xbf16, #tpu.memory_space<vmem>>, vector<1x8x8x128xbf16>
    %101 = vector.shape_cast %100 : vector<1x8x8x128xbf16> to vector<8x8x128xbf16>
    %102 = vector.shape_cast %99 : vector<8x8x128xbf16> to vector<1x8x8x128xbf16>
    tpu.vector_store %arg8[%c1_101, %c1_102, %c0_103, %c640_104], %102 {strides = array<i32>} : memref<3x10x8x1152xbf16, #tpu.memory_space<vmem>>, vector<1x8x8x128xbf16>,
    %c1_105 = arith.constant 1 : index
    %c1_106 = arith.constant 1 : index
    %c7_107 = arith.constant 7 : index
    %c640_108 = arith.constant 640 : index
    %103 = vector.load %arg8[%c1_105, %c1_106, %c7_107, %c640_108] : memref<3x10x8x1152xbf16, #tpu.memory_space<vmem>>, vector<1x8x1x128xbf16>
    %104 = vector.shape_cast %103 : vector<1x8x1x128xbf16> to vector<8x1x128xbf16>
    %105 = vector.shape_cast %3 : vector<8x1x128xbf16> to vector<1x8x1x128xbf16>
    tpu.vector_store %arg8[%c1_105, %c1_106, %c7_107, %c640_108], %105 {strides = array<i32>} : memref<3x10x8x1152xbf16, #tpu.memory_space<vmem>>, vector<1x8x1x128xbf16>,
    %106 = vector.extract_strided_slice %1 {offsets = [1, 1, 0], sizes = [8, 8, 128], strides = [1, 1, 1]} : vector<10x10x128xbf16> to vector<8x8x128xbf16>
    %c1_109 = arith.constant 1 : index
    %c1_110 = arith.constant 1 : index
    %c0_111 = arith.constant 0 : index
    %c768_112 = arith.constant 768 : index
    %107 = vector.load %arg8[%c1_109, %c1_110, %c0_111, %c768_112] : memref<3x10x8x1152xbf16, #tpu.memory_space<vmem>>, vector<1x8x8x128xbf16>
    %108 = vector.shape_cast %107 : vector<1x8x8x128xbf16> to vector<8x8x128xbf16>
    %109 = vector.shape_cast %106 : vector<8x8x128xbf16> to vector<1x8x8x128xbf16>
    tpu.vector_store %arg8[%c1_109, %c1_110, %c0_111, %c768_112], %109 {strides = array<i32>} : memref<3x10x8x1152xbf16, #tpu.memory_space<vmem>>, vector<1x8x8x128xbf16>,
    %c1_113 = arith.constant 1 : index
    %c1_114 = arith.constant 1 : index
    %c0_115 = arith.constant 0 : index
    %c768_116 = arith.constant 768 : index
    %110 = vector.load %arg8[%c1_113, %c1_114, %c0_115, %c768_116] : memref<3x10x8x1152xbf16, #tpu.memory_space<vmem>>, vector<1x8x1x128xbf16>
    %111 = vector.shape_cast %110 : vector<1x8x1x128xbf16> to vector<8x1x128xbf16>
    %112 = vector.shape_cast %3 : vector<8x1x128xbf16> to vector<1x8x1x128xbf16>
    tpu.vector_store %arg8[%c1_113, %c1_114, %c0_115, %c768_116], %112 {strides = array<i32>} : memref<3x10x8x1152xbf16, #tpu.memory_space<vmem>>, vector<1x8x1x128xbf16>,
    %113 = vector.extract_strided_slice %1 {offsets = [1, 2, 0], sizes = [8, 8, 128], strides = [1, 1, 1]} : vector<10x10x128xbf16> to vector<8x8x128xbf16>
    %c1_117 = arith.constant 1 : index
    %c1_118 = arith.constant 1 : index
    %c0_119 = arith.constant 0 : index
    %c896_120 = arith.constant 896 : index
    %114 = vector.load %arg8[%c1_117, %c1_118, %c0_119, %c896_120] : memref<3x10x8x1152xbf16, #tpu.memory_space<vmem>>, vector<1x8x8x128xbf16>
    %115 = vector.shape_cast %114 : vector<1x8x8x128xbf16> to vector<8x8x128xbf16>
    %116 = vector.shape_cast %113 : vector<8x8x128xbf16> to vector<1x8x8x128xbf16>
    tpu.vector_store %arg8[%c1_117, %c1_118, %c0_119, %c896_120], %116 {strides = array<i32>} : memref<3x10x8x1152xbf16, #tpu.memory_space<vmem>>, vector<1x8x8x128xbf16>,
    %117 = vector.extract_strided_slice %1 {offsets = [1, 3, 0], sizes = [8, 7, 128], strides = [1, 1, 1]} : vector<10x10x128xbf16> to vector<8x7x128xbf16>
    %c1_121 = arith.constant 1 : index
    %c1_122 = arith.constant 1 : index
    %c0_123 = arith.constant 0 : index
    %c1024_124 = arith.constant 1024 : index
    %118 = vector.load %arg8[%c1_121, %c1_122, %c0_123, %c1024_124] : memref<3x10x8x1152xbf16, #tpu.memory_space<vmem>>, vector<1x8x7x128xbf16>
    %119 = vector.shape_cast %118 : vector<1x8x7x128xbf16> to vector<8x7x128xbf16>
    %120 = vector.shape_cast %117 : vector<8x7x128xbf16> to vector<1x8x7x128xbf16>
    tpu.vector_store %arg8[%c1_121, %c1_122, %c0_123, %c1024_124], %120 {strides = array<i32>} : memref<3x10x8x1152xbf16, #tpu.memory_space<vmem>>, vector<1x8x7x128xbf16>,
    %c1_125 = arith.constant 1 : index
    %c1_126 = arith.constant 1 : index
    %c7_127 = arith.constant 7 : index
    %c1024_128 = arith.constant 1024 : index
    %121 = vector.load %arg8[%c1_125, %c1_126, %c7_127, %c1024_128] : memref<3x10x8x1152xbf16, #tpu.memory_space<vmem>>, vector<1x8x1x128xbf16>
    %122 = vector.shape_cast %121 : vector<1x8x1x128xbf16> to vector<8x1x128xbf16>
    %123 = vector.shape_cast %3 : vector<8x1x128xbf16> to vector<1x8x1x128xbf16>
    tpu.vector_store %arg8[%c1_125, %c1_126, %c7_127, %c1024_128], %123 {strides = array<i32>} : memref<3x10x8x1152xbf16, #tpu.memory_space<vmem>>, vector<1x8x1x128xbf16>,
    %c2 = arith.constant 2 : index
    %c0_129 = arith.constant 0 : index
    %c0_130 = arith.constant 0 : index
    %c0_131 = arith.constant 0 : index
    %124 = vector.load %arg8[%c2, %c0_129, %c0_130, %c0_131] : memref<3x10x8x1152xbf16, #tpu.memory_space<vmem>>, vector<1x1x8x1152xbf16>
    %125 = vector.shape_cast %124 : vector<1x1x8x1152xbf16> to vector<1x8x1152xbf16>
    %126 = vector.shape_cast %2 : vector<1x8x1152xbf16> to vector<1x1x8x1152xbf16>
    tpu.vector_store %arg8[%c2, %c0_129, %c0_130, %c0_131], %126 {strides = array<i32>} : memref<3x10x8x1152xbf16, #tpu.memory_space<vmem>>, vector<1x1x8x1152xbf16>,
    %c2_132 = arith.constant 2 : index
    %c9_133 = arith.constant 9 : index
    %c0_134 = arith.constant 0 : index
    %c0_135 = arith.constant 0 : index
    %127 = vector.load %arg8[%c2_132, %c9_133, %c0_134, %c0_135] : memref<3x10x8x1152xbf16, #tpu.memory_space<vmem>>, vector<1x1x8x1152xbf16>
    %128 = vector.shape_cast %127 : vector<1x1x8x1152xbf16> to vector<1x8x1152xbf16>
    %129 = vector.shape_cast %2 : vector<1x8x1152xbf16> to vector<1x1x8x1152xbf16>
    tpu.vector_store %arg8[%c2_132, %c9_133, %c0_134, %c0_135], %129 {strides = array<i32>} : memref<3x10x8x1152xbf16, #tpu.memory_space<vmem>>, vector<1x1x8x1152xbf16>,
    %130 = vector.extract_strided_slice %1 {offsets = [2, 0, 0], sizes = [8, 7, 128], strides = [1, 1, 1]} : vector<10x10x128xbf16> to vector<8x7x128xbf16>
    %c2_136 = arith.constant 2 : index
    %c1_137 = arith.constant 1 : index
    %c1_138 = arith.constant 1 : index
    %c0_139 = arith.constant 0 : index
    %131 = vector.load %arg8[%c2_136, %c1_137, %c1_138, %c0_139] : memref<3x10x8x1152xbf16, #tpu.memory_space<vmem>>, vector<1x8x7x128xbf16>
    %132 = vector.shape_cast %131 : vector<1x8x7x128xbf16> to vector<8x7x128xbf16>
    %133 = vector.shape_cast %130 : vector<8x7x128xbf16> to vector<1x8x7x128xbf16>
    tpu.vector_store %arg8[%c2_136, %c1_137, %c1_138, %c0_139], %133 {strides = array<i32>} : memref<3x10x8x1152xbf16, #tpu.memory_space<vmem>>, vector<1x8x7x128xbf16>,
    %c2_140 = arith.constant 2 : index
    %c1_141 = arith.constant 1 : index
    %c0_142 = arith.constant 0 : index
    %c0_143 = arith.constant 0 : index
    %134 = vector.load %arg8[%c2_140, %c1_141, %c0_142, %c0_143] : memref<3x10x8x1152xbf16, #tpu.memory_space<vmem>>, vector<1x8x1x128xbf16>
    %135 = vector.shape_cast %134 : vector<1x8x1x128xbf16> to vector<8x1x128xbf16>
    %136 = vector.shape_cast %3 : vector<8x1x128xbf16> to vector<1x8x1x128xbf16>
    tpu.vector_store %arg8[%c2_140, %c1_141, %c0_142, %c0_143], %136 {strides = array<i32>} : memref<3x10x8x1152xbf16, #tpu.memory_space<vmem>>, vector<1x8x1x128xbf16>,
    %137 = vector.extract_strided_slice %1 {offsets = [2, 0, 0], sizes = [8, 8, 128], strides = [1, 1, 1]} : vector<10x10x128xbf16> to vector<8x8x128xbf16>
    %c2_144 = arith.constant 2 : index
    %c1_145 = arith.constant 1 : index
    %c0_146 = arith.constant 0 : index
    %c128_147 = arith.constant 128 : index
    %138 = vector.load %arg8[%c2_144, %c1_145, %c0_146, %c128_147] : memref<3x10x8x1152xbf16, #tpu.memory_space<vmem>>, vector<1x8x8x128xbf16>
    %139 = vector.shape_cast %138 : vector<1x8x8x128xbf16> to vector<8x8x128xbf16>
    %140 = vector.shape_cast %137 : vector<8x8x128xbf16> to vector<1x8x8x128xbf16>
    tpu.vector_store %arg8[%c2_144, %c1_145, %c0_146, %c128_147], %140 {strides = array<i32>} : memref<3x10x8x1152xbf16, #tpu.memory_space<vmem>>, vector<1x8x8x128xbf16>,
    %141 = vector.extract_strided_slice %1 {offsets = [2, 1, 0], sizes = [8, 8, 128], strides = [1, 1, 1]} : vector<10x10x128xbf16> to vector<8x8x128xbf16>
    %c2_148 = arith.constant 2 : index
    %c1_149 = arith.constant 1 : index
    %c0_150 = arith.constant 0 : index
    %c256_151 = arith.constant 256 : index
    %142 = vector.load %arg8[%c2_148, %c1_149, %c0_150, %c256_151] : memref<3x10x8x1152xbf16, #tpu.memory_space<vmem>>, vector<1x8x8x128xbf16>
    %143 = vector.shape_cast %142 : vector<1x8x8x128xbf16> to vector<8x8x128xbf16>
    %144 = vector.shape_cast %141 : vector<8x8x128xbf16> to vector<1x8x8x128xbf16>
    tpu.vector_store %arg8[%c2_148, %c1_149, %c0_150, %c256_151], %144 {strides = array<i32>} : memref<3x10x8x1152xbf16, #tpu.memory_space<vmem>>, vector<1x8x8x128xbf16>,
    %c2_152 = arith.constant 2 : index
    %c1_153 = arith.constant 1 : index
    %c7_154 = arith.constant 7 : index
    %c256_155 = arith.constant 256 : index
    %145 = vector.load %arg8[%c2_152, %c1_153, %c7_154, %c256_155] : memref<3x10x8x1152xbf16, #tpu.memory_space<vmem>>, vector<1x8x1x128xbf16>
    %146 = vector.shape_cast %145 : vector<1x8x1x128xbf16> to vector<8x1x128xbf16>
    %147 = vector.shape_cast %3 : vector<8x1x128xbf16> to vector<1x8x1x128xbf16>
    tpu.vector_store %arg8[%c2_152, %c1_153, %c7_154, %c256_155], %147 {strides = array<i32>} : memref<3x10x8x1152xbf16, #tpu.memory_space<vmem>>, vector<1x8x1x128xbf16>,
    %148 = vector.extract_strided_slice %1 {offsets = [2, 0, 0], sizes = [8, 8, 128], strides = [1, 1, 1]} : vector<10x10x128xbf16> to vector<8x8x128xbf16>
    %c2_156 = arith.constant 2 : index
    %c1_157 = arith.constant 1 : index
    %c0_158 = arith.constant 0 : index
    %c384_159 = arith.constant 384 : index
    %149 = vector.load %arg8[%c2_156, %c1_157, %c0_158, %c384_159] : memref<3x10x8x1152xbf16, #tpu.memory_space<vmem>>, vector<1x8x8x128xbf16>
    %150 = vector.shape_cast %149 : vector<1x8x8x128xbf16> to vector<8x8x128xbf16>
    %151 = vector.shape_cast %148 : vector<8x8x128xbf16> to vector<1x8x8x128xbf16>
    tpu.vector_store %arg8[%c2_156, %c1_157, %c0_158, %c384_159], %151 {strides = array<i32>} : memref<3x10x8x1152xbf16, #tpu.memory_space<vmem>>, vector<1x8x8x128xbf16>,
    %c2_160 = arith.constant 2 : index
    %c1_161 = arith.constant 1 : index
    %c0_162 = arith.constant 0 : index
    %c384_163 = arith.constant 384 : index
    %152 = vector.load %arg8[%c2_160, %c1_161, %c0_162, %c384_163] : memref<3x10x8x1152xbf16, #tpu.memory_space<vmem>>, vector<1x8x1x128xbf16>
    %153 = vector.shape_cast %152 : vector<1x8x1x128xbf16> to vector<8x1x128xbf16>
    %154 = vector.shape_cast %3 : vector<8x1x128xbf16> to vector<1x8x1x128xbf16>
    tpu.vector_store %arg8[%c2_160, %c1_161, %c0_162, %c384_163], %154 {strides = array<i32>} : memref<3x10x8x1152xbf16, #tpu.memory_space<vmem>>, vector<1x8x1x128xbf16>,
    %155 = vector.extract_strided_slice %1 {offsets = [2, 1, 0], sizes = [8, 8, 128], strides = [1, 1, 1]} : vector<10x10x128xbf16> to vector<8x8x128xbf16>
    %c2_164 = arith.constant 2 : index
    %c1_165 = arith.constant 1 : index
    %c0_166 = arith.constant 0 : index
    %c512_167 = arith.constant 512 : index
    %156 = vector.load %arg8[%c2_164, %c1_165, %c0_166, %c512_167] : memref<3x10x8x1152xbf16, #tpu.memory_space<vmem>>, vector<1x8x8x128xbf16>
    %157 = vector.shape_cast %156 : vector<1x8x8x128xbf16> to vector<8x8x128xbf16>
    %158 = vector.shape_cast %155 : vector<8x8x128xbf16> to vector<1x8x8x128xbf16>
    tpu.vector_store %arg8[%c2_164, %c1_165, %c0_166, %c512_167], %158 {strides = array<i32>} : memref<3x10x8x1152xbf16, #tpu.memory_space<vmem>>, vector<1x8x8x128xbf16>,
    %159 = vector.extract_strided_slice %1 {offsets = [2, 2, 0], sizes = [8, 8, 128], strides = [1, 1, 1]} : vector<10x10x128xbf16> to vector<8x8x128xbf16>
    %c2_168 = arith.constant 2 : index
    %c1_169 = arith.constant 1 : index
    %c0_170 = arith.constant 0 : index
    %c640_171 = arith.constant 640 : index
    %160 = vector.load %arg8[%c2_168, %c1_169, %c0_170, %c640_171] : memref<3x10x8x1152xbf16, #tpu.memory_space<vmem>>, vector<1x8x8x128xbf16>
    %161 = vector.shape_cast %160 : vector<1x8x8x128xbf16> to vector<8x8x128xbf16>
    %162 = vector.shape_cast %159 : vector<8x8x128xbf16> to vector<1x8x8x128xbf16>
    tpu.vector_store %arg8[%c2_168, %c1_169, %c0_170, %c640_171], %162 {strides = array<i32>} : memref<3x10x8x1152xbf16, #tpu.memory_space<vmem>>, vector<1x8x8x128xbf16>,
    %c2_172 = arith.constant 2 : index
    %c1_173 = arith.constant 1 : index
    %c7_174 = arith.constant 7 : index
    %c640_175 = arith.constant 640 : index
    %163 = vector.load %arg8[%c2_172, %c1_173, %c7_174, %c640_175] : memref<3x10x8x1152xbf16, #tpu.memory_space<vmem>>, vector<1x8x1x128xbf16>
    %164 = vector.shape_cast %163 : vector<1x8x1x128xbf16> to vector<8x1x128xbf16>
    %165 = vector.shape_cast %3 : vector<8x1x128xbf16> to vector<1x8x1x128xbf16>
    tpu.vector_store %arg8[%c2_172, %c1_173, %c7_174, %c640_175], %165 {strides = array<i32>} : memref<3x10x8x1152xbf16, #tpu.memory_space<vmem>>, vector<1x8x1x128xbf16>,
    %166 = vector.extract_strided_slice %1 {offsets = [2, 1, 0], sizes = [8, 8, 128], strides = [1, 1, 1]} : vector<10x10x128xbf16> to vector<8x8x128xbf16>
    %c2_176 = arith.constant 2 : index
    %c1_177 = arith.constant 1 : index
    %c0_178 = arith.constant 0 : index
    %c768_179 = arith.constant 768 : index
    %167 = vector.load %arg8[%c2_176, %c1_177, %c0_178, %c768_179] : memref<3x10x8x1152xbf16, #tpu.memory_space<vmem>>, vector<1x8x8x128xbf16>
    %168 = vector.shape_cast %167 : vector<1x8x8x128xbf16> to vector<8x8x128xbf16>
    %169 = vector.shape_cast %166 : vector<8x8x128xbf16> to vector<1x8x8x128xbf16>
    tpu.vector_store %arg8[%c2_176, %c1_177, %c0_178, %c768_179], %169 {strides = array<i32>} : memref<3x10x8x1152xbf16, #tpu.memory_space<vmem>>, vector<1x8x8x128xbf16>,
    %c2_180 = arith.constant 2 : index
    %c1_181 = arith.constant 1 : index
    %c0_182 = arith.constant 0 : index
    %c768_183 = arith.constant 768 : index
    %170 = vector.load %arg8[%c2_180, %c1_181, %c0_182, %c768_183] : memref<3x10x8x1152xbf16, #tpu.memory_space<vmem>>, vector<1x8x1x128xbf16>
    %171 = vector.shape_cast %170 : vector<1x8x1x128xbf16> to vector<8x1x128xbf16>
    %172 = vector.shape_cast %3 : vector<8x1x128xbf16> to vector<1x8x1x128xbf16>
    tpu.vector_store %arg8[%c2_180, %c1_181, %c0_182, %c768_183], %172 {strides = array<i32>} : memref<3x10x8x1152xbf16, #tpu.memory_space<vmem>>, vector<1x8x1x128xbf16>,
    %173 = vector.extract_strided_slice %1 {offsets = [2, 2, 0], sizes = [8, 8, 128], strides = [1, 1, 1]} : vector<10x10x128xbf16> to vector<8x8x128xbf16>
    %c2_184 = arith.constant 2 : index
    %c1_185 = arith.constant 1 : index
    %c0_186 = arith.constant 0 : index
    %c896_187 = arith.constant 896 : index
    %174 = vector.load %arg8[%c2_184, %c1_185, %c0_186, %c896_187] : memref<3x10x8x1152xbf16, #tpu.memory_space<vmem>>, vector<1x8x8x128xbf16>
    %175 = vector.shape_cast %174 : vector<1x8x8x128xbf16> to vector<8x8x128xbf16>
    %176 = vector.shape_cast %173 : vector<8x8x128xbf16> to vector<1x8x8x128xbf16>
    tpu.vector_store %arg8[%c2_184, %c1_185, %c0_186, %c896_187], %176 {strides = array<i32>} : memref<3x10x8x1152xbf16, #tpu.memory_space<vmem>>, vector<1x8x8x128xbf16>,
    %177 = vector.extract_strided_slice %1 {offsets = [2, 3, 0], sizes = [8, 7, 128], strides = [1, 1, 1]} : vector<10x10x128xbf16> to vector<8x7x128xbf16>
    %c2_188 = arith.constant 2 : index
    %c1_189 = arith.constant 1 : index
    %c0_190 = arith.constant 0 : index
    %c1024_191 = arith.constant 1024 : index
    %178 = vector.load %arg8[%c2_188, %c1_189, %c0_190, %c1024_191] : memref<3x10x8x1152xbf16, #tpu.memory_space<vmem>>, vector<1x8x7x128xbf16>
    %179 = vector.shape_cast %178 : vector<1x8x7x128xbf16> to vector<8x7x128xbf16>
    %180 = vector.shape_cast %177 : vector<8x7x128xbf16> to vector<1x8x7x128xbf16>
    tpu.vector_store %arg8[%c2_188, %c1_189, %c0_190, %c1024_191], %180 {strides = array<i32>} : memref<3x10x8x1152xbf16, #tpu.memory_space<vmem>>, vector<1x8x7x128xbf16>,
    %c2_192 = arith.constant 2 : index
    %c1_193 = arith.constant 1 : index
    %c7_194 = arith.constant 7 : index
    %c1024_195 = arith.constant 1024 : index
    %181 = vector.load %arg8[%c2_192, %c1_193, %c7_194, %c1024_195] : memref<3x10x8x1152xbf16, #tpu.memory_space<vmem>>, vector<1x8x1x128xbf16>
    %182 = vector.shape_cast %181 : vector<1x8x1x128xbf16> to vector<8x1x128xbf16>
    %183 = vector.shape_cast %3 : vector<8x1x128xbf16> to vector<1x8x1x128xbf16>
    tpu.vector_store %arg8[%c2_192, %c1_193, %c7_194, %c1024_195], %183 {strides = array<i32>} : memref<3x10x8x1152xbf16, #tpu.memory_space<vmem>>, vector<1x8x1x128xbf16>,
    %c0_196 = arith.constant 0 : index
    %c0_197 = arith.constant 0 : index
    %c0_198 = arith.constant 0 : index
    %c0_199 = arith.constant 0 : index
    %184 = vector.load %arg8[%c0_196, %c0_197, %c0_198, %c0_199] : memref<3x10x8x1152xbf16, #tpu.memory_space<vmem>>, vector<1x8x8x1152xbf16>
    %185 = vector.shape_cast %184 : vector<1x8x8x1152xbf16> to vector<8x8x1152xbf16>
    %186 = vector.shape_cast %185 : vector<8x8x1152xbf16> to vector<64x1152xbf16>
    %c0_200 = arith.constant 0 : index
    %c0_201 = arith.constant 0 : index
    %c0_202 = arith.constant 0 : index
    %c0_203 = arith.constant 0 : index
    %187 = vector.load %arg2[%c0_200, %c0_201, %c0_202, %c0_203] : memref<3x3x1152x128xbf16, #tpu.memory_space<vmem>>, vector<1x1x1152x128xbf16>
    %188 = vector.shape_cast %187 : vector<1x1x1152x128xbf16> to vector<1152x128xbf16>
    %cst_204 = arith.constant dense<0.000000e+00> : vector<64x128xf32>
    %189 = tpu.matmul %186, %188, %cst_204 {dimension_numbers = #tpu.dot_dimension_numbers<[1], [0], [0], [1], [0, 0, 1, 1], [], []>} : vector<64x1152xbf16>, vector<1152x128xbf16>, vector<64x128xf32> -> vector<64x128xf32>
    %c0_205 = arith.constant 0 : index
    %c1_206 = arith.constant 1 : index
    %c0_207 = arith.constant 0 : index
    %c0_208 = arith.constant 0 : index
    %190 = vector.load %arg8[%c0_205, %c1_206, %c0_207, %c0_208] : memref<3x10x8x1152xbf16, #tpu.memory_space<vmem>>, vector<1x8x8x1152xbf16>
    %191 = vector.shape_cast %190 : vector<1x8x8x1152xbf16> to vector<8x8x1152xbf16>
    %192 = vector.shape_cast %191 : vector<8x8x1152xbf16> to vector<64x1152xbf16>
    %c0_209 = arith.constant 0 : index
    %c1_210 = arith.constant 1 : index
    %c0_211 = arith.constant 0 : index
    %c0_212 = arith.constant 0 : index
    %193 = vector.load %arg2[%c0_209, %c1_210, %c0_211, %c0_212] : memref<3x3x1152x128xbf16, #tpu.memory_space<vmem>>, vector<1x1x1152x128xbf16>
    %194 = vector.shape_cast %193 : vector<1x1x1152x128xbf16> to vector<1152x128xbf16>
    %cst_213 = arith.constant dense<0.000000e+00> : vector<64x128xf32>
    %195 = tpu.matmul %192, %194, %cst_213 {dimension_numbers = #tpu.dot_dimension_numbers<[1], [0], [0], [1], [0, 0, 1, 1], [], []>} : vector<64x1152xbf16>, vector<1152x128xbf16>, vector<64x128xf32> -> vector<64x128xf32>
    %196 = arith.addf %189, %195 : vector<64x128xf32>
    %c0_214 = arith.constant 0 : index
    %c2_215 = arith.constant 2 : index
    %c0_216 = arith.constant 0 : index
    %c0_217 = arith.constant 0 : index
    %197 = vector.load %arg8[%c0_214, %c2_215, %c0_216, %c0_217] : memref<3x10x8x1152xbf16, #tpu.memory_space<vmem>>, vector<1x8x8x1152xbf16>
    %198 = vector.shape_cast %197 : vector<1x8x8x1152xbf16> to vector<8x8x1152xbf16>
    %199 = vector.shape_cast %198 : vector<8x8x1152xbf16> to vector<64x1152xbf16>
    %c0_218 = arith.constant 0 : index
    %c2_219 = arith.constant 2 : index
    %c0_220 = arith.constant 0 : index
    %c0_221 = arith.constant 0 : index
    %200 = vector.load %arg2[%c0_218, %c2_219, %c0_220, %c0_221] : memref<3x3x1152x128xbf16, #tpu.memory_space<vmem>>, vector<1x1x1152x128xbf16>
    %201 = vector.shape_cast %200 : vector<1x1x1152x128xbf16> to vector<1152x128xbf16>
    %cst_222 = arith.constant dense<0.000000e+00> : vector<64x128xf32>
    %202 = tpu.matmul %199, %201, %cst_222 {dimension_numbers = #tpu.dot_dimension_numbers<[1], [0], [0], [1], [0, 0, 1, 1], [], []>} : vector<64x1152xbf16>, vector<1152x128xbf16>, vector<64x128xf32> -> vector<64x128xf32>
    %203 = arith.addf %196, %202 : vector<64x128xf32>
    %c1_223 = arith.constant 1 : index
    %c0_224 = arith.constant 0 : index
    %c0_225 = arith.constant 0 : index
    %c0_226 = arith.constant 0 : index
    %204 = vector.load %arg8[%c1_223, %c0_224, %c0_225, %c0_226] : memref<3x10x8x1152xbf16, #tpu.memory_space<vmem>>, vector<1x8x8x1152xbf16>
    %205 = vector.shape_cast %204 : vector<1x8x8x1152xbf16> to vector<8x8x1152xbf16>
    %206 = vector.shape_cast %205 : vector<8x8x1152xbf16> to vector<64x1152xbf16>
    %c1_227 = arith.constant 1 : index
    %c0_228 = arith.constant 0 : index
    %c0_229 = arith.constant 0 : index
    %c0_230 = arith.constant 0 : index
    %207 = vector.load %arg2[%c1_227, %c0_228, %c0_229, %c0_230] : memref<3x3x1152x128xbf16, #tpu.memory_space<vmem>>, vector<1x1x1152x128xbf16>
    %208 = vector.shape_cast %207 : vector<1x1x1152x128xbf16> to vector<1152x128xbf16>
    %cst_231 = arith.constant dense<0.000000e+00> : vector<64x128xf32>
    %209 = tpu.matmul %206, %208, %cst_231 {dimension_numbers = #tpu.dot_dimension_numbers<[1], [0], [0], [1], [0, 0, 1, 1], [], []>} : vector<64x1152xbf16>, vector<1152x128xbf16>, vector<64x128xf32> -> vector<64x128xf32>
    %210 = arith.addf %203, %209 : vector<64x128xf32>
    %c1_232 = arith.constant 1 : index
    %c1_233 = arith.constant 1 : index
    %c0_234 = arith.constant 0 : index
    %c0_235 = arith.constant 0 : index
    %211 = vector.load %arg8[%c1_232, %c1_233, %c0_234, %c0_235] : memref<3x10x8x1152xbf16, #tpu.memory_space<vmem>>, vector<1x8x8x1152xbf16>
    %212 = vector.shape_cast %211 : vector<1x8x8x1152xbf16> to vector<8x8x1152xbf16>
    %213 = vector.shape_cast %212 : vector<8x8x1152xbf16> to vector<64x1152xbf16>
    %c1_236 = arith.constant 1 : index
    %c1_237 = arith.constant 1 : index
    %c0_238 = arith.constant 0 : index
    %c0_239 = arith.constant 0 : index
    %214 = vector.load %arg2[%c1_236, %c1_237, %c0_238, %c0_239] : memref<3x3x1152x128xbf16, #tpu.memory_space<vmem>>, vector<1x1x1152x128xbf16>
    %215 = vector.shape_cast %214 : vector<1x1x1152x128xbf16> to vector<1152x128xbf16>
    %cst_240 = arith.constant dense<0.000000e+00> : vector<64x128xf32>
    %216 = tpu.matmul %213, %215, %cst_240 {dimension_numbers = #tpu.dot_dimension_numbers<[1], [0], [0], [1], [0, 0, 1, 1], [], []>} : vector<64x1152xbf16>, vector<1152x128xbf16>, vector<64x128xf32> -> vector<64x128xf32>
    %217 = arith.addf %210, %216 : vector<64x128xf32>
    %c1_241 = arith.constant 1 : index
    %c2_242 = arith.constant 2 : index
    %c0_243 = arith.constant 0 : index
    %c0_244 = arith.constant 0 : index
    %218 = vector.load %arg8[%c1_241, %c2_242, %c0_243, %c0_244] : memref<3x10x8x1152xbf16, #tpu.memory_space<vmem>>, vector<1x8x8x1152xbf16>
    %219 = vector.shape_cast %218 : vector<1x8x8x1152xbf16> to vector<8x8x1152xbf16>
    %220 = vector.shape_cast %219 : vector<8x8x1152xbf16> to vector<64x1152xbf16>
    %c1_245 = arith.constant 1 : index
    %c2_246 = arith.constant 2 : index
    %c0_247 = arith.constant 0 : index
    %c0_248 = arith.constant 0 : index
    %221 = vector.load %arg2[%c1_245, %c2_246, %c0_247, %c0_248] : memref<3x3x1152x128xbf16, #tpu.memory_space<vmem>>, vector<1x1x1152x128xbf16>
    %222 = vector.shape_cast %221 : vector<1x1x1152x128xbf16> to vector<1152x128xbf16>
    %cst_249 = arith.constant dense<0.000000e+00> : vector<64x128xf32>
    %223 = tpu.matmul %220, %222, %cst_249 {dimension_numbers = #tpu.dot_dimension_numbers<[1], [0], [0], [1], [0, 0, 1, 1], [], []>} : vector<64x1152xbf16>, vector<1152x128xbf16>, vector<64x128xf32> -> vector<64x128xf32>
    %224 = arith.addf %217, %223 : vector<64x128xf32>
    %c2_250 = arith.constant 2 : index
    %c0_251 = arith.constant 0 : index
    %c0_252 = arith.constant 0 : index
    %c0_253 = arith.constant 0 : index
    %225 = vector.load %arg8[%c2_250, %c0_251, %c0_252, %c0_253] : memref<3x10x8x1152xbf16, #tpu.memory_space<vmem>>, vector<1x8x8x1152xbf16>
    %226 = vector.shape_cast %225 : vector<1x8x8x1152xbf16> to vector<8x8x1152xbf16>
    %227 = vector.shape_cast %226 : vector<8x8x1152xbf16> to vector<64x1152xbf16>
    %c2_254 = arith.constant 2 : index
    %c0_255 = arith.constant 0 : index
    %c0_256 = arith.constant 0 : index
    %c0_257 = arith.constant 0 : index
    %228 = vector.load %arg2[%c2_254, %c0_255, %c0_256, %c0_257] : memref<3x3x1152x128xbf16, #tpu.memory_space<vmem>>, vector<1x1x1152x128xbf16>
    %229 = vector.shape_cast %228 : vector<1x1x1152x128xbf16> to vector<1152x128xbf16>
    %cst_258 = arith.constant dense<0.000000e+00> : vector<64x128xf32>
    %230 = tpu.matmul %227, %229, %cst_258 {dimension_numbers = #tpu.dot_dimension_numbers<[1], [0], [0], [1], [0, 0, 1, 1], [], []>} : vector<64x1152xbf16>, vector<1152x128xbf16>, vector<64x128xf32> -> vector<64x128xf32>
    %231 = arith.addf %224, %230 : vector<64x128xf32>
    %c2_259 = arith.constant 2 : index
    %c1_260 = arith.constant 1 : index
    %c0_261 = arith.constant 0 : index
    %c0_262 = arith.constant 0 : index
    %232 = vector.load %arg8[%c2_259, %c1_260, %c0_261, %c0_262] : memref<3x10x8x1152xbf16, #tpu.memory_space<vmem>>, vector<1x8x8x1152xbf16>
    %233 = vector.shape_cast %232 : vector<1x8x8x1152xbf16> to vector<8x8x1152xbf16>
    %234 = vector.shape_cast %233 : vector<8x8x1152xbf16> to vector<64x1152xbf16>
    %c2_263 = arith.constant 2 : index
    %c1_264 = arith.constant 1 : index
    %c0_265 = arith.constant 0 : index
    %c0_266 = arith.constant 0 : index
    %235 = vector.load %arg2[%c2_263, %c1_264, %c0_265, %c0_266] : memref<3x3x1152x128xbf16, #tpu.memory_space<vmem>>, vector<1x1x1152x128xbf16>
    %236 = vector.shape_cast %235 : vector<1x1x1152x128xbf16> to vector<1152x128xbf16>
    %cst_267 = arith.constant dense<0.000000e+00> : vector<64x128xf32>
    %237 = tpu.matmul %234, %236, %cst_267 {dimension_numbers = #tpu.dot_dimension_numbers<[1], [0], [0], [1], [0, 0, 1, 1], [], []>} : vector<64x1152xbf16>, vector<1152x128xbf16>, vector<64x128xf32> -> vector<64x128xf32>
    %238 = arith.addf %231, %237 : vector<64x128xf32>
    %c2_268 = arith.constant 2 : index
    %c2_269 = arith.constant 2 : index
    %c0_270 = arith.constant 0 : index
    %c0_271 = arith.constant 0 : index
    %239 = vector.load %arg8[%c2_268, %c2_269, %c0_270, %c0_271] : memref<3x10x8x1152xbf16, #tpu.memory_space<vmem>>, vector<1x8x8x1152xbf16>
    %240 = vector.shape_cast %239 : vector<1x8x8x1152xbf16> to vector<8x8x1152xbf16>
    %241 = vector.shape_cast %240 : vector<8x8x1152xbf16> to vector<64x1152xbf16>
    %c2_272 = arith.constant 2 : index
    %c2_273 = arith.constant 2 : index
    %c0_274 = arith.constant 0 : index
    %c0_275 = arith.constant 0 : index
    %242 = vector.load %arg2[%c2_272, %c2_273, %c0_274, %c0_275] : memref<3x3x1152x128xbf16, #tpu.memory_space<vmem>>, vector<1x1x1152x128xbf16>
    %243 = vector.shape_cast %242 : vector<1x1x1152x128xbf16> to vector<1152x128xbf16>
    %cst_276 = arith.constant dense<0.000000e+00> : vector<64x128xf32>
    %244 = tpu.matmul %241, %243, %cst_276 {dimension_numbers = #tpu.dot_dimension_numbers<[1], [0], [0], [1], [0, 0, 1, 1], [], []>} : vector<64x1152xbf16>, vector<1152x128xbf16>, vector<64x128xf32> -> vector<64x128xf32>
    %245 = arith.addf %238, %244 : vector<64x128xf32>
    %cst_277 = arith.constant dense<0.000000e+00> : vector<128xf32>
    %246 = vector.multi_reduction <add>, %245, %cst_277 [0] : vector<64x128xf32> to vector<128xf32>
    %c0_278 = arith.constant 0 : index
    %c0_279 = arith.constant 0 : index
    %247 = vector.load %arg6[%c0_278, %c0_279] : memref<1x128xf32, #tpu.memory_space<vmem>>, vector<1x128xf32>
    %248 = vector.shape_cast %247 : vector<1x128xf32> to vector<128xf32>
    %249 = vector.shape_cast %246 : vector<128xf32> to vector<1x128xf32>
    tpu.vector_store %arg6[%c0_278, %c0_279], %249 {strides = array<i32>} : memref<1x128xf32, #tpu.memory_space<vmem>>, vector<1x128xf32>,
    %250 = arith.mulf %245, %245 : vector<64x128xf32>
    %cst_280 = arith.constant dense<0.000000e+00> : vector<128xf32>
    %251 = vector.multi_reduction <add>, %250, %cst_280 [0] : vector<64x128xf32> to vector<128xf32>
    %c0_281 = arith.constant 0 : index
    %c0_282 = arith.constant 0 : index
    %252 = vector.load %arg7[%c0_281, %c0_282] : memref<1x128xf32, #tpu.memory_space<vmem>>, vector<1x128xf32>
    %253 = vector.shape_cast %252 : vector<1x128xf32> to vector<128xf32>
    %254 = vector.shape_cast %251 : vector<128xf32> to vector<1x128xf32>
    tpu.vector_store %arg7[%c0_281, %c0_282], %254 {strides = array<i32>} : memref<1x128xf32, #tpu.memory_space<vmem>>, vector<1x128xf32>,
    %255 = vector.shape_cast %245 : vector<64x128xf32> to vector<8x8x128xf32>
    %256 = arith.truncf %255 : vector<8x8x128xf32> to vector<8x8x128xbf16>
    %c0_283 = arith.constant 0 : index
    %c0_284 = arith.constant 0 : index
    %c0_285 = arith.constant 0 : index
    %c0_286 = arith.constant 0 : index
    %257 = vector.load %arg5[%c0_283, %c0_284, %c0_285, %c0_286] : memref<1x8x8x128xbf16, #tpu.memory_space<vmem>>, vector<1x8x8x128xbf16>
    %258 = vector.shape_cast %257 : vector<1x8x8x128xbf16> to vector<8x8x128xbf16>
    %259 = vector.shape_cast %256 : vector<8x8x128xbf16> to vector<1x8x8x128xbf16>
    tpu.vector_store %arg5[%c0_283, %c0_284, %c0_285, %c0_286], %259 {strides = array<i32>} : memref<1x8x8x128xbf16, #tpu.memory_space<vmem>>, vector<1x8x8x128xbf16>,
    return
  }
  func.func @transform_0(%arg0: i32) -> (i32, i32, i32, i32) {
    %c0_i32 = arith.constant 0 : i32
    %c0_i32_0 = arith.constant 0 : i32
    %c0_i32_1 = arith.constant 0 : i32
    %c0_i32_2 = arith.constant 0 : i32
    return %arg0, %c0_i32, %c0_i32_0, %c0_i32_1 : i32, i32, i32, i32
  }
  func.func @transform_1(%arg0: i32) -> (i32, i32, i32, i32) {
    %c0_i32 = arith.constant 0 : i32
    %c0_i32_0 = arith.constant 0 : i32
    %c0_i32_1 = arith.constant 0 : i32
    %c0_i32_2 = arith.constant 0 : i32
    %c0_i32_3 = arith.constant 0 : i32
    return %c0_i32, %c0_i32_0, %c0_i32_1, %c0_i32_2 : i32, i32, i32, i32
  }
  func.func @transform_2(%arg0: i32) -> (i32, i32) {
    %c0_i32 = arith.constant 0 : i32
    %c0_i32_0 = arith.constant 0 : i32
    %c0_i32_1 = arith.constant 0 : i32
    return %c0_i32, %c0_i32_0 : i32, i32
  }
  func.func @transform_3(%arg0: i32) -> (i32, i32) {
    %c0_i32 = arith.constant 0 : i32
    %c0_i32_0 = arith.constant 0 : i32
    %c0_i32_1 = arith.constant 0 : i32
    return %c0_i32, %c0_i32_0 : i32, i32
  }
  func.func @transform_4(%arg0: i32) -> (i32, i32, i32, i32) {
    %c0_i32 = arith.constant 0 : i32
    %c0_i32_0 = arith.constant 0 : i32
    %c0_i32_1 = arith.constant 0 : i32
    %c0_i32_2 = arith.constant 0 : i32
    return %arg0, %c0_i32, %c0_i32_0, %c0_i32_1 : i32, i32, i32, i32
  }
  func.func @transform_5(%arg0: i32) -> (i32, i32) {
    %c0_i32 = arith.constant 0 : i32
    %c0_i32_0 = arith.constant 0 : i32
    return %arg0, %c0_i32 : i32, i32
  }
  func.func @transform_6(%arg0: i32) -> (i32, i32) {
    %c0_i32 = arith.constant 0 : i32
    %c0_i32_0 = arith.constant 0 : i32
    return %arg0, %c0_i32 : i32, i32
  }
}

</mosaic_0001>

<bundles_post_ra>
// kernel: cdc_conv.1
= control target key start
LH: loop header
LB: loop body
LE: loop exit
PB: predicated region body
PF: predicated region fallthrough
CT: control target
= control target key end

     0   :  { %12 = vsyncpa [#allocation4], 0  ;;  %vm119_vm0 = vcmask 1043456   ;;  %v16452_v31 = vmov 0   ;;  %vm146_vm1 = vcmask 1040384   ;;  %vm355_vm10 = vcmask 1042432   ;;  %s20348_s0 = inlined_call_operand.vmem [shape: bf16[1,10,10,128], index: 0, kind: input, shape index: {}]   ;;  %s20349_s1 = inlined_call_operand.vmem [shape: bf16[3,3,1152,128], index: 1, kind: input, shape index: {}]   ;;  %s20350_s2 = inlined_call_operand.vmem [shape: f32[1,128], index: 2, kind: input, shape index: {}, may-alias: {2,3}]   ;;  %s20351_s3 = inlined_call_operand.vmem [shape: f32[1,128], index: 3, kind: input, shape index: {}, may-alias: {2,3}]   ;;  %s20352_s4 = inlined_call_operand.hbm [shape: bf16[1,8,8,128], index: 4, kind: output, shape index: {0}]   ;;  %s20353_s5 = inlined_call_operand.hbm [shape: f32[1,128], index: 5, kind: output, shape index: {1}]   ;;  %s20354_s6 = inlined_call_operand.hbm [shape: f32[1,128], index: 6, kind: output, shape index: {2}]  }
   0x1   :  { %v15434_v0 = vld [vmem:[%s20349_s1 + $0x2b8] sm:$0xff]   ;;  %v15438_v4 = vld [vmem:[%s20349_s1 + $0x2b0] sm:$0xff]   ;;  %v15442_v8 = vld [vmem:[%s20349_s1 + $0x2a8] sm:$0xff]   ;;  %43 = vst [vmem:[#allocation2] sm:$0xff] %v16452_v31  ;;  %vm120_vm2 = vsmask.f32 7938 }
   0x2   :  { %v15435_v1 = vld [vmem:[%s20349_s1 + $0x338] sm:$0xff]   ;;  %13648 = vmatprep.subr.bf16.mxu0 %v15434_v0  ;;  %v15439_v5 = vld [vmem:[%s20349_s1 + $0x330] sm:$0xff]   ;;  %v15443_v9 = vld [vmem:[%s20349_s1 + $0x328] sm:$0xff]   ;;  %47 = vst [vmem:[#allocation2 + $0x20] sm:$0xf] %v16452_v31  ;;  %v20372_v62 = vmov 0 }
   0x3   :  { %v15436_v2 = vld [vmem:[%s20349_s1 + $0x278] sm:$0xff]   ;;  %13688 = vmatprep.subr.bf16.mxu1 %v15435_v1  ;;  %v15440_v6 = vld [vmem:[%s20349_s1 + $0x270] sm:$0xff]   ;;  %v15444_v10 = vld [vmem:[%s20349_s1 + $0x268] sm:$0xff]   ;;  %53 = vst [vmem:[#allocation2 + $0x164] sm:$0xf] %v16452_v31  ;;  %vm356_vm12 = vcmask 1046532  }
   0x4   :  { %v15437_v3 = vld [vmem:[%s20349_s1 + $0x2f8] sm:$0xff]   ;;  %13649 = vmatpush3.bf16.msra.mxu0 %v15436_v2  ;;  %v15441_v7 = vld [vmem:[%s20349_s1 + $0x2f0] sm:$0xff]   ;;  %v15445_v11 = vld [vmem:[%s20349_s1 + $0x2e8] sm:$0xff]   ;;  %615 = vst [vmem:[#allocation2 + $0x188] sm:$0xf] %v16452_v31  ;;  %vm272_vm14 = vcmask 1043459  }
   0x5   :  { %13689 = vmatpush3.bf16.msra.mxu1 %v15437_v3  ;;  %13650 = vmatprep.subr.bf16.mxu0 %v15438_v4  ;;  %v15446_v12 = vld [vmem:[%s20349_s1 + $0x2a0] sm:$0xff]   ;;  %v15450_v16 = vld [vmem:[%s20349_s1 + $0x298] sm:$0xff]   ;;  %v15454_v20 = vld [vmem:[%s20349_s1 + $0x290] sm:$0xff]   ;;  %621 = vst [vmem:[#allocation2 + $0x2cc] sm:$0xf] %v16452_v31 }
   0x6   :  { %13690 = vmatprep.subr.bf16.mxu1 %v15439_v5  ;;  %v15447_v13 = vld [vmem:[%s20349_s1 + $0x320] sm:$0xff]   ;;  %v15451_v17 = vld [vmem:[%s20349_s1 + $0x318] sm:$0xff]   ;;  %v15455_v21 = vld [vmem:[%s20349_s1 + $0x310] sm:$0xff]   ;;  %912 = vst [vmem:[#allocation2 + $0x2f0] sm:$0xf] %v16452_v31 }
   0x7   :  { %v15448_v14 = vld [vmem:[%s20349_s1 + $0x260] sm:$0xff]   ;;  %v15452_v18 = vld [vmem:[%s20349_s1 + $0x258] sm:$0xff]   ;;  %v15456_v22 = vld [vmem:[%s20349_s1 + $0x250] sm:$0xff]   ;;  %918 = vst [vmem:[#allocation2 + $0x434] sm:$0xf] %v16452_v31 }
   0x8   :  { %13651 = vmatpush3.bf16.msra.mxu0 %v15440_v6  ;;  %v15449_v15 = vld [vmem:[%s20349_s1 + $0x2e0] sm:$0xff]   ;;  %v15453_v19 = vld [vmem:[%s20349_s1 + $0x2d8] sm:$0xff]   ;;  %v15457_v23 = vld [vmem:[%s20349_s1 + $0x2d0] sm:$0xff]   ;;  %vm147_vm3 = vsmask.f32 256 }
   0x9   :  { %13691 = vmatpush3.bf16.msra.mxu1 %v15441_v7  ;;  %13652 = vmatprep.subr.bf16.mxu0 %v15442_v8  ;;  %v15458_v24 = vld [vmem:[%s20349_s1 + $0x288] sm:$0xff]   ;;  %v15462_v28 = vld [vmem:[%s20349_s1 + $0x280] sm:$0xff]   ;;  %vm16633_vm4 = vmand %vm119_vm0, %vm120_vm2  ;;  %vm181_vm5 = vsmask.f32 3328  ;;  %vm182_vm6 = vsmask.f32 7440 }
   0xa   :  { %13692 = vmatprep.subr.bf16.mxu1 %v15443_v9  ;;  %v15459_v25 = vld [vmem:[%s20349_s1 + $0x308] sm:$0xff]   ;;  %v15463_v29 = vld [vmem:[%s20349_s1 + $0x300] sm:$0xff]   ;;  %vm16644_vm7 = vmand %vm146_vm1, %vm147_vm3  ;;  %vm273_vm8 = vsmask.f32 7950  ;;  %v20375_v9 = vmov 0 }
   0xb   :  { %v15460_v26 = vld [vmem:[%s20349_s1 + $0x248] sm:$0xff]   ;;  %v15464_v30 = vld [vmem:[%s20349_s1 + $0x240] sm:$0xff]   ;;  %vm16652_vm9 = vmand %vm119_vm0, %vm181_vm5  ;;  %vm470_vm0 = vsmask.f32 2304  ;;  %vm471_vm1 = vsmask.f32 6416 }
   0xc   :  { %13653 = vmatpush3.bf16.msra.mxu0 %v15444_v10  ;;  %v15461_v27 = vld [vmem:[%s20349_s1 + $0x2c8] sm:$0xff]   ;;  %v15465_v32 = vld [vmem:[%s20349_s1 + $0x2c0] sm:$0xff]   ;;  %v15472_v58 = vld [vmem:[%s20349_s1 + $0x3b8] sm:$0xff]  }
   0xd   :  { %13693 = vmatpush3.bf16.msra.mxu1 %v15445_v11  ;;  %13654 = vmatprep.subr.bf16.mxu0 %v15446_v12  ;;  %v16592_v33 = vld [vmem:[%s20348_s0] sm:$0xf]  ;;  %v16597_v34 = vld [vmem:[%s20348_s0 + $0x8] sm:$0xf]  ;;  %v122_v39 = vld [vmem:[#allocation2 + $0x24] sm:$0xf] }
   0xe   :  { %13694 = vmatprep.subr.bf16.mxu1 %v15447_v13  ;;  %v16600_v35 = vshrl.u32 %v16592_v33, 16  ;;  %v16603_v36 = vshll.u32 %v16592_v33, 16  ;;  %v16606_v37 = vshrl.u32 %v16597_v34, 16  ;;  %v16609_v38 = vshll.u32 %v16597_v34, 16  ;;  %173 = vst [vmem:[#allocation2 + $0x28] sm:$0xf] %v16592_v33  ;;  %vm16669_vm11 = vmor %vm181_vm5, %vm182_vm6 }
   0xf   :  { %174 = vst [vmem:[#allocation2 + $0x4c] sm:$0xf] %v16597_v34  ;;  %299 = vst [vmem:[#allocation2 + $0x30] sm:$0xf] %v16592_v33  ;;  %v125_v40 = vld [vmem:[#allocation2 + $0x48] sm:$0xf] }
  0x10   :  { %13655 = vmatpush3.bf16.msra.mxu0 %v15448_v14  ;;  %300 = vst [vmem:[#allocation2 + $0x54] sm:$0xf] %v16597_v34  ;;  %679 = vst [vmem:[#allocation2 + $0x190] sm:$0xf] %v16597_v34  ;;  %v16620_v41 = vld [vmem:[%s20348_s0 + $0x4] sm:$0x1] }
  0x11   :  { %13695 = vmatpush3.bf16.msra.mxu1 %v15449_v15  ;;  %13656 = vmatprep.subr.bf16.mxu0 %v15450_v16  ;;  %729 = vst [vmem:[#allocation2 + $0x198] sm:$0xf] %v16597_v34  ;;  %v57_v42 = vrot.slane %v16600_v35, 7  ;;  %v64_v43 = vrot.slane %v16606_v37, 7  ;;  %v194_v44 = vrot.slane %v16609_v38, 5  ;;  %v184_v46 = vrot.slane %v16600_v35, 4  ;;  %vm16684_vm13 = vmor %vm355_vm10, %vm356_vm12 }
  0x12   :  { %13696 = vmatprep.subr.bf16.mxu1 %v15451_v17  ;;  %v16628_v45 = vld [vmem:[%s20348_s0 + $0xc] sm:$0x1]  ;;  %v185_v48 = vrot.slane %v16603_v36, 5  ;;  %v189_v49 = vshll.u32 %v16620_v41, 16  ;;  %v193_v53 = vrot.slane %v16606_v37, 4  ;;  %v15473_v59 = vld [vmem:[%s20349_s1 + $0x438] sm:$0xff]   ;;  %vm16702_vm15 = vmand %vm272_vm14, %vm273_vm8 }
  0x13   :  { %v60_v50 = vor.u32 %v16603_v36, %v57_v42  ;;  %v16641_v51 = vor.u32 %v16609_v38, %v64_v43  ;;  %v198_v54 = vshll.u32 %v16628_v45, 16  ;;  %v20373_v62 = vsel %vm16669_vm11, 4294967295, %v20372_v62  ;;  %v131_v31 = vld [vmem:[#allocation2 + $0x90] sm:$0xf]  ;;  %vm17110_vm2 = vmor %vm470_vm0, %vm471_vm1  ;;  %v16275_v52 = vld [vmem:[%s20349_s1 + $0x12a0] sm:$0xff]  }
  0x14   :  { %13657 = vmatpush3.bf16.msra.mxu0 %v15452_v18  ;;  %v186_v55 = vor.u32 %v185_v48, %v184_v46  ;;  %v191_v56 = vrot.slane %v189_v49, 5  ;;  %20374 = vst [vmem:[#allocation10_spill] sm:$0xff] %v20373_v62  ;;  %v195_v63 = vor.u32 %v194_v44, %v193_v53  ;;  %v20376_v9 = vsel %vm16684_vm13, 4294967295, %v20375_v9 }
  0x15   :  { %13697 = vmatpush3.bf16.msra.mxu1 %v15453_v19  ;;  %13658 = vmatprep.subr.bf16.mxu0 %v15454_v20  ;;  %v123_v60 = vsel %vm16633_vm4, %v60_v50, %v122_v39  ;;  %v126_v61 = vsel %vm16633_vm4, %v16641_v51, %v125_v40  ;;  %v200_v0 = vrot.slane %v198_v54, 5  ;;  %20377 = vst [vmem:[#allocation11_spill] sm:$0xff] %v20376_v9  ;;  %v11491_v10 = vrot.slane %v16592_v33, 9 }
  0x16   :  { %13698 = vmatprep.subr.bf16.mxu1 %v15455_v21  ;;  %124 = vst [vmem:[#allocation2 + $0x24] sm:$0xf] %v123_v60  ;;  %127 = vst [vmem:[#allocation2 + $0x48] sm:$0xf] %v126_v61  ;;  %v187_v1 = vrot.slane %v186_v55, 4  ;;  %v196_v4 = vrot.slane %v195_v63, 4 }
  0x17   :  { %v307_v2 = vld [vmem:[#allocation2 + $0x30] sm:$0x1]  ;;  %v310_v3 = vld [vmem:[#allocation2 + $0x54] sm:$0x1]  ;;  %v360_v11 = vrot.slane %v16620_v41, 5  ;;  %v11492_v12 = vrot.slane %v16597_v34, 9 }
  0x18   :  { %13659 = vmatpush3.bf16.msra.mxu0 %v15456_v22  ;;  %v308_v5 = vsel %vm16644_vm7, 0, %v307_v2  ;;  %v311_v6 = vsel %vm16644_vm7, 0, %v310_v3  ;;  %v192_v7 = vsel %vm16669_vm11, %v187_v1, %v191_v56  ;;  %v201_v8 = vsel %vm16669_vm11, %v196_v4, %v200_v0  ;;  %v16709_v22 = vld [vmem:[%s20348_s0 + $0x10] sm:$0xf]  ;;  %v15474_v63 = vld [vmem:[%s20349_s1 + $0x378] sm:$0xff]  }
  0x19   :  { %13699 = vmatpush3.bf16.msra.mxu1 %v15457_v23  ;;  %13660 = vmatprep.subr.bf16.mxu0 %v15458_v24  ;;  %309 = vst [vmem:[#allocation2 + $0x30] sm:$0x1] %v308_v5  ;;  %312 = vst [vmem:[#allocation2 + $0x54] sm:$0x1] %v311_v6  ;;  %v361_v13 = vsel %vm16684_vm13, %v11491_v10, %v360_v11  ;;  %v364_v14 = vrot.slane %v16628_v45, 5  ;;  %v477_v17 = vshrl.u32 %v16620_v41, 16 }
  0x1a   :  { %13700 = vmatprep.subr.bf16.mxu1 %v15459_v25  ;;  %264 = vst [vmem:[#allocation2 + $0x2c] sm:$0xf] %v192_v7  ;;  %331 = vst [vmem:[#allocation2 + $0x34] sm:$0xf] %v192_v7  ;;  %v16695_v18 = vrot.slane %v189_v49, 6  ;;  %v69_v25 = vshrl.u32 %v16709_v22, 16 }
  0x1b   :  { %430 = vst [vmem:[#allocation2 + $0x3c] sm:$0xf] %v192_v7  ;;  %265 = vst [vmem:[#allocation2 + $0x50] sm:$0xf] %v201_v8  ;;  %v16714_v23 = vld [vmem:[%s20348_s0 + $0x18] sm:$0xf]  ;;  %v365_v24 = vsel %vm16684_vm13, %v11492_v12, %v364_v14 }
  0x1c   :  { %13661 = vmatpush3.bf16.msra.mxu0 %v15460_v26  ;;  %332 = vst [vmem:[#allocation2 + $0x58] sm:$0xf] %v201_v8  ;;  %431 = vst [vmem:[#allocation2 + $0x60] sm:$0xf] %v201_v8  ;;  %v72_v26 = vshll.u32 %v16709_v22, 16  ;;  %v71_v39 = vrot.slane %v69_v25, 7 }
  0x1d   :  { %13701 = vmatpush3.bf16.msra.mxu1 %v15461_v27  ;;  %13662 = vmatprep.subr.bf16.mxu0 %v15462_v28  ;;  %697 = vst [vmem:[#allocation2 + $0x194] sm:$0xf] %v201_v8  ;;  %761 = vst [vmem:[#allocation2 + $0x19c] sm:$0xf] %v201_v8  ;;  %v149_v15 = vld [vmem:[#allocation2 + $0x24] sm:$0x1] }
  0x1e   :  { %13702 = vmatprep.subr.bf16.mxu1 %v15463_v29  ;;  %808 = vst [vmem:[#allocation2 + $0x1a4] sm:$0xf] %v201_v8  ;;  %v152_v16 = vld [vmem:[#allocation2 + $0x48] sm:$0x1]  ;;  %398 = vst [vmem:[#allocation2 + $0x38] sm:$0xf] %v361_v13  ;;  %v16748_v50 = vor.u32 %v72_v26, %v71_v39 }
  0x1f   :  { %462 = vst [vmem:[#allocation2 + $0x40] sm:$0xf] %v361_v13  ;;  %v150_v19 = vsel %vm16644_vm7, 0, %v149_v15  ;;  %v153_v20 = vsel %vm16644_vm7, 0, %v152_v16  ;;  %v76_v27 = vshrl.u32 %v16714_v23, 16  ;;  %v79_v28 = vshll.u32 %v16714_v23, 16 }
  0x20   :  { %13663 = vmatpush3.bf16.msra.mxu0 %v15464_v30  ;;  %151 = vst [vmem:[#allocation2 + $0x24] sm:$0x1] %v150_v19  ;;  %154 = vst [vmem:[#allocation2 + $0x48] sm:$0x1] %v153_v20  ;;  %v128_v30 = vld [vmem:[#allocation2 + $0x6c] sm:$0xf] }
  0x21   :  { %13703 = vmatpush3.bf16.msra.mxu1 %v15465_v32  ;;  %13728 = vmatprep.subr.bf16.mxu0 %v15472_v58  ;;  %175 = vst [vmem:[#allocation2 + $0x70] sm:$0xf] %v16709_v22  ;;  %176 = vst [vmem:[#allocation2 + $0x94] sm:$0xf] %v16714_v23  ;;  %v275_v29 = vld [vmem:[#allocation2 + $0x2c] sm:$0x8]  ;;  %v129_v0 = vsel %vm16633_vm4, %v16748_v50, %v128_v30 }
  0x22   :  { %13768 = vmatprep.subr.bf16.mxu1 %v15473_v59  ;;  %301 = vst [vmem:[#allocation2 + $0x78] sm:$0xf] %v16709_v22  ;;  %302 = vst [vmem:[#allocation2 + $0x9c] sm:$0xf] %v16714_v23  ;;  %v16737_v32 = vld [vmem:[%s20348_s0 + $0x14] sm:$0x1] }
  0x23   :  { %680 = vst [vmem:[#allocation2 + $0x1b4] sm:$0xf] %v16709_v22  ;;  %681 = vst [vmem:[#allocation2 + $0x1d8] sm:$0xf] %v16714_v23  ;;  %v276_v33 = vsel %vm16702_vm15, 0, %v275_v29  ;;  %v78_v40 = vrot.slane %v76_v27, 7 }
  0x24   :  { %730 = vst [vmem:[#allocation2 + $0x1bc] sm:$0xf] %v16709_v22  ;;  %731 = vst [vmem:[#allocation2 + $0x1e0] sm:$0xf] %v16714_v23  ;;  %v278_v34 = vld [vmem:[#allocation2 + $0x50] sm:$0x8] }
  0x25   :  { %976 = vst [vmem:[#allocation2 + $0x2f8] sm:$0xf] %v16709_v22  ;;  %977 = vst [vmem:[#allocation2 + $0x31c] sm:$0xf] %v16714_v23  ;;  %v202_v42 = vrot.slane %v69_v25, 4  ;;  %v279_v43 = vsel %vm16702_vm15, 0, %v278_v34  ;;  %v16750_v53 = vor.u32 %v79_v28, %v78_v40 }
  0x26   :  { %1026 = vst [vmem:[#allocation2 + $0x300] sm:$0xf] %v16709_v22  ;;  %1027 = vst [vmem:[#allocation2 + $0x324] sm:$0xf] %v16714_v23  ;;  %v203_v44 = vrot.slane %v72_v26, 5  ;;  %v211_v46 = vrot.slane %v76_v27, 4 }
  0x27   :  { %399 = vst [vmem:[#allocation2 + $0x5c] sm:$0xf] %v365_v24  ;;  %463 = vst [vmem:[#allocation2 + $0x64] sm:$0xf] %v365_v24  ;;  %v212_v48 = vrot.slane %v79_v28, 5  ;;  %v493_v55 = vrot.slane %v69_v25, 5  ;;  %v132_v1 = vsel %vm16633_vm4, %v16750_v53, %v131_v31 }
  0x28   :  { %776 = vst [vmem:[#allocation2 + $0x1a0] sm:$0xf] %v365_v24  ;;  %840 = vst [vmem:[#allocation2 + $0x1a8] sm:$0xf] %v365_v24  ;;  %v16746_v49 = vld [vmem:[%s20348_s0 + $0x1c] sm:$0x1]  ;;  %v204_v58 = vor.u32 %v203_v44, %v202_v42 }
  0x29   :  { %277 = vst [vmem:[#allocation2 + $0x2c] sm:$0x8] %v276_v33  ;;  %280 = vst [vmem:[#allocation2 + $0x50] sm:$0x8] %v279_v43  ;;  %v494_v56 = vrot.slane %v72_v26, 6  ;;  %v213_v59 = vor.u32 %v212_v48, %v211_v46  ;;  %v503_v60 = vrot.slane %v76_v27, 5 }
  0x2a   :  { %v504_v61 = vrot.slane %v79_v28, 6  ;;  %v207_v2 = vshll.u32 %v16737_v32, 16  ;;  %v216_v3 = vshll.u32 %v16746_v49, 16  ;;  %v15466_v4 = vld [vmem:[#allocation2 + $0x24] ss:$36 sps:$4 sm:$0xff]   ;;  %v205_v5 = vrot.slane %v204_v58, 4 }
  0x2b   :  { %130 = vst [vmem:[#allocation2 + $0x6c] sm:$0xf] %v129_v0  ;;  %133 = vst [vmem:[#allocation2 + $0x90] sm:$0xf] %v132_v1  ;;  %v214_v6 = vrot.slane %v213_v59, 4  ;;  %v16763_v7 = vor.u32 %v494_v56, %v493_v55  ;;  %v15475_v14 = vld [vmem:[%s20349_s1 + $0x3f8] sm:$0xff]  }
  0x2c   :  { %v16765_v8 = vor.u32 %v504_v61, %v503_v60  ;;  %v15468_v10 = vld [vmem:[#allocation2 + $0x28] ss:$36 sps:$4 sm:$0xff]   ;;  %v209_v11 = vrot.slane %v207_v2, 5  ;;  %v218_v12 = vrot.slane %v216_v3, 5  ;;  %v313_v13 = vld [vmem:[#allocation2 + $0x78] sm:$0x1] }
  0x2d   :  { %v15476_v15 = vld [vmem:[%s20349_s1 + $0x3b0] sm:$0xff]   ;;  %v314_v16 = vsel %vm16644_vm7, 0, %v313_v13  ;;  %v316_v19 = vld [vmem:[#allocation2 + $0x9c] sm:$0x1]  ;;  %2221 = vmatprep.mubr.bf16.mxu0 %v15468_v10  ;;  %v11493_v30 = vrot.slane %v16709_v22, 9  ;;  %v368_v31 = vrot.slane %v16737_v32, 5 }
  0x2e   :  { %v15477_v20 = vld [vmem:[%s20349_s1 + $0x430] sm:$0xff]   ;;  %v210_v25 = vsel %vm16669_vm11, %v205_v5, %v209_v11  ;;  %v219_v26 = vsel %vm16669_vm11, %v214_v6, %v218_v12  ;;  %315 = vst [vmem:[#allocation2 + $0x78] sm:$0x1] %v314_v16  ;;  %v317_v27 = vsel %vm16644_vm7, 0, %v316_v19  ;;  %2222 = vmatmul.mubr.bf16.vlgmr.msra.gmra.mxu0 %v15466_v4  ;;  %v473_v33 = vrot.slane %v16600_v35, 5  ;;  %v15484_v39 = vld [vmem:[%s20349_s1 + $0x3a8] sm:$0xff]  }
  0x2f   :  { %v15478_v24 = vld [vmem:[%s20349_s1 + $0x370] sm:$0xff]   ;;  %266 = vst [vmem:[#allocation2 + $0x74] sm:$0xf] %v210_v25  ;;  %267 = vst [vmem:[#allocation2 + $0x98] sm:$0xf] %v219_v26  ;;  %13729 = vmatpush3.bf16.msra.mxu0 %v15474_v63  ;;  %v11494_v40 = vrot.slane %v16714_v23, 9  ;;  %v369_v35 = vsel %vm16684_vm13, %v11493_v30, %v368_v31 }
  0x30   :  { %v15469_v28 = vld [vmem:[#allocation2 + $0x2c] ss:$36 sps:$4 sm:$0xff]   ;;  %318 = vst [vmem:[#allocation2 + $0x9c] sm:$0x1] %v317_v27  ;;  %333 = vst [vmem:[#allocation2 + $0x7c] sm:$0xf] %v210_v25  ;;  %13730 = vmatprep.subr.bf16.mxu0 %v15476_v15 }
  0x31   :  { %v15471_v29 = vld [vmem:[#allocation2 + $0x30] ss:$36 sps:$4 sm:$0xff]   ;;  %334 = vst [vmem:[#allocation2 + $0xa0] sm:$0xf] %v219_v26  ;;  %432 = vst [vmem:[#allocation2 + $0x84] sm:$0xf] %v210_v25 }
  0x32   :  { %433 = vst [vmem:[#allocation2 + $0xa8] sm:$0xf] %v219_v26  ;;  %698 = vst [vmem:[#allocation2 + $0x1b8] sm:$0xf] %v210_v25  ;;  %2286 = vmatprep.mubr.bf16.mxu1 %v15471_v29  ;;  %v15479_v34 = vld [vmem:[%s20349_s1 + $0x3f0] sm:$0xff]   ;;  %v15485_v43 = vld [vmem:[%s20349_s1 + $0x428] sm:$0xff]  }
  0x33   :  { %699 = vst [vmem:[#allocation2 + $0x1dc] sm:$0xf] %v219_v26  ;;  %762 = vst [vmem:[#allocation2 + $0x1c0] sm:$0xf] %v210_v25  ;;  %2287 = vmatmul.mubr.bf16.vlgmr.msra.gmra.mxu1 %v15469_v28  ;;  %v155_v42 = vld [vmem:[#allocation2 + $0x6c] sm:$0x1]  ;;  %13731 = vmatpush3.bf16.msra.mxu0 %v15478_v24 }
  0x34   :  { %763 = vst [vmem:[#allocation2 + $0x1e4] sm:$0xf] %v219_v26  ;;  %809 = vst [vmem:[#allocation2 + $0x1c8] sm:$0xf] %v210_v25  ;;  %v158_v22 = vld [vmem:[#allocation2 + $0x90] sm:$0x1]  ;;  %13769 = vmatpush3.bf16.msra.mxu1 %v15475_v14  ;;  %13732 = vmatprep.subr.bf16.mxu0 %v15484_v39 }
  0x35   :  { %810 = vst [vmem:[#allocation2 + $0x1ec] sm:$0xf] %v219_v26  ;;  %994 = vst [vmem:[#allocation2 + $0x2fc] sm:$0xf] %v210_v25  ;;  %v372_v44 = vrot.slane %v16746_v49, 5  ;;  %v156_v46 = vsel %vm16644_vm7, 0, %v155_v42  ;;  %13770 = vmatprep.subr.bf16.mxu1 %v15477_v20 }
  0x36   :  { %995 = vst [vmem:[#allocation2 + $0x320] sm:$0xf] %v219_v26  ;;  %1058 = vst [vmem:[#allocation2 + $0x304] sm:$0xf] %v210_v25  ;;  %v159_v48 = vsel %vm16644_vm7, 0, %v158_v22  ;;  %v15486_v23 = vld [vmem:[%s20349_s1 + $0x368] sm:$0xff]  }
  0x37   :  { %1059 = vst [vmem:[#allocation2 + $0x328] sm:$0xf] %v219_v26  ;;  %1105 = vst [vmem:[#allocation2 + $0x30c] sm:$0xf] %v210_v25  ;;  %v373_v55 = vsel %vm16684_vm13, %v11494_v40, %v372_v44  ;;  %v474_v56 = vrot.slane %v16603_v36, 6  ;;  %v15487_v58 = vld [vmem:[%s20349_s1 + $0x3e8] sm:$0xff]   ;;  %13733 = vmatpush3.bf16.msra.mxu0 %v15486_v23 }
  0x38   :  { %1106 = vst [vmem:[#allocation2 + $0x330] sm:$0xf] %v219_v26  ;;  %400 = vst [vmem:[#allocation2 + $0x80] sm:$0xf] %v369_v35  ;;  %v15488_v59 = vld [vmem:[%s20349_s1 + $0x3a0] sm:$0xff]   ;;  %v16835_v36 = vrot.slane %v477_v17, 5  ;;  %13771 = vmatpush3.bf16.msra.mxu1 %v15479_v34 }
  0x39   :  { %464 = vst [vmem:[#allocation2 + $0x88] sm:$0xf] %v369_v35  ;;  %777 = vst [vmem:[#allocation2 + $0x1c4] sm:$0xf] %v369_v35  ;;  %v16826_v60 = vld [vmem:[%s20348_s0 + $0x20] sm:$0xf]  ;;  %v16858_v41 = vor.u32 %v474_v56, %v473_v33  ;;  %13772 = vmatprep.subr.bf16.mxu1 %v15485_v43  ;;  %13734 = vmatprep.subr.bf16.mxu0 %v15488_v59 }
  0x3a   :  { %841 = vst [vmem:[#allocation2 + $0x1cc] sm:$0xf] %v369_v35  ;;  %1073 = vst [vmem:[#allocation2 + $0x308] sm:$0xf] %v369_v35  ;;  %v16831_v61 = vld [vmem:[%s20348_s0 + $0x28] sm:$0xf]  ;;  %v481_v20 = vor.u32 %v16695_v18, %v16835_v36 }
  0x3b   :  { %1137 = vst [vmem:[#allocation2 + $0x310] sm:$0xf] %v369_v35  ;;  %157 = vst [vmem:[#allocation2 + $0x6c] sm:$0x1] %v156_v46  ;;  %v281_v63 = vld [vmem:[#allocation2 + $0x74] sm:$0x8] }
  0x3c   :  { %160 = vst [vmem:[#allocation2 + $0x90] sm:$0x1] %v159_v48  ;;  %401 = vst [vmem:[#allocation2 + $0xa4] sm:$0xf] %v373_v55  ;;  %v284_v0 = vld [vmem:[#allocation2 + $0x98] sm:$0x8]  ;;  %13773 = vmatpush3.bf16.msra.mxu1 %v15487_v58 }
  0x3d   :  { %465 = vst [vmem:[#allocation2 + $0xac] sm:$0xf] %v373_v55  ;;  %778 = vst [vmem:[#allocation2 + $0x1e8] sm:$0xf] %v373_v55  ;;  %v15489_v1 = vld [vmem:[%s20349_s1 + $0x420] sm:$0xff]   ;;  %v16841_v4 = vshrl.u32 %v16826_v60, 16 }
  0x3e   :  { %842 = vst [vmem:[#allocation2 + $0x1f0] sm:$0xf] %v373_v55  ;;  %1074 = vst [vmem:[#allocation2 + $0x32c] sm:$0xf] %v373_v55  ;;  %v16844_v5 = vshll.u32 %v16826_v60, 16  ;;  %v282_v17 = vsel %vm16702_vm15, 0, %v281_v63  ;;  %13774 = vmatprep.subr.bf16.mxu1 %v15489_v1 }
  0x3f   :  { %1138 = vst [vmem:[#allocation2 + $0x334] sm:$0xf] %v373_v55  ;;  %177 = vst [vmem:[#allocation2 + $0xb8] sm:$0xf] %v16826_v60  ;;  %v285_v6 = vsel %vm16702_vm15, 0, %v284_v0  ;;  %v16865_v10 = vshrl.u32 %v16831_v61, 16 }
  0x40   :  { %178 = vst [vmem:[#allocation2 + $0xdc] sm:$0xf] %v16831_v61  ;;  %303 = vst [vmem:[#allocation2 + $0xc0] sm:$0xf] %v16826_v60  ;;  %v16868_v11 = vshll.u32 %v16831_v61, 16  ;;  %v15490_v13 = vld [vmem:[%s20349_s1 + $0x360] sm:$0xff]  }
  0x41   :  { %304 = vst [vmem:[#allocation2 + $0xe4] sm:$0xf] %v16831_v61  ;;  %682 = vst [vmem:[#allocation2 + $0x1fc] sm:$0xf] %v16826_v60  ;;  %v134_v12 = vld [vmem:[#allocation2 + $0xb4] sm:$0xf]  ;;  %13735 = vmatpush3.bf16.msra.mxu0 %v15490_v13 }
  0x42   :  { %683 = vst [vmem:[#allocation2 + $0x220] sm:$0xf] %v16831_v61  ;;  %732 = vst [vmem:[#allocation2 + $0x204] sm:$0xf] %v16826_v60  ;;  %v85_v14 = vrot.slane %v16841_v4, 7  ;;  %v220_v16 = vrot.slane %v16841_v4, 4 }
  0x43   :  { %733 = vst [vmem:[#allocation2 + $0x228] sm:$0xf] %v16831_v61  ;;  %978 = vst [vmem:[#allocation2 + $0x340] sm:$0xf] %v16826_v60  ;;  %v137_v15 = vld [vmem:[#allocation2 + $0xd8] sm:$0xf] }
  0x44   :  { %979 = vst [vmem:[#allocation2 + $0x364] sm:$0xf] %v16831_v61  ;;  %1028 = vst [vmem:[#allocation2 + $0x348] sm:$0xf] %v16826_v60  ;;  %v221_v19 = vrot.slane %v16844_v5, 5  ;;  %v15491_v24 = vld [vmem:[%s20349_s1 + $0x3e0] sm:$0xff]   ;;  %v16893_v30 = vor.u32 %v16844_v5, %v85_v14 }
  0x45   :  { %1029 = vst [vmem:[#allocation2 + $0x36c] sm:$0xf] %v16831_v61  ;;  %283 = vst [vmem:[#allocation2 + $0x74] sm:$0x8] %v282_v17  ;;  %v92_v25 = vrot.slane %v16865_v10, 7  ;;  %v229_v26 = vrot.slane %v16865_v10, 4  ;;  %13775 = vmatpush3.bf16.msra.mxu1 %v15491_v24 }
  0x46   :  { %286 = vst [vmem:[#allocation2 + $0x98] sm:$0x8] %v285_v6  ;;  %v230_v27 = vrot.slane %v16868_v11, 5  ;;  %v16887_v28 = vld [vmem:[%s20348_s0 + $0x24] sm:$0x1]  ;;  %v15496_v29 = vld [vmem:[%s20349_s1 + $0x398] sm:$0xff]   ;;  %v222_v31 = vor.u32 %v221_v19, %v220_v16  ;;  %v135_v55 = vsel %vm16633_vm4, %v16893_v30, %v134_v12 }
  0x47   :  { %v16898_v33 = vld [vmem:[%s20348_s0 + $0x2c] sm:$0x1]  ;;  %v225_v34 = vshll.u32 %v16887_v28, 16  ;;  %v15497_v39 = vld [vmem:[%s20349_s1 + $0x418] sm:$0xff]   ;;  %v1403_v22 = vld [vmem:[#allocation2 + $0x90] sm:$0xff]  ;;  %v16908_v35 = vor.u32 %v16868_v11, %v92_v25  ;;  %v11495_v48 = vrot.slane %v16826_v60, 9  ;;  %13736 = vmatprep.subr.bf16.mxu0 %v15496_v29 }
  0x48   :  { %v15498_v40 = vld [vmem:[%s20349_s1 + $0x358] sm:$0xff]   ;;  %v1398_v42 = vld [vmem:[#allocation2 + $0x6c] sm:$0xff]  ;;  %v231_v44 = vor.u32 %v230_v27, %v229_v26  ;;  %v234_v46 = vshll.u32 %v16898_v33, 16  ;;  %v223_v56 = vrot.slane %v222_v31, 4  ;;  %136 = vst [vmem:[#allocation2 + $0xb4] sm:$0xf] %v135_v55  ;;  %13776 = vmatprep.subr.bf16.mxu1 %v15497_v39 }
  0x49   :  { %v15480_v43 = vld [vmem:[#allocation2 + $0x70] ss:$36 sps:$4 sm:$0xff]   ;;  %v11654_v23 = vcombine.low %v1398_v42, %v1403_v22  ;;  %v227_v59 = vrot.slane %v225_v34, 5  ;;  %v138_v58 = vsel %vm16633_vm4, %v16908_v35, %v137_v15  ;;  %v319_v0 = vld [vmem:[#allocation2 + $0xc0] sm:$0x1]  ;;  %v376_v19 = vrot.slane %v16887_v28, 5  ;;  %13737 = vmatpush3.bf16.msra.mxu0 %v15498_v40 }
  0x4a   :  { %2229 = vmatprep.mubr.bf16.mxu0 %v15480_v43  ;;  %v232_v63 = vrot.slane %v231_v44, 4  ;;  %v236_v60 = vrot.slane %v234_v46, 5  ;;  %v322_v1 = vld [vmem:[#allocation2 + $0xe4] sm:$0x1]  ;;  %139 = vst [vmem:[#allocation2 + $0xd8] sm:$0xf] %v138_v58 }
  0x4b   :  { %2230 = vmatmul.mubr.bf16.gmra.mxu0 %v11654_v23  ;;  %v228_v17 = vsel %vm16669_vm11, %v223_v56, %v227_v59  ;;  %v320_v6 = vsel %vm16644_vm7, 0, %v319_v0  ;;  %v323_v12 = vsel %vm16644_vm7, 0, %v322_v1  ;;  %v15482_v15 = vld [vmem:[#allocation2 + $0x78] ss:$36 sps:$4 sm:$0xff]   ;;  %v11496_v25 = vrot.slane %v16831_v61, 9  ;;  %v15500_v29 = vld [vmem:[%s20349_s1 + $0x390] sm:$0xff]  }
  0x4c   :  { %v1399_v13 = vld [vmem:[#allocation2 + $0x74] sm:$0xff]  ;;  %v237_v16 = vsel %vm16669_vm11, %v232_v63, %v236_v60  ;;  %268 = vst [vmem:[#allocation2 + $0xbc] sm:$0xf] %v228_v17  ;;  %321 = vst [vmem:[#allocation2 + $0xc0] sm:$0x1] %v320_v6  ;;  %2294 = vmatprep.mubr.bf16.mxu1 %v15482_v15  ;;  %v377_v61 = vsel %vm16684_vm13, %v11495_v48, %v376_v19  ;;  %v380_v27 = vrot.slane %v16898_v33, 5  ;;  %13738 = vmatprep.subr.bf16.mxu0 %v15500_v29 }
  0x4d   :  { %v1404_v14 = vld [vmem:[#allocation2 + $0x98] sm:$0xff]  ;;  %324 = vst [vmem:[#allocation2 + $0xe4] sm:$0x1] %v323_v12  ;;  %335 = vst [vmem:[#allocation2 + $0xc4] sm:$0xf] %v228_v17  ;;  %v15501_v31 = vld [vmem:[%s20349_s1 + $0x410] sm:$0xff]  }
  0x4e   :  { %434 = vst [vmem:[#allocation2 + $0xcc] sm:$0xf] %v228_v17  ;;  %700 = vst [vmem:[#allocation2 + $0x200] sm:$0xf] %v228_v17  ;;  %v11656_v26 = vcombine.low %v1399_v13, %v1404_v14  ;;  %v15499_v24 = vld [vmem:[%s20349_s1 + $0x3d8] sm:$0xff]   ;;  %v381_v39 = vsel %vm16684_vm13, %v11496_v25, %v380_v27  ;;  %v483_v40 = vrot.slane %v16606_v37, 5 }
  0x4f   :  { %764 = vst [vmem:[#allocation2 + $0x208] sm:$0xf] %v228_v17  ;;  %811 = vst [vmem:[#allocation2 + $0x210] sm:$0xf] %v228_v17  ;;  %13777 = vmatpush3.bf16.msra.mxu1 %v15499_v24  ;;  %v161_v42 = vld [vmem:[#allocation2 + $0xb4] sm:$0x1] }
  0x50   :  { %996 = vst [vmem:[#allocation2 + $0x344] sm:$0xf] %v228_v17  ;;  %1060 = vst [vmem:[#allocation2 + $0x34c] sm:$0xf] %v228_v17  ;;  %2295 = vmatmul.mubr.bf16.gmra.mxu1 %v11656_v26  ;;  %v15502_v22 = vld [vmem:[%s20349_s1 + $0x350] sm:$0xff]   ;;  %v484_v43 = vrot.slane %v16609_v38, 6  ;;  %13778 = vmatprep.subr.bf16.mxu1 %v15501_v31 }
  0x51   :  { %1107 = vst [vmem:[#allocation2 + $0x354] sm:$0xf] %v228_v17  ;;  %269 = vst [vmem:[#allocation2 + $0xe0] sm:$0xf] %v237_v16  ;;  %v162_v44 = vsel %vm16644_vm7, 0, %v161_v42  ;;  %v15503_v37 = vld [vmem:[%s20349_s1 + $0x3d0] sm:$0xff]   ;;  %13739 = vmatpush3.bf16.msra.mxu0 %v15502_v22 }
  0x52   :  { %336 = vst [vmem:[#allocation2 + $0xe8] sm:$0xf] %v237_v16  ;;  %435 = vst [vmem:[#allocation2 + $0xf0] sm:$0xf] %v237_v16  ;;  %v164_v48 = vld [vmem:[#allocation2 + $0xd8] sm:$0x1]  ;;  %v16966_v59 = vor.u32 %v484_v43, %v483_v40 }
  0x53   :  { %701 = vst [vmem:[#allocation2 + $0x224] sm:$0xf] %v237_v16  ;;  %765 = vst [vmem:[#allocation2 + $0x22c] sm:$0xf] %v237_v16  ;;  %v165_v23 = vsel %vm16644_vm7, 0, %v164_v48  ;;  %v15508_v38 = vld [vmem:[%s20349_s1 + $0x388] sm:$0xff]   ;;  %13779 = vmatpush3.bf16.msra.mxu1 %v15503_v37 }
  0x54   :  { %812 = vst [vmem:[#allocation2 + $0x234] sm:$0xf] %v237_v16  ;;  %997 = vst [vmem:[#allocation2 + $0x368] sm:$0xf] %v237_v16  ;;  %v287_v55 = vld [vmem:[#allocation2 + $0xbc] sm:$0x8]  ;;  %13740 = vmatprep.subr.bf16.mxu0 %v15508_v38 }
  0x55   :  { %1061 = vst [vmem:[#allocation2 + $0x370] sm:$0xf] %v237_v16  ;;  %1108 = vst [vmem:[#allocation2 + $0x378] sm:$0xf] %v237_v16  ;;  %v16961_v56 = vld [vmem:[%s20348_s0 + $0x30] sm:$0xf] }
  0x56   :  { %402 = vst [vmem:[#allocation2 + $0xc8] sm:$0xf] %v377_v61  ;;  %466 = vst [vmem:[#allocation2 + $0xd0] sm:$0xf] %v377_v61  ;;  %v288_v58 = vsel %vm16702_vm15, 0, %v287_v55  ;;  %v16976_v0 = vshrl.u32 %v16961_v56, 16 }
  0x57   :  { %779 = vst [vmem:[#allocation2 + $0x20c] sm:$0xf] %v377_v61  ;;  %843 = vst [vmem:[#allocation2 + $0x214] sm:$0xf] %v377_v61  ;;  %v16973_v60 = vld [vmem:[%s20348_s0 + $0x38] sm:$0xf] }
  0x58   :  { %1075 = vst [vmem:[#allocation2 + $0x350] sm:$0xf] %v377_v61  ;;  %1139 = vst [vmem:[#allocation2 + $0x358] sm:$0xf] %v377_v61  ;;  %v290_v63 = vld [vmem:[#allocation2 + $0xe0] sm:$0x8] }
  0x59   :  { %403 = vst [vmem:[#allocation2 + $0xec] sm:$0xf] %v381_v39  ;;  %467 = vst [vmem:[#allocation2 + $0xf4] sm:$0xf] %v381_v39  ;;  %v291_v1 = vsel %vm16702_vm15, 0, %v290_v63  ;;  %v16987_v17 = vshll.u32 %v16961_v56, 16 }
  0x5a   :  { %780 = vst [vmem:[#allocation2 + $0x230] sm:$0xf] %v381_v39  ;;  %844 = vst [vmem:[#allocation2 + $0x238] sm:$0xf] %v381_v39  ;;  %v16990_v6 = vshrl.u32 %v16973_v60, 16  ;;  %v16993_v12 = vshll.u32 %v16973_v60, 16 }
  0x5b   :  { %1076 = vst [vmem:[#allocation2 + $0x374] sm:$0xf] %v381_v39  ;;  %1140 = vst [vmem:[#allocation2 + $0x37c] sm:$0xf] %v381_v39  ;;  %v140_v13 = vld [vmem:[#allocation2 + $0xfc] sm:$0xf] }
  0x5c   :  { %163 = vst [vmem:[#allocation2 + $0xb4] sm:$0x1] %v162_v44  ;;  %166 = vst [vmem:[#allocation2 + $0xd8] sm:$0x1] %v165_v23  ;;  %v99_v14 = vrot.slane %v16976_v0, 7  ;;  %v238_v16 = vrot.slane %v16976_v0, 4 }
  0x5d   :  { %179 = vst [vmem:[#allocation2 + $0x100] sm:$0xf] %v16961_v56  ;;  %305 = vst [vmem:[#allocation2 + $0x108] sm:$0xf] %v16961_v56  ;;  %v143_v15 = vld [vmem:[#allocation2 + $0x120] sm:$0xf] }
  0x5e   :  { %684 = vst [vmem:[#allocation2 + $0x244] sm:$0xf] %v16961_v56  ;;  %734 = vst [vmem:[#allocation2 + $0x24c] sm:$0xf] %v16961_v56  ;;  %v17006_v19 = vld [vmem:[%s20348_s0 + $0x34] sm:$0x1]  ;;  %v17018_v29 = vor.u32 %v16987_v17, %v99_v14 }
  0x5f   :  { %980 = vst [vmem:[#allocation2 + $0x388] sm:$0xf] %v16961_v56  ;;  %1030 = vst [vmem:[#allocation2 + $0x390] sm:$0xf] %v16961_v56  ;;  %v106_v25 = vrot.slane %v16990_v6, 7  ;;  %v239_v26 = vrot.slane %v16987_v17, 5 }
  0x60   :  { %289 = vst [vmem:[#allocation2 + $0xbc] sm:$0x8] %v288_v58  ;;  %180 = vst [vmem:[#allocation2 + $0x124] sm:$0xf] %v16973_v60  ;;  %v247_v24 = vrot.slane %v16990_v6, 4  ;;  %v248_v61 = vrot.slane %v16993_v12, 5  ;;  %v141_v37 = vsel %vm16633_vm4, %v17018_v29, %v140_v13 }
  0x61   :  { %306 = vst [vmem:[#allocation2 + $0x12c] sm:$0xf] %v16973_v60  ;;  %685 = vst [vmem:[#allocation2 + $0x268] sm:$0xf] %v16973_v60  ;;  %v17015_v27 = vld [vmem:[%s20348_s0 + $0x3c] sm:$0x1]  ;;  %v17023_v40 = vor.u32 %v16993_v12, %v106_v25  ;;  %v240_v42 = vor.u32 %v239_v26, %v238_v16 }
  0x62   :  { %735 = vst [vmem:[#allocation2 + $0x270] sm:$0xf] %v16973_v60  ;;  %981 = vst [vmem:[#allocation2 + $0x3ac] sm:$0xf] %v16973_v60  ;;  %v243_v31 = vshll.u32 %v17006_v19, 16  ;;  %v20355_v39 = vshll.u32 %v17015_v27, 16  ;;  %v249_v22 = vor.u32 %v248_v61, %v247_v24 }
  0x63   :  { %1031 = vst [vmem:[#allocation2 + $0x3b4] sm:$0xf] %v16973_v60  ;;  %292 = vst [vmem:[#allocation2 + $0xe0] sm:$0x8] %v291_v1  ;;  %v15509_v43 = vld [vmem:[%s20349_s1 + $0x408] sm:$0xff]   ;;  %v11497_v44 = vrot.slane %v16961_v56, 9  ;;  %v144_v56 = vsel %vm16633_vm4, %v17023_v40, %v143_v15 }
  0x64   :  { %20380 = vst [vmem:[#allocation12_spill] sm:$0xff] %v17018_v29  ;;  %20381 = vst [vmem:[#allocation13_spill] sm:$0xff] %v17023_v40  ;;  %v1408_v48 = vld [vmem:[#allocation2 + $0xb4] sm:$0xff]  ;;  %v245_v23 = vrot.slane %v243_v31, 5  ;;  %v254_v55 = vrot.slane %v20355_v39, 5  ;;  %v15510_v38 = vld [vmem:[%s20349_s1 + $0x348] sm:$0xff]   ;;  %13780 = vmatprep.subr.bf16.mxu1 %v15509_v43 }
  0x65   :  { %v1413_v58 = vld [vmem:[#allocation2 + $0xd8] sm:$0xff]  ;;  %142 = vst [vmem:[#allocation2 + $0xfc] sm:$0xf] %v141_v37  ;;  %v241_v1 = vrot.slane %v240_v42, 4  ;;  %v250_v14 = vrot.slane %v249_v22, 4  ;;  %v15511_v13 = vld [vmem:[%s20349_s1 + $0x3c8] sm:$0xff]   ;;  %13741 = vmatpush3.bf16.msra.mxu0 %v15510_v38 }
  0x66   :  { %v15492_v63 = vld [vmem:[#allocation2 + $0xb8] ss:$36 sps:$4 sm:$0xff]   ;;  %v11663_v25 = vcombine.low %v1408_v48, %v1413_v58  ;;  %145 = vst [vmem:[#allocation2 + $0x120] sm:$0xf] %v144_v56  ;;  %v325_v26 = vld [vmem:[#allocation2 + $0x108] sm:$0x1]  ;;  %13781 = vmatpush3.bf16.msra.mxu1 %v15511_v13 }
  0x67   :  { %v1409_v16 = vld [vmem:[#allocation2 + $0xbc] sm:$0xff]  ;;  %v384_v61 = vrot.slane %v17006_v19, 5  ;;  %2237 = vmatprep.mubr.bf16.mxu0 %v15492_v63  ;;  %v246_v15 = vsel %vm16669_vm11, %v241_v1, %v245_v23  ;;  %v255_v42 = vsel %vm16669_vm11, %v250_v14, %v254_v55  ;;  %v326_v22 = vsel %vm16644_vm7, 0, %v325_v26  ;;  %v406_v13 = vld [vmem:[#allocation2 + $0x38] sm:$0x8]  ;;  %v15526_v18 = vld [vmem:[%s20349_s1 + $0x70] sm:$0xff]  }
  0x68   :  { %v328_v24 = vld [vmem:[#allocation2 + $0x12c] sm:$0x1]  ;;  %v15494_v39 = vld [vmem:[#allocation2 + $0xc0] ss:$36 sps:$4 sm:$0xff]   ;;  %2238 = vmatmul.mubr.bf16.gmra.mxu0 %v11663_v25  ;;  %270 = vst [vmem:[#allocation2 + $0x104] sm:$0xf] %v246_v15 }
  0x69   :  { %v329_v43 = vsel %vm16644_vm7, 0, %v328_v24  ;;  %v15512_v48 = vld [vmem:[%s20349_s1 + $0x380] sm:$0xff]   ;;  %271 = vst [vmem:[#allocation2 + $0x128] sm:$0xf] %v255_v42  ;;  %327 = vst [vmem:[#allocation2 + $0x108] sm:$0x1] %v326_v22  ;;  %v385_v23 = vsel %vm16684_vm13, %v11497_v44, %v384_v61  ;;  %2302 = vmatprep.mubr.bf16.mxu1 %v15494_v39 }
  0x6a   :  { %v1414_v37 = vld [vmem:[#allocation2 + $0xe0] sm:$0xff]  ;;  %330 = vst [vmem:[#allocation2 + $0x12c] sm:$0x1] %v329_v43  ;;  %337 = vst [vmem:[#allocation2 + $0x10c] sm:$0xf] %v246_v15  ;;  %13742 = vmatprep.subr.bf16.mxu0 %v15512_v48  ;;  %v11498_v58 = vrot.slane %v16973_v60, 9 }
  0x6b   :  { %v11665_v38 = vcombine.low %v1409_v16, %v1414_v37  ;;  %338 = vst [vmem:[#allocation2 + $0x130] sm:$0xf] %v255_v42  ;;  %436 = vst [vmem:[#allocation2 + $0x114] sm:$0xf] %v246_v15  ;;  %v15513_v55 = vld [vmem:[%s20349_s1 + $0x400] sm:$0xff]   ;;  %v388_v39 = vrot.slane %v17015_v27, 5 }
  0x6c   :  { %437 = vst [vmem:[#allocation2 + $0x138] sm:$0xf] %v255_v42  ;;  %702 = vst [vmem:[#allocation2 + $0x248] sm:$0xf] %v246_v15  ;;  %v15514_v63 = vld [vmem:[%s20349_s1 + $0x340] sm:$0xff]   ;;  %13782 = vmatprep.subr.bf16.mxu1 %v15513_v55  ;;  %v17075_v60 = vld [vmem:[%s20349_s1 + $0x478] sm:$0xff]  }
  0x6d   :  { %703 = vst [vmem:[#allocation2 + $0x26c] sm:$0xf] %v255_v42  ;;  %766 = vst [vmem:[#allocation2 + $0x250] sm:$0xf] %v246_v15  ;;  %2303 = vmatmul.mubr.bf16.gmra.mxu1 %v11665_v38  ;;  %v167_v44 = vld [vmem:[#allocation2 + $0xfc] sm:$0x1]  ;;  %13743 = vmatpush3.bf16.msra.mxu0 %v15514_v63  ;;  %v389_v16 = vsel %vm16684_vm13, %v11498_v58, %v388_v39 }
  0x6e   :  { %767 = vst [vmem:[#allocation2 + $0x274] sm:$0xf] %v255_v42  ;;  %813 = vst [vmem:[#allocation2 + $0x258] sm:$0xf] %v246_v15  ;;  %v15515_v56 = vld [vmem:[%s20349_s1 + $0x3c0] sm:$0xff]   ;;  %v168_v1 = vsel %vm16644_vm7, 0, %v167_v44  ;;  %15196 = vmatprep.subr.bf16.mxu0 %v17075_v60 }
  0x6f   :  { %814 = vst [vmem:[#allocation2 + $0x27c] sm:$0xf] %v255_v42  ;;  %998 = vst [vmem:[#allocation2 + $0x38c] sm:$0xf] %v246_v15  ;;  %v170_v14 = vld [vmem:[#allocation2 + $0x120] sm:$0x1]  ;;  %13783 = vmatpush3.bf16.msra.mxu1 %v15515_v56 }
  0x70   :  { %999 = vst [vmem:[#allocation2 + $0x3b0] sm:$0xf] %v255_v42  ;;  %1062 = vst [vmem:[#allocation2 + $0x394] sm:$0xf] %v246_v15  ;;  %v171_v25 = vsel %vm16644_vm7, 0, %v170_v14  ;;  %v407_v26 = vsel %vm16702_vm15, 0, %v406_v13 }
  0x71   :  { %1063 = vst [vmem:[#allocation2 + $0x3b8] sm:$0xf] %v255_v42  ;;  %1109 = vst [vmem:[#allocation2 + $0x39c] sm:$0xf] %v246_v15  ;;  %v409_v24 = vld [vmem:[#allocation2 + $0x5c] sm:$0x8] }
  0x72   :  { %1110 = vst [vmem:[#allocation2 + $0x3c0] sm:$0xf] %v255_v42  ;;  %404 = vst [vmem:[#allocation2 + $0x110] sm:$0xf] %v385_v23  ;;  %v438_v61 = vld [vmem:[#allocation2 + $0x3c] sm:$0x1] }
  0x73   :  { %468 = vst [vmem:[#allocation2 + $0x118] sm:$0xf] %v385_v23  ;;  %781 = vst [vmem:[#allocation2 + $0x254] sm:$0xf] %v385_v23  ;;  %v293_v37 = vld [vmem:[#allocation2 + $0x104] sm:$0x8] }
  0x74   :  { %845 = vst [vmem:[#allocation2 + $0x25c] sm:$0xf] %v385_v23  ;;  %1077 = vst [vmem:[#allocation2 + $0x398] sm:$0xf] %v385_v23  ;;  %v296_v15 = vld [vmem:[#allocation2 + $0x128] sm:$0x8] }
  0x75   :  { %1141 = vst [vmem:[#allocation2 + $0x3a0] sm:$0xf] %v385_v23  ;;  %169 = vst [vmem:[#allocation2 + $0xfc] sm:$0x1] %v168_v1  ;;  %v410_v42 = vsel %vm16702_vm15, 0, %v409_v24  ;;  %v439_v22 = vsel %vm16644_vm7, 0, %v438_v61 }
  0x76   :  { %405 = vst [vmem:[#allocation2 + $0x134] sm:$0xf] %v389_v16  ;;  %469 = vst [vmem:[#allocation2 + $0x13c] sm:$0xf] %v389_v16  ;;  %v294_v43 = vsel %vm16702_vm15, 0, %v293_v37  ;;  %v297_v48 = vsel %vm16702_vm15, 0, %v296_v15 }
  0x77   :  { %782 = vst [vmem:[#allocation2 + $0x278] sm:$0xf] %v389_v16  ;;  %846 = vst [vmem:[#allocation2 + $0x280] sm:$0xf] %v389_v16  ;;  %v441_v38 = vld [vmem:[#allocation2 + $0x60] sm:$0x1] }
  0x78   :  { %1078 = vst [vmem:[#allocation2 + $0x3bc] sm:$0xf] %v389_v16  ;;  %1142 = vst [vmem:[#allocation2 + $0x3c4] sm:$0xf] %v389_v16  ;;  %v442_v23 = vsel %vm16644_vm7, 0, %v441_v38  ;;  %v15523_v55 = vld [vmem:[%s20349_s1 + $0x78] sm:$0xff]  }
  0x79   :  { %172 = vst [vmem:[#allocation2 + $0x120] sm:$0x1] %v171_v25  ;;  %408 = vst [vmem:[#allocation2 + $0x38] sm:$0x8] %v407_v26  ;;  %13820 = vmatprep.subr.bf16.mxu1 %v15523_v55  ;;  %v15504_v39 = vld [vmem:[#allocation2 + $0x100] ss:$36 sps:$4 sm:$0xff]  }
  0x7a   :  { %411 = vst [vmem:[#allocation2 + $0x5c] sm:$0x8] %v410_v42  ;;  %440 = vst [vmem:[#allocation2 + $0x3c] sm:$0x1] %v439_v22  ;;  %2245 = vmatprep.mubr.bf16.mxu0 %v15504_v39  ;;  %v15506_v13 = vld [vmem:[#allocation2 + $0x108] ss:$36 sps:$4 sm:$0xff]  }
  0x7b   :  { %295 = vst [vmem:[#allocation2 + $0x104] sm:$0x8] %v294_v43  ;;  %298 = vst [vmem:[#allocation2 + $0x128] sm:$0x8] %v297_v48  ;;  %v497_v16 = vshrl.u32 %v16737_v32, 16  ;;  %v476_v26 = vrot.slane %v16858_v41, 4  ;;  %2310 = vmatprep.mubr.bf16.mxu1 %v15506_v13 }
  0x7c   :  { %443 = vst [vmem:[#allocation2 + $0x60] sm:$0x1] %v442_v23  ;;  %v1418_v58 = vld [vmem:[#allocation2 + $0xfc] sm:$0xff]  ;;  %v500_v24 = vrot.slane %v207_v2, 6  ;;  %v496_v37 = vrot.slane %v16763_v7, 4  ;;  %v510_v36 = vrot.slane %v216_v3, 6 }
  0x7d   :  { %v15521_v61 = vld [vmem:[#allocation2 + $0x40] ss:$36 sps:$4 sm:$0xff]   ;;  %v499_v15 = vrot.slane %v497_v16, 5  ;;  %v15516_v42 = vld [vmem:[#allocation2 + $0x34] ss:$36 sps:$4 sm:$0xff]   ;;  %v15533_v16 = vld [vmem:[%s20349_s1 + $0x468] sm:$0xff]  }
  0x7e   :  { %v412_v22 = vld [vmem:[#allocation2 + $0x80] sm:$0x8]  ;;  %v415_v43 = vld [vmem:[#allocation2 + $0xa4] sm:$0x8]  ;;  %v444_v48 = vld [vmem:[#allocation2 + $0x84] sm:$0x1] }
  0x7f   :  { %v413_v38 = vsel %vm16702_vm15, 0, %v412_v22  ;;  %v416_v41 = vsel %vm16702_vm15, 0, %v415_v43  ;;  %v445_v32 = vsel %vm16644_vm7, 0, %v444_v48  ;;  %v447_v2 = vld [vmem:[#allocation2 + $0xa8] sm:$0x1]  ;;  %v501_v23 = vor.u32 %v500_v24, %v499_v15  ;;  %v15524_v39 = vld [vmem:[%s20349_s1 + $0x38] sm:$0xff]  }
  0x80   :  { %v1423_v63 = vld [vmem:[#allocation2 + $0x120] sm:$0xff]  ;;  %414 = vst [vmem:[#allocation2 + $0x80] sm:$0x8] %v413_v38  ;;  %417 = vst [vmem:[#allocation2 + $0xa4] sm:$0x8] %v416_v41  ;;  %v15527_v13 = vld [vmem:[%s20349_s1 + $0x30] sm:$0xff]  }
  0x81   :  { %v11672_v44 = vcombine.low %v1418_v58, %v1423_v63  ;;  %v15518_v56 = vld [vmem:[#allocation2 + $0x38] ss:$36 sps:$4 sm:$0xff]   ;;  %446 = vst [vmem:[#allocation2 + $0x84] sm:$0x1] %v445_v32  ;;  %v448_v58 = vsel %vm16644_vm7, 0, %v447_v2  ;;  %v17121_v63 = vsel %vm17110_vm2, %v476_v26, %v481_v20  ;;  %v506_v20 = vrot.slane %v16765_v8, 4 }
  0x82   :  { %v1419_v1 = vld [vmem:[#allocation2 + $0x104] sm:$0xff]  ;;  %449 = vst [vmem:[#allocation2 + $0xa8] sm:$0x1] %v448_v58  ;;  %v421_v26 = vld [vmem:[#allocation2 + $0xec] sm:$0x8]  ;;  %v517_v2 = vshrl.u32 %v16887_v28, 16 }
  0x83   :  { %v1424_v14 = vld [vmem:[#allocation2 + $0x128] sm:$0xff]  ;;  %2246 = vmatmul.mubr.bf16.gmra.mxu0 %v11672_v44  ;;  %v15519_v55 = vld [vmem:[#allocation2 + $0x3c] ss:$36 sps:$4 sm:$0xff]   ;;  %v17128_v44 = vsel %vm17110_vm2, %v496_v37, %v501_v23  ;;  %v513_v37 = vrot.slane %v16841_v4, 5  ;;  %v422_v43 = vsel %vm16702_vm15, 0, %v421_v26  ;;  %v514_v4 = vrot.slane %v16844_v5, 6 }
  0x84   :  { %v11674_v25 = vcombine.low %v1419_v1, %v1424_v14  ;;  %2351 = vmatprep.mubr.bf16.mxu0 %v15518_v56  ;;  %20384 = vst [vmem:[#allocation14_spill] sm:$0xff] %v17128_v44  ;;  %v15525_v56 = vld [vmem:[%s20349_s1 + $0x470] sm:$0xff]   ;;  %v507_v1 = vshrl.u32 %v16746_v49, 16  ;;  %v16372_v49 = vld [vmem:[%s20348_s0 + $0xc] sm:$0x1]  ;;  %v523_v45 = vrot.slane %v16865_v10, 5 }
  0x85   :  { %v487_v3 = vshrl.u32 %v16372_v49, 16  ;;  %v15534_v8 = vld [vmem:[%s20349_s1 + $0x68] sm:$0xff]   ;;  %423 = vst [vmem:[#allocation2 + $0xec] sm:$0x8] %v422_v43  ;;  %v453_v58 = vld [vmem:[#allocation2 + $0xf0] sm:$0x1]  ;;  %v515_v5 = vor.u32 %v514_v4, %v513_v37 }
  0x86   :  { %2311 = vmatmul.mubr.bf16.gmra.mxu1 %v11674_v25  ;;  %v509_v14 = vrot.slane %v507_v1, 5  ;;  %v418_v25 = vld [vmem:[#allocation2 + $0xc8] sm:$0x8]  ;;  %v450_v24 = vld [vmem:[#allocation2 + $0xcc] sm:$0x1]  ;;  %v454_v1 = vsel %vm16644_vm7, 0, %v453_v58 }
  0x87   :  { %2416 = vmatprep.mubr.bf16.mxu1 %v15521_v61  ;;  %v1400_v15 = vld [vmem:[#allocation2 + $0x7c] sm:$0xff]  ;;  %v451_v48 = vsel %vm16644_vm7, 0, %v450_v24  ;;  %v15530_v38 = vld [vmem:[#allocation2 + $0x88] ss:$36 sps:$4 sm:$0xff]   ;;  %455 = vst [vmem:[#allocation2 + $0xf0] sm:$0x1] %v454_v1 }
  0x88   :  { %v511_v61 = vor.u32 %v510_v36, %v509_v14  ;;  %v15528_v22 = vld [vmem:[#allocation2 + $0x80] ss:$36 sps:$4 sm:$0xff]   ;;  %452 = vst [vmem:[#allocation2 + $0xcc] sm:$0x1] %v451_v48  ;;  %v519_v14 = vrot.slane %v517_v2, 5  ;;  %v520_v49 = vrot.slane %v225_v34, 6 }
  0x89   :  { %v15532_v23 = vld [vmem:[#allocation2 + $0x84] ss:$36 sps:$4 sm:$0xff]   ;;  %v15545_v24 = vld [vmem:[%s20349_s1 + $0x58] sm:$0xff]   ;;  %v486_v37 = vrot.slane %v16966_v59, 4  ;;  %v427_v34 = vld [vmem:[#allocation2 + $0x134] sm:$0x8] }
  0x8a   :  { %v17162_v32 = vsel %vm17110_vm2, %v506_v20, %v511_v61  ;;  %v15538_v36 = vld [vmem:[%s20349_s1 + $0x20] sm:$0xff]   ;;  %v15544_v20 = vld [vmem:[%s20349_s1 + $0x458] sm:$0xff]   ;;  %v424_v61 = vld [vmem:[#allocation2 + $0x110] sm:$0x8]  ;;  %v428_v48 = vsel %vm16702_vm15, 0, %v427_v34  ;;  %v530_v58 = vrot.slane %v234_v46, 6 }
  0x8b   :  { %2352 = vmatmul.mubr.bf16.vlgmr.msra.gmra.mxu0 %v15516_v42  ;;  %v1405_v42 = vld [vmem:[#allocation2 + $0xa0] sm:$0xff]  ;;  %v15546_v10 = vld [vmem:[%s20349_s1 + $0x18] sm:$0xff]   ;;  %v425_v28 = vsel %vm16702_vm15, 0, %v424_v61  ;;  %v15548_v43 = vld [vmem:[%s20349_s1 + $0x50] sm:$0xff]   ;;  %429 = vst [vmem:[#allocation2 + $0x134] sm:$0x8] %v428_v48 }
  0x8c   :  { %15197 = vmatpush3.bf16.msra.mxu0 %v17075_v60  ;;  %v419_v60 = vsel %vm16702_vm15, 0, %v418_v25  ;;  %v11658_v41 = vcombine.low %v1400_v15, %v1405_v42  ;;  %2359 = vmatprep.mubr.bf16.mxu0 %v15528_v22  ;;  %v516_v25 = vrot.slane %v515_v5, 4  ;;  %v521_v15 = vor.u32 %v520_v49, %v519_v14  ;;  %v15541_v22 = vld [vmem:[#allocation2 + $0xd0] ss:$36 sps:$4 sm:$0xff]   ;;  %426 = vst [vmem:[#allocation2 + $0x110] sm:$0x8] %v425_v28 }
  0x8d   :  { %15198 = vmatprep.subr.bf16.mxu0 %v15525_v56  ;;  %420 = vst [vmem:[#allocation2 + $0xc8] sm:$0x8] %v419_v60  ;;  %v524_v60 = vrot.slane %v16868_v11, 6  ;;  %v15547_v11 = vld [vmem:[%s20349_s1 + $0x450] sm:$0xff]   ;;  %v459_v4 = vld [vmem:[#allocation2 + $0x138] sm:$0x1] }
  0x8e   :  { %2417 = vmatmul.mubr.bf16.vlgmr.msra.gmra.mxu1 %v15519_v55  ;;  %v15535_v55 = vld [vmem:[%s20349_s1 + $0x28] sm:$0xff]   ;;  %v562_v14 = vld [vmem:[#allocation2 + $0x44] sm:$0xf]  ;;  %v534_v49 = vrot.slane %v16987_v17, 6  ;;  %v16280_v21 = vld [vmem:[%s20349_s1 + $0x1218] sm:$0xff]  }
  0x8f   :  { %13821 = vmatpush3.bf16.msra.mxu1 %v15524_v39  ;;  %2424 = vmatprep.mubr.bf16.mxu1 %v15530_v38  ;;  %v15536_v39 = vld [vmem:[%s20349_s1 + $0x460] sm:$0xff]   ;;  %v17201_v42 = vor.u32 %v524_v60, %v523_v45  ;;  %v15543_v59 = vld [vmem:[#allocation2 + $0xcc] ss:$36 sps:$4 sm:$0xff]   ;;  %v17210_v38 = vsel %vm17110_vm2, %v516_v25, %v521_v15 }
  0x90   :  { %13822 = vmatprep.subr.bf16.mxu1 %v15526_v18  ;;  %15199 = vmatpush3.bf16.msra.mxu0 %v15525_v56  ;;  %v15537_v56 = vld [vmem:[%s20349_s1 + $0x60] sm:$0xff]   ;;  %v490_v18 = vrot.slane %v198_v54, 6  ;;  %v1415_v54 = vld [vmem:[#allocation2 + $0xe8] sm:$0xff]  ;;  %v862_v15 = vld [vmem:[#allocation2 + $0x1d0] sm:$0xf] }
  0x91   :  { %15200 = vmatprep.subr.bf16.mxu0 %v15533_v16  ;;  %v15554_v1 = vld [vmem:[%s20349_s1 + $0x448] sm:$0xff]   ;;  %v17256_v61 = vld [vmem:[#allocation2] sm:$0xff] }
  0x92   :  { %v15555_v5 = vld [vmem:[%s20349_s1 + $0x48] sm:$0xff]   ;;  %v1425_v45 = vld [vmem:[#allocation2 + $0x130] sm:$0xff] }
  0x93   :  { %13823 = vmatpush3.bf16.msra.mxu1 %v15527_v13  ;;  %2360 = vmatmul.mubr.bf16.gmra.mxu0 %v11658_v41  ;;  %v568_v60 = vld [vmem:[#allocation2 + $0x8c] sm:$0xf] }
  0x94   :  { %13824 = vmatprep.subr.bf16.mxu1 %v15534_v8  ;;  %15201 = vmatpush3.bf16.msra.mxu0 %v15533_v16  ;;  %v1410_v13 = vld [vmem:[#allocation2 + $0xc4] sm:$0xff]  ;;  %v489_v8 = vrot.slane %v487_v3, 5  ;;  %v456_v3 = vld [vmem:[#allocation2 + $0x114] sm:$0x1]  ;;  %v569_v34 = vsel %vm16652_vm9, %v17128_v44, %v568_v60  ;;  %v547_v60 = vshrl.u32 %v17015_v27, 16 }
  0x95   :  { %15202 = vmatprep.subr.bf16.mxu0 %v15536_v39  ;;  %v15539_v16 = vld [vmem:[#allocation2 + $0xc8] ss:$36 sps:$4 sm:$0xff]   ;;  %v11667_v26 = vcombine.low %v1410_v13, %v1415_v54  ;;  %v457_v41 = vsel %vm16644_vm7, 0, %v456_v3  ;;  %570 = vst [vmem:[#allocation2 + $0x8c] sm:$0xf] %v569_v34 }
  0x96   :  { %2425 = vmatmul.mubr.bf16.gmra.mxu1 %v15532_v23  ;;  %2367 = vmatprep.mubr.bf16.mxu0 %v15539_v16  ;;  %v491_v2 = vor.u32 %v490_v18, %v489_v8  ;;  %v527_v23 = vshrl.u32 %v16898_v33, 16  ;;  %458 = vst [vmem:[#allocation2 + $0x114] sm:$0x1] %v457_v41  ;;  %v533_v18 = vrot.slane %v16976_v0, 5  ;;  %v565_v13 = vld [vmem:[#allocation2 + $0x68] sm:$0xf]  ;;  %v563_v0 = vsel %vm16652_vm9, %v17121_v63, %v562_v14 }
  0x97   :  { %13825 = vmatpush3.bf16.msra.mxu1 %v15535_v55  ;;  %2432 = vmatprep.mubr.bf16.mxu1 %v15541_v22  ;;  %v460_v55 = vsel %vm16644_vm7, 0, %v459_v4  ;;  %v15556_v54 = vld [vmem:[%s20349_s1 + $0x8] sm:$0xff]   ;;  %564 = vst [vmem:[#allocation2 + $0x44] sm:$0xf] %v563_v0  ;;  %v15559_v41 = vld [vmem:[%s20349_s1] sm:$0xff]  }
  0x98   :  { %13826 = vmatprep.subr.bf16.mxu1 %v15537_v56  ;;  %15203 = vmatpush3.bf16.msra.mxu0 %v15536_v39  ;;  %v15549_v39 = vld [vmem:[%s20349_s1 + $0x10] sm:$0xff]   ;;  %461 = vst [vmem:[#allocation2 + $0x138] sm:$0x1] %v460_v55  ;;  %v17230_v33 = vsel %vm17110_vm2, %v486_v37, %v491_v2  ;;  %v529_v46 = vrot.slane %v527_v23, 5  ;;  %v526_v56 = vrot.slane %v17201_v42, 4  ;;  %v17249_v8 = vld [vmem:[#allocation2 + $0x24] sm:$0xff]  ;;  %v863_v42 = vsel %vm16652_vm9, %v17128_v44, %v862_v15 }
  0x99   :  { %15204 = vmatprep.subr.bf16.mxu0 %v15544_v20  ;;  %v566_v16 = vsel %vm16652_vm9, %v17230_v33, %v565_v13  ;;  %v11754_v63 = vcombine.high %v17256_v61, %v17249_v8  ;;  %v571_v37 = vld [vmem:[#allocation2 + $0xb0] sm:$0xf]  ;;  %864 = vst [vmem:[#allocation2 + $0x1d0] sm:$0xf] %v863_v42  ;;  %v535_v48 = vor.u32 %v534_v49, %v533_v18  ;;  %v15562_v23 = vld [vmem:[%s20349_s1 + $0xf8] sm:$0xff]   ;;  %v16268_v7 = vld [vmem:[%s20349_s1 + $0x1268] sm:$0xff]  }
  0x9a   :  { %v531_v25 = vor.u32 %v530_v58, %v529_v46  ;;  %567 = vst [vmem:[#allocation2 + $0x68] sm:$0xf] %v566_v16  ;;  %v572_v3 = vsel %vm16652_vm9, %v17162_v32, %v571_v37  ;;  %v540_v58 = vrot.slane %v243_v31, 6  ;;  %v11753_v18 = vcombine.low %v17256_v61, %v17249_v8  ;;  %v574_v0 = vld [vmem:[#allocation2 + $0xd4] sm:$0xf] }
  0x9b   :  { %13827 = vmatpush3.bf16.msra.mxu1 %v15538_v36  ;;  %2368 = vmatmul.mubr.bf16.gmra.mxu0 %v11667_v26  ;;  %v17234_v36 = vld [vmem:[#allocation2 + $0x10c] sm:$0xff]  ;;  %573 = vst [vmem:[#allocation2 + $0xb0] sm:$0xf] %v572_v3  ;;  %v577_v16 = vld [vmem:[#allocation2 + $0xf8] sm:$0xf] }
  0x9c   :  { %13828 = vmatprep.subr.bf16.mxu1 %v15545_v24  ;;  %15205 = vmatpush3.bf16.msra.mxu0 %v15544_v20  ;;  %v15557_v20 = vld [vmem:[%s20349_s1 + $0x440] sm:$0xff]   ;;  %v11677_v17 = vcombine.high %v17234_v36, %v1425_v45  ;;  %v11676_v26 = vcombine.low %v17234_v36, %v1425_v45  ;;  %v17272_v22 = vsel %vm17110_vm2, %v526_v56, %v531_v25  ;;  %v592_v13 = vld [vmem:[#allocation2 + $0x8c] sm:$0x8]  ;;  %v580_v34 = vld [vmem:[#allocation2 + $0x11c] sm:$0xf] }
  0x9d   :  { %15206 = vmatprep.subr.bf16.mxu0 %v15547_v11  ;;  %v15558_v24 = vld [vmem:[%s20349_s1 + $0x40] sm:$0xff]   ;;  %20385 = vst [vmem:[#allocation15_spill] sm:$0xff] %v17272_v22  ;;  %v593_v49 = vsel %vm16702_vm15, 0, %v592_v13  ;;  %v15564_v3 = vld [vmem:[%s20349_s1 + $0xb8] sm:$0xff]  }
  0x9e   :  { %2433 = vmatmul.mubr.bf16.gmra.mxu1 %v15543_v59  ;;  %2375 = vmatprep.mubr.bf16.mxu0 %v11677_v17  ;;  %v865_v59 = vld [vmem:[#allocation2 + $0x1f4] sm:$0xf]  ;;  %v586_v46 = vld [vmem:[#allocation2 + $0x44] sm:$0x8]  ;;  %594 = vst [vmem:[#allocation2 + $0x8c] sm:$0x8] %v593_v49  ;;  %v575_v17 = vsel %vm16652_vm9, %v17210_v38, %v574_v0 }
  0x9f   :  { %13829 = vmatpush3.bf16.msra.mxu1 %v15546_v10  ;;  %v537_v10 = vshrl.u32 %v17006_v19, 16  ;;  %v15553_v28 = vld [vmem:[#allocation2 + $0x114] ss:$36 sps:$4 sm:$0xff]   ;;  %v866_v4 = vsel %vm16652_vm9, %v17162_v32, %v865_v59  ;;  %v587_v19 = vsel %vm16702_vm15, 0, %v586_v46  ;;  %576 = vst [vmem:[#allocation2 + $0xd4] sm:$0xf] %v575_v17 }
  0xa0   :  { %13830 = vmatprep.subr.bf16.mxu1 %v15548_v43  ;;  %15207 = vmatpush3.bf16.msra.mxu0 %v15547_v11  ;;  %v15551_v11 = vld [vmem:[#allocation2 + $0x118] ss:$36 sps:$4 sm:$0xff]   ;;  %867 = vst [vmem:[#allocation2 + $0x1f4] sm:$0xf] %v866_v4  ;;  %588 = vst [vmem:[#allocation2 + $0x44] sm:$0x8] %v587_v19 }
  0xa1   :  { %15208 = vmatprep.subr.bf16.mxu0 %v15554_v1  ;;  %v1159_v43 = vld [vmem:[#allocation2 + $0x338] sm:$0xf]  ;;  %2440 = vmatprep.mubr.bf16.mxu1 %v15551_v11  ;;  %v539_v55 = vrot.slane %v537_v10, 5  ;;  %v589_v56 = vld [vmem:[#allocation2 + $0x68] sm:$0x8]  ;;  %v15582_v13 = vld [vmem:[%s20349_s1 + $0x120] sm:$0xff]  }
  0xa2   :  { %v1160_v2 = vsel %vm16652_vm9, %v17162_v32, %v1159_v43  ;;  %v543_v32 = vrot.slane %v16990_v6, 5  ;;  %v590_v31 = vsel %vm16702_vm15, 0, %v589_v56  ;;  %v15565_v6 = vld [vmem:[%s20349_s1 + $0x138] sm:$0xff]   ;;  %v595_v25 = vld [vmem:[#allocation2 + $0xb0] sm:$0x8]  ;;  %v15581_v49 = vld [vmem:[%s20349_s1 + $0xa0] sm:$0xff]  }
  0xa3   :  { %13831 = vmatpush3.bf16.msra.mxu1 %v15549_v39  ;;  %2376 = vmatmul.mubr.bf16.gmra.mxu0 %v11676_v26  ;;  %1161 = vst [vmem:[#allocation2 + $0x338] sm:$0xf] %v1160_v2  ;;  %v15563_v39 = vld [vmem:[%s20349_s1 + $0x178] sm:$0xff]   ;;  %591 = vst [vmem:[#allocation2 + $0x68] sm:$0x8] %v590_v31  ;;  %v596_v45 = vsel %vm16702_vm15, 0, %v595_v25  ;;  %v578_v26 = vsel %vm16652_vm9, %v17272_v22, %v577_v16 }
  0xa4   :  { %13832 = vmatprep.subr.bf16.mxu1 %v15555_v5  ;;  %15209 = vmatpush3.bf16.msra.mxu0 %v15554_v1  ;;  %v536_v1 = vrot.slane %v535_v48, 4  ;;  %v544_v5 = vrot.slane %v16993_v12, 6  ;;  %v15567_v12 = vld [vmem:[%s20349_s1 + $0x170] sm:$0xff]   ;;  %597 = vst [vmem:[#allocation2 + $0xb0] sm:$0x8] %v596_v45  ;;  %v15586_v16 = vld [vmem:[%s20349_s1 + $0xd8] sm:$0xff]  }
  0xa5   :  { %15210 = vmatprep.subr.bf16.mxu0 %v15557_v20  ;;  %579 = vst [vmem:[#allocation2 + $0xf8] sm:$0xf] %v578_v26  ;;  %v17328_v10 = vld [vmem:[#allocation2 + $0x4c] ss:$36 sps:$4 sm:$0xff]   ;;  %v583_v42 = vld [vmem:[#allocation2 + $0x140] sm:$0xf] }
  0xa6   :  { %2441 = vmatmul.mubr.bf16.gmra.mxu1 %v15553_v28  ;;  %v545_v14 = vor.u32 %v544_v5, %v543_v32  ;;  %v549_v28 = vrot.slane %v547_v60, 5  ;;  %v17336_v59 = vld [vmem:[#allocation2 + $0x48] ss:$36 sps:$4 sm:$0xff]   ;;  %v15566_v48 = vld [vmem:[%s20349_s1 + $0xf0] sm:$0xff]   ;;  %v15587_v17 = vld [vmem:[%s20349_s1 + $0x158] sm:$0xff]  }
  0xa7   :  { %13833 = vmatpush3.bf16.msra.mxu1 %v15556_v54  ;;  %3162 = vmatprep.mubr.bf16.mxu1 %v11754_v63  ;;  %v15569_v54 = vld [vmem:[%s20349_s1 + $0x130] sm:$0xff]   ;;  %v20387_v63 = vshll.u32 %v17015_v27, 16  ;;  %v15578_v5 = vld [vmem:[%s20349_s1 + $0x128] sm:$0xff]   ;;  %v15588_v26 = vld [vmem:[%s20349_s1 + $0x98] sm:$0xff]  }
  0xa8   :  { %13834 = vmatprep.subr.bf16.mxu1 %v15558_v24  ;;  %15211 = vmatpush3.bf16.msra.mxu0 %v15557_v20  ;;  %v541_v20 = vor.u32 %v540_v58, %v539_v55  ;;  %v1162_v24 = vld [vmem:[#allocation2 + $0x35c] sm:$0xf]  ;;  %v546_v11 = vrot.slane %v545_v14, 4  ;;  %v15576_v58 = vld [vmem:[%s20349_s1 + $0x168] sm:$0xff]   ;;  %v598_v32 = vld [vmem:[#allocation2 + $0xd4] sm:$0x8] }
  0xa9   :  { %13860 = vmatprep.subr.bf16.mxu0 %v15562_v23  ;;  %v550_v37 = vrot.slane %v20387_v63, 6  ;;  %v1163_v15 = vsel %vm16652_vm9, %v17210_v38, %v1162_v24  ;;  %v15568_v23 = vld [vmem:[%s20349_s1 + $0xb0] sm:$0xff]   ;;  %v599_v46 = vsel %vm16702_vm15, 0, %v598_v32  ;;  %v15579_v14 = vld [vmem:[%s20349_s1 + $0xe0] sm:$0xff]   ;;  %v15589_v24 = vld [vmem:[%s20349_s1 + $0x118] sm:$0xff]  }
  0xaa   :  { %v17314_v8 = vsel %vm17110_vm2, %v536_v1, %v541_v20  ;;  %1164 = vst [vmem:[#allocation2 + $0x35c] sm:$0xf] %v1163_v15  ;;  %v15560_v43 = vld [vmem:[#allocation2 + $0x44] ss:$36 sps:$4 sm:$0xff]   ;;  %600 = vst [vmem:[#allocation2 + $0xd4] sm:$0x8] %v599_v46 }
  0xab   :  { %13835 = vmatpush3.bf16.msra.mxu1 %v15559_v41  ;;  %20386 = vst [vmem:[#allocation16_spill] sm:$0xff] %v17314_v8  ;;  %v581_v27 = vsel %vm16652_vm9, %v17314_v8, %v580_v34  ;;  %v551_v41 = vor.u32 %v550_v37, %v549_v28  ;;  %15212 = vmatprep.mubr.bf16.mxu0 %v15560_v43  ;;  %v15561_v4 = vld [vmem:[#allocation2 + $0x8c] ss:$36 sps:$4 sm:$0xff]   ;;  %v15580_v20 = vld [vmem:[%s20349_s1 + $0x160] sm:$0xff]   ;;  %v15605_v46 = vld [vmem:[%s20349_s1 + $0x1f8] sm:$0xff]  }
  0xac   :  { %13900 = vmatprep.subr.bf16.mxu1 %v15563_v39  ;;  %582 = vst [vmem:[#allocation2 + $0x11c] sm:$0xf] %v581_v27  ;;  %15213 = vmatmul.mubr.bf16.vlgmr.msra.gmra.mxu0 %v15561_v4  ;;  %v15575_v39 = vld [vmem:[%s20349_s1 + $0xe8] sm:$0xff]   ;;  %v601_v1 = vld [vmem:[#allocation2 + $0xf8] sm:$0x8]  ;;  %v15590_v63 = vld [vmem:[%s20349_s1 + $0xd0] sm:$0xff]  }
  0xad   :  { %v17344_v2 = vsel %vm17110_vm2, %v546_v11, %v551_v41  ;;  %13861 = vmatpush3.bf16.msra.mxu0 %v15564_v3  ;;  %v602_v56 = vsel %vm16702_vm15, 0, %v601_v1  ;;  %v17389_v0 = vld [vmem:[#allocation2 + $0x90] ss:$36 sps:$4 sm:$0xff]   ;;  %v17417_v34 = vld [vmem:[#allocation2 + $0xdc] ss:$36 sps:$4 sm:$0xff]   ;;  %v15597_v27 = vld [vmem:[%s20349_s1 + $0xc8] sm:$0xff]  }
  0xae   :  { %3163 = vmatmul.mubr.bf16.vlgmr.msra.gmra.mxu1 %v11753_v18  ;;  %20388 = vst [vmem:[#allocation17_spill] sm:$0xff] %v17344_v2  ;;  %v584_v55 = vsel %vm16652_vm9, %v17344_v2, %v583_v42  ;;  %13862 = vmatprep.subr.bf16.mxu0 %v15566_v48  ;;  %603 = vst [vmem:[#allocation2 + $0xf8] sm:$0x8] %v602_v56  ;;  %v15591_v37 = vld [vmem:[%s20349_s1 + $0x150] sm:$0xff]   ;;  %v17419_v3 = vld [vmem:[#allocation2 + $0xd8] ss:$36 sps:$4 sm:$0xff]  }
  0xaf   :  { %13901 = vmatpush3.bf16.msra.mxu1 %v15565_v6  ;;  %3170 = vmatprep.mubr.bf16.mxu1 %v17328_v10  ;;  %585 = vst [vmem:[#allocation2 + $0x140] sm:$0xf] %v584_v55  ;;  %v15577_v6 = vld [vmem:[%s20349_s1 + $0xa8] sm:$0xff]   ;;  %v15592_v11 = vld [vmem:[%s20349_s1 + $0x90] sm:$0xff]   ;;  %v15601_v41 = vld [vmem:[%s20349_s1 + $0xc0] sm:$0xff]  }
  0xb0   :  { %13902 = vmatprep.subr.bf16.mxu1 %v15567_v12  ;;  %v15593_v28 = vld [vmem:[%s20349_s1 + $0x110] sm:$0xff]   ;;  %v15598_v42 = vld [vmem:[%s20349_s1 + $0x148] sm:$0xff]   ;;  %v15602_v4 = vld [vmem:[%s20349_s1 + $0x140] sm:$0xff]  }
  0xb1   :  { %v1186_v18 = vld [vmem:[#allocation2 + $0x35c] sm:$0x8]  ;;  %13863 = vmatpush3.bf16.msra.mxu0 %v15568_v23  ;;  %v15599_v43 = vld [vmem:[%s20349_s1 + $0x88] sm:$0xff]   ;;  %v15603_v23 = vld [vmem:[%s20349_s1 + $0x80] sm:$0xff]  }
  0xb2   :  { %v1187_v19 = vsel %vm16702_vm15, 0, %v1186_v18  ;;  %13864 = vmatprep.subr.bf16.mxu0 %v15575_v39  ;;  %v15600_v48 = vld [vmem:[%s20349_s1 + $0x108] sm:$0xff]   ;;  %v15604_v55 = vld [vmem:[%s20349_s1 + $0x100] sm:$0xff]   ;;  %v1211_v39 = vld [vmem:[#allocation2 + $0x34] sm:$0xff] }
  0xb3   :  { %13903 = vmatpush3.bf16.msra.mxu1 %v15569_v54  ;;  %v604_v31 = vld [vmem:[#allocation2 + $0x11c] sm:$0x8]  ;;  %1188 = vst [vmem:[#allocation2 + $0x35c] sm:$0x8] %v1187_v19  ;;  %v17387_v54 = vld [vmem:[#allocation2 + $0x94] ss:$36 sps:$4 sm:$0xff]   ;;  %v11758_v56 = vcombine.high %v17256_v61, %v1211_v39 }
  0xb4   :  { %13904 = vmatprep.subr.bf16.mxu1 %v15576_v58  ;;  %v605_v12 = vsel %vm16702_vm15, 0, %v604_v31  ;;  %v1210_v58 = vld [vmem:[#allocation2 + $0x2c] sm:$0xff]  ;;  %v15606_v18 = vld [vmem:[%s20349_s1 + $0x238] sm:$0xff]  }
  0xb5   :  { %606 = vst [vmem:[#allocation2 + $0x11c] sm:$0x8] %v605_v12  ;;  %13865 = vmatpush3.bf16.msra.mxu0 %v15577_v6  ;;  %v15570_v60 = vld [vmem:[#allocation2 + $0xd4] ss:$36 sps:$4 sm:$0xff]   ;;  %v11755_v32 = vcombine.low %v17256_v61, %v1210_v58  ;;  %v11756_v1 = vcombine.high %v17256_v61, %v1210_v58  ;;  %v15638_v58 = vld [vmem:[%s20349_s1 + $0x1c8] sm:$0xff]  }
  0xb6   :  { %3171 = vmatmul.mubr.bf16.gmra.mxu1 %v17336_v59  ;;  %v607_v25 = vld [vmem:[#allocation2 + $0x140] sm:$0x8]  ;;  %13866 = vmatprep.subr.bf16.mxu0 %v15579_v14  ;;  %v15607_v19 = vld [vmem:[%s20349_s1 + $0x1b8] sm:$0xff]   ;;  %v15608_v31 = vld [vmem:[%s20349_s1 + $0x1f0] sm:$0xff]  }
  0xb7   :  { %13905 = vmatpush3.bf16.msra.mxu1 %v15578_v5  ;;  %v608_v45 = vsel %vm16702_vm15, 0, %v607_v25  ;;  %3178 = vmatprep.mubr.bf16.mxu1 %v17387_v54  ;;  %v11757_v5 = vcombine.low %v17256_v61, %v1211_v39  ;;  %v15609_v6 = vld [vmem:[%s20349_s1 + $0x230] sm:$0xff]   ;;  %v15616_v25 = vld [vmem:[%s20349_s1 + $0x1e8] sm:$0xff]  }
  0xb8   :  { %13906 = vmatprep.subr.bf16.mxu1 %v15580_v20  ;;  %609 = vst [vmem:[#allocation2 + $0x140] sm:$0x8] %v608_v45  ;;  %15216 = vmatprep.mubr.bf16.mxu0 %v15570_v60  ;;  %v15610_v12 = vld [vmem:[%s20349_s1 + $0x1b0] sm:$0xff]   ;;  %v17483_v45 = vld [vmem:[#allocation2 + $0x58] ss:$36 sps:$4 sm:$0xff]   ;;  %v15620_v60 = vld [vmem:[%s20349_s1 + $0x1e0] sm:$0xff]  }
  0xb9   :  { %13867 = vmatpush3.bf16.msra.mxu0 %v15581_v49  ;;  %v17469_v20 = vld [vmem:[#allocation2 + $0x54] ss:$36 sps:$4 sm:$0xff]   ;;  %v15617_v49 = vld [vmem:[%s20349_s1 + $0x228] sm:$0xff]  }
  0xba   :  { %13868 = vmatprep.subr.bf16.mxu0 %v15586_v16  ;;  %v17471_v14 = vld [vmem:[#allocation2 + $0x50] ss:$36 sps:$4 sm:$0xff]   ;;  %v15619_v16 = vld [vmem:[%s20349_s1 + $0x1a8] sm:$0xff]  }
  0xbb   :  { %13907 = vmatpush3.bf16.msra.mxu1 %v15582_v13  ;;  %v17473_v13 = vld [vmem:[#allocation2 + $0x5c] ss:$36 sps:$4 sm:$0xff]  }
  0xbc   :  { %13908 = vmatprep.subr.bf16.mxu1 %v15587_v17  ;;  %v15621_v17 = vld [vmem:[%s20349_s1 + $0x220] sm:$0xff]  }
  0xbd   :  { %13869 = vmatpush3.bf16.msra.mxu0 %v15588_v26  ;;  %v15622_v26 = vld [vmem:[%s20349_s1 + $0x1a0] sm:$0xff]  }
  0xbe   :  { %3179 = vmatmul.mubr.bf16.gmra.mxu1 %v17389_v0  ;;  %13870 = vmatprep.subr.bf16.mxu0 %v15590_v63  ;;  %v17501_v63 = vld [vmem:[#allocation2 + $0x98] ss:$36 sps:$4 sm:$0xff]  }
  0xbf   :  { %13909 = vmatpush3.bf16.msra.mxu1 %v15589_v24  ;;  %v15573_v15 = vld [vmem:[#allocation2 + $0x11c] ss:$36 sps:$4 sm:$0xff]   ;;  %3186 = vmatprep.mubr.bf16.mxu1 %v17417_v34 }
  0xc0   :  { %13910 = vmatprep.subr.bf16.mxu1 %v15591_v37  ;;  %15217 = vmatmul.mubr.bf16.gmra.mxu0 %v15573_v15  ;;  %v17499_v24 = vld [vmem:[#allocation2 + $0x9c] ss:$36 sps:$4 sm:$0xff]   ;;  %v17503_v37 = vld [vmem:[#allocation2 + $0xa4] ss:$36 sps:$4 sm:$0xff]  }
  0xc1   :  { %13871 = vmatpush3.bf16.msra.mxu0 %v15592_v11  ;;  %3227 = vmatprep.mubr.bf16.mxu0 %v11756_v1  ;;  %v15628_v15 = vld [vmem:[%s20349_s1 + $0x1d8] sm:$0xff]   ;;  %v15640_v1 = vld [vmem:[%s20349_s1 + $0x188] sm:$0xff]  }
  0xc2   :  { %13872 = vmatprep.subr.bf16.mxu0 %v15597_v27  ;;  %v15629_v11 = vld [vmem:[%s20349_s1 + $0x218] sm:$0xff]  }
  0xc3   :  { %13911 = vmatpush3.bf16.msra.mxu1 %v15593_v28  ;;  %v17513_v28 = vld [vmem:[#allocation2 + $0xa0] ss:$36 sps:$4 sm:$0xff]   ;;  %v15631_v27 = vld [vmem:[%s20349_s1 + $0x198] sm:$0xff]  }
  0xc4   :  { %13912 = vmatprep.subr.bf16.mxu1 %v15598_v42  ;;  %v15632_v42 = vld [vmem:[%s20349_s1 + $0x1d0] sm:$0xff]  }
  0xc5   :  { %13873 = vmatpush3.bf16.msra.mxu0 %v15599_v43  ;;  %v15633_v43 = vld [vmem:[%s20349_s1 + $0x210] sm:$0xff]  }
  0xc6   :  { %3187 = vmatmul.mubr.bf16.gmra.mxu1 %v17419_v3  ;;  %13874 = vmatprep.subr.bf16.mxu0 %v15601_v41  ;;  %v17529_v41 = vld [vmem:[#allocation2 + $0xe4] ss:$36 sps:$4 sm:$0xff]  }
  0xc7   :  { %13913 = vmatpush3.bf16.msra.mxu1 %v15600_v48  ;;  %3292 = vmatprep.mubr.bf16.mxu1 %v11758_v56  ;;  %v15634_v48 = vld [vmem:[%s20349_s1 + $0x190] sm:$0xff]   ;;  %v1212_v56 = vld [vmem:[#allocation2 + $0x3c] sm:$0xff] }
  0xc8   :  { %13914 = vmatprep.subr.bf16.mxu1 %v15602_v4  ;;  %v17531_v4 = vld [vmem:[#allocation2 + $0xe0] ss:$36 sps:$4 sm:$0xff]  }
  0xc9   :  { %13875 = vmatpush3.bf16.msra.mxu0 %v15603_v23  ;;  %v17533_v23 = vld [vmem:[#allocation2 + $0xe8] sm:$0xff] }
  0xca   :  { %13940 = vmatprep.subr.bf16.mxu0 %v15605_v46  ;;  %v11784_v39 = vcombine.low %v17533_v23, %v17234_v36  ;;  %v15643_v46 = vld [vmem:[%s20349_s1 + $0x180] sm:$0xff]  }
  0xcb   :  { %13915 = vmatpush3.bf16.msra.mxu1 %v15604_v55  ;;  %v11785_v55 = vcombine.high %v17533_v23, %v17234_v36  ;;  %v15642_v36 = vld [vmem:[%s20349_s1 + $0x200] sm:$0xff]  }
  0xcc   :  { %3228 = vmatmul.mubr.bf16.vlgmr.msra.gmra.mxu0 %v11755_v32  ;;  %15220 = vmatprep.subr.bf16.mxu1 %v15606_v18  ;;  %v15639_v32 = vld [vmem:[%s20349_s1 + $0x208] sm:$0xff]  }
  0xcd   :  { %13941 = vmatpush3.bf16.msra.mxu0 %v15607_v19  ;;  %3235 = vmatprep.mubr.bf16.mxu0 %v17469_v20  ;;  %v15644_v19 = vld [vmem:[#allocation2 + $0x20] ss:$36 sps:$4 sm:$0xff]  }
  0xce   :  { %3293 = vmatmul.mubr.bf16.vlgmr.msra.gmra.mxu1 %v11757_v5  ;;  %13942 = vmatprep.subr.bf16.mxu0 %v15608_v31  ;;  %v15641_v5 = vld [vmem:[%s20349_s1 + $0x1c0] sm:$0xff]   ;;  %v11759_v31 = vcombine.low %v17256_v61, %v1212_v56 }
  0xcf   :  { %15221 = vmatpush3.bf16.msra.mxu1 %v15606_v18  ;;  %3300 = vmatprep.mubr.bf16.mxu1 %v17473_v13  ;;  %v11760_v18 = vcombine.high %v17256_v61, %v1212_v56  ;;  %v15649_v61 = vld [vmem:[%s20349_s1 + $0x538] sm:$0xff]  }
  0xd0   :  { %15222 = vmatprep.subr.bf16.mxu1 %v15609_v6  ;;  %v15670_v56 = vld [vmem:[%s20349_s1 + $0x498] sm:$0xff]  }
  0xd1   :  { %13943 = vmatpush3.bf16.msra.mxu0 %v15610_v12  ;;  %v15646_v12 = vld [vmem:[%s20349_s1 + $0x578] sm:$0xff]  }
  0xd2   :  { %13944 = vmatprep.subr.bf16.mxu0 %v15616_v25  ;;  %v15647_v25 = vld [vmem:[#allocation2 + $0x68] ss:$36 sps:$4 sm:$0xff]  }
  0xd3   :  { %15223 = vmatpush3.bf16.msra.mxu1 %v15609_v6  ;;  %v15645_v6 = vld [vmem:[%s20349_s1 + $0x4f8] sm:$0xff]  }
  0xd4   :  { %3236 = vmatmul.mubr.bf16.gmra.mxu0 %v17471_v14  ;;  %15224 = vmatprep.subr.bf16.mxu1 %v15617_v49 }
  0xd5   :  { %13945 = vmatpush3.bf16.msra.mxu0 %v15619_v16  ;;  %3243 = vmatprep.mubr.bf16.mxu0 %v17499_v24  ;;  %v15650_v16 = vld [vmem:[%s20349_s1 + $0x4f0] sm:$0xff]  }
  0xd6   :  { %3301 = vmatmul.mubr.bf16.gmra.mxu1 %v17483_v45  ;;  %13946 = vmatprep.subr.bf16.mxu0 %v15620_v60  ;;  %v15651_v60 = vld [vmem:[%s20349_s1 + $0x570] sm:$0xff]  }
  0xd7   :  { %15225 = vmatpush3.bf16.msra.mxu1 %v15617_v49  ;;  %3308 = vmatprep.mubr.bf16.mxu1 %v17503_v37  ;;  %v15648_v49 = vld [vmem:[%s20349_s1 + $0x4b8] sm:$0xff]  }
  0xd8   :  { %15226 = vmatprep.subr.bf16.mxu1 %v15621_v17 }
  0xd9   :  { %13947 = vmatpush3.bf16.msra.mxu0 %v15622_v26  ;;  %v15653_v26 = vld [vmem:[%s20349_s1 + $0x530] sm:$0xff]  }
  0xda   :  { %13948 = vmatprep.subr.bf16.mxu0 %v15628_v15  ;;  %v17585_v15 = vld [vmem:[#allocation2 + $0x64] ss:$36 sps:$4 sm:$0xff]  }
  0xdb   :  { %15227 = vmatpush3.bf16.msra.mxu1 %v15621_v17  ;;  %v15652_v17 = vld [vmem:[%s20349_s1 + $0x4b0] sm:$0xff]  }
  0xdc   :  { %3244 = vmatmul.mubr.bf16.gmra.mxu0 %v17501_v63  ;;  %15228 = vmatprep.subr.bf16.mxu1 %v15629_v11 }
  0xdd   :  { %13949 = vmatpush3.bf16.msra.mxu0 %v15631_v27  ;;  %3251 = vmatprep.mubr.bf16.mxu0 %v17529_v41  ;;  %v15657_v27 = vld [vmem:[%s20349_s1 + $0x4e8] sm:$0xff]  }
  0xde   :  { %3309 = vmatmul.mubr.bf16.gmra.mxu1 %v17513_v28  ;;  %13950 = vmatprep.subr.bf16.mxu0 %v15632_v42  ;;  %v15658_v42 = vld [vmem:[%s20349_s1 + $0x568] sm:$0xff]  }
  0xdf   :  { %15229 = vmatpush3.bf16.msra.mxu1 %v15629_v11  ;;  %3316 = vmatprep.mubr.bf16.mxu1 %v11785_v55  ;;  %v17587_v11 = vld [vmem:[#allocation2 + $0x60] ss:$36 sps:$4 sm:$0xff]  }
  0xe0   :  { %15230 = vmatprep.subr.bf16.mxu1 %v15633_v43  ;;  %v15661_v55 = vld [vmem:[%s20349_s1 + $0x4e0] sm:$0xff]  }
  0xe1   :  { %13951 = vmatpush3.bf16.msra.mxu0 %v15634_v48  ;;  %v15660_v48 = vld [vmem:[%s20349_s1 + $0x528] sm:$0xff]  }
  0xe2   :  { %13952 = vmatprep.subr.bf16.mxu0 %v15638_v58  ;;  %v15662_v58 = vld [vmem:[%s20349_s1 + $0x560] sm:$0xff]  }
  0xe3   :  { %15231 = vmatpush3.bf16.msra.mxu1 %v15633_v43  ;;  %v15659_v43 = vld [vmem:[%s20349_s1 + $0x4a8] sm:$0xff]  }
  0xe4   :  { %3252 = vmatmul.mubr.bf16.gmra.mxu0 %v17531_v4  ;;  %15232 = vmatprep.subr.bf16.mxu1 %v15639_v32 }
  0xe5   :  { %13953 = vmatpush3.bf16.msra.mxu0 %v15640_v1  ;;  %3357 = vmatprep.mubr.bf16.mxu0 %v11760_v18  ;;  %v17615_v1 = vld [vmem:[#allocation2 + $0xac] ss:$36 sps:$4 sm:$0xff]   ;;  %v15671_v18 = vld [vmem:[%s20349_s1 + $0x518] sm:$0xff]  }
  0xe6   :  { %3317 = vmatmul.mubr.bf16.gmra.mxu1 %v11784_v39  ;;  %13954 = vmatprep.subr.bf16.mxu0 %v15641_v5  ;;  %v15663_v39 = vld [vmem:[%s20349_s1 + $0x4a0] sm:$0xff]   ;;  %v17617_v5 = vld [vmem:[#allocation2 + $0xa8] ss:$36 sps:$4 sm:$0xff]  }
  0xe7   :  { %15233 = vmatpush3.bf16.msra.mxu1 %v15639_v32  ;;  %15236 = vmatprep.mubr.bf16.mxu1 %v15644_v19  ;;  %v15664_v32 = vld [vmem:[%s20349_s1 + $0x520] sm:$0xff]   ;;  %v15672_v19 = vld [vmem:[#allocation2 + $0xb0] ss:$36 sps:$4 sm:$0xff]  }
  0xe8   :  { %15234 = vmatprep.subr.bf16.mxu1 %v15642_v36 }
  0xe9   :  { %13955 = vmatpush3.bf16.msra.mxu0 %v15643_v46  ;;  %v15669_v46 = vld [vmem:[%s20349_s1 + $0x558] sm:$0xff]  }
  0xea   :  { %13992 = vmatprep.subr.bf16.mxu0 %v15645_v6  ;;  %v15674_v6 = vld [vmem:[%s20349_s1 + $0x4d0] sm:$0xff]  }
  0xeb   :  { %15235 = vmatpush3.bf16.msra.mxu1 %v15642_v36  ;;  %v15668_v36 = vld [vmem:[%s20349_s1 + $0x4d8] sm:$0xff]  }
  0xec   :  { %14032 = vmatprep.subr.bf16.mxu1 %v15646_v12  ;;  %3358 = vmatmul.mubr.bf16.vlgmr.msra.gmra.mxu0 %v11759_v31  ;;  %v15673_v31 = vld [vmem:[#allocation2 + $0xf8] ss:$36 sps:$4 sm:$0xff]   ;;  %v15675_v12 = vld [vmem:[%s20349_s1 + $0x550] sm:$0xff]  }
  0xed   :  { %13993 = vmatpush3.bf16.msra.mxu0 %v15648_v49  ;;  %3365 = vmatprep.mubr.bf16.mxu0 %v17585_v15  ;;  %v15677_v49 = vld [vmem:[%s20349_s1 + $0x510] sm:$0xff]  }
  0xee   :  { %15237 = vmatmul.mubr.bf16.vlgmr.msra.gmra.mxu1 %v15647_v25  ;;  %13994 = vmatprep.subr.bf16.mxu0 %v15650_v16  ;;  %v15676_v25 = vld [vmem:[%s20349_s1 + $0x490] sm:$0xff]  }
  0xef   :  { %14033 = vmatpush3.bf16.msra.mxu1 %v15649_v61  ;;  %15240 = vmatprep.mubr.bf16.mxu1 %v15672_v19  ;;  %v13664_v61 = vpop.f32.mrf.mxu0  ;;  %v17646_v16 = vld [vmem:[#allocation2 + $0xf4] ss:$36 sps:$4 sm:$0xff]  }
  0xf0   :  { %14034 = vmatprep.subr.bf16.mxu1 %v15651_v60  ;;  %v17648_v60 = vld [vmem:[#allocation2 + $0xf0] ss:$36 sps:$4 sm:$0xff]  }
  0xf1   :  { %13995 = vmatpush3.bf16.msra.mxu0 %v15652_v17  ;;  %v15681_v17 = vld [vmem:[%s20349_s1 + $0x4c8] sm:$0xff]  }
  0xf2   :  { %13996 = vmatprep.subr.bf16.mxu0 %v15657_v27 }
  0xf3   :  { %14035 = vmatpush3.bf16.msra.mxu1 %v15653_v26  ;;  %v13665_v26 = vpop.f32.mrf.mxu0  ;;  %v13704_v27 = vpop.f32.mrf.mxu1 }
  0xf4   :  { %3366 = vmatmul.mubr.bf16.gmra.mxu0 %v17587_v11  ;;  %14036 = vmatprep.subr.bf16.mxu1 %v15658_v42  ;;  %v13666_v42 = vadd.f32 %v13665_v26, %v13664_v61  ;;  %v15691_v61 = vld [vmem:[%s20349_s1 + $0x5b8] sm:$0xff]  }
  0xf5   :  { %13997 = vmatpush3.bf16.msra.mxu0 %v15659_v43  ;;  %3373 = vmatprep.mubr.bf16.mxu0 %v17615_v1  ;;  %v15683_v43 = vld [vmem:[%s20349_s1 + $0x488] sm:$0xff]   ;;  %v15692_v26 = vld [vmem:[%s20349_s1 + $0x638] sm:$0xff]  }
  0xf6   :  { %13998 = vmatprep.subr.bf16.mxu0 %v15661_v55  ;;  %15241 = vmatmul.mubr.bf16.gmra.mxu1 %v15673_v31  ;;  %v15684_v55 = vld [vmem:[%s20349_s1 + $0x508] sm:$0xff]   ;;  %v15688_v31 = vld [vmem:[%s20349_s1 + $0x500] sm:$0xff]  }
  0xf7   :  { %14037 = vmatpush3.bf16.msra.mxu1 %v15660_v48  ;;  %4354 = vmatprep.mubr.bf16.mxu1 %v17469_v20  ;;  %v15682_v20 = vld [vmem:[%s20349_s1 + $0x548] sm:$0xff]   ;;  %v13667_v48 = vpop.f32.mrf.mxu0 }
  0xf8   :  { %14038 = vmatprep.subr.bf16.mxu1 %v15662_v58  ;;  %v13705_v58 = vpop.f32.mrf.mxu1 }
  0xf9   :  { %13999 = vmatpush3.bf16.msra.mxu0 %v15663_v39  ;;  %v15685_v39 = vld [vmem:[%s20349_s1 + $0x4c0] sm:$0xff]  }
  0xfa   :  { %14000 = vmatprep.subr.bf16.mxu0 %v15668_v36  ;;  %v13668_v36 = vpop.f32.mrf.mxu0 }
  0xfb   :  { %14039 = vmatpush3.bf16.msra.mxu1 %v15664_v32  ;;  %v13706_v32 = vadd.f32 %v13705_v58, %v13704_v27  ;;  %v13669_v19 = vadd.f32 %v13668_v36, %v13667_v48  ;;  %v15694_v27 = vld [vmem:[%s20349_s1 + $0x670] sm:$0xff]   ;;  %v15697_v48 = vld [vmem:[%s20349_s1 + $0x5e8] sm:$0xff]  }
  0xfc   :  { %3374 = vmatmul.mubr.bf16.gmra.mxu0 %v17617_v5  ;;  %14040 = vmatprep.subr.bf16.mxu1 %v15669_v46  ;;  %v15686_v46 = vld [vmem:[%s20349_s1 + $0x540] sm:$0xff]  }
  0xfd   :  { %14001 = vmatpush3.bf16.msra.mxu0 %v15670_v56  ;;  %3381 = vmatprep.mubr.bf16.mxu0 %v17646_v16  ;;  %v13707_v56 = vpop.f32.mrf.mxu1 }
  0xfe   :  { %14002 = vmatprep.subr.bf16.mxu0 %v15674_v6 }
  0xff   :  { %14041 = vmatpush3.bf16.msra.mxu1 %v15671_v18  ;;  %v15687_v18 = vld [vmem:[%s20349_s1 + $0x480] sm:$0xff]   ;;  %v13708_v6 = vpop.f32.mrf.mxu1 }
 0x100   :  { %14042 = vmatprep.subr.bf16.mxu1 %v15675_v12  ;;  %v15689_v12 = vld [vmem:[%s20349_s1 + $0x5f8] sm:$0xff]  }
 0x101   :  { %14003 = vmatpush3.bf16.msra.mxu0 %v15676_v25  ;;  %v13709_v25 = vadd.f32 %v13708_v6, %v13707_v56  ;;  %v15701_v56 = vld [vmem:[%s20349_s1 + $0x5e0] sm:$0xff]  }
 0x102   :  { %14004 = vmatprep.subr.bf16.mxu0 %v15681_v17 }
 0x103   :  { %14043 = vmatpush3.bf16.msra.mxu1 %v15677_v49  ;;  %v15690_v49 = vld [vmem:[%s20349_s1 + $0x678] sm:$0xff]   ;;  %v17688_v17 = vadd.f32 %v13709_v25, %v13669_v19 }
 0x104   :  { %3382 = vmatmul.mubr.bf16.gmra.mxu0 %v17648_v60  ;;  %14044 = vmatprep.subr.bf16.mxu1 %v15682_v20  ;;  %v15693_v20 = vld [vmem:[%s20349_s1 + $0x5f0] sm:$0xff]  }
 0x105   :  { %4289 = vmatprep.mubr.bf16.mxu0 %v17328_v10  ;;  %14005 = vmatpush3.bf16.msra.mxu0 %v15683_v43  ;;  %v17674_v10 = vadd.f32 %v13706_v32, %v13666_v42  ;;  %v15695_v42 = vld [vmem:[%s20349_s1 + $0x5b0] sm:$0xff]   ;;  %v15700_v32 = vld [vmem:[%s20349_s1 + $0x628] sm:$0xff]  }
 0x106   :  { %14006 = vmatprep.subr.bf16.mxu0 %v15685_v39 }
 0x107   :  { %14045 = vmatpush3.bf16.msra.mxu1 %v15684_v55  ;;  %v15698_v55 = vld [vmem:[%s20349_s1 + $0x668] sm:$0xff]  }
 0x108   :  { %14046 = vmatprep.subr.bf16.mxu1 %v15686_v46 }
 0x109   :  { %14007 = vmatpush3.bf16.msra.mxu0 %v15687_v18 }
 0x10a   :  { %14072 = vmatprep.subr.bf16.mxu0 %v15689_v12  ;;  %v15704_v12 = vld [vmem:[%s20349_s1 + $0x620] sm:$0xff]  }
 0x10b   :  { %14047 = vmatpush3.bf16.msra.mxu1 %v15688_v31  ;;  %v15703_v31 = vld [vmem:[%s20349_s1 + $0x5a0] sm:$0xff]  }
 0x10c   :  { %4290 = vmatmul.mubr.bf16.vlgmr.msra.gmra.mxu0 %v17336_v59  ;;  %14112 = vmatprep.subr.bf16.mxu1 %v15690_v49  ;;  %v13670_v59 = vpop.f32.mrf.mxu0 }
 0x10d   :  { %14073 = vmatpush3.bf16.msra.mxu0 %v15691_v61  ;;  %4297 = vmatprep.mubr.bf16.mxu0 %v17387_v54  ;;  %v15707_v61 = vld [vmem:[%s20349_s1 + $0x598] sm:$0xff]  }
 0x10e   :  { %4355 = vmatmul.mubr.bf16.vlgmr.msra.gmra.mxu1 %v17471_v14  ;;  %14074 = vmatprep.subr.bf16.mxu0 %v15693_v20  ;;  %v15696_v14 = vld [vmem:[%s20349_s1 + $0x630] sm:$0xff]   ;;  %v13671_v43 = vpop.f32.mrf.mxu0  ;;  %v15708_v20 = vld [vmem:[%s20349_s1 + $0x618] sm:$0xff]  }
 0x10f   :  { %14113 = vmatpush3.bf16.msra.mxu1 %v15692_v26  ;;  %4362 = vmatprep.mubr.bf16.mxu1 %v17499_v24  ;;  %v13672_v54 = vadd.f32 %v13671_v43, %v13670_v59  ;;  %v15699_v24 = vld [vmem:[%s20349_s1 + $0x5a8] sm:$0xff]   ;;  %v15710_v59 = vld [vmem:[%s20349_s1 + $0x650] sm:$0xff]  }
 0x110   :  { %14114 = vmatprep.subr.bf16.mxu1 %v15694_v27  ;;  %v13710_v58 = vpop.f32.mrf.mxu1  ;;  %v13673_v39 = vpop.f32.mrf.mxu0  ;;  %v15709_v27 = vld [vmem:[%s20349_s1 + $0x5d0] sm:$0xff]  }
 0x111   :  { %14075 = vmatpush3.bf16.msra.mxu0 %v15695_v42  ;;  %v3486_v42 = vld [vmem:[#allocation2 + $0x120] sm:$0xff] }
 0x112   :  { %14076 = vmatprep.subr.bf16.mxu0 %v15697_v48  ;;  %v13711_v36 = vpop.f32.mrf.mxu1  ;;  %v13674_v46 = vpop.f32.mrf.mxu0  ;;  %v17767_v48 = vld [vmem:[#allocation2] sm:$0xff] }
 0x113   :  { %14115 = vmatpush3.bf16.msra.mxu1 %v15696_v14  ;;  %v13712_v18 = vadd.f32 %v13711_v36, %v13710_v58  ;;  %v13675_v6 = vadd.f32 %v13674_v46, %v13673_v39  ;;  %v3487_v14 = vld [vmem:[#allocation2 + $0x128] sm:$0xff]  ;;  %v12032_v58 = vcombine.low %v3486_v42, %v17767_v48 }
 0x114   :  { %4298 = vmatmul.mubr.bf16.gmra.mxu0 %v17389_v0  ;;  %14116 = vmatprep.subr.bf16.mxu1 %v15698_v55  ;;  %v15702_v0 = vld [vmem:[%s20349_s1 + $0x660] sm:$0xff]   ;;  %v13713_v19 = vpop.f32.mrf.mxu1  ;;  %v12035_v55 = vcombine.high %v3487_v14, %v17767_v48  ;;  %v12034_v39 = vcombine.low %v3487_v14, %v17767_v48 }
 0x115   :  { %14077 = vmatpush3.bf16.msra.mxu0 %v15699_v24  ;;  %4305 = vmatprep.mubr.bf16.mxu0 %v17417_v34  ;;  %v15705_v34 = vld [vmem:[%s20349_s1 + $0x5d8] sm:$0xff]   ;;  %v15713_v24 = vld [vmem:[%s20349_s1 + $0x5c8] sm:$0xff]  }
 0x116   :  { %4363 = vmatmul.mubr.bf16.gmra.mxu1 %v17501_v63  ;;  %14078 = vmatprep.subr.bf16.mxu0 %v15701_v56  ;;  %v17734_v63 = vadd.f32 %v13712_v18, %v13672_v54  ;;  %v13714_v25 = vpop.f32.mrf.mxu1  ;;  %v12033_v54 = vcombine.high %v3486_v42, %v17767_v48  ;;  %v15715_v56 = vld [vmem:[%s20349_s1 + $0x588] sm:$0xff]   ;;  %v15723_v42 = vld [vmem:[%s20349_s1 + $0x6f8] sm:$0xff]  }
 0x117   :  { %14117 = vmatpush3.bf16.msra.mxu1 %v15700_v32  ;;  %4370 = vmatprep.mubr.bf16.mxu1 %v17529_v41  ;;  %v13715_v49 = vadd.f32 %v13714_v25, %v13713_v19  ;;  %v15706_v41 = vld [vmem:[%s20349_s1 + $0x658] sm:$0xff]   ;;  %v15714_v32 = vld [vmem:[%s20349_s1 + $0x648] sm:$0xff]   ;;  %v15718_v25 = vld [vmem:[%s20349_s1 + $0x640] sm:$0xff]  }
 0x118   :  { %14118 = vmatprep.subr.bf16.mxu1 %v15702_v0  ;;  %v15716_v0 = vld [vmem:[%s20349_s1 + $0x608] sm:$0xff]  }
 0x119   :  { %14079 = vmatpush3.bf16.msra.mxu0 %v15703_v31  ;;  %v17748_v26 = vadd.f32 %v13715_v49, %v13675_v6  ;;  %v15717_v6 = vld [vmem:[%s20349_s1 + $0x5c0] sm:$0xff]  }
 0x11a   :  { %14080 = vmatprep.subr.bf16.mxu0 %v15705_v34 }
 0x11b   :  { %14119 = vmatpush3.bf16.msra.mxu1 %v15704_v12 }
 0x11c   :  { %4306 = vmatmul.mubr.bf16.gmra.mxu0 %v17419_v3  ;;  %14120 = vmatprep.subr.bf16.mxu1 %v15706_v41  ;;  %v15711_v3 = vld [vmem:[%s20349_s1 + $0x590] sm:$0xff]   ;;  %v15719_v41 = vld [vmem:[%s20349_s1 + $0x580] sm:$0xff]  }
 0x11d   :  { %14081 = vmatpush3.bf16.msra.mxu0 %v15707_v61  ;;  %4313 = vmatprep.mubr.bf16.mxu0 %v12033_v54  ;;  %v15726_v54 = vld [vmem:[%s20349_s1 + $0x6f0] sm:$0xff]  }
 0x11e   :  { %4371 = vmatmul.mubr.bf16.gmra.mxu1 %v17531_v4  ;;  %14082 = vmatprep.subr.bf16.mxu0 %v15709_v27  ;;  %v15712_v4 = vld [vmem:[%s20349_s1 + $0x610] sm:$0xff]   ;;  %v15720_v27 = vld [vmem:[%s20349_s1 + $0x600] sm:$0xff]  }
 0x11f   :  { %14121 = vmatpush3.bf16.msra.mxu1 %v15708_v20  ;;  %4378 = vmatprep.mubr.bf16.mxu1 %v12035_v55  ;;  %v15727_v55 = vld [vmem:[%s20349_s1 + $0x6a8] sm:$0xff]  }
 0x120   :  { %14122 = vmatprep.subr.bf16.mxu1 %v15710_v59 }
 0x121   :  { %14083 = vmatpush3.bf16.msra.mxu0 %v15711_v3  ;;  %v15721_v3 = vld [vmem:[%s20349_s1 + $0x6b8] sm:$0xff]  }
 0x122   :  { %14084 = vmatprep.subr.bf16.mxu0 %v15713_v24 }
 0x123   :  { %14123 = vmatpush3.bf16.msra.mxu1 %v15712_v4 }
 0x124   :  { %4314 = vmatmul.mubr.bf16.gmra.mxu0 %v12032_v58  ;;  %14124 = vmatprep.subr.bf16.mxu1 %v15714_v32  ;;  %v3483_v32 = vld [vmem:[#allocation2 + $0x10c] sm:$0xff] }
 0x125   :  { %14085 = vmatpush3.bf16.msra.mxu0 %v15715_v56  ;;  %4419 = vmatprep.mubr.bf16.mxu0 %v17473_v13  ;;  %v15722_v13 = vld [vmem:[%s20349_s1 + $0x738] sm:$0xff]   ;;  %v12028_v56 = vcombine.high %v17533_v23, %v3483_v32 }
 0x126   :  { %4379 = vmatmul.mubr.bf16.gmra.mxu1 %v12034_v39  ;;  %14086 = vmatprep.subr.bf16.mxu0 %v15717_v6  ;;  %v15730_v39 = vld [vmem:[%s20349_s1 + $0x6a0] sm:$0xff]  }
 0x127   :  { %14125 = vmatpush3.bf16.msra.mxu1 %v15716_v0  ;;  %4484 = vmatprep.mubr.bf16.mxu1 %v17585_v15  ;;  %v15724_v15 = vld [vmem:[%s20349_s1 + $0x6b0] sm:$0xff]  }
 0x128   :  { %v13676_v43 = vpop.f32.mrf.mxu0  ;;  %14126 = vmatprep.subr.bf16.mxu1 %v15718_v25 }
 0x129   :  { %14087 = vmatpush3.bf16.msra.mxu0 %v15719_v41 }
 0x12a   :  { %v13677_v46 = vpop.f32.mrf.mxu0  ;;  %15244 = vmatprep.subr.bf16.mxu0 %v15721_v3 }
 0x12b   :  { %v13678_v18 = vadd.f32 %v13677_v46, %v13676_v43  ;;  %14127 = vmatpush3.bf16.msra.mxu1 %v15720_v27  ;;  %v15725_v43 = vld [vmem:[%s20349_s1 + $0x730] sm:$0xff]   ;;  %v15732_v46 = vld [vmem:[%s20349_s1 + $0x6e0] sm:$0xff]  }
 0x12c   :  { %v13679_v31 = vpop.f32.mrf.mxu0  ;;  %14164 = vmatprep.subr.bf16.mxu1 %v15722_v13  ;;  %4420 = vmatmul.mubr.bf16.vlgmr.msra.gmra.mxu0 %v17483_v45  ;;  %v15728_v45 = vld [vmem:[%s20349_s1 + $0x728] sm:$0xff]  }
 0x12d   :  { %v13716_v36 = vpop.f32.mrf.mxu1  ;;  %15245 = vmatpush3.bf16.msra.mxu0 %v15721_v3  ;;  %4427 = vmatprep.mubr.bf16.mxu0 %v17503_v37  ;;  %v15731_v37 = vld [vmem:[%s20349_s1 + $0x720] sm:$0xff]   ;;  %v3488_v3 = vld [vmem:[#allocation2 + $0x130] sm:$0xff] }
 0x12e   :  { %v13680_v49 = vpop.f32.mrf.mxu0  ;;  %4485 = vmatmul.mubr.bf16.vlgmr.msra.gmra.mxu1 %v17587_v11  ;;  %15246 = vmatprep.subr.bf16.mxu0 %v15724_v15  ;;  %v15729_v11 = vld [vmem:[%s20349_s1 + $0x6e8] sm:$0xff]  }
 0x12f   :  { %v13717_v19 = vpop.f32.mrf.mxu1  ;;  %v13681_v20 = vadd.f32 %v13680_v49, %v13679_v31  ;;  %14165 = vmatpush3.bf16.msra.mxu1 %v15723_v42  ;;  %4492 = vmatprep.mubr.bf16.mxu1 %v17615_v1  ;;  %v15738_v49 = vld [vmem:[%s20349_s1 + $0x690] sm:$0xff]   ;;  %v12037_v42 = vcombine.high %v3488_v3, %v17767_v48 }
 0x130   :  { %v13718_v12 = vadd.f32 %v13717_v19, %v13716_v36  ;;  %14166 = vmatprep.subr.bf16.mxu1 %v15725_v43  ;;  %v15735_v19 = vld [vmem:[%s20349_s1 + $0x698] sm:$0xff]   ;;  %v15740_v43 = vld [vmem:[%s20349_s1 + $0x6d0] sm:$0xff]  }
 0x131   :  { %v13719_v34 = vpop.f32.mrf.mxu1  ;;  %15247 = vmatpush3.bf16.msra.mxu0 %v15724_v15 }
 0x132   :  { %v17795_v61 = vadd.f32 %v13718_v12, %v13678_v18  ;;  %15248 = vmatprep.subr.bf16.mxu0 %v15727_v55  ;;  %v15737_v12 = vld [vmem:[%s20349_s1 + $0x6d8] sm:$0xff]  }
 0x133   :  { %v13720_v59 = vpop.f32.mrf.mxu1  ;;  %14167 = vmatpush3.bf16.msra.mxu1 %v15726_v54 }
 0x134   :  { %v13721_v4 = vadd.f32 %v13720_v59, %v13719_v34  ;;  %14168 = vmatprep.subr.bf16.mxu1 %v15728_v45  ;;  %4428 = vmatmul.mubr.bf16.gmra.mxu0 %v17513_v28  ;;  %v15736_v28 = vld [vmem:[%s20349_s1 + $0x718] sm:$0xff]   ;;  %v12027_v34 = vcombine.low %v17533_v23, %v3483_v32 }
 0x135   :  { %15249 = vmatpush3.bf16.msra.mxu0 %v15727_v55  ;;  %4435 = vmatprep.mubr.bf16.mxu0 %v12028_v56  ;;  %v15743_v56 = vld [vmem:[%s20349_s1 + $0x6c8] sm:$0xff]  }
 0x136   :  { %v17810_v14 = vadd.f32 %v13721_v4, %v13681_v20  ;;  %4493 = vmatmul.mubr.bf16.gmra.mxu1 %v17617_v5  ;;  %15250 = vmatprep.subr.bf16.mxu0 %v15730_v39  ;;  %v3489_v4 = vld [vmem:[#allocation2 + $0x138] sm:$0xff] }
 0x137   :  { %14169 = vmatpush3.bf16.msra.mxu1 %v15729_v11  ;;  %4500 = vmatprep.mubr.bf16.mxu1 %v17646_v16  ;;  %v15739_v16 = vld [vmem:[%s20349_s1 + $0x710] sm:$0xff]   ;;  %v12039_v15 = vcombine.high %v3489_v4, %v17767_v48 }
 0x138   :  { %14170 = vmatprep.subr.bf16.mxu1 %v15731_v37 }
 0x139   :  { %15251 = vmatpush3.bf16.msra.mxu0 %v15730_v39 }
 0x13a   :  { %15252 = vmatprep.subr.bf16.mxu0 %v15735_v19 }
 0x13b   :  { %14171 = vmatpush3.bf16.msra.mxu1 %v15732_v46  ;;  %v12038_v46 = vcombine.low %v3489_v4, %v17767_v48 }
 0x13c   :  { %14172 = vmatprep.subr.bf16.mxu1 %v15736_v28  ;;  %4436 = vmatmul.mubr.bf16.gmra.mxu0 %v12027_v34 }
 0x13d   :  { %15253 = vmatpush3.bf16.msra.mxu0 %v15735_v19  ;;  %4443 = vmatprep.mubr.bf16.mxu0 %v12037_v42 }
 0x13e   :  { %4501 = vmatmul.mubr.bf16.gmra.mxu1 %v17648_v60  ;;  %15254 = vmatprep.subr.bf16.mxu0 %v15738_v49  ;;  %v15742_v60 = vld [vmem:[%s20349_s1 + $0x708] sm:$0xff]  }
 0x13f   :  { %14173 = vmatpush3.bf16.msra.mxu1 %v15737_v12  ;;  %4508 = vmatprep.mubr.bf16.mxu1 %v12039_v15 }
 0x140   :  { %14174 = vmatprep.subr.bf16.mxu1 %v15739_v16 }
 0x141   :  { %15255 = vmatpush3.bf16.msra.mxu0 %v15738_v49 }
 0x143   :  { %v13682_v58 = vpop.f32.mrf.mxu0  ;;  %14175 = vmatpush3.bf16.msra.mxu1 %v15740_v43 }
 0x144   :  { %14176 = vmatprep.subr.bf16.mxu1 %v15742_v60  ;;  %v15753_v60 = vld [vmem:[%s20349_s1 + $0x7b0] sm:$0xff]  }
 0x145   :  { %v13683_v24 = vpop.f32.mrf.mxu0 }
 0x146   :  { %v13722_v1 = vpop.f32.mrf.mxu1  ;;  %v13684_v36 = vadd.f32 %v13683_v24, %v13682_v58  ;;  %v15741_v58 = vld [vmem:[%s20349_s1 + $0x688] sm:$0xff]   ;;  %4509 = vmatmul.mubr.bf16.gmra.mxu1 %v12038_v46 }
 0x147   :  { %v13685_v0 = vpop.f32.mrf.mxu0  ;;  %15256 = vmatprep.subr.bf16.mxu0 %v15741_v58  ;;  %14177 = vmatpush3.bf16.msra.mxu1 %v15743_v56  ;;  %v15757_v56 = vld [vmem:[#allocation2 + $0xf8] ss:$36 sps:$4 sm:$0xff]  }
 0x148   :  { %v13723_v18 = vpop.f32.mrf.mxu1  ;;  %15257 = vmatpush3.bf16.msra.mxu0 %v15741_v58 }
 0x149   :  { %v13724_v31 = vadd.f32 %v13723_v18, %v13722_v1  ;;  %v13686_v6 = vpop.f32.mrf.mxu0 }
 0x14a   :  { %v13725_v5 = vpop.f32.mrf.mxu1  ;;  %v13687_v41 = vadd.f32 %v13686_v6, %v13685_v0  ;;  %v631_v6 = vld [vmem:[#allocation2 + $0x18c] sm:$0xf] }
 0x14b   :  { %v17856_v25 = vadd.f32 %v13724_v31, %v13684_v36  ;;  %v13744_v27 = vpop.f32.mrf.mxu0  ;;  %v12036_v36 = vcombine.low %v3488_v3, %v17767_v48  ;;  %v632_v49 = vsel %vm16633_vm4, %v16641_v51, %v631_v6  ;;  %v15749_v3 = vld [vmem:[%s20349_s1 + $0x7b8] sm:$0xff]  }
 0x14c   :  { %v13726_v20 = vpop.f32.mrf.mxu1  ;;  %633 = vst [vmem:[#allocation2 + $0x18c] sm:$0xf] %v632_v49 }
 0x14d   :  { %v13727_v59 = vadd.f32 %v13726_v20, %v13725_v5  ;;  %v13745_v23 = vpop.f32.mrf.mxu0  ;;  %v15745_v5 = vld [vmem:[%s20349_s1 + $0x700] sm:$0xff]   ;;  %4444 = vmatmul.mubr.bf16.gmra.mxu0 %v12036_v36 }
 0x14e   :  { %v13784_v13 = vpop.f32.mrf.mxu1  ;;  %v13746_v55 = vadd.f32 %v13745_v23, %v13744_v27  ;;  %14178 = vmatprep.subr.bf16.mxu1 %v15745_v5 }
 0x14f   :  { %v17871_v54 = vadd.f32 %v13727_v59, %v13687_v41  ;;  %v13747_v11 = vpop.f32.mrf.mxu0  ;;  %v15747_v41 = vld [vmem:[#allocation2 + $0x68] ss:$36 sps:$4 sm:$0xff]  }
 0x150   :  { %v13785_v45 = vpop.f32.mrf.mxu1  ;;  %v2354_v37 = vadd.f32 %v13746_v55, %v17674_v10  ;;  %v15744_v10 = vld [vmem:[%s20349_s1 + $0x680] sm:$0xff]   ;;  %15260 = vmatprep.mubr.bf16.mxu0 %v15747_v41  ;;  %v15748_v55 = vld [vmem:[#allocation2 + $0xb0] ss:$36 sps:$4 sm:$0xff]  }
 0x151   :  { %v13786_v39 = vadd.f32 %v13785_v45, %v13784_v13  ;;  %v13748_v24 = vpop.f32.mrf.mxu0  ;;  %15258 = vmatprep.subr.bf16.mxu0 %v15744_v10  ;;  %v15750_v13 = vld [vmem:[%s20349_s1 + $0x838] sm:$0xff]  }
 0x152   :  { %v13787_v1 = vpop.f32.mrf.mxu1  ;;  %v13749_v32 = vadd.f32 %v13748_v24, %v13747_v11  ;;  %15259 = vmatpush3.bf16.msra.mxu0 %v15744_v10  ;;  %v634_v10 = vld [vmem:[#allocation2 + $0x1b0] sm:$0xf] }
 0x153   :  { %v13750_v0 = vpop.f32.mrf.mxu0  ;;  %v17885_v19 = vadd.f32 %v13786_v39, %v2354_v37  ;;  %14204 = vmatprep.subr.bf16.mxu0 %v15749_v3  ;;  %v655_v24 = vld [vmem:[#allocation2 + $0x18c] sm:$0x1]  ;;  %v635_v6 = vsel %vm16633_vm4, %v16748_v50, %v634_v10 }
 0x154   :  { %v13788_v18 = vpop.f32.mrf.mxu1  ;;  %v2357_v31 = vadd.f32 %v13749_v32, %v17688_v17  ;;  %v15746_v17 = vld [vmem:[%s20349_s1 + $0x6c0] sm:$0xff]   ;;  %v656_v46 = vsel %vm16644_vm7, 0, %v655_v24  ;;  %636 = vst [vmem:[#allocation2 + $0x1b0] sm:$0xf] %v635_v6 }
 0x155   :  { %v13789_v28 = vadd.f32 %v13788_v18, %v13787_v1  ;;  %v13751_v34 = vpop.f32.mrf.mxu0  ;;  %14179 = vmatpush3.bf16.msra.mxu1 %v15746_v17  ;;  %15261 = vmatmul.mubr.bf16.vlgmr.msra.gmra.mxu0 %v15748_v55  ;;  %657 = vst [vmem:[#allocation2 + $0x18c] sm:$0x1] %v656_v46 }
 0x156   :  { %v13790_v12 = vpop.f32.mrf.mxu1  ;;  %v13752_v20 = vadd.f32 %v13751_v34, %v13750_v0  ;;  %14244 = vmatprep.subr.bf16.mxu1 %v15750_v13  ;;  %15264 = vmatprep.mubr.bf16.mxu0 %v15757_v56 }
 0x157   :  { %v17897_v27 = vadd.f32 %v13789_v28, %v2357_v31  ;;  %v13753_v59 = vpop.f32.mrf.mxu0  ;;  %v15761_v31 = vld [vmem:[%s20349_s1 + $0x7a8] sm:$0xff]  }
 0x158   :  { %v13791_v16 = vpop.f32.mrf.mxu1  ;;  %v2362_v51 = vadd.f32 %v13752_v20, %v17734_v63  ;;  %v15751_v63 = vld [vmem:[%s20349_s1 + $0x778] sm:$0xff]  }
 0x159   :  { %v13792_v4 = vadd.f32 %v13791_v16, %v13790_v12  ;;  %v13754_v42 = vpop.f32.mrf.mxu0  ;;  %14205 = vmatpush3.bf16.msra.mxu0 %v15751_v63  ;;  %v637_v12 = vld [vmem:[#allocation2 + $0x1d4] sm:$0xf]  ;;  %v15758_v16 = vld [vmem:[#allocation2 + $0x140] ss:$36 sps:$4 sm:$0xff]  }
 0x15a   :  { %v13793_v23 = vpop.f32.mrf.mxu1  ;;  %v13755_v15 = vadd.f32 %v13754_v42, %v13753_v59  ;;  %14206 = vmatprep.subr.bf16.mxu0 %v15753_v60  ;;  %v638_v49 = vsel %vm16633_vm4, %v16750_v53, %v637_v12  ;;  %v15764_v59 = vld [vmem:[%s20349_s1 + $0x768] sm:$0xff]   ;;  %v15768_v63 = vld [vmem:[%s20349_s1 + $0x760] sm:$0xff]   ;;  %v15754_v60 = vld [vmem:[%s20349_s1 + $0x830] sm:$0xff]  }
 0x15b   :  { %v17909_v43 = vadd.f32 %v13792_v4, %v2362_v51  ;;  %v13756_v11 = vpop.f32.mrf.mxu0  ;;  %639 = vst [vmem:[#allocation2 + $0x1d4] sm:$0xf] %v638_v49  ;;  %v15766_v4 = vld [vmem:[%s20349_s1 + $0x7a0] sm:$0xff]   ;;  %v15775_v49 = vld [vmem:[%s20349_s1 + $0x758] sm:$0xff]  }
 0x15c   :  { %v13794_v45 = vpop.f32.mrf.mxu1  ;;  %v2365_v58 = vadd.f32 %v13755_v15, %v17748_v26  ;;  %v15755_v26 = vld [vmem:[%s20349_s1 + $0x770] sm:$0xff]  }
 0x15d   :  { %v13795_v39 = vadd.f32 %v13794_v45, %v13793_v23  ;;  %v13757_v1 = vpop.f32.mrf.mxu0  ;;  %14207 = vmatpush3.bf16.msra.mxu0 %v15755_v26  ;;  %v15752_v23 = vld [vmem:[%s20349_s1 + $0x7f8] sm:$0xff]   ;;  %v4595_v55 = vld [vmem:[#allocation2 + $0x18c] sm:$0xff] }
 0x15e   :  { %v13796_v37 = vpop.f32.mrf.mxu1  ;;  %v13758_v32 = vadd.f32 %v13757_v1, %v13756_v11  ;;  %14208 = vmatprep.subr.bf16.mxu0 %v15761_v31  ;;  %15265 = vmatmul.mubr.bf16.gmra.mxu0 %v15758_v16  ;;  %v12257_v11 = vcombine.low %v17767_v48, %v4595_v55  ;;  %v640_v1 = vld [vmem:[#allocation2 + $0x1f8] sm:$0xf]  ;;  %v15765_v16 = vld [vmem:[%s20349_s1 + $0x7e8] sm:$0xff]  }
 0x15f   :  { %v17918_v36 = vadd.f32 %v13795_v39, %v2365_v58  ;;  %v13759_v0 = vpop.f32.mrf.mxu0  ;;  %v641_v56 = vsel %vm16633_vm4, %v16893_v30, %v640_v1 }
 0x160   :  { %v13797_v18 = vpop.f32.mrf.mxu1  ;;  %v2370_v28 = vadd.f32 %v13758_v32, %v17795_v61  ;;  %642 = vst [vmem:[#allocation2 + $0x1f8] sm:$0xf] %v641_v56 }
 0x161   :  { %v13798_v5 = vadd.f32 %v13797_v18, %v13796_v37  ;;  %v13760_v41 = vpop.f32.mrf.mxu0  ;;  %14209 = vmatpush3.bf16.msra.mxu0 %v15764_v59  ;;  %v658_v37 = vld [vmem:[#allocation2 + $0x1b0] sm:$0x1]  ;;  %v643_v18 = vld [vmem:[#allocation2 + $0x21c] sm:$0xf] }
 0x162   :  { %v13799_v34 = vpop.f32.mrf.mxu1  ;;  %v13761_v20 = vadd.f32 %v13760_v41, %v13759_v0  ;;  %14210 = vmatprep.subr.bf16.mxu0 %v15766_v4  ;;  %v659_v46 = vsel %vm16644_vm7, 0, %v658_v37  ;;  %v661_v26 = vld [vmem:[#allocation2 + $0x1d4] sm:$0x1]  ;;  %v15773_v0 = vld [vmem:[%s20349_s1 + $0x798] sm:$0xff]   ;;  %v644_v6 = vsel %vm16633_vm4, %v16908_v35, %v643_v18 }
 0x163   :  { %v17935_v17 = vadd.f32 %v13798_v5, %v2370_v28  ;;  %v13762_v13 = vpop.f32.mrf.mxu0  ;;  %660 = vst [vmem:[#allocation2 + $0x1b0] sm:$0x1] %v659_v46  ;;  %v662_v28 = vsel %vm16644_vm7, 0, %v661_v26  ;;  %v15762_v5 = vld [vmem:[%s20349_s1 + $0x828] sm:$0xff]   ;;  %645 = vst [vmem:[#allocation2 + $0x21c] sm:$0xf] %v644_v6 }
 0x164   :  { %v13800_v61 = vpop.f32.mrf.mxu1  ;;  %v2373_v3 = vadd.f32 %v13761_v20, %v17810_v14  ;;  %v12258_v14 = vcombine.high %v17767_v48, %v4595_v55  ;;  %v15756_v48 = vld [vmem:[%s20349_s1 + $0x7f0] sm:$0xff]   ;;  %663 = vst [vmem:[#allocation2 + $0x1d4] sm:$0x1] %v662_v28  ;;  %v15776_v18 = vld [vmem:[%s20349_s1 + $0x7d8] sm:$0xff]  }
 0x165   :  { %v13801_v51 = vadd.f32 %v13800_v61, %v13799_v34  ;;  %v13763_v45 = vpop.f32.mrf.mxu0  ;;  %14211 = vmatpush3.bf16.msra.mxu0 %v15768_v63 }
 0x166   :  { %v13802_v42 = vpop.f32.mrf.mxu1  ;;  %v13764_v58 = vadd.f32 %v13763_v45, %v13762_v13  ;;  %5423 = vmatprep.mubr.bf16.mxu1 %v12258_v14  ;;  %14212 = vmatprep.subr.bf16.mxu0 %v15773_v0 }
 0x167   :  { %v17947_v15 = vadd.f32 %v13801_v51, %v2373_v3  ;;  %v13765_v32 = vpop.f32.mrf.mxu0  ;;  %5424 = vmatmul.mubr.bf16.vlgmr.msra.gmra.mxu1 %v12257_v11  ;;  %v15777_v3 = vld [vmem:[%s20349_s1 + $0x790] sm:$0xff]   ;;  %v15767_v51 = vld [vmem:[%s20349_s1 + $0x820] sm:$0xff]   ;;  %v664_v55 = vld [vmem:[#allocation2 + $0x1f8] sm:$0x1] }
 0x168   :  { %v13803_v39 = vpop.f32.mrf.mxu1  ;;  %v2378_v10 = vadd.f32 %v13764_v58, %v17856_v25  ;;  %14245 = vmatpush3.bf16.msra.mxu1 %v15752_v23  ;;  %v15759_v11 = vld [vmem:[#allocation2 + $0x1b4] ss:$36 sps:$4 sm:$0xff]   ;;  %v665_v63 = vsel %vm16644_vm7, 0, %v664_v55 }
 0x169   :  { %v13804_v24 = vadd.f32 %v13803_v39, %v13802_v42  ;;  %v13766_v12 = vpop.f32.mrf.mxu0  ;;  %14246 = vmatprep.subr.bf16.mxu1 %v15754_v60  ;;  %14213 = vmatpush3.bf16.msra.mxu0 %v15775_v49  ;;  %v15769_v42 = vld [vmem:[%s20349_s1 + $0x7e0] sm:$0xff]   ;;  %666 = vst [vmem:[#allocation2 + $0x1f8] sm:$0x1] %v665_v63  ;;  %v15774_v39 = vld [vmem:[%s20349_s1 + $0x818] sm:$0xff]   ;;  %v15780_v49 = vld [vmem:[%s20349_s1 + $0x7d0] sm:$0xff]  }
 0x16a   :  { %v13805_v31 = vpop.f32.mrf.mxu1  ;;  %v13767_v25 = vadd.f32 %v13766_v12, %v13765_v32  ;;  %14214 = vmatprep.subr.bf16.mxu0 %v15777_v3  ;;  %v667_v58 = vld [vmem:[#allocation2 + $0x21c] sm:$0x1]  ;;  %v646_v60 = vld [vmem:[#allocation2 + $0x240] sm:$0xf]  ;;  %5431 = vmatprep.mubr.bf16.mxu1 %v15759_v11  ;;  %v649_v32 = vld [vmem:[#allocation2 + $0x264] sm:$0xf] }
 0x16b   :  { %v17977_v41 = vadd.f32 %v13804_v24, %v2378_v10  ;;  %v15763_v14 = vld [vmem:[#allocation2 + $0x1b0] ss:$36 sps:$4 sm:$0xff]   ;;  %v668_v1 = vsel %vm16644_vm7, 0, %v667_v58  ;;  %v647_v24 = vsel %vm16633_vm4, %v17018_v29, %v646_v60  ;;  %v650_v46 = vsel %vm16633_vm4, %v17023_v40, %v649_v32  ;;  %v15786_v10 = vld [vmem:[%s20349_s1 + $0x748] sm:$0xff]   ;;  %v15790_v3 = vld [vmem:[%s20349_s1 + $0x740] sm:$0xff]  }
 0x16c   :  { %v13806_v34 = vpop.f32.mrf.mxu1  ;;  %v2381_v61 = vadd.f32 %v13767_v25, %v17871_v54  ;;  %14247 = vmatpush3.bf16.msra.mxu1 %v15756_v48  ;;  %v15779_v54 = vld [vmem:[%s20349_s1 + $0x750] sm:$0xff]   ;;  %v15784_v48 = vld [vmem:[%s20349_s1 + $0x788] sm:$0xff]   ;;  %669 = vst [vmem:[#allocation2 + $0x21c] sm:$0x1] %v668_v1  ;;  %648 = vst [vmem:[#allocation2 + $0x240] sm:$0xf] %v647_v24  ;;  %v15214_v26 = vpop.f32.mrf.mxu0 }
 0x16d   :  { %v13807_v20 = vadd.f32 %v13806_v34, %v13805_v31  ;;  %14248 = vmatprep.subr.bf16.mxu1 %v15762_v5  ;;  %14215 = vmatpush3.bf16.msra.mxu0 %v15779_v54  ;;  %651 = vst [vmem:[#allocation2 + $0x264] sm:$0xf] %v650_v46  ;;  %v2492_v0 = vadd.f32 %v15214_v26, %v17909_v43  ;;  %v15778_v5 = vld [vmem:[%s20349_s1 + $0x810] sm:$0xff]   ;;  %v15788_v43 = vld [vmem:[%s20349_s1 + $0x780] sm:$0xff]   ;;  %v15787_v63 = vld [vmem:[%s20349_s1 + $0x7c8] sm:$0xff]  }
 0x16e   :  { %v13836_v59 = vpop.f32.mrf.mxu1  ;;  %14216 = vmatprep.subr.bf16.mxu0 %v15784_v48  ;;  %v2483_v31 = vpop.f32.mrf.mxu0  ;;  %v705_v58 = vld [vmem:[#allocation2 + $0x194] sm:$0x8]  ;;  %v737_v24 = vld [vmem:[#allocation2 + $0x198] sm:$0x1]  ;;  %v784_v32 = vld [vmem:[#allocation2 + $0x1a0] sm:$0x8] }
 0x16f   :  { %v17992_v13 = vadd.f32 %v13807_v20, %v2381_v61  ;;  %5432 = vmatmul.mubr.bf16.gmra.mxu1 %v15763_v14  ;;  %v2484_v6 = vadd.f32 %v2483_v31, %v17885_v19  ;;  %v15785_v19 = vld [vmem:[%s20349_s1 + $0x808] sm:$0xff]   ;;  %v706_v1 = vsel %vm16702_vm15, 0, %v705_v58  ;;  %v738_v48 = vsel %vm16644_vm7, 0, %v737_v24  ;;  %v18074_v31 = vld [vmem:[%s20349_s1 + $0x8f8] sm:$0xff]  }
 0x170   :  { %v13837_v4 = vpop.f32.mrf.mxu1  ;;  %14249 = vmatpush3.bf16.msra.mxu1 %v15765_v16  ;;  %v15215_v25 = vpop.f32.mrf.mxu0  ;;  %707 = vst [vmem:[#allocation2 + $0x194] sm:$0x8] %v706_v1  ;;  %v785_v46 = vsel %vm16702_vm15, 0, %v784_v32  ;;  %739 = vst [vmem:[#allocation2 + $0x198] sm:$0x1] %v738_v48 }
 0x171   :  { %v13838_v23 = vadd.f32 %v13837_v4, %v13836_v59  ;;  %14250 = vmatprep.subr.bf16.mxu1 %v15767_v51  ;;  %14217 = vmatpush3.bf16.msra.mxu0 %v15786_v10  ;;  %v2495_v16 = vadd.f32 %v15215_v25, %v17918_v36  ;;  %786 = vst [vmem:[#allocation2 + $0x1a0] sm:$0x8] %v785_v46  ;;  %v711_v25 = vld [vmem:[#allocation2 + $0x1dc] sm:$0x8] }
 0x172   :  { %v13839_v45 = vpop.f32.mrf.mxu1  ;;  %14218 = vmatprep.subr.bf16.mxu0 %v15788_v43  ;;  %v2486_v51 = vpop.f32.mrf.mxu0  ;;  %v15794_v43 = vld [vmem:[%s20349_s1 + $0x878] sm:$0xff]  }
 0x173   :  { %v18033_v20 = vadd.f32 %v13838_v23, %v2484_v6  ;;  %v15770_v54 = vld [vmem:[#allocation2 + $0x1f8] ss:$36 sps:$4 sm:$0xff]   ;;  %v2487_v36 = vadd.f32 %v2486_v51, %v17897_v27  ;;  %v670_v55 = vld [vmem:[#allocation2 + $0x240] sm:$0x1] }
 0x174   :  { %v13840_v37 = vpop.f32.mrf.mxu1  ;;  %14251 = vmatpush3.bf16.msra.mxu1 %v15769_v42  ;;  %v15772_v23 = vld [vmem:[#allocation2 + $0x1fc] ss:$36 sps:$4 sm:$0xff]   ;;  %v671_v11 = vsel %vm16644_vm7, 0, %v670_v55 }
 0x175   :  { %14252 = vmatprep.subr.bf16.mxu1 %v15774_v39  ;;  %v13841_v61 = vadd.f32 %v13840_v37, %v13839_v45  ;;  %v673_v45 = vld [vmem:[#allocation2 + $0x264] sm:$0x1]  ;;  %14219 = vmatpush3.bf16.msra.mxu0 %v15790_v3  ;;  %v15792_v27 = vld [vmem:[%s20349_s1 + $0x8b8] sm:$0xff]   ;;  %672 = vst [vmem:[#allocation2 + $0x240] sm:$0x1] %v671_v11  ;;  %v712_v3 = vsel %vm16702_vm15, 0, %v711_v25 }
 0x176   :  { %v13842_v56 = vpop.f32.mrf.mxu1  ;;  %5439 = vmatprep.mubr.bf16.mxu1 %v15772_v23  ;;  %v674_v14 = vsel %vm16644_vm7, 0, %v673_v45  ;;  %v15789_v37 = vld [vmem:[%s20349_s1 + $0x800] sm:$0xff]   ;;  %14284 = vmatprep.subr.bf16.mxu0 %v15792_v27  ;;  %713 = vst [vmem:[#allocation2 + $0x1dc] sm:$0x8] %v712_v3  ;;  %v790_v11 = vld [vmem:[#allocation2 + $0x1e8] sm:$0x8] }
 0x177   :  { %v18055_v39 = vadd.f32 %v13841_v61, %v2487_v36  ;;  %5440 = vmatmul.mubr.bf16.gmra.mxu1 %v15770_v54  ;;  %675 = vst [vmem:[#allocation2 + $0x264] sm:$0x1] %v674_v14  ;;  %v4596_v61 = vld [vmem:[#allocation2 + $0x194] sm:$0xff]  ;;  %v18086_v23 = vld [vmem:[#allocation2] sm:$0xff]  ;;  %v791_v27 = vsel %vm16702_vm15, 0, %v790_v11  ;;  %v15805_v11 = vld [vmem:[%s20349_s1 + $0x868] sm:$0xff]  }
 0x178   :  { %v13843_v28 = vpop.f32.mrf.mxu1  ;;  %14253 = vmatpush3.bf16.msra.mxu1 %v15776_v18  ;;  %v12259_v36 = vcombine.low %v18086_v23, %v4596_v61  ;;  %v787_v45 = vld [vmem:[#allocation2 + $0x1c4] sm:$0x8]  ;;  %792 = vst [vmem:[#allocation2 + $0x1e8] sm:$0x8] %v791_v27 }
 0x179   :  { %v13844_v12 = vadd.f32 %v13843_v28, %v13842_v56  ;;  %14254 = vmatprep.subr.bf16.mxu1 %v15778_v5  ;;  %v708_v28 = vld [vmem:[#allocation2 + $0x1b8] sm:$0x8]  ;;  %v788_v58 = vsel %vm16702_vm15, 0, %v787_v45 }
 0x17a   :  { %v13845_v34 = vpop.f32.mrf.mxu1  ;;  %v709_v6 = vsel %vm16702_vm15, 0, %v708_v28  ;;  %789 = vst [vmem:[#allocation2 + $0x1c4] sm:$0x8] %v788_v58  ;;  %v15803_v28 = vld [vmem:[%s20349_s1 + $0x8a8] sm:$0xff]   ;;  %v796_v58 = vld [vmem:[#allocation2 + $0x230] sm:$0x8] }
 0x17b   :  { %v18036_v59 = vadd.f32 %v13844_v12, %v2492_v0  ;;  %v15791_v0 = vld [vmem:[%s20349_s1 + $0x7c0] sm:$0xff]   ;;  %710 = vst [vmem:[#allocation2 + $0x1b8] sm:$0x8] %v709_v6 }
 0x17c   :  { %v13846_v4 = vpop.f32.mrf.mxu1  ;;  %14255 = vmatpush3.bf16.msra.mxu1 %v15780_v49  ;;  %v15783_v12 = vld [vmem:[#allocation2 + $0x244] ss:$36 sps:$4 sm:$0xff]  }
 0x17d   :  { %v13847_v42 = vadd.f32 %v13846_v4, %v13845_v34  ;;  %14256 = vmatprep.subr.bf16.mxu1 %v15785_v19  ;;  %v740_v34 = vld [vmem:[#allocation2 + $0x1bc] sm:$0x1]  ;;  %v743_v4 = vld [vmem:[#allocation2 + $0x1e0] sm:$0x1]  ;;  %5447 = vmatprep.mubr.bf16.mxu1 %v15783_v12  ;;  %v714_v12 = vld [vmem:[#allocation2 + $0x200] sm:$0x8] }
 0x17e   :  { %v13848_v26 = vpop.f32.mrf.mxu1  ;;  %v15781_v5 = vld [vmem:[#allocation2 + $0x240] ss:$36 sps:$4 sm:$0xff]   ;;  %v741_v51 = vsel %vm16644_vm7, 0, %v740_v34 }
 0x17f   :  { %v18057_v60 = vadd.f32 %v13847_v42, %v2495_v16  ;;  %v4597_v19 = vld [vmem:[#allocation2 + $0x19c] sm:$0xff]  ;;  %v12260_v42 = vcombine.high %v18086_v23, %v4596_v61  ;;  %742 = vst [vmem:[#allocation2 + $0x1bc] sm:$0x1] %v741_v51  ;;  %5448 = vmatmul.mubr.bf16.gmra.mxu1 %v15781_v5  ;;  %v749_v61 = vld [vmem:[#allocation2 + $0x228] sm:$0x1] }
 0x180   :  { %v13849_v56 = vpop.f32.mrf.mxu1  ;;  %14257 = vmatpush3.bf16.msra.mxu1 %v15787_v63  ;;  %v15218_v49 = vpop.f32.mrf.mxu0  ;;  %v12262_v55 = vcombine.high %v18086_v23, %v4597_v19  ;;  %v744_v63 = vsel %vm16644_vm7, 0, %v743_v4  ;;  %v15804_v51 = vld [vmem:[%s20349_s1 + $0x8e8] sm:$0xff]  }
 0x181   :  { %v13850_v18 = vadd.f32 %v13849_v56, %v13848_v26  ;;  %14258 = vmatprep.subr.bf16.mxu1 %v15789_v37  ;;  %v2508_v54 = vadd.f32 %v15218_v49, %v17977_v41  ;;  %v15795_v41 = vld [vmem:[%s20349_s1 + $0x8b0] sm:$0xff]   ;;  %5488 = vmatprep.mubr.bf16.mxu0 %v12260_v42  ;;  %745 = vst [vmem:[#allocation2 + $0x1e0] sm:$0x1] %v744_v63  ;;  %v715_v49 = vsel %vm16702_vm15, 0, %v714_v12  ;;  %v15802_v45 = vld [vmem:[#allocation2 + $0x1c4] ss:$36 sps:$4 sm:$0xff]  }
 0x182   :  { %v13851_v10 = vpop.f32.mrf.mxu1  ;;  %v2499_v14 = vpop.f32.mrf.mxu0  ;;  %5553 = vmatprep.mubr.bf16.mxu1 %v12262_v55  ;;  %5489 = vmatmul.mubr.bf16.vlgmr.msra.gmra.mxu0 %v12259_v36  ;;  %v15797_v26 = vld [vmem:[%s20349_s1 + $0x870] sm:$0xff]   ;;  %716 = vst [vmem:[#allocation2 + $0x200] sm:$0x8] %v715_v49  ;;  %v15806_v63 = vld [vmem:[%s20349_s1 + $0x8a0] sm:$0xff]   ;;  %v15816_v12 = vld [vmem:[%s20349_s1 + $0x858] sm:$0xff]  }
 0x183   :  { %v2500_v37 = vadd.f32 %v2499_v14, %v17935_v17  ;;  %14285 = vmatpush3.bf16.msra.mxu0 %v15794_v43  ;;  %v717_v43 = vld [vmem:[#allocation2 + $0x224] sm:$0x8]  ;;  %v793_v14 = vld [vmem:[#allocation2 + $0x20c] sm:$0x8] }
 0x184   :  { %v13852_v16 = vpop.f32.mrf.mxu1  ;;  %14259 = vmatpush3.bf16.msra.mxu1 %v15791_v0  ;;  %v15219_v1 = vpop.f32.mrf.mxu0  ;;  %v12261_v0 = vcombine.low %v18086_v23, %v4597_v19  ;;  %14286 = vmatprep.subr.bf16.mxu0 %v15795_v41  ;;  %v15800_v41 = vld [vmem:[#allocation2 + $0x1c0] ss:$36 sps:$4 sm:$0xff]  }
 0x185   :  { %15268 = vmatprep.subr.bf16.mxu1 %v18074_v31  ;;  %v2511_v32 = vadd.f32 %v15219_v1, %v17992_v13  ;;  %v18103_v48 = vadd.f32 %v13850_v18, %v2500_v37  ;;  %v13853_v46 = vadd.f32 %v13852_v16, %v13851_v10  ;;  %v15796_v18 = vld [vmem:[%s20349_s1 + $0x8f0] sm:$0xff]   ;;  %v746_v16 = vld [vmem:[#allocation2 + $0x204] sm:$0x1]  ;;  %v797_v37 = vsel %vm16702_vm15, 0, %v796_v58 }
 0x186   :  { %v13854_v24 = vpop.f32.mrf.mxu1  ;;  %v2502_v56 = vpop.f32.mrf.mxu0  ;;  %v18116_v6 = vld [vmem:[#allocation2 + $0x1b8] sm:$0xff]  ;;  %v747_v4 = vsel %vm16644_vm7, 0, %v746_v16  ;;  %798 = vst [vmem:[#allocation2 + $0x230] sm:$0x8] %v797_v37  ;;  %v799_v37 = vld [vmem:[#allocation2 + $0x254] sm:$0x8] }
 0x187   :  { %v2503_v5 = vadd.f32 %v2502_v56, %v17947_v15  ;;  %14287 = vmatpush3.bf16.msra.mxu0 %v15797_v26  ;;  %v718_v15 = vsel %vm16702_vm15, 0, %v717_v43  ;;  %5554 = vmatmul.mubr.bf16.vlgmr.msra.gmra.mxu1 %v12261_v0  ;;  %748 = vst [vmem:[#allocation2 + $0x204] sm:$0x1] %v747_v4  ;;  %v15814_v56 = vld [vmem:[%s20349_s1 + $0x898] sm:$0xff]   ;;  %v752_v4 = vld [vmem:[#allocation2 + $0x24c] sm:$0x1] }
 0x188   :  { %v13855_v17 = vpop.f32.mrf.mxu1  ;;  %v4606_v3 = vld [vmem:[#allocation2 + $0x1dc] sm:$0xff]  ;;  %14288 = vmatprep.subr.bf16.mxu0 %v15803_v28  ;;  %719 = vst [vmem:[#allocation2 + $0x224] sm:$0x8] %v718_v15  ;;  %15269 = vmatpush3.bf16.msra.mxu1 %v18074_v31  ;;  %v794_v31 = vsel %vm16702_vm15, 0, %v793_v14  ;;  %v18618_v62 = vld [vmem:[#allocation2 + $0x264] sm:$0xff] }
 0x189   :  { %v13856_v13 = vadd.f32 %v13855_v17, %v13854_v24  ;;  %v18118_v25 = vadd.f32 %v13853_v46, %v2503_v5  ;;  %v12268_v42 = vcombine.low %v18116_v6, %v4606_v3  ;;  %v12269_v55 = vcombine.high %v18116_v6, %v4606_v3  ;;  %15270 = vmatprep.subr.bf16.mxu1 %v15796_v18  ;;  %v15807_v24 = vld [vmem:[%s20349_s1 + $0x8e0] sm:$0xff]   ;;  %v723_v3 = vld [vmem:[#allocation2 + $0x26c] sm:$0x8] }
 0x18a   :  { %v13857_v10 = vpop.f32.mrf.mxu1  ;;  %5561 = vmatprep.mubr.bf16.mxu1 %v15802_v45  ;;  %795 = vst [vmem:[#allocation2 + $0x20c] sm:$0x8] %v794_v31 }
 0x18b   :  { %v18120_v34 = vadd.f32 %v13856_v13, %v2508_v54  ;;  %v750_v54 = vsel %vm16644_vm7, 0, %v749_v61  ;;  %5496 = vmatprep.mubr.bf16.mxu0 %v12269_v55  ;;  %14289 = vmatpush3.bf16.msra.mxu0 %v15805_v11  ;;  %v15817_v61 = vld [vmem:[%s20349_s1 + $0x890] sm:$0xff]   ;;  %v15811_v11 = vld [vmem:[#allocation2 + $0x208] ss:$36 sps:$4 sm:$0xff]  }
 0x18c   :  { %v13858_v19 = vpop.f32.mrf.mxu1  ;;  %751 = vst [vmem:[#allocation2 + $0x228] sm:$0x1] %v750_v54  ;;  %v13876_v1 = vpop.f32.mrf.mxu0  ;;  %5497 = vmatmul.mubr.bf16.gmra.mxu0 %v12268_v42  ;;  %15271 = vmatpush3.bf16.msra.mxu1 %v15796_v18  ;;  %v755_v42 = vld [vmem:[#allocation2 + $0x270] sm:$0x1] }
 0x18d   :  { %v13859_v36 = vadd.f32 %v13858_v19, %v13857_v10  ;;  %15272 = vmatprep.subr.bf16.mxu1 %v15804_v51  ;;  %14290 = vmatprep.subr.bf16.mxu0 %v15806_v63  ;;  %v15815_v10 = vld [vmem:[%s20349_s1 + $0x8d8] sm:$0xff]   ;;  %v720_v19 = vld [vmem:[#allocation2 + $0x248] sm:$0x8] }
 0x18e   :  { %v13916_v46 = vpop.f32.mrf.mxu1  ;;  %v13877_v26 = vpop.f32.mrf.mxu0  ;;  %v18157_v13 = vld [vmem:[#allocation2 + $0x200] sm:$0xff] }
 0x18f   :  { %v18144_v27 = vadd.f32 %v13859_v36, %v2511_v32  ;;  %v15808_v32 = vld [vmem:[%s20349_s1 + $0x860] sm:$0xff]   ;;  %v13878_v17 = vadd.f32 %v13877_v26, %v13876_v1  ;;  %5562 = vmatmul.mubr.bf16.gmra.mxu1 %v15800_v41  ;;  %v753_v36 = vsel %vm16644_vm7, 0, %v752_v4  ;;  %v756_v41 = vsel %vm16644_vm7, 0, %v755_v42  ;;  %v802_v1 = vld [vmem:[#allocation2 + $0x278] sm:$0x8]  ;;  %v15819_v26 = vld [vmem:[%s20349_s1 + $0x850] sm:$0xff]  }
 0x190   :  { %v13917_v0 = vpop.f32.mrf.mxu1  ;;  %v13879_v28 = vpop.f32.mrf.mxu0  ;;  %15273 = vmatpush3.bf16.msra.mxu1 %v15804_v51  ;;  %14291 = vmatpush3.bf16.msra.mxu0 %v15808_v32  ;;  %v724_v51 = vsel %vm16702_vm15, 0, %v723_v3  ;;  %754 = vst [vmem:[#allocation2 + $0x24c] sm:$0x1] %v753_v36  ;;  %757 = vst [vmem:[#allocation2 + $0x270] sm:$0x1] %v756_v41  ;;  %v15818_v32 = vld [vmem:[%s20349_s1 + $0x8d0] sm:$0xff]  }
 0x191   :  { %v13918_v5 = vadd.f32 %v13917_v0, %v13916_v46  ;;  %v3230_v43 = vadd.f32 %v13878_v17, %v18033_v20  ;;  %15274 = vmatprep.subr.bf16.mxu1 %v15807_v24  ;;  %14292 = vmatprep.subr.bf16.mxu0 %v15814_v56  ;;  %v721_v20 = vsel %vm16702_vm15, 0, %v720_v19  ;;  %v15813_v14 = vld [vmem:[#allocation2 + $0x20c] ss:$36 sps:$4 sm:$0xff]   ;;  %725 = vst [vmem:[#allocation2 + $0x26c] sm:$0x8] %v724_v51  ;;  %v800_v56 = vsel %vm16702_vm15, 0, %v799_v37 }
 0x192   :  { %v13919_v49 = vpop.f32.mrf.mxu1  ;;  %v13880_v54 = vpop.f32.mrf.mxu0  ;;  %722 = vst [vmem:[#allocation2 + $0x248] sm:$0x8] %v721_v20  ;;  %5569 = vmatprep.mubr.bf16.mxu1 %v15813_v14  ;;  %v803_v17 = vsel %vm16702_vm15, 0, %v802_v1  ;;  %801 = vst [vmem:[#allocation2 + $0x254] sm:$0x8] %v800_v56  ;;  %v15827_v3 = vld [vmem:[%s20349_s1 + $0x848] sm:$0xff]  }
 0x193   :  { %v4616_v18 = vld [vmem:[#allocation2 + $0x224] sm:$0xff]  ;;  %v18177_v55 = vadd.f32 %v13918_v5, %v3230_v43  ;;  %v13881_v63 = vadd.f32 %v13880_v54, %v13879_v28  ;;  %804 = vst [vmem:[#allocation2 + $0x278] sm:$0x8] %v803_v17  ;;  %v859_v51 = vld [vmem:[#allocation2 + $0x1ac] sm:$0xf] }
 0x194   :  { %v12277_v15 = vcombine.low %v18157_v13, %v4616_v18  ;;  %v12278_v16 = vcombine.high %v18157_v13, %v4616_v18  ;;  %v13920_v45 = vpop.f32.mrf.mxu1  ;;  %v13882_v31 = vpop.f32.mrf.mxu0  ;;  %15275 = vmatpush3.bf16.msra.mxu1 %v15807_v24  ;;  %14293 = vmatpush3.bf16.msra.mxu0 %v15816_v12  ;;  %v15825_v18 = vld [vmem:[%s20349_s1 + $0x888] sm:$0xff]   ;;  %v15828_v14 = vld [vmem:[%s20349_s1 + $0x880] sm:$0xff]  }
 0x195   :  { %v13921_v58 = vadd.f32 %v13920_v45, %v13919_v49  ;;  %v3233_v0 = vadd.f32 %v13881_v63, %v18055_v39  ;;  %15276 = vmatprep.subr.bf16.mxu1 %v15815_v10  ;;  %14294 = vmatprep.subr.bf16.mxu0 %v15817_v61  ;;  %v15826_v12 = vld [vmem:[%s20349_s1 + $0x8c8] sm:$0xff]   ;;  %v860_v63 = vsel %vm16652_vm9, %v17230_v33, %v859_v51  ;;  %v15829_v17 = vld [vmem:[%s20349_s1 + $0x8c0] sm:$0xff]  }
 0x196   :  { %5504 = vmatprep.mubr.bf16.mxu0 %v12278_v16  ;;  %v13922_v46 = vpop.f32.mrf.mxu1  ;;  %v13883_v28 = vpop.f32.mrf.mxu0  ;;  %861 = vst [vmem:[#allocation2 + $0x1ac] sm:$0xf] %v860_v63 }
 0x197   :  { %5505 = vmatmul.mubr.bf16.gmra.mxu0 %v12277_v15  ;;  %v13884_v24 = vadd.f32 %v13883_v28, %v13882_v31  ;;  %v18195_v43 = vadd.f32 %v13921_v58, %v3233_v0  ;;  %5570 = vmatmul.mubr.bf16.gmra.mxu1 %v15811_v11  ;;  %v15822_v58 = vld [vmem:[#allocation2 + $0x250] ss:$36 sps:$4 sm:$0xff]  }
 0x198   :  { %v13923_v5 = vpop.f32.mrf.mxu1  ;;  %v13885_v49 = vpop.f32.mrf.mxu0  ;;  %15277 = vmatpush3.bf16.msra.mxu1 %v15815_v10  ;;  %14295 = vmatpush3.bf16.msra.mxu0 %v15819_v26  ;;  %v816_v10 = vld [vmem:[#allocation2 + $0x1a4] sm:$0x1]  ;;  %v886_v0 = vld [vmem:[#allocation2 + $0x1d0] sm:$0x8] }
 0x199   :  { %v13924_v15 = vadd.f32 %v13923_v5, %v13922_v46  ;;  %v3238_v16 = vadd.f32 %v13884_v24, %v18036_v59  ;;  %15278 = vmatprep.subr.bf16.mxu1 %v15818_v32  ;;  %v18201_v61 = vld [vmem:[#allocation2 + $0x248] sm:$0xff]  ;;  %14296 = vmatprep.subr.bf16.mxu0 %v15825_v18  ;;  %v817_v41 = vsel %vm16644_vm7, 0, %v816_v10  ;;  %v887_v24 = vsel %vm16702_vm15, 0, %v886_v0  ;;  %v889_v5 = vld [vmem:[#allocation2 + $0x1f4] sm:$0x8] }
 0x19a   :  { %v13925_v39 = vpop.f32.mrf.mxu1  ;;  %v13886_v19 = vpop.f32.mrf.mxu0  ;;  %v4626_v59 = vld [vmem:[#allocation2 + $0x26c] sm:$0xff]  ;;  %818 = vst [vmem:[#allocation2 + $0x1a4] sm:$0x1] %v817_v41  ;;  %v15824_v46 = vld [vmem:[#allocation2 + $0x254] ss:$36 sps:$4 sm:$0xff]  }
 0x19b   :  { %v18206_v4 = vadd.f32 %v13924_v15, %v3238_v16  ;;  %v13887_v54 = vadd.f32 %v13886_v19, %v13885_v49  ;;  %v12286_v45 = vcombine.low %v18201_v61, %v4626_v59  ;;  %v12287_v11 = vcombine.high %v18201_v61, %v4626_v59  ;;  %5577 = vmatprep.mubr.bf16.mxu1 %v15824_v46  ;;  %v15832_v15 = vld [vmem:[%s20349_s1 + $0x978] sm:$0xff]   ;;  %v15839_v0 = vld [vmem:[%s20349_s1 + $0x930] sm:$0xff]  }
 0x19c   :  { %v13926_v20 = vpop.f32.mrf.mxu1  ;;  %v13888_v36 = vpop.f32.mrf.mxu0  ;;  %15279 = vmatpush3.bf16.msra.mxu1 %v15818_v32  ;;  %14297 = vmatpush3.bf16.msra.mxu0 %v15827_v3  ;;  %888 = vst [vmem:[#allocation2 + $0x1d0] sm:$0x8] %v887_v24  ;;  %v890_v16 = vsel %vm16702_vm15, 0, %v889_v5 }
 0x19d   :  { %v13927_v42 = vadd.f32 %v13926_v20, %v13925_v39  ;;  %v3241_v37 = vadd.f32 %v13887_v54, %v18057_v60  ;;  %5512 = vmatprep.mubr.bf16.mxu0 %v12287_v11  ;;  %15280 = vmatprep.subr.bf16.mxu1 %v15826_v12  ;;  %v15830_v60 = vld [vmem:[%s20349_s1 + $0x840] sm:$0xff]   ;;  %891 = vst [vmem:[#allocation2 + $0x1f4] sm:$0x8] %v890_v16  ;;  %v883_v51 = vld [vmem:[#allocation2 + $0x1ac] sm:$0x8]  ;;  %v15835_v11 = vld [vmem:[%s20349_s1 + $0x938] sm:$0xff]  }
 0x19e   :  { %v13928_v31 = vpop.f32.mrf.mxu1  ;;  %v13889_v1 = vpop.f32.mrf.mxu0  ;;  %14298 = vmatprep.subr.bf16.mxu0 %v15828_v14  ;;  %v15845_v16 = vld [vmem:[%s20349_s1 + $0x928] sm:$0xff]  }
 0x19f   :  { %v13890_v26 = vadd.f32 %v13889_v1, %v13888_v36  ;;  %5513 = vmatmul.mubr.bf16.gmra.mxu0 %v12286_v45  ;;  %v18222_v33 = vadd.f32 %v13927_v42, %v3241_v37  ;;  %5578 = vmatmul.mubr.bf16.gmra.mxu1 %v15822_v58  ;;  %v884_v45 = vsel %vm16702_vm15, 0, %v883_v51  ;;  %v822_v58 = vld [vmem:[#allocation2 + $0x1ec] sm:$0x1] }
 0x1a0   :  { %v13929_v56 = vpop.f32.mrf.mxu1  ;;  %v13891_v32 = vpop.f32.mrf.mxu0  ;;  %15281 = vmatpush3.bf16.msra.mxu1 %v15826_v12  ;;  %14299 = vmatpush3.bf16.msra.mxu0 %v15830_v60  ;;  %885 = vst [vmem:[#allocation2 + $0x1ac] sm:$0x8] %v884_v45  ;;  %v15843_v60 = vld [vmem:[%s20349_s1 + $0x968] sm:$0xff]  }
 0x1a1   :  { %v13930_v28 = vadd.f32 %v13929_v56, %v13928_v31  ;;  %v3246_v18 = vadd.f32 %v13890_v26, %v18103_v48  ;;  %15282 = vmatprep.subr.bf16.mxu1 %v15829_v17  ;;  %v15833_v48 = vld [vmem:[%s20349_s1 + $0x9f8] sm:$0xff]   ;;  %v4598_v10 = vld [vmem:[#allocation2 + $0x1a4] sm:$0xff]  ;;  %14336 = vmatprep.subr.bf16.mxu0 %v15832_v15  ;;  %v823_v26 = vsel %vm16644_vm7, 0, %v822_v58  ;;  %v15838_v15 = vld [vmem:[%s20349_s1 + $0x9f0] sm:$0xff]  }
 0x1a2   :  { %v13931_v49 = vpop.f32.mrf.mxu1  ;;  %v13892_v39 = vpop.f32.mrf.mxu0  ;;  %v12263_v42 = vcombine.low %v18086_v23, %v4598_v10  ;;  %v12264_v12 = vcombine.high %v18086_v23, %v4598_v10  ;;  %v819_v23 = vld [vmem:[#allocation2 + $0x1c8] sm:$0x1]  ;;  %824 = vst [vmem:[#allocation2 + $0x1ec] sm:$0x1] %v823_v26  ;;  %v825_v58 = vld [vmem:[#allocation2 + $0x210] sm:$0x1] }
 0x1a3   :  { %v18235_v19 = vadd.f32 %v13930_v28, %v3246_v18  ;;  %v13893_v3 = vadd.f32 %v13892_v39, %v13891_v32  ;;  %v820_v46 = vsel %vm16644_vm7, 0, %v819_v23  ;;  %v15844_v23 = vld [vmem:[%s20349_s1 + $0x9e8] sm:$0xff]   ;;  %v826_v26 = vsel %vm16644_vm7, 0, %v825_v58  ;;  %v15860_v58 = vld [vmem:[%s20349_s1 + $0x9d0] sm:$0xff]  }
 0x1a4   :  { %v13932_v54 = vpop.f32.mrf.mxu1  ;;  %v13894_v20 = vpop.f32.mrf.mxu0  ;;  %15283 = vmatpush3.bf16.msra.mxu1 %v15829_v17  ;;  %5618 = vmatprep.mubr.bf16.mxu0 %v12264_v12  ;;  %821 = vst [vmem:[#allocation2 + $0x1c8] sm:$0x1] %v820_v46  ;;  %v15834_v18 = vld [vmem:[#allocation2 + $0x1d0] ss:$36 sps:$4 sm:$0xff]   ;;  %v15846_v46 = vld [vmem:[%s20349_s1 + $0x9a8] sm:$0xff]  }
 0x1a5   :  { %v13933_v59 = vadd.f32 %v13932_v54, %v13931_v49  ;;  %v3249_v36 = vadd.f32 %v13893_v3, %v18118_v25  ;;  %v15837_v25 = vld [vmem:[%s20349_s1 + $0x970] sm:$0xff]   ;;  %14376 = vmatprep.subr.bf16.mxu1 %v15833_v48  ;;  %827 = vst [vmem:[#allocation2 + $0x210] sm:$0x1] %v826_v26 }
 0x1a6   :  { %v13895_v14 = vpop.f32.mrf.mxu0  ;;  %v13934_v41 = vpop.f32.mrf.mxu1 }
 0x1a7   :  { %v18251_v63 = vadd.f32 %v13933_v59, %v3249_v36  ;;  %v13896_v31 = vadd.f32 %v13895_v14, %v13894_v20  ;;  %5619 = vmatmul.mubr.bf16.vlgmr.msra.gmra.mxu0 %v12263_v42  ;;  %v15831_v48 = vld [vmem:[#allocation2 + $0x188] ss:$36 sps:$4 sm:$0xff]   ;;  %v15847_v59 = vld [vmem:[%s20349_s1 + $0x960] sm:$0xff]   ;;  %v15840_v36 = vld [vmem:[%s20349_s1 + $0x9b0] sm:$0xff]  }
 0x1a8   :  { %v13897_v37 = vpop.f32.mrf.mxu0  ;;  %v13935_v1 = vpop.f32.mrf.mxu1  ;;  %14337 = vmatpush3.bf16.msra.mxu0 %v15835_v11  ;;  %15284 = vmatprep.mubr.bf16.mxu1 %v15831_v48 }
 0x1a9   :  { %v3254_v56 = vadd.f32 %v13896_v31, %v18120_v34  ;;  %v13936_v17 = vadd.f32 %v13935_v1, %v13934_v41  ;;  %14338 = vmatprep.subr.bf16.mxu0 %v15837_v25  ;;  %v15836_v34 = vld [vmem:[%s20349_s1 + $0x9b8] sm:$0xff]   ;;  %15285 = vmatmul.mubr.bf16.vlgmr.msra.gmra.mxu1 %v15834_v18  ;;  %v4608_v12 = vld [vmem:[#allocation2 + $0x1ec] sm:$0xff]  ;;  %v15849_v25 = vld [vmem:[%s20349_s1 + $0x920] sm:$0xff]  }
 0x1aa   :  { %v13898_v32 = vpop.f32.mrf.mxu0  ;;  %v13937_v28 = vpop.f32.mrf.mxu1  ;;  %14377 = vmatpush3.bf16.msra.mxu1 %v15836_v34  ;;  %v15850_v34 = vld [vmem:[%s20349_s1 + $0x9a0] sm:$0xff]  }
 0x1ab   :  { %v18264_v24 = vadd.f32 %v13936_v17, %v3254_v56  ;;  %v13899_v5 = vadd.f32 %v13898_v32, %v13897_v37  ;;  %v18286_v42 = vld [vmem:[#allocation2 + $0x1c8] sm:$0xff]  ;;  %14378 = vmatprep.subr.bf16.mxu1 %v15838_v15  ;;  %v828_v37 = vld [vmem:[#allocation2 + $0x234] sm:$0x1]  ;;  %v871_v15 = vld [vmem:[#allocation2 + $0x23c] sm:$0xf] }
 0x1ac   :  { %v13938_v49 = vpop.f32.mrf.mxu1  ;;  %v13956_v54 = vpop.f32.mrf.mxu0  ;;  %14339 = vmatpush3.bf16.msra.mxu0 %v15839_v0  ;;  %v12272_v14 = vcombine.low %v18286_v42, %v4608_v12  ;;  %v12273_v41 = vcombine.high %v18286_v42, %v4608_v12  ;;  %v15853_v0 = vld [vmem:[%s20349_s1 + $0x958] sm:$0xff]  }
 0x1ad   :  { %v3257_v39 = vadd.f32 %v13899_v5, %v18144_v27  ;;  %v13939_v3 = vadd.f32 %v13938_v49, %v13937_v28  ;;  %14340 = vmatprep.subr.bf16.mxu0 %v15843_v60  ;;  %v15848_v28 = vld [vmem:[%s20349_s1 + $0x9e0] sm:$0xff]   ;;  %v15855_v5 = vld [vmem:[%s20349_s1 + $0x918] sm:$0xff]  }
 0x1ae   :  { %v18276_v20 = vpop.f32.mrf.mxu1  ;;  %v13957_v51 = vpop.f32.mrf.mxu0  ;;  %5626 = vmatprep.mubr.bf16.mxu0 %v12273_v41  ;;  %14379 = vmatpush3.bf16.msra.mxu1 %v15840_v36  ;;  %v868_v49 = vld [vmem:[#allocation2 + $0x218] sm:$0xf] }
 0x1af   :  { %v18281_v10 = vadd.f32 %v13939_v3, %v3257_v39  ;;  %v13958_v27 = vadd.f32 %v13957_v51, %v13956_v54  ;;  %5627 = vmatmul.mubr.bf16.gmra.mxu0 %v12272_v14  ;;  %14380 = vmatprep.subr.bf16.mxu1 %v15844_v23  ;;  %v869_v39 = vsel %vm16652_vm9, %v17210_v38, %v868_v49  ;;  %v874_v3 = vld [vmem:[#allocation2 + $0x260] sm:$0xf]  ;;  %v877_v54 = vld [vmem:[#allocation2 + $0x284] sm:$0xf]  ;;  %v15859_v38 = vld [vmem:[%s20349_s1 + $0x950] sm:$0xff]  }
 0x1b0   :  { %v13959_v45 = vpop.f32.mrf.mxu0  ;;  %v3424_v11 = vpop.f32.mrf.mxu1  ;;  %14341 = vmatpush3.bf16.msra.mxu0 %v15845_v16  ;;  %870 = vst [vmem:[#allocation2 + $0x218] sm:$0xf] %v869_v39  ;;  %v878_v51 = vsel %vm16652_vm9, %v17344_v2, %v877_v54  ;;  %v15856_v14 = vld [vmem:[%s20349_s1 + $0x998] sm:$0xff]   ;;  %v15861_v23 = vld [vmem:[%s20349_s1 + $0x910] sm:$0xff]  }
 0x1b1   :  { %v3360_v31 = vadd.f32 %v13958_v27, %v18177_v55  ;;  %14342 = vmatprep.subr.bf16.mxu0 %v15847_v59  ;;  %v829_v55 = vsel %vm16644_vm7, 0, %v828_v37  ;;  %v875_v59 = vsel %vm16652_vm9, %v17314_v8, %v874_v3  ;;  %v15854_v27 = vld [vmem:[%s20349_s1 + $0x9d8] sm:$0xff]   ;;  %879 = vst [vmem:[#allocation2 + $0x284] sm:$0xf] %v878_v51  ;;  %v15867_v51 = vld [vmem:[%s20349_s1 + $0x908] sm:$0xff]  }
 0x1b2   :  { %v13960_v1 = vpop.f32.mrf.mxu0  ;;  %830 = vst [vmem:[#allocation2 + $0x234] sm:$0x1] %v829_v55  ;;  %14381 = vmatpush3.bf16.msra.mxu1 %v15846_v46  ;;  %876 = vst [vmem:[#allocation2 + $0x260] sm:$0xf] %v875_v59  ;;  %v831_v37 = vld [vmem:[#allocation2 + $0x258] sm:$0x1]  ;;  %v15239_v46 = vpop.f32.mrf.mxu1 }
 0x1b3   :  { %v18304_v56 = vadd.f32 %v3424_v11, %v3360_v31  ;;  %v13961_v17 = vadd.f32 %v13960_v1, %v13959_v45  ;;  %14382 = vmatprep.subr.bf16.mxu1 %v15848_v28  ;;  %v18340_v45 = vld [vmem:[#allocation2 + $0x210] sm:$0xff]  ;;  %v834_v1 = vld [vmem:[#allocation2 + $0x27c] sm:$0x1] }
 0x1b4   :  { %v13962_v32 = vpop.f32.mrf.mxu0  ;;  %14343 = vmatpush3.bf16.msra.mxu0 %v15849_v25  ;;  %v835_v55 = vsel %vm16644_vm7, 0, %v834_v1  ;;  %v15871_v1 = vld [vmem:[%s20349_s1 + $0x900] sm:$0xff]  }
 0x1b5   :  { %v18313_v60 = vadd.f32 %v13961_v17, %v18195_v43  ;;  %14344 = vmatprep.subr.bf16.mxu0 %v15853_v0  ;;  %v872_v43 = vsel %vm16652_vm9, %v17272_v22, %v871_v15  ;;  %v15862_v0 = vld [vmem:[%s20349_s1 + $0x990] sm:$0xff]   ;;  %836 = vst [vmem:[#allocation2 + $0x27c] sm:$0x1] %v835_v55 }
 0x1b6   :  { %v13963_v18 = vpop.f32.mrf.mxu0  ;;  %873 = vst [vmem:[#allocation2 + $0x23c] sm:$0xf] %v872_v43  ;;  %14383 = vmatpush3.bf16.msra.mxu1 %v15850_v34  ;;  %v18376_v43 = vpop.f32.mrf.mxu1 }
 0x1b7   :  { %v13964_v16 = vadd.f32 %v13963_v18, %v13962_v32  ;;  %14384 = vmatprep.subr.bf16.mxu1 %v15854_v27  ;;  %v892_v28 = vld [vmem:[#allocation2 + $0x218] sm:$0x8]  ;;  %v15866_v18 = vld [vmem:[%s20349_s1 + $0x9c8] sm:$0xff]  }
 0x1b8   :  { %v13965_v48 = vpop.f32.mrf.mxu0  ;;  %14345 = vmatpush3.bf16.msra.mxu0 %v15855_v5  ;;  %v893_v49 = vsel %vm16702_vm15, 0, %v892_v28  ;;  %v901_v39 = vld [vmem:[#allocation2 + $0x284] sm:$0x8]  ;;  %v15868_v27 = vld [vmem:[%s20349_s1 + $0x988] sm:$0xff]   ;;  %v5725_v28 = vld [vmem:[#allocation2 + $0x194] sm:$0xff] }
 0x1b9   :  { %v3368_v36 = vadd.f32 %v13964_v16, %v18206_v4  ;;  %v4618_v11 = vld [vmem:[#allocation2 + $0x234] sm:$0xff]  ;;  %14346 = vmatprep.subr.bf16.mxu0 %v15859_v38  ;;  %v898_v16 = vld [vmem:[#allocation2 + $0x260] sm:$0x8]  ;;  %894 = vst [vmem:[#allocation2 + $0x218] sm:$0x8] %v893_v49  ;;  %v15242_v38 = vpop.f32.mrf.mxu1 }
 0x1ba   :  { %v13966_v12 = vpop.f32.mrf.mxu0  ;;  %v12281_v4 = vcombine.low %v18340_v45, %v4618_v11  ;;  %v12282_v31 = vcombine.high %v18340_v45, %v4618_v11  ;;  %14385 = vmatpush3.bf16.msra.mxu1 %v15856_v14  ;;  %v899_v54 = vsel %vm16702_vm15, 0, %v898_v16  ;;  %v15869_v11 = vld [vmem:[%s20349_s1 + $0x940] sm:$0xff]   ;;  %v15878_v49 = vld [vmem:[%s20349_s1 + $0xaf8] sm:$0xff]  }
 0x1bb   :  { %v13967_v41 = vadd.f32 %v13966_v12, %v13965_v48  ;;  %v18346_v25 = vadd.f32 %v18276_v20, %v3368_v36  ;;  %v832_v20 = vsel %vm16644_vm7, 0, %v831_v37  ;;  %v902_v48 = vsel %vm16702_vm15, 0, %v901_v39  ;;  %14386 = vmatprep.subr.bf16.mxu1 %v15860_v58  ;;  %900 = vst [vmem:[#allocation2 + $0x260] sm:$0x8] %v899_v54  ;;  %v15879_v54 = vld [vmem:[%s20349_s1 + $0xa38] sm:$0xff]  }
 0x1bc   :  { %5634 = vmatprep.mubr.bf16.mxu0 %v12282_v31  ;;  %v13968_v17 = vpop.f32.mrf.mxu0  ;;  %833 = vst [vmem:[#allocation2 + $0x258] sm:$0x1] %v832_v20  ;;  %14347 = vmatpush3.bf16.msra.mxu0 %v15861_v23  ;;  %903 = vst [vmem:[#allocation2 + $0x284] sm:$0x8] %v902_v48  ;;  %v4628_v31 = vld [vmem:[#allocation2 + $0x27c] sm:$0xff] }
 0x1bd   :  { %v3371_v26 = vadd.f32 %v13967_v41, %v18222_v33  ;;  %5635 = vmatmul.mubr.bf16.gmra.mxu0 %v12281_v4  ;;  %v15865_v33 = vld [vmem:[%s20349_s1 + $0x948] sm:$0xff]   ;;  %v895_v5 = vld [vmem:[#allocation2 + $0x23c] sm:$0x8]  ;;  %v3440_v41 = vpop.f32.mrf.mxu1 }
 0x1be   :  { %v13969_v34 = vpop.f32.mrf.mxu0  ;;  %v896_v15 = vsel %vm16702_vm15, 0, %v895_v5  ;;  %14348 = vmatprep.subr.bf16.mxu0 %v15865_v33  ;;  %14387 = vmatpush3.bf16.msra.mxu1 %v15862_v0  ;;  %v5724_v0 = vld [vmem:[#allocation2 + $0x18c] sm:$0xff]  ;;  %v15880_v48 = vld [vmem:[%s20349_s1 + $0xab8] sm:$0xff]  }
 0x1bf   :  { %v18367_v32 = vadd.f32 %v15239_v46, %v3371_v26  ;;  %v13970_v3 = vadd.f32 %v13969_v34, %v13968_v17  ;;  %897 = vst [vmem:[#allocation2 + $0x23c] sm:$0x8] %v896_v15  ;;  %14388 = vmatprep.subr.bf16.mxu1 %v15866_v18  ;;  %v15872_v26 = vld [vmem:[%s20349_s1 + $0x980] sm:$0xff]   ;;  %v18410_v33 = vld [vmem:[#allocation2 + $0x1b0] sm:$0xff]  ;;  %v12512_v18 = vcombine.high %v5725_v28, %v18116_v6  ;;  %v15877_v34 = vld [vmem:[%s20349_s1 + $0xa78] sm:$0xff]   ;;  %v15243_v15 = vpop.f32.mrf.mxu1 }
 0x1c0   :  { %v13971_v59 = vpop.f32.mrf.mxu0  ;;  %14349 = vmatpush3.bf16.msra.mxu0 %v15867_v51 }
 0x1c1   :  { %v3376_v36 = vadd.f32 %v13970_v3, %v18235_v19  ;;  %v15870_v19 = vld [vmem:[%s20349_s1 + $0x9c0] sm:$0xff]   ;;  %14350 = vmatprep.subr.bf16.mxu0 %v15869_v11  ;;  %v12509_v3 = vcombine.low %v5724_v0, %v18410_v33  ;;  %v15882_v11 = vld [vmem:[%s20349_s1 + $0xaf0] sm:$0xff]  }
 0x1c2   :  { %v13972_v12 = vpop.f32.mrf.mxu0  ;;  %14389 = vmatpush3.bf16.msra.mxu1 %v15868_v27  ;;  %v15881_v27 = vld [vmem:[%s20349_s1 + $0xa70] sm:$0xff]  }
 0x1c3   :  { %v13973_v14 = vadd.f32 %v13972_v12, %v13971_v59  ;;  %v18392_v4 = vld [vmem:[#allocation2 + $0x258] sm:$0xff]  ;;  %v18397_v23 = vadd.f32 %v3440_v41, %v3376_v36  ;;  %v15858_v17 = vld [vmem:[#allocation2 + $0x260] ss:$36 sps:$4 sm:$0xff]   ;;  %14390 = vmatprep.subr.bf16.mxu1 %v15870_v19  ;;  %v12511_v36 = vcombine.low %v5725_v28, %v18116_v6  ;;  %v15884_v19 = vld [vmem:[%s20349_s1 + $0xab0] sm:$0xff]  }
 0x1c4   :  { %v12290_v58 = vcombine.low %v18392_v4, %v4628_v31  ;;  %v12291_v37 = vcombine.high %v18392_v4, %v4628_v31  ;;  %v13974_v55 = vpop.f32.mrf.mxu0  ;;  %14351 = vmatpush3.bf16.msra.mxu0 %v15871_v1  ;;  %v5735_v1 = vld [vmem:[#allocation2 + $0x1dc] sm:$0xff] }
 0x1c5   :  { %v18405_v46 = vadd.f32 %v13973_v14, %v18251_v63  ;;  %v12510_v63 = vcombine.high %v5724_v0, %v18410_v33  ;;  %14416 = vmatprep.subr.bf16.mxu0 %v15877_v34  ;;  %v18435_v14 = vpop.f32.mrf.mxu1  ;;  %v15889_v0 = vld [vmem:[%s20349_s1 + $0xa68] sm:$0xff]  }
 0x1c6   :  { %v15857_v20 = vld [vmem:[#allocation2 + $0x218] ss:$36 sps:$4 sm:$0xff]   ;;  %5642 = vmatprep.mubr.bf16.mxu0 %v12291_v37  ;;  %v13975_v5 = vpop.f32.mrf.mxu0  ;;  %14391 = vmatpush3.bf16.msra.mxu1 %v15872_v26 }
 0x1c7   :  { %5643 = vmatmul.mubr.bf16.gmra.mxu0 %v12290_v58  ;;  %15288 = vmatprep.mubr.bf16.mxu1 %v15857_v20  ;;  %v13976_v16 = vadd.f32 %v13975_v5, %v13974_v55  ;;  %v18446_v37 = vld [vmem:[#allocation2 + $0x1d4] sm:$0xff]  ;;  %v15890_v5 = vld [vmem:[%s20349_s1 + $0xae8] sm:$0xff]  }
 0x1c8   :  { %15289 = vmatmul.mubr.bf16.gmra.mxu1 %v15858_v17  ;;  %v13977_v39 = vpop.f32.mrf.mxu0  ;;  %6557 = vmatprep.mubr.bf16.mxu0 %v12510_v63  ;;  %v12521_v17 = vcombine.high %v5735_v1, %v18157_v13 }
 0x1c9   :  { %6622 = vmatprep.mubr.bf16.mxu1 %v12512_v18  ;;  %14456 = vmatprep.subr.bf16.mxu1 %v15878_v49  ;;  %v3384_v59 = vadd.f32 %v13976_v16, %v18264_v24  ;;  %v15883_v24 = vld [vmem:[%s20349_s1 + $0xa30] sm:$0xff]   ;;  %v15891_v16 = vld [vmem:[%s20349_s1 + $0xa28] sm:$0xff]  }
 0x1ca   :  { %v13978_v51 = vpop.f32.mrf.mxu0 }
 0x1cb   :  { %v13979_v12 = vadd.f32 %v13978_v51, %v13977_v39  ;;  %v18437_v41 = vadd.f32 %v15242_v38, %v3384_v59  ;;  %v18448_v38 = vld [vmem:[#allocation2 + $0x1f8] sm:$0xff]  ;;  %v15893_v51 = vld [vmem:[%s20349_s1 + $0xa60] sm:$0xff]  }
 0x1cc   :  { %v14008_v31 = vpop.f32.mrf.mxu0  ;;  %v12519_v55 = vcombine.high %v18446_v37, %v18448_v38 }
 0x1cd   :  { %v3387_v6 = vadd.f32 %v13979_v12, %v18281_v10  ;;  %v12518_v10 = vcombine.low %v18446_v37, %v18448_v38 }
 0x1ce   :  { %v14048_v58 = vpop.f32.mrf.mxu1  ;;  %v14009_v26 = vpop.f32.mrf.mxu0 }
 0x1cf   :  { %6558 = vmatmul.mubr.bf16.vlgmr.msra.gmra.mxu0 %v12509_v3  ;;  %v18450_v20 = vadd.f32 %v15243_v15, %v3387_v6  ;;  %v14010_v63 = vadd.f32 %v14009_v26, %v14008_v31  ;;  %v12520_v3 = vcombine.low %v5735_v1, %v18157_v13  ;;  %v15894_v13 = vld [vmem:[%s20349_s1 + $0xae0] sm:$0xff]  }
 0x1d0   :  { %14417 = vmatpush3.bf16.msra.mxu0 %v15879_v54  ;;  %6623 = vmatmul.mubr.bf16.vlgmr.msra.gmra.mxu1 %v12511_v36  ;;  %v14049_v28 = vpop.f32.mrf.mxu1  ;;  %v14011_v34 = vpop.f32.mrf.mxu0  ;;  %v15892_v54 = vld [vmem:[%s20349_s1 + $0xaa8] sm:$0xff]   ;;  %v15896_v31 = vld [vmem:[%s20349_s1 + $0xaa0] sm:$0xff]  }
 0x1d1   :  { %14418 = vmatprep.subr.bf16.mxu0 %v15881_v27  ;;  %14457 = vmatpush3.bf16.msra.mxu1 %v15880_v48  ;;  %v14050_v18 = vadd.f32 %v14049_v28, %v14048_v58  ;;  %v18490_v1 = vld [vmem:[#allocation2 + $0x21c] sm:$0xff] }
 0x1d2   :  { %14458 = vmatprep.subr.bf16.mxu1 %v15882_v11  ;;  %6565 = vmatprep.mubr.bf16.mxu0 %v12519_v55  ;;  %v14051_v39 = vpop.f32.mrf.mxu1  ;;  %v14012_v59 = vpop.f32.mrf.mxu0  ;;  %v5749_v26 = vld [vmem:[#allocation2 + $0x240] sm:$0xff] }
 0x1d3   :  { %6630 = vmatprep.mubr.bf16.mxu1 %v12521_v17  ;;  %v18474_v48 = vadd.f32 %v14050_v18, %v14010_v63  ;;  %v14013_v36 = vadd.f32 %v14012_v59, %v14011_v34  ;;  %v12528_v28 = vcombine.high %v18490_v1, %v5749_v26  ;;  %v15901_v63 = vld [vmem:[%s20349_s1 + $0xa58] sm:$0xff]  }
 0x1d4   :  { %14419 = vmatpush3.bf16.msra.mxu0 %v15883_v24  ;;  %v14052_v27 = vpop.f32.mrf.mxu1  ;;  %v14014_v11 = vpop.f32.mrf.mxu0  ;;  %v15895_v24 = vld [vmem:[%s20349_s1 + $0xa20] sm:$0xff]   ;;  %v15902_v34 = vld [vmem:[%s20349_s1 + $0xad8] sm:$0xff]  }
 0x1d5   :  { %14420 = vmatprep.subr.bf16.mxu0 %v15889_v0  ;;  %14459 = vmatpush3.bf16.msra.mxu1 %v15884_v19  ;;  %v14053_v12 = vadd.f32 %v14052_v27, %v14051_v39  ;;  %v12527_v0 = vcombine.low %v18490_v1, %v5749_v26  ;;  %v15904_v27 = vld [vmem:[%s20349_s1 + $0xa98] sm:$0xff]   ;;  %v15907_v26 = vld [vmem:[%s20349_s1 + $0xa10] sm:$0xff]  }
 0x1d6   :  { %14460 = vmatprep.subr.bf16.mxu1 %v15890_v5  ;;  %v14054_v6 = vpop.f32.mrf.mxu1  ;;  %v14015_v58 = vpop.f32.mrf.mxu0  ;;  %v18613_v15 = vld [vmem:[#allocation2 + $0x19c] sm:$0xff] }
 0x1d7   :  { %6566 = vmatmul.mubr.bf16.gmra.mxu0 %v12518_v10  ;;  %v18488_v19 = vadd.f32 %v14053_v12, %v14013_v36  ;;  %v5745_v10 = vld [vmem:[#allocation2 + $0x224] sm:$0xff]  ;;  %v14016_v55 = vadd.f32 %v14015_v58, %v14014_v11 }
 0x1d8   :  { %14421 = vmatpush3.bf16.msra.mxu0 %v15891_v16  ;;  %6631 = vmatmul.mubr.bf16.gmra.mxu1 %v12520_v3  ;;  %v14055_v17 = vpop.f32.mrf.mxu1  ;;  %v12530_v5 = vcombine.high %v5745_v10, %v18201_v61  ;;  %v14017_v18 = vpop.f32.mrf.mxu0  ;;  %v12529_v59 = vcombine.low %v5745_v10, %v18201_v61  ;;  %v15905_v61 = vld [vmem:[%s20349_s1 + $0xa50] sm:$0xff]  }
 0x1d9   :  { %14422 = vmatprep.subr.bf16.mxu0 %v15893_v51  ;;  %14461 = vmatpush3.bf16.msra.mxu1 %v15892_v54  ;;  %v14056_v16 = vadd.f32 %v14055_v17, %v14054_v6  ;;  %v15903_v51 = vld [vmem:[%s20349_s1 + $0xa18] sm:$0xff]   ;;  %v15908_v17 = vld [vmem:[%s20349_s1 + $0xa90] sm:$0xff]  }
 0x1da   :  { %14462 = vmatprep.subr.bf16.mxu1 %v15894_v13  ;;  %v14057_v39 = vpop.f32.mrf.mxu1  ;;  %6573 = vmatprep.mubr.bf16.mxu0 %v12528_v28  ;;  %v14018_v36 = vpop.f32.mrf.mxu0 }
 0x1db   :  { %6638 = vmatprep.mubr.bf16.mxu1 %v12530_v5  ;;  %v18512_v13 = vadd.f32 %v14056_v16, %v14016_v55  ;;  %v14019_v12 = vadd.f32 %v14018_v36, %v14017_v18  ;;  %v18531_v5 = vld [vmem:[%s20348_s0 + $0x40] sm:$0xf]  ;;  %v652_v36 = vld [vmem:[#allocation2 + $0x288] sm:$0xf] }
 0x1dc   :  { %14423 = vmatpush3.bf16.msra.mxu0 %v15895_v24  ;;  %v14058_v11 = vpop.f32.mrf.mxu1  ;;  %v14020_v6 = vpop.f32.mrf.mxu0  ;;  %v18537_v16 = vshll.u32 %v18531_v5, 16  ;;  %686 = vst [vmem:[#allocation2 + $0x28c] sm:$0xf] %v18531_v5  ;;  %736 = vst [vmem:[#allocation2 + $0x294] sm:$0xf] %v18531_v5 }
 0x1dd   :  { %14463 = vmatpush3.bf16.msra.mxu1 %v15896_v31  ;;  %14424 = vmatprep.subr.bf16.mxu0 %v15901_v63  ;;  %v14059_v24 = vadd.f32 %v14058_v11, %v14057_v39  ;;  %v15906_v31 = vld [vmem:[%s20349_s1 + $0xad0] sm:$0xff]   ;;  %982 = vst [vmem:[#allocation2 + $0x3d0] sm:$0xf] %v18531_v5  ;;  %1032 = vst [vmem:[#allocation2 + $0x3d8] sm:$0xf] %v18531_v5 }
 0x1de   :  { %14464 = vmatprep.subr.bf16.mxu1 %v15902_v34  ;;  %v14060_v58 = vpop.f32.mrf.mxu1  ;;  %v14021_v55 = vpop.f32.mrf.mxu0  ;;  %v18534_v34 = vshrl.u32 %v18531_v5, 16  ;;  %v18546_v39 = vld [vmem:[%s20348_s0 + $0x44] sm:$0x1] }
 0x1df   :  { %6574 = vmatmul.mubr.bf16.gmra.mxu0 %v12527_v0  ;;  %v18523_v10 = vadd.f32 %v14059_v24, %v14019_v12  ;;  %v14022_v0 = vadd.f32 %v14021_v55, %v14020_v6  ;;  %v15915_v12 = vld [vmem:[%s20349_s1 + $0xac8] sm:$0xff]   ;;  %v688_v6 = vrot.slane %v18537_v16, 5 }
 0x1e0   :  { %14425 = vmatpush3.bf16.msra.mxu0 %v15903_v51  ;;  %6639 = vmatmul.mubr.bf16.gmra.mxu1 %v12529_v59  ;;  %v14061_v28 = vpop.f32.mrf.mxu1  ;;  %v14023_v18 = vpop.f32.mrf.mxu0  ;;  %v15914_v59 = vld [vmem:[%s20349_s1 + $0xa48] sm:$0xff]   ;;  %v625_v24 = vrot.slane %v18534_v34, 7 }
 0x1e1   :  { %14426 = vmatprep.subr.bf16.mxu0 %v15905_v61  ;;  %14465 = vmatpush3.bf16.msra.mxu1 %v15904_v27  ;;  %v14062_v63 = vadd.f32 %v14061_v28, %v14060_v58  ;;  %v20356_v27 = vshll.u32 %v18546_v39, 16  ;;  %v15916_v58 = vld [vmem:[%s20349_s1 + $0xa08] sm:$0xff]  }
 0x1e2   :  { %14466 = vmatprep.subr.bf16.mxu1 %v15906_v31  ;;  %v14063_v51 = vpop.f32.mrf.mxu1  ;;  %v14024_v61 = vpop.f32.mrf.mxu0  ;;  %v687_v31 = vrot.slane %v18534_v34, 4 }
 0x1e3   :  { %v18555_v11 = vadd.f32 %v14062_v63, %v14022_v0  ;;  %v694_v28 = vrot.slane %v20356_v27, 5  ;;  %v18569_v63 = vor.u32 %v18537_v16, %v625_v24  ;;  %v15919_v24 = vld [vmem:[%s20349_s1 + $0xac0] sm:$0xff]  }
 0x1e4   :  { %14427 = vmatpush3.bf16.msra.mxu0 %v15907_v26  ;;  %v14025_v26 = vadd.f32 %v14024_v61, %v14023_v18  ;;  %v14064_v55 = vpop.f32.mrf.mxu1  ;;  %v689_v3 = vor.u32 %v688_v6, %v687_v31  ;;  %v15918_v18 = vld [vmem:[%s20349_s1 + $0xa40] sm:$0xff]  }
 0x1e5   :  { %14467 = vmatpush3.bf16.msra.mxu1 %v15908_v17  ;;  %14428 = vmatprep.subr.bf16.mxu0 %v15914_v59  ;;  %v15917_v17 = vld [vmem:[%s20349_s1 + $0xa88] sm:$0xff]   ;;  %v14065_v0 = vadd.f32 %v14064_v55, %v14063_v51  ;;  %20389 = vst [vmem:[#allocation18_spill] sm:$0xff] %v18569_v63  ;;  %v14026_v59 = vpop.f32.mrf.mxu0  ;;  %v653_v49 = vsel %vm16633_vm4, %v18569_v63, %v652_v36  ;;  %v18616_v27 = vld [vmem:[#allocation2 + $0x1c0] sm:$0xff] }
 0x1e6   :  { %14468 = vmatprep.subr.bf16.mxu1 %v15915_v12  ;;  %v14066_v54 = vpop.f32.mrf.mxu1  ;;  %v11499_v12 = vrot.slane %v18531_v5, 9  ;;  %v690_v51 = vrot.slane %v689_v3, 4  ;;  %654 = vst [vmem:[#allocation2 + $0x288] sm:$0xf] %v653_v49  ;;  %v15920_v3 = vld [vmem:[%s20349_s1 + $0xa00] sm:$0xff]  }
 0x1e7   :  { %v18574_v61 = vadd.f32 %v14065_v0, %v14025_v26  ;;  %v14027_v6 = vpop.f32.mrf.mxu0  ;;  %v15921_v49 = vld [vmem:[%s20349_s1 + $0xa80] sm:$0xff]  }
 0x1e8   :  { %14429 = vmatpush3.bf16.msra.mxu0 %v15916_v58  ;;  %v14067_v31 = vpop.f32.mrf.mxu1  ;;  %v758_v58 = vld [vmem:[#allocation2 + $0x294] sm:$0x1]  ;;  %v14028_v55 = vadd.f32 %v14027_v6, %v14026_v59  ;;  %v695_v5 = vsel %vm16669_vm11, %v690_v51, %v694_v28  ;;  %v18599_v51 = vld [vmem:[%s20349_s1 + $0xb38] sm:$0xff]  }
 0x1e9   :  { %14469 = vmatpush3.bf16.msra.mxu1 %v15917_v17  ;;  %14430 = vmatprep.subr.bf16.mxu0 %v15918_v18  ;;  %v14068_v26 = vadd.f32 %v14067_v31, %v14066_v54  ;;  %v759_v0 = vsel %vm16644_vm7, 0, %v758_v58  ;;  %v14029_v36 = vpop.f32.mrf.mxu0  ;;  %704 = vst [vmem:[#allocation2 + $0x290] sm:$0xf] %v695_v5  ;;  %768 = vst [vmem:[#allocation2 + $0x298] sm:$0xf] %v695_v5  ;;  %v773_v54 = vrot.slane %v18546_v39, 5 }
 0x1ea   :  { %14470 = vmatprep.subr.bf16.mxu1 %v15919_v24  ;;  %v14069_v17 = vpop.f32.mrf.mxu1  ;;  %760 = vst [vmem:[#allocation2 + $0x294] sm:$0x1] %v759_v0  ;;  %815 = vst [vmem:[#allocation2 + $0x2a0] sm:$0xf] %v695_v5  ;;  %v15927_v31 = vld [vmem:[%s20349_s1 + $0xbb8] sm:$0xff]  }
 0x1eb   :  { %1000 = vst [vmem:[#allocation2 + $0x3d4] sm:$0xf] %v695_v5  ;;  %1064 = vst [vmem:[#allocation2 + $0x3dc] sm:$0xf] %v695_v5  ;;  %v18594_v28 = vadd.f32 %v14068_v26, %v14028_v55  ;;  %v14030_v59 = vpop.f32.mrf.mxu0  ;;  %v774_v24 = vsel %vm16684_vm13, %v11499_v12, %v773_v54 }
 0x1ec   :  { %1111 = vst [vmem:[#allocation2 + $0x3e4] sm:$0xf] %v695_v5  ;;  %14431 = vmatpush3.bf16.msra.mxu0 %v15920_v3  ;;  %v14070_v18 = vpop.f32.mrf.mxu1  ;;  %v14031_v6 = vadd.f32 %v14030_v59, %v14029_v36  ;;  %783 = vst [vmem:[#allocation2 + $0x29c] sm:$0xf] %v774_v24 }
 0x1ed   :  { %14471 = vmatpush3.bf16.msra.mxu1 %v15921_v49  ;;  %847 = vst [vmem:[#allocation2 + $0x2a4] sm:$0xf] %v774_v24  ;;  %1079 = vst [vmem:[#allocation2 + $0x3e0] sm:$0xf] %v774_v24  ;;  %v14071_v58 = vadd.f32 %v14070_v18, %v14069_v17  ;;  %15292 = vmatprep.subr.bf16.mxu0 %v18599_v51  ;;  %v14088_v55 = vpop.f32.mrf.mxu0  ;;  %v676_v5 = vld [vmem:[#allocation2 + $0x288] sm:$0x1] }
 0x1ee   :  { %1143 = vst [vmem:[#allocation2 + $0x3e8] sm:$0xf] %v774_v24  ;;  %v14128_v26 = vpop.f32.mrf.mxu1  ;;  %14508 = vmatprep.subr.bf16.mxu1 %v15927_v31  ;;  %v677_v12 = vsel %vm16644_vm7, 0, %v676_v5 }
 0x1ef   :  { %v18607_v0 = vadd.f32 %v14071_v58, %v14031_v6  ;;  %v14089_v3 = vpop.f32.mrf.mxu0  ;;  %678 = vst [vmem:[#allocation2 + $0x288] sm:$0x1] %v677_v12 }
 0x1f0   :  { %v14129_v36 = vpop.f32.mrf.mxu1  ;;  %v726_v49 = vld [vmem:[#allocation2 + $0x290] sm:$0x8]  ;;  %v14090_v54 = vadd.f32 %v14089_v3, %v14088_v55  ;;  %v5727_v3 = vld [vmem:[#allocation2 + $0x1a4] sm:$0xff] }
 0x1f1   :  { %v14130_v59 = vadd.f32 %v14129_v36, %v14128_v26  ;;  %v727_v17 = vsel %vm16702_vm15, 0, %v726_v49  ;;  %v14091_v18 = vpop.f32.mrf.mxu0  ;;  %v15913_v8 = vld [vmem:[#allocation2 + $0x270] ss:$36 sps:$4 sm:$0xff]  }
 0x1f2   :  { %v14131_v24 = vpop.f32.mrf.mxu1  ;;  %728 = vst [vmem:[#allocation2 + $0x290] sm:$0x8] %v727_v17  ;;  %v4422_v6 = vadd.f32 %v14090_v54, %v18474_v48  ;;  %v12514_v48 = vcombine.high %v18613_v15, %v18616_v27  ;;  %6646 = vmatprep.mubr.bf16.mxu1 %v15913_v8  ;;  %v18642_v8 = vld [vmem:[#allocation2 + $0x208] sm:$0xff] }
 0x1f3   :  { %v14092_v31 = vpop.f32.mrf.mxu0 }
 0x1f4   :  { %v14132_v58 = vpop.f32.mrf.mxu1  ;;  %v14093_v5 = vadd.f32 %v14092_v31, %v14091_v18  ;;  %v18620_v26 = vadd.f32 %v14130_v59, %v4422_v6 }
 0x1f5   :  { %v14094_v12 = vpop.f32.mrf.mxu0  ;;  %v14133_v49 = vadd.f32 %v14132_v58, %v14131_v24 }
 0x1f6   :  { %v14134_v55 = vpop.f32.mrf.mxu1  ;;  %v4425_v36 = vadd.f32 %v14093_v5, %v18488_v19  ;;  %v18623_v17 = vld [vmem:[#allocation2 + $0x288] sm:$0xff]  ;;  %v12516_v19 = vcombine.high %v5727_v3, %v18286_v42 }
 0x1f7   :  { %v14095_v54 = vpop.f32.mrf.mxu0  ;;  %v12536_v18 = vcombine.low %v18618_v62, %v18623_v17  ;;  %v12537_v31 = vcombine.high %v18618_v62, %v18623_v17 }
 0x1f8   :  { %v14135_v9 = vpop.f32.mrf.mxu1  ;;  %v14096_v2 = vadd.f32 %v14095_v54, %v14094_v12  ;;  %v18633_v22 = vadd.f32 %v14133_v49, %v4425_v36  ;;  %v18637_v54 = vld [vmem:[#allocation2 + $0x1e4] sm:$0xff] }
 0x1f9   :  { %v14136_v59 = vadd.f32 %v14135_v9, %v14134_v55  ;;  %v15911_v6 = vld [vmem:[#allocation2 + $0x26c] ss:$36 sps:$4 sm:$0xff]   ;;  %v14097_v24 = vpop.f32.mrf.mxu0  ;;  %6581 = vmatprep.mubr.bf16.mxu0 %v12537_v31 }
 0x1fa   :  { %v14137_v58 = vpop.f32.mrf.mxu1  ;;  %v4430_v5 = vadd.f32 %v14096_v2, %v18512_v13  ;;  %6582 = vmatmul.mubr.bf16.gmra.mxu0 %v12536_v18  ;;  %6647 = vmatmul.mubr.bf16.gmra.mxu1 %v15911_v6  ;;  %v12513_v2 = vcombine.low %v18613_v15, %v18616_v27  ;;  %v848_v13 = vrot.slane %v18534_v34, 5  ;;  %v18648_v18 = vld [vmem:[#allocation2 + $0x1ec] sm:$0xff] }
 0x1fb   :  { %v14098_v44 = vpop.f32.mrf.mxu0  ;;  %6687 = vmatprep.mubr.bf16.mxu0 %v12514_v48  ;;  %6752 = vmatprep.mubr.bf16.mxu1 %v12516_v19  ;;  %v15928_v48 = vld [vmem:[%s20349_s1 + $0xb78] sm:$0xff]   ;;  %v15929_v15 = vld [vmem:[%s20349_s1 + $0xb30] sm:$0xff]   ;;  %v837_v19 = vld [vmem:[#allocation2 + $0x2a0] sm:$0x1] }
 0x1fc   :  { %v14138_v63 = vpop.f32.mrf.mxu1  ;;  %v14099_v40 = vadd.f32 %v14098_v44, %v14097_v24  ;;  %v18635_v9 = vadd.f32 %v14136_v59, %v4430_v5  ;;  %v16376_v44 = vld [vmem:[#allocation2 + $0x1c8] sm:$0xff]  ;;  %v805_v59 = vld [vmem:[#allocation2 + $0x29c] sm:$0x8]  ;;  %v12523_v5 = vcombine.high %v18637_v54, %v18642_v8 }
 0x1fd   :  { %v14139_v12 = vadd.f32 %v14138_v63, %v14137_v58  ;;  %v14100_v55 = vpop.f32.mrf.mxu0  ;;  %v12515_v63 = vcombine.low %v5727_v3, %v16376_v44  ;;  %v806_v34 = vsel %vm16702_vm15, 0, %v805_v59  ;;  %v15930_v58 = vld [vmem:[%s20349_s1 + $0xbb0] sm:$0xff]   ;;  %v15936_v44 = vld [vmem:[%s20349_s1 + $0xb28] sm:$0xff]  }
 0x1fe   :  { %v14140_v42 = vpop.f32.mrf.mxu1  ;;  %v4433_v31 = vadd.f32 %v14099_v40, %v18523_v10  ;;  %807 = vst [vmem:[#allocation2 + $0x29c] sm:$0x8] %v806_v34 }
 0x1ff   :  { %v14101_v36 = vpop.f32.mrf.mxu0 }
 0x200   :  { %v14141_v49 = vpop.f32.mrf.mxu1  ;;  %v14102_v6 = vadd.f32 %v14101_v36, %v14100_v55  ;;  %v18650_v10 = vadd.f32 %v14139_v12, %v4433_v31  ;;  %v838_v12 = vsel %vm16644_vm7, 0, %v837_v19  ;;  %v12525_v31 = vcombine.high %v18648_v18, %v18340_v45  ;;  %v15937_v45 = vld [vmem:[%s20349_s1 + $0xba8] sm:$0xff]  }
 0x201   :  { %v14142_v40 = vadd.f32 %v14141_v49, %v14140_v42  ;;  %v14103_v3 = vpop.f32.mrf.mxu0  ;;  %v15931_v42 = vld [vmem:[%s20349_s1 + $0xb70] sm:$0xff]   ;;  %839 = vst [vmem:[#allocation2 + $0x2a0] sm:$0x1] %v838_v12 }
 0x202   :  { %v14143_v24 = vpop.f32.mrf.mxu1  ;;  %v4438_v55 = vadd.f32 %v14102_v6, %v18555_v11  ;;  %6688 = vmatmul.mubr.bf16.vlgmr.msra.gmra.mxu0 %v12513_v2  ;;  %6753 = vmatmul.mubr.bf16.vlgmr.msra.gmra.mxu1 %v12515_v63  ;;  %v849_v11 = vrot.slane %v18537_v16, 6  ;;  %v852_v63 = vshrl.u32 %v18546_v39, 16  ;;  %v18681_v19 = vld [vmem:[#allocation2 + $0x22c] sm:$0xff] }
 0x203   :  { %v14104_v36 = vpop.f32.mrf.mxu0  ;;  %15293 = vmatpush3.bf16.msra.mxu0 %v18599_v51  ;;  %14509 = vmatpush3.bf16.msra.mxu1 %v15928_v48  ;;  %v18686_v48 = vld [vmem:[#allocation2 + $0x250] sm:$0xff] }
 0x204   :  { %v14144_v49 = vpop.f32.mrf.mxu1  ;;  %v14105_v2 = vadd.f32 %v14104_v36, %v14103_v3  ;;  %v18675_v6 = vadd.f32 %v14142_v40, %v4438_v55  ;;  %15294 = vmatprep.subr.bf16.mxu0 %v15929_v15  ;;  %14510 = vmatprep.subr.bf16.mxu1 %v15930_v58  ;;  %v12522_v40 = vcombine.low %v18637_v54, %v18642_v8  ;;  %v16377_v12 = vld [vmem:[#allocation2 + $0x210] sm:$0xff] }
 0x205   :  { %v14145_v59 = vadd.f32 %v14144_v49, %v14143_v24  ;;  %6695 = vmatprep.mubr.bf16.mxu0 %v12523_v5  ;;  %6760 = vmatprep.mubr.bf16.mxu1 %v12525_v31  ;;  %v12524_v55 = vcombine.low %v18648_v18, %v16377_v12  ;;  %v18689_v36 = vld [vmem:[#allocation2 + $0x234] sm:$0xff]  ;;  %v15939_v31 = vld [vmem:[%s20349_s1 + $0xb20] sm:$0xff]   ;;  %v20390_v18 = vshll.u32 %v18546_v39, 16 }
 0x206   :  { %v14146_v51 = vpop.f32.mrf.mxu1  ;;  %v4441_v16 = vadd.f32 %v14105_v2, %v18574_v61  ;;  %v15938_v61 = vld [vmem:[%s20349_s1 + $0xb68] sm:$0xff]   ;;  %v854_v2 = vrot.slane %v852_v63, 5  ;;  %v12534_v39 = vcombine.high %v18689_v36, %v18392_v4 }
 0x207   :  { %15295 = vmatpush3.bf16.msra.mxu0 %v15929_v15  ;;  %14511 = vmatpush3.bf16.msra.mxu1 %v15931_v42  ;;  %v850_v15 = vor.u32 %v849_v11, %v848_v13  ;;  %v855_v12 = vrot.slane %v20390_v18, 6  ;;  %v15940_v42 = vld [vmem:[%s20349_s1 + $0xba0] sm:$0xff]  }
 0x208   :  { %v14147_v24 = vpop.f32.mrf.mxu1  ;;  %v18691_v49 = vadd.f32 %v14145_v59, %v4441_v16  ;;  %15296 = vmatprep.subr.bf16.mxu0 %v15936_v44  ;;  %14512 = vmatprep.subr.bf16.mxu1 %v15937_v45  ;;  %v12532_v59 = vcombine.high %v18681_v19, %v18686_v48  ;;  %v15941_v13 = vld [vmem:[%s20349_s1 + $0xb60] sm:$0xff]   ;;  %v15946_v45 = vld [vmem:[%s20349_s1 + $0xb18] sm:$0xff]  }
 0x209   :  { %v14148_v5 = vadd.f32 %v14147_v24, %v14146_v51 }
 0x20a   :  { %6696 = vmatmul.mubr.bf16.gmra.mxu0 %v12522_v40  ;;  %6761 = vmatmul.mubr.bf16.gmra.mxu1 %v12524_v55  ;;  %v851_v40 = vrot.slane %v850_v15, 4  ;;  %v18718_v55 = vld [vmem:[#allocation2 + $0x274] sm:$0xff] }
 0x20b   :  { %15297 = vmatpush3.bf16.msra.mxu0 %v15936_v44  ;;  %14513 = vmatpush3.bf16.msra.mxu1 %v15938_v61  ;;  %v18727_v61 = vld [vmem:[#allocation2 + $0x298] sm:$0xff] }
 0x20c   :  { %15298 = vmatprep.subr.bf16.mxu0 %v15939_v31  ;;  %14514 = vmatprep.subr.bf16.mxu1 %v15940_v42 }
 0x20d   :  { %v14106_v34 = vpop.f32.mrf.mxu0  ;;  %6703 = vmatprep.mubr.bf16.mxu0 %v12532_v59  ;;  %6768 = vmatprep.mubr.bf16.mxu1 %v12534_v39  ;;  %v15949_v59 = vld [vmem:[%s20349_s1 + $0xb10] sm:$0xff]   ;;  %v3428_v39 = vadd.f32 %v18376_v43, %v18313_v60  ;;  %v15954_v43 = vld [vmem:[%s20349_s1 + $0xb08] sm:$0xff]  }
 0x20f   :  { %v14107_v3 = vpop.f32.mrf.mxu0  ;;  %15299 = vmatpush3.bf16.msra.mxu0 %v15939_v31  ;;  %14515 = vmatpush3.bf16.msra.mxu1 %v15941_v13 }
 0x210   :  { %v14108_v58 = vadd.f32 %v14107_v3, %v14106_v34  ;;  %v14149_v34 = vpop.f32.mrf.mxu1  ;;  %15300 = vmatprep.subr.bf16.mxu0 %v15946_v45 }
 0x211   :  { %v14109_v29 = vpop.f32.mrf.mxu0 }
 0x212   :  { %v4446_v51 = vadd.f32 %v14108_v58, %v18594_v28  ;;  %v14150_v63 = vpop.f32.mrf.mxu1  ;;  %v15947_v28 = vld [vmem:[%s20349_s1 + $0xb98] sm:$0xff]   ;;  %v856_v58 = vor.u32 %v855_v12, %v854_v2 }
 0x213   :  { %v14110_v11 = vpop.f32.mrf.mxu0  ;;  %v14151_v3 = vadd.f32 %v14150_v63, %v14149_v34  ;;  %v16378_v2 = vld [vmem:[#allocation2 + $0x258] sm:$0xff]  ;;  %v5762_v34 = vld [vmem:[#allocation2 + $0x2a0] sm:$0xff]  ;;  %14516 = vmatprep.subr.bf16.mxu1 %v15947_v28  ;;  %15301 = vmatpush3.bf16.msra.mxu0 %v15946_v45  ;;  %v15951_v28 = vld [vmem:[%s20349_s1 + $0xb50] sm:$0xff]  }
 0x214   :  { %v14111_v16 = vadd.f32 %v14110_v11, %v14109_v29  ;;  %v4511_v24 = vadd.f32 %v14148_v5, %v4446_v51  ;;  %v12531_v29 = vcombine.low %v18681_v19, %v18686_v48  ;;  %v15948_v5 = vld [vmem:[%s20349_s1 + $0xb58] sm:$0xff]   ;;  %v12533_v12 = vcombine.low %v18689_v36, %v16378_v2  ;;  %15302 = vmatprep.subr.bf16.mxu0 %v15949_v59 }
 0x215   :  { %v15262_v4 = vpop.f32.mrf.mxu0  ;;  %v18739_v51 = vsel %vm17110_vm2, %v851_v40, %v856_v58  ;;  %v16379_v11 = vld [vmem:[#allocation2 + $0x27c] sm:$0xff]  ;;  %14517 = vmatpush3.bf16.msra.mxu1 %v15948_v5  ;;  %v15955_v40 = vld [vmem:[%s20349_s1 + $0xb88] sm:$0xff]  }
 0x216   :  { %v4449_v44 = vadd.f32 %v14111_v16, %v18607_v0  ;;  %v4560_v18 = vadd.f32 %v15262_v4, %v18635_v9  ;;  %6704 = vmatmul.mubr.bf16.gmra.mxu0 %v12531_v29  ;;  %v12543_v63 = vcombine.high %v16379_v11, %v5762_v34  ;;  %v880_v16 = vld [vmem:[#allocation2 + $0x2a8] sm:$0xf]  ;;  %6769 = vmatmul.mubr.bf16.gmra.mxu1 %v12533_v12  ;;  %v15957_v29 = vld [vmem:[%s20349_s1 + $0xb00] sm:$0xff]  }
 0x217   :  { %v4551_v15 = vpop.f32.mrf.mxu0  ;;  %v15956_v4 = vld [vmem:[%s20349_s1 + $0xb48] sm:$0xff]   ;;  %15303 = vmatpush3.bf16.msra.mxu0 %v15949_v59 }
 0x218   :  { %v18731_v0 = vadd.f32 %v4560_v18, %v18346_v25  ;;  %v4552_v9 = vadd.f32 %v4551_v15, %v18620_v26  ;;  %v4514_v42 = vadd.f32 %v14151_v3, %v4449_v44  ;;  %v15950_v25 = vld [vmem:[%s20349_s1 + $0xb90] sm:$0xff]   ;;  %v12541_v26 = vcombine.high %v18718_v55, %v18727_v61  ;;  %6776 = vmatprep.mubr.bf16.mxu1 %v12543_v63  ;;  %v15958_v15 = vld [vmem:[%s20349_s1 + $0xb80] sm:$0xff]  }
 0x219   :  { %v15263_v31 = vpop.f32.mrf.mxu0  ;;  %14518 = vmatprep.subr.bf16.mxu1 %v15950_v25  ;;  %v12542_v18 = vcombine.low %v16379_v11, %v5762_v34  ;;  %15304 = vmatprep.subr.bf16.mxu0 %v15954_v43 }
 0x21a   :  { %v18747_v36 = vadd.f32 %v4552_v9, %v18304_v56  ;;  %v4563_v13 = vadd.f32 %v15263_v31, %v18650_v10  ;;  %v881_v56 = vsel %vm16652_vm9, %v18739_v51, %v880_v16  ;;  %6711 = vmatprep.mubr.bf16.mxu0 %v12541_v26  ;;  %14519 = vmatpush3.bf16.msra.mxu1 %v15951_v28  ;;  %v15960_v9 = vld [vmem:[#allocation2 + $0x1ac] ss:$36 sps:$4 sm:$0xff]   ;;  %v15964_v26 = vld [vmem:[%s20349_s1 + $0xc38] sm:$0xff]  }
 0x21b   :  { %v4554_v3 = vpop.f32.mrf.mxu0  ;;  %882 = vst [vmem:[#allocation2 + $0x2a8] sm:$0xf] %v881_v56  ;;  %14520 = vmatprep.subr.bf16.mxu1 %v15955_v40  ;;  %15305 = vmatpush3.bf16.msra.mxu0 %v15954_v43  ;;  %v20391_v16 = vcombine.high %v18410_v33, %v18446_v37  ;;  %v15968_v28 = vld [vmem:[%s20349_s1 + $0xc30] sm:$0xff]  }
 0x21c   :  { %v18759_v10 = vadd.f32 %v4563_v13, %v18367_v32  ;;  %v4555_v60 = vadd.f32 %v4554_v3, %v18633_v22  ;;  %v12540_v22 = vcombine.low %v18718_v55, %v18727_v61  ;;  %15306 = vmatprep.subr.bf16.mxu0 %v15957_v29  ;;  %v15967_v3 = vld [vmem:[%s20349_s1 + $0xc78] sm:$0xff]   ;;  %v15970_v43 = vld [vmem:[%s20349_s1 + $0xbf0] sm:$0xff]  }
 0x21d   :  { %v15971_v40 = vld [vmem:[%s20349_s1 + $0xc70] sm:$0xff]  }
 0x21e   :  { %v15266_v45 = vpop.f32.mrf.mxu0  ;;  %v18768_v58 = vadd.f32 %v4555_v60, %v3428_v39  ;;  %6712 = vmatmul.mubr.bf16.gmra.mxu0 %v12540_v22  ;;  %6777 = vmatmul.mubr.bf16.gmra.mxu1 %v12542_v18  ;;  %v15965_v39 = vld [vmem:[%s20349_s1 + $0xcb8] sm:$0xff]   ;;  %v15969_v60 = vld [vmem:[%s20349_s1 + $0xcb0] sm:$0xff]   ;;  %v15976_v22 = vld [vmem:[%s20349_s1 + $0xc28] sm:$0xff]  }
 0x21f   :  { %v4576_v32 = vadd.f32 %v15266_v45, %v4511_v24  ;;  %14521 = vmatpush3.bf16.msra.mxu1 %v15956_v4  ;;  %15308 = vmatprep.mubr.bf16.mxu0 %v15960_v9  ;;  %v15972_v45 = vld [vmem:[#allocation2 + $0x23c] ss:$36 sps:$4 sm:$0xff]   ;;  %v15978_v18 = vld [vmem:[%s20349_s1 + $0xbe8] sm:$0xff]  }
 0x220   :  { %v4567_v44 = vpop.f32.mrf.mxu0  ;;  %14522 = vmatprep.subr.bf16.mxu1 %v15958_v15  ;;  %7692 = vmatprep.mubr.bf16.mxu1 %v20391_v16  ;;  %v15979_v15 = vld [vmem:[%s20349_s1 + $0xc68] sm:$0xff]   ;;  %v15981_v9 = vld [vmem:[%s20349_s1 + $0xca0] sm:$0xff]   ;;  %v15990_v16 = vld [vmem:[%s20349_s1 + $0xc10] sm:$0xff]  }
 0x221   :  { %v18779_v5 = vadd.f32 %v4576_v32, %v18437_v41  ;;  %v4568_v24 = vadd.f32 %v4567_v44, %v18675_v6  ;;  %v3444_v41 = vadd.f32 %v18435_v14, %v18405_v46  ;;  %v15959_v6 = vld [vmem:[%s20349_s1 + $0xb40] sm:$0xff]   ;;  %v15961_v14 = vld [vmem:[#allocation2 + $0x1f4] ss:$36 sps:$4 sm:$0xff]   ;;  %15307 = vmatpush3.bf16.msra.mxu0 %v15957_v29  ;;  %v20392_v32 = vcombine.low %v18410_v33, %v18446_v37  ;;  %v15977_v44 = vld [vmem:[%s20349_s1 + $0xca8] sm:$0xff]  }
 0x222   :  { %v15267_v12 = vpop.f32.mrf.mxu0  ;;  %v904_v13 = vld [vmem:[#allocation2 + $0x2a8] sm:$0x8]  ;;  %14548 = vmatprep.subr.bf16.mxu0 %v15964_v26  ;;  %v20393_v29 = vcombine.high %v18448_v38, %v18490_v1  ;;  %v15983_v26 = vld [vmem:[%s20349_s1 + $0xc60] sm:$0xff]  }
 0x223   :  { %v18786_v34 = vadd.f32 %v4568_v24, %v18397_v23  ;;  %v4579_v59 = vadd.f32 %v15267_v12, %v4514_v42  ;;  %v905_v11 = vsel %vm16702_vm15, 0, %v904_v13  ;;  %14523 = vmatpush3.bf16.msra.mxu1 %v15959_v6  ;;  %v15980_v12 = vld [vmem:[%s20349_s1 + $0xc20] sm:$0xff]   ;;  %v15986_v13 = vld [vmem:[%s20349_s1 + $0xc18] sm:$0xff]  }
 0x224   :  { %v4570_v25 = vpop.f32.mrf.mxu0  ;;  %906 = vst [vmem:[#allocation2 + $0x2a8] sm:$0x8] %v905_v11  ;;  %14588 = vmatprep.subr.bf16.mxu1 %v15965_v39  ;;  %v15989_v11 = vld [vmem:[%s20349_s1 + $0xc58] sm:$0xff]  }
 0x225   :  { %v18799_v42 = vadd.f32 %v4579_v59, %v18450_v20  ;;  %v4571_v46 = vadd.f32 %v4570_v25, %v18691_v49  ;;  %v15966_v20 = vld [vmem:[%s20349_s1 + $0xbf8] sm:$0xff]   ;;  %v16380_v59 = vld [vmem:[#allocation2 + $0x240] sm:$0xff]  ;;  %v20394_v25 = vcombine.low %v18448_v38, %v18490_v1 }
 0x226   :  { %15309 = vmatmul.mubr.bf16.vlgmr.msra.gmra.mxu0 %v15961_v14  ;;  %7693 = vmatmul.mubr.bf16.vlgmr.msra.gmra.mxu1 %v20392_v32  ;;  %v15987_v14 = vld [vmem:[%s20349_s1 + $0xc98] sm:$0xff]   ;;  %v12779_v39 = vcombine.low %v16380_v59, %v18618_v62  ;;  %v15994_v32 = vld [vmem:[%s20349_s1 + $0xc08] sm:$0xff]  }
 0x227   :  { %v14180_v2 = vpop.f32.mrf.mxu1  ;;  %v18812_v49 = vadd.f32 %v4571_v46, %v3444_v41  ;;  %14549 = vmatpush3.bf16.msra.mxu0 %v15966_v20  ;;  %14589 = vmatpush3.bf16.msra.mxu1 %v15967_v3  ;;  %v12780_v41 = vcombine.high %v16380_v59, %v18618_v62  ;;  %v16004_v46 = vld [vmem:[#allocation2 + $0x1bc] ss:$36 sps:$4 sm:$0xff]  }
 0x228   :  { %14550 = vmatprep.subr.bf16.mxu0 %v15968_v28  ;;  %14590 = vmatprep.subr.bf16.mxu1 %v15969_v60  ;;  %v15988_v1 = vld [vmem:[%s20349_s1 + $0xbd8] sm:$0xff]   ;;  %v15991_v28 = vld [vmem:[%s20349_s1 + $0xc90] sm:$0xff]   ;;  %v18895_v60 = vld [vmem:[#allocation2] sm:$0xff] }
 0x229   :  { %v14181_v31 = vpop.f32.mrf.mxu1  ;;  %15312 = vmatprep.mubr.bf16.mxu0 %v15972_v45  ;;  %7700 = vmatprep.mubr.bf16.mxu1 %v20393_v29  ;;  %v12789_v62 = vcombine.high %v18623_v17, %v18895_v60  ;;  %v15992_v45 = vld [vmem:[%s20349_s1 + $0xbd0] sm:$0xff]   ;;  %v16000_v59 = vld [vmem:[%s20349_s1 + $0xbc0] sm:$0xff]  }
 0x22a   :  { %v18796_v23 = vadd.f32 %v14181_v31, %v14180_v2  ;;  %v15982_v31 = vld [vmem:[%s20349_s1 + $0xbe0] sm:$0xff]  }
 0x22b   :  { %v18807_v63 = vpop.f32.mrf.mxu1  ;;  %v15973_v37 = vld [vmem:[#allocation2 + $0x284] ss:$36 sps:$4 sm:$0xff]   ;;  %14551 = vmatpush3.bf16.msra.mxu0 %v15970_v43  ;;  %14591 = vmatpush3.bf16.msra.mxu1 %v15971_v40  ;;  %v15993_v40 = vld [vmem:[%s20349_s1 + $0xc50] sm:$0xff]  }
 0x22c   :  { %14552 = vmatprep.subr.bf16.mxu0 %v15976_v22  ;;  %14592 = vmatprep.subr.bf16.mxu1 %v15977_v44  ;;  %v15996_v44 = vld [vmem:[%s20349_s1 + $0xbc8] sm:$0xff]  }
 0x22d   :  { %v18823_v56 = vpop.f32.mrf.mxu1 }
 0x22e   :  { %15313 = vmatmul.mubr.bf16.gmra.mxu0 %v15973_v37  ;;  %7701 = vmatmul.mubr.bf16.gmra.mxu1 %v20394_v25  ;;  %v15998_v37 = vld [vmem:[%s20349_s1 + $0xc00] sm:$0xff]   ;;  %v16007_v25 = vld [vmem:[%s20349_s1 + $0xd38] sm:$0xff]  }
 0x22f   :  { %v14186_v4 = vpop.f32.mrf.mxu1  ;;  %14553 = vmatpush3.bf16.msra.mxu0 %v15978_v18  ;;  %14593 = vmatpush3.bf16.msra.mxu1 %v15979_v15  ;;  %v12788_v18 = vcombine.low %v18623_v17, %v18895_v60  ;;  %v15999_v15 = vld [vmem:[%s20349_s1 + $0xc80] sm:$0xff]  }
 0x230   :  { %14554 = vmatprep.subr.bf16.mxu0 %v15980_v12  ;;  %14594 = vmatprep.subr.bf16.mxu1 %v15981_v9  ;;  %v12766_v12 = vcombine.high %v18616_v27, %v18637_v54 }
 0x231   :  { %v14187_v33 = vpop.f32.mrf.mxu1  ;;  %7708 = vmatprep.mubr.bf16.mxu1 %v12780_v41  ;;  %7757 = vmatprep.mubr.bf16.mxu0 %v16004_v46  ;;  %v16001_v41 = vld [vmem:[%s20349_s1 + $0xc40] sm:$0xff]   ;;  %v16008_v46 = vld [vmem:[%s20349_s1 + $0xd78] sm:$0xff]  }
 0x232   :  { %v18849_v24 = vadd.f32 %v14187_v33, %v14186_v4  ;;  %v15995_v4 = vld [vmem:[%s20349_s1 + $0xc88] sm:$0xff]  }
 0x233   :  { %v18854_v2 = vpop.f32.mrf.mxu1  ;;  %14555 = vmatpush3.bf16.msra.mxu0 %v15982_v31  ;;  %14595 = vmatpush3.bf16.msra.mxu1 %v15983_v26  ;;  %v15997_v33 = vld [vmem:[%s20349_s1 + $0xc48] sm:$0xff]  }
 0x234   :  { %14556 = vmatprep.subr.bf16.mxu0 %v15986_v13  ;;  %14596 = vmatprep.subr.bf16.mxu1 %v15987_v14 }
 0x235   :  { %v18863_v6 = vpop.f32.mrf.mxu1 }
 0x236   :  { %7709 = vmatmul.mubr.bf16.gmra.mxu1 %v12779_v39 }
 0x237   :  { %v14192_v38 = vpop.f32.mrf.mxu1  ;;  %14557 = vmatpush3.bf16.msra.mxu0 %v15988_v1  ;;  %14597 = vmatpush3.bf16.msra.mxu1 %v15989_v11  ;;  %v12765_v11 = vcombine.low %v18616_v27, %v18637_v54  ;;  %v16015_v27 = vld [vmem:[#allocation2 + $0x204] ss:$36 sps:$4 sm:$0xff]   ;;  %v14185_v54 = vadd.f32 %v18823_v56, %v18807_v63 }
 0x238   :  { %14558 = vmatprep.subr.bf16.mxu0 %v15990_v16  ;;  %14598 = vmatprep.subr.bf16.mxu1 %v15991_v28  ;;  %v16010_v28 = vld [vmem:[%s20349_s1 + $0xd30] sm:$0xff]   ;;  %v16018_v63 = vld [vmem:[%s20349_s1 + $0xd28] sm:$0xff]  }
 0x239   :  { %v14193_v20 = vpop.f32.mrf.mxu1  ;;  %7716 = vmatprep.mubr.bf16.mxu1 %v12789_v62 }
 0x23a   :  { %v18890_v3 = vadd.f32 %v14193_v20, %v14192_v38  ;;  %v16002_v38 = vld [vmem:[#allocation2 + $0x1b8] ss:$36 sps:$4 sm:$0xff]  }
 0x23b   :  { %v18899_v43 = vpop.f32.mrf.mxu1  ;;  %14559 = vmatpush3.bf16.msra.mxu0 %v15992_v45  ;;  %14599 = vmatpush3.bf16.msra.mxu1 %v15993_v40  ;;  %v16009_v20 = vld [vmem:[%s20349_s1 + $0xcf8] sm:$0xff]   ;;  %v16011_v40 = vld [vmem:[%s20349_s1 + $0xd70] sm:$0xff]  }
 0x23c   :  { %14560 = vmatprep.subr.bf16.mxu0 %v15994_v32  ;;  %14600 = vmatprep.subr.bf16.mxu1 %v15995_v4 }
 0x23d   :  { %v18910_v22 = vpop.f32.mrf.mxu1 }
 0x23e   :  { %7717 = vmatmul.mubr.bf16.gmra.mxu1 %v12788_v18 }
 0x23f   :  { %v14198_v29 = vpop.f32.mrf.mxu1  ;;  %14561 = vmatpush3.bf16.msra.mxu0 %v15996_v44  ;;  %14601 = vmatpush3.bf16.msra.mxu1 %v15997_v33  ;;  %v16012_v44 = vld [vmem:[%s20349_s1 + $0xcf0] sm:$0xff]  }
 0x240   :  { %14562 = vmatprep.subr.bf16.mxu0 %v15998_v37  ;;  %14602 = vmatprep.subr.bf16.mxu1 %v15999_v15  ;;  %v16013_v37 = vld [vmem:[#allocation2 + $0x200] ss:$36 sps:$4 sm:$0xff]   ;;  %v16019_v15 = vld [vmem:[%s20349_s1 + $0xd68] sm:$0xff]  }
 0x241   :  { %v14199_v17 = vpop.f32.mrf.mxu1  ;;  %7822 = vmatprep.mubr.bf16.mxu1 %v12766_v12 }
 0x242   :  { %v14220_v9 = vpop.f32.mrf.mxu0  ;;  %v18937_v31 = vadd.f32 %v14199_v17, %v14198_v29  ;;  %v16020_v17 = vld [vmem:[%s20349_s1 + $0xce8] sm:$0xff]  }
 0x243   :  { %v18942_v26 = vpop.f32.mrf.mxu1  ;;  %14563 = vmatpush3.bf16.msra.mxu0 %v16000_v59  ;;  %14603 = vmatpush3.bf16.msra.mxu1 %v16001_v41  ;;  %v12774_v41 = vcombine.low %v18642_v8, %v18681_v19 }
 0x244   :  { %v14221_v13 = vpop.f32.mrf.mxu0  ;;  %14628 = vmatprep.subr.bf16.mxu0 %v16007_v25  ;;  %15316 = vmatprep.subr.bf16.mxu1 %v16008_v46  ;;  %v16021_v25 = vld [vmem:[%s20349_s1 + $0xd20] sm:$0xff]  }
 0x245   :  { %v14222_v14 = vadd.f32 %v14221_v13, %v14220_v9  ;;  %v18947_v1 = vpop.f32.mrf.mxu1 }
 0x246   :  { %v14223_v39 = vpop.f32.mrf.mxu0  ;;  %7758 = vmatmul.mubr.bf16.vlgmr.msra.gmra.mxu0 %v16002_v38  ;;  %7823 = vmatmul.mubr.bf16.vlgmr.msra.gmra.mxu1 %v12765_v11  ;;  %v16026_v11 = vld [vmem:[#allocation2 + $0x24c] ss:$36 sps:$4 sm:$0xff]  }
 0x247   :  { %v5491_v16 = vadd.f32 %v14222_v14, %v18796_v23  ;;  %v14260_v62 = vpop.f32.mrf.mxu1  ;;  %v12775_v23 = vcombine.high %v18642_v8, %v18681_v19  ;;  %14629 = vmatpush3.bf16.msra.mxu0 %v16009_v20  ;;  %15317 = vmatpush3.bf16.msra.mxu1 %v16008_v46  ;;  %v16022_v14 = vld [vmem:[%s20349_s1 + $0xd60] sm:$0xff]   ;;  %v12784_v19 = vcombine.high %v18686_v48, %v18718_v55 }
 0x248   :  { %v14224_v45 = vpop.f32.mrf.mxu0  ;;  %14630 = vmatprep.subr.bf16.mxu0 %v16010_v28  ;;  %15318 = vmatprep.subr.bf16.mxu1 %v16011_v40 }
 0x249   :  { %v14225_v32 = vadd.f32 %v14224_v45, %v14223_v39  ;;  %v14261_v4 = vpop.f32.mrf.mxu1  ;;  %7765 = vmatprep.mubr.bf16.mxu0 %v16015_v27  ;;  %7830 = vmatprep.mubr.bf16.mxu1 %v12775_v23  ;;  %v14191_v45 = vadd.f32 %v18863_v6, %v18854_v2  ;;  %v6890_v6 = vld [vmem:[#allocation2 + $0x290] sm:$0xff] }
 0x24a   :  { %v14262_v18 = vadd.f32 %v14261_v4, %v14260_v62  ;;  %v16023_v62 = vld [vmem:[%s20349_s1 + $0xce0] sm:$0xff]   ;;  %v16030_v4 = vld [vmem:[%s20349_s1 + $0xd58] sm:$0xff]  }
 0x24b   :  { %v5494_v33 = vadd.f32 %v14225_v32, %v14185_v54  ;;  %v14263_v56 = vpop.f32.mrf.mxu1  ;;  %14631 = vmatpush3.bf16.msra.mxu0 %v16012_v44  ;;  %15319 = vmatpush3.bf16.msra.mxu1 %v16011_v40  ;;  %v16029_v54 = vld [vmem:[%s20349_s1 + $0xd18] sm:$0xff]  }
 0x24c   :  { %v14226_v29 = vpop.f32.mrf.mxu0  ;;  %v18974_v12 = vadd.f32 %v14262_v18, %v5491_v16  ;;  %14632 = vmatprep.subr.bf16.mxu0 %v16018_v63  ;;  %15320 = vmatprep.subr.bf16.mxu1 %v16019_v15  ;;  %v16031_v63 = vld [vmem:[%s20349_s1 + $0xcd8] sm:$0xff]  }
 0x24d   :  { %v14264_v9 = vpop.f32.mrf.mxu1 }
 0x24e   :  { %v14227_v59 = vpop.f32.mrf.mxu0  ;;  %v14265_v13 = vadd.f32 %v14264_v9, %v14263_v56  ;;  %7766 = vmatmul.mubr.bf16.gmra.mxu0 %v16013_v37  ;;  %7831 = vmatmul.mubr.bf16.gmra.mxu1 %v12774_v41  ;;  %v12783_v37 = vcombine.low %v18686_v48, %v18718_v55  ;;  %v12791_v48 = vcombine.high %v6890_v6, %v18895_v60 }
 0x24f   :  { %v14228_v46 = vadd.f32 %v14227_v59, %v14226_v29  ;;  %v14266_v38 = vpop.f32.mrf.mxu1  ;;  %14633 = vmatpush3.bf16.msra.mxu0 %v16020_v17  ;;  %15321 = vmatpush3.bf16.msra.mxu1 %v16019_v15  ;;  %v16032_v15 = vld [vmem:[%s20349_s1 + $0xd10] sm:$0xff]  }
 0x250   :  { %v14229_v39 = vpop.f32.mrf.mxu0  ;;  %v18987_v20 = vadd.f32 %v14265_v13, %v5494_v33  ;;  %14634 = vmatprep.subr.bf16.mxu0 %v16021_v25  ;;  %15322 = vmatprep.subr.bf16.mxu1 %v16022_v14  ;;  %v16033_v59 = vld [vmem:[%s20349_s1 + $0xd50] sm:$0xff]   ;;  %v12793_v25 = vcombine.high %v18727_v61, %v18895_v60 }
 0x251   :  { %v5499_v8 = vadd.f32 %v14228_v46, %v18849_v24  ;;  %v14267_v16 = vpop.f32.mrf.mxu1  ;;  %v16024_v24 = vld [vmem:[#allocation2 + $0x248] ss:$36 sps:$4 sm:$0xff]   ;;  %7773 = vmatprep.mubr.bf16.mxu0 %v16026_v11  ;;  %7838 = vmatprep.mubr.bf16.mxu1 %v12784_v19 }
 0x252   :  { %v14230_v28 = vpop.f32.mrf.mxu0  ;;  %v14268_v40 = vadd.f32 %v14267_v16, %v14266_v38  ;;  %v14197_v38 = vadd.f32 %v18910_v22, %v18899_v43  ;;  %v16036_v19 = vld [vmem:[%s20349_s1 + $0xd48] sm:$0xff]   ;;  %v12790_v43 = vcombine.low %v6890_v6, %v18895_v60  ;;  %v16044_v6 = vld [vmem:[#allocation2 + $0x1d0] ss:$36 sps:$4 sm:$0xff]  }
 0x253   :  { %v14231_v27 = vadd.f32 %v14230_v28, %v14229_v39  ;;  %v14269_v32 = vpop.f32.mrf.mxu1  ;;  %14635 = vmatpush3.bf16.msra.mxu0 %v16023_v62  ;;  %15323 = vmatpush3.bf16.msra.mxu1 %v16022_v14  ;;  %v16034_v14 = vld [vmem:[%s20349_s1 + $0xcd0] sm:$0xff]   ;;  %v16037_v22 = vld [vmem:[%s20349_s1 + $0xcc8] sm:$0xff]  }
 0x254   :  { %v19003_v44 = vadd.f32 %v14268_v40, %v5499_v8  ;;  %14636 = vmatprep.subr.bf16.mxu0 %v16029_v54  ;;  %15324 = vmatprep.subr.bf16.mxu1 %v16030_v4  ;;  %v16038_v40 = vld [vmem:[%s20349_s1 + $0xd00] sm:$0xff]  }
 0x255   :  { %v5502_v2 = vadd.f32 %v14231_v27, %v14191_v45  ;;  %v14270_v18 = vpop.f32.mrf.mxu1  ;;  %v12792_v45 = vcombine.low %v18727_v61, %v18895_v60  ;;  %v16039_v54 = vld [vmem:[%s20349_s1 + $0xd40] sm:$0xff]  }
 0x256   :  { %v14271_v56 = vadd.f32 %v14270_v18, %v14269_v32  ;;  %7774 = vmatmul.mubr.bf16.gmra.mxu0 %v16024_v24  ;;  %7839 = vmatmul.mubr.bf16.gmra.mxu1 %v12783_v37  ;;  %v16040_v32 = vld [vmem:[%s20349_s1 + $0xcc0] sm:$0xff]  }
 0x257   :  { %v14232_v23 = vpop.f32.mrf.mxu0  ;;  %v14272_v17 = vpop.f32.mrf.mxu1  ;;  %14637 = vmatpush3.bf16.msra.mxu0 %v16031_v63  ;;  %15325 = vmatpush3.bf16.msra.mxu1 %v16030_v4 }
 0x258   :  { %v19017_v55 = vadd.f32 %v14271_v56, %v5502_v2  ;;  %14638 = vmatprep.subr.bf16.mxu0 %v16032_v15  ;;  %15326 = vmatprep.subr.bf16.mxu1 %v16033_v59  ;;  %v16041_v56 = vld [vmem:[#allocation2 + $0x1c8] ss:$36 sps:$4 sm:$0xff]  }
 0x259   :  { %v14233_v33 = vpop.f32.mrf.mxu0  ;;  %v14273_v13 = vpop.f32.mrf.mxu1  ;;  %7781 = vmatprep.mubr.bf16.mxu0 %v12791_v48  ;;  %7846 = vmatprep.mubr.bf16.mxu1 %v12793_v25  ;;  %v14203_v25 = vadd.f32 %v18947_v1, %v18942_v26  ;;  %v16051_v26 = vld [vmem:[%s20349_s1 + $0xe70] sm:$0xff]  }
 0x25a   :  { %v14234_v29 = vadd.f32 %v14233_v33, %v14232_v23  ;;  %v14274_v39 = vadd.f32 %v14273_v13, %v14272_v17  ;;  %v16043_v23 = vld [vmem:[#allocation2 + $0x1cc] ss:$36 sps:$4 sm:$0xff]   ;;  %v16045_v33 = vld [vmem:[%s20349_s1 + $0xdf8] sm:$0xff]  }
 0x25b   :  { %v14235_v9 = vpop.f32.mrf.mxu0  ;;  %v14275_v8 = vpop.f32.mrf.mxu1  ;;  %14639 = vmatpush3.bf16.msra.mxu0 %v16034_v14  ;;  %15327 = vmatpush3.bf16.msra.mxu1 %v16033_v59  ;;  %v16048_v59 = vld [vmem:[%s20349_s1 + $0xdb8] sm:$0xff]   ;;  %v16050_v14 = vld [vmem:[%s20349_s1 + $0xdf0] sm:$0xff]  }
 0x25c   :  { %v5507_v41 = vadd.f32 %v14234_v29, %v18890_v3  ;;  %v16035_v3 = vld [vmem:[%s20349_s1 + $0xd08] sm:$0xff]   ;;  %15328 = vmatprep.subr.bf16.mxu1 %v16036_v19  ;;  %v16046_v29 = vld [vmem:[%s20349_s1 + $0xe78] sm:$0xff]  }
 0x25d   :  { %v14236_v46 = vpop.f32.mrf.mxu0  ;;  %v14276_v62 = vpop.f32.mrf.mxu1  ;;  %14640 = vmatprep.subr.bf16.mxu0 %v16035_v3  ;;  %v16049_v13 = vld [vmem:[%s20349_s1 + $0xe38] sm:$0xff]   ;;  %v16052_v3 = vld [vmem:[%s20349_s1 + $0xdb0] sm:$0xff]  }
 0x25e   :  { %v14237_v11 = vadd.f32 %v14236_v46, %v14235_v9  ;;  %v19033_v16 = vadd.f32 %v14274_v39, %v5507_v41  ;;  %v14277_v24 = vadd.f32 %v14276_v62, %v14275_v8  ;;  %7782 = vmatmul.mubr.bf16.gmra.mxu0 %v12790_v43  ;;  %7847 = vmatmul.mubr.bf16.gmra.mxu1 %v12792_v45  ;;  %v16047_v9 = vld [vmem:[#allocation2 + $0x218] ss:$36 sps:$4 sm:$0xff]   ;;  %v16057_v62 = vld [vmem:[%s20349_s1 + $0xde8] sm:$0xff]  }
 0x25f   :  { %v14238_v27 = vpop.f32.mrf.mxu0  ;;  %v14278_v2 = vpop.f32.mrf.mxu1  ;;  %14641 = vmatpush3.bf16.msra.mxu0 %v16037_v22  ;;  %15329 = vmatpush3.bf16.msra.mxu1 %v16036_v19  ;;  %v16056_v8 = vld [vmem:[#allocation2 + $0x214] ss:$36 sps:$4 sm:$0xff]  }
 0x260   :  { %v5510_v28 = vadd.f32 %v14237_v11, %v14197_v38  ;;  %14642 = vmatprep.subr.bf16.mxu0 %v16038_v40  ;;  %15330 = vmatprep.subr.bf16.mxu1 %v16039_v54  ;;  %v16053_v19 = vld [vmem:[%s20349_s1 + $0xe30] sm:$0xff]  }
 0x261   :  { %v14239_v61 = vpop.f32.mrf.mxu0  ;;  %v14279_v63 = vpop.f32.mrf.mxu1  ;;  %7887 = vmatprep.mubr.bf16.mxu0 %v16043_v23  ;;  %15332 = vmatprep.mubr.bf16.mxu1 %v16044_v6  ;;  %v16054_v40 = vld [vmem:[#allocation2 + $0x210] ss:$36 sps:$4 sm:$0xff]   ;;  %v16060_v23 = vld [vmem:[%s20349_s1 + $0xe28] sm:$0xff]   ;;  %v16067_v6 = vld [vmem:[#allocation2 + $0x25c] ss:$36 sps:$4 sm:$0xff]  }
 0x262   :  { %v19050_v4 = vadd.f32 %v14277_v24, %v5510_v28  ;;  %v14240_v18 = vadd.f32 %v14239_v61, %v14238_v27  ;;  %v14280_v17 = vadd.f32 %v14279_v63, %v14278_v2  ;;  %v16072_v28 = vld [vmem:[#allocation2 + $0x260] ss:$36 sps:$4 sm:$0xff]   ;;  %v16058_v27 = vld [vmem:[%s20349_s1 + $0xe68] sm:$0xff]  }
 0x263   :  { %v14241_v37 = vpop.f32.mrf.mxu0  ;;  %v14281_v41 = vpop.f32.mrf.mxu1  ;;  %14643 = vmatpush3.bf16.msra.mxu0 %v16040_v32  ;;  %15331 = vmatpush3.bf16.msra.mxu1 %v16039_v54  ;;  %v16059_v54 = vld [vmem:[%s20349_s1 + $0xda8] sm:$0xff]   ;;  %v16061_v61 = vld [vmem:[%s20349_s1 + $0xde0] sm:$0xff]  }
 0x264   :  { %v5515_v15 = vadd.f32 %v14240_v18, %v18937_v31  ;;  %14680 = vmatprep.subr.bf16.mxu0 %v16045_v33  ;;  %14720 = vmatprep.subr.bf16.mxu1 %v16046_v29  ;;  %v16062_v33 = vld [vmem:[%s20349_s1 + $0xe60] sm:$0xff]   ;;  %v16073_v63 = vld [vmem:[#allocation2 + $0x2a8] ss:$36 sps:$4 sm:$0xff]  }
 0x265   :  { %v14242_v48 = vpop.f32.mrf.mxu0  ;;  %v14282_v38 = vpop.f32.mrf.mxu1  ;;  %v16064_v29 = vld [vmem:[%s20349_s1 + $0xe20] sm:$0xff]  }
 0x266   :  { %v19067_v46 = vadd.f32 %v14280_v17, %v5515_v15  ;;  %v14243_v31 = vadd.f32 %v14242_v48, %v14241_v37  ;;  %v14283_v39 = vadd.f32 %v14282_v38, %v14281_v41  ;;  %7888 = vmatmul.mubr.bf16.vlgmr.msra.gmra.mxu0 %v16041_v56  ;;  %15333 = vmatmul.mubr.bf16.vlgmr.msra.gmra.mxu1 %v16047_v9  ;;  %v16063_v37 = vld [vmem:[%s20349_s1 + $0xda0] sm:$0xff]   ;;  %v16068_v15 = vld [vmem:[%s20349_s1 + $0xdd8] sm:$0xff]  }
 0x267   :  { %v14300_v11 = vpop.f32.mrf.mxu0  ;;  %14681 = vmatpush3.bf16.msra.mxu0 %v16048_v59  ;;  %14721 = vmatpush3.bf16.msra.mxu1 %v16049_v13  ;;  %v16069_v9 = vld [vmem:[%s20349_s1 + $0xe58] sm:$0xff]   ;;  %v6892_v48 = vld [vmem:[#allocation2 + $0x2a0] sm:$0xff] }
 0x268   :  { %v5518_v1 = vadd.f32 %v14243_v31, %v14203_v25  ;;  %14682 = vmatprep.subr.bf16.mxu0 %v16050_v14  ;;  %14722 = vmatprep.subr.bf16.mxu1 %v16051_v26  ;;  %v16070_v13 = vld [vmem:[%s20349_s1 + $0xd98] sm:$0xff]  }
 0x269   :  { %v14301_v22 = vpop.f32.mrf.mxu0  ;;  %7895 = vmatprep.mubr.bf16.mxu0 %v16056_v8  ;;  %15336 = vmatprep.mubr.bf16.mxu1 %v16072_v28  ;;  %v16071_v14 = vld [vmem:[%s20349_s1 + $0xe18] sm:$0xff]   ;;  %v928_v8 = vld [vmem:[#allocation2 + $0x2f4] sm:$0xf] }
 0x26a   :  { %v19081_v43 = vadd.f32 %v14283_v39, %v5518_v1  ;;  %v14302_v45 = vadd.f32 %v14301_v22, %v14300_v11  ;;  %v16074_v1 = vld [vmem:[%s20349_s1 + $0xdd0] sm:$0xff]   ;;  %v12795_v39 = vcombine.high %v6892_v48, %v18895_v60 }
 0x26b   :  { %v14303_v24 = vpop.f32.mrf.mxu0  ;;  %14683 = vmatpush3.bf16.msra.mxu0 %v16052_v3  ;;  %14723 = vmatpush3.bf16.msra.mxu1 %v16053_v19  ;;  %v1002_v19 = vld [vmem:[#allocation2 + $0x2fc] sm:$0x8]  ;;  %v16076_v22 = vld [vmem:[%s20349_s1 + $0xd90] sm:$0xff]  }
 0x26c   :  { %v5621_v32 = vadd.f32 %v14302_v45, %v18974_v12  ;;  %14684 = vmatprep.subr.bf16.mxu0 %v16057_v62  ;;  %v15286_v12 = vpop.f32.mrf.mxu1  ;;  %14724 = vmatprep.subr.bf16.mxu1 %v16058_v27  ;;  %v929_v62 = vsel %vm16633_vm4, %v16748_v50, %v928_v8  ;;  %v1003_v45 = vsel %vm16702_vm15, 0, %v1002_v19  ;;  %v1040_v8 = vld [vmem:[#allocation2 + $0x348] sm:$0x1] }
 0x26d   :  { %v14304_v2 = vpop.f32.mrf.mxu0  ;;  %930 = vst [vmem:[#allocation2 + $0x2f4] sm:$0xf] %v929_v62  ;;  %1004 = vst [vmem:[#allocation2 + $0x2fc] sm:$0x8] %v1003_v45 }
 0x26e   :  { %v14305_v18 = vadd.f32 %v14304_v2, %v14303_v24  ;;  %7896 = vmatmul.mubr.bf16.gmra.mxu0 %v16054_v40  ;;  %v5685_v17 = vpop.f32.mrf.mxu1  ;;  %15337 = vmatmul.mubr.bf16.gmra.mxu1 %v16073_v63  ;;  %v1034_v40 = vld [vmem:[#allocation2 + $0x300] sm:$0x1]  ;;  %v16080_v2 = vld [vmem:[%s20349_s1 + $0xd88] sm:$0xff]  }
 0x26f   :  { %14685 = vmatpush3.bf16.msra.mxu0 %v16059_v54  ;;  %7903 = vmatprep.mubr.bf16.mxu0 %v16067_v6  ;;  %v5686_v59 = vadd.f32 %v5685_v17, %v5621_v32  ;;  %v14306_v25 = vpop.f32.mrf.mxu0  ;;  %v16077_v54 = vld [vmem:[%s20349_s1 + $0xe10] sm:$0xff]   ;;  %v16078_v32 = vld [vmem:[%s20349_s1 + $0xdc8] sm:$0xff]   ;;  %v1035_v50 = vsel %vm16644_vm7, 0, %v1034_v40 }
 0x270   :  { %v5624_v56 = vadd.f32 %v14305_v18, %v18987_v20  ;;  %14725 = vmatpush3.bf16.msra.mxu1 %v16060_v23  ;;  %14686 = vmatprep.subr.bf16.mxu0 %v16061_v61  ;;  %v16065_v20 = vld [vmem:[#allocation2 + $0x258] ss:$36 sps:$4 sm:$0xff]   ;;  %v15287_v41 = vpop.f32.mrf.mxu1  ;;  %1036 = vst [vmem:[#allocation2 + $0x300] sm:$0x1] %v1035_v50  ;;  %v16079_v61 = vld [vmem:[%s20349_s1 + $0xe48] sm:$0xff]   ;;  %v16090_v50 = vld [vmem:[%s20349_s1 + $0xef0] sm:$0xff]  }
 0x271   :  { %14726 = vmatprep.subr.bf16.mxu1 %v16062_v33  ;;  %v19119_v31 = vadd.f32 %v5686_v59, %v18747_v36  ;;  %v14307_v26 = vpop.f32.mrf.mxu0  ;;  %v16075_v36 = vld [vmem:[%s20349_s1 + $0xe50] sm:$0xff]   ;;  %v12794_v33 = vcombine.low %v6892_v48, %v18895_v60  ;;  %v16085_v59 = vld [vmem:[%s20349_s1 + $0xe00] sm:$0xff]  }
 0x272   :  { %v5688_v38 = vpop.f32.mrf.mxu1  ;;  %v14308_v3 = vadd.f32 %v14307_v26, %v14306_v25  ;;  %v934_v25 = vld [vmem:[#allocation2 + $0x33c] sm:$0xf] }
 0x273   :  { %14687 = vmatpush3.bf16.msra.mxu0 %v16063_v37  ;;  %v5689_v11 = vadd.f32 %v5688_v38, %v5624_v56  ;;  %v14309_v28 = vpop.f32.mrf.mxu0  ;;  %v16082_v37 = vld [vmem:[%s20349_s1 + $0xdc0] sm:$0xff]   ;;  %v16086_v38 = vld [vmem:[%s20349_s1 + $0xef8] sm:$0xff]   ;;  %v935_v26 = vsel %vm16633_vm4, %v16893_v30, %v934_v25 }
 0x274   :  { %14727 = vmatpush3.bf16.msra.mxu1 %v16064_v29  ;;  %14688 = vmatprep.subr.bf16.mxu0 %v16068_v15  ;;  %v5629_v24 = vadd.f32 %v14308_v3, %v19003_v44  ;;  %v952_v29 = vld [vmem:[#allocation2 + $0x2f4] sm:$0x1]  ;;  %v931_v15 = vld [vmem:[#allocation2 + $0x318] sm:$0xf]  ;;  %936 = vst [vmem:[#allocation2 + $0x33c] sm:$0xf] %v935_v26 }
 0x275   :  { %14728 = vmatprep.subr.bf16.mxu1 %v16069_v9  ;;  %v19140_v27 = vadd.f32 %v5689_v11, %v18768_v58  ;;  %v14310_v23 = vpop.f32.mrf.mxu0  ;;  %v16087_v30 = vld [vmem:[%s20349_s1 + $0xf78] sm:$0xff]  }
 0x276   :  { %7904 = vmatmul.mubr.bf16.gmra.mxu0 %v16065_v20  ;;  %v5694_v58 = vadd.f32 %v15286_v12, %v5629_v24  ;;  %v14311_v44 = vadd.f32 %v14310_v23, %v14309_v28  ;;  %v16081_v12 = vld [vmem:[%s20349_s1 + $0xe08] sm:$0xff]   ;;  %v953_v20 = vsel %vm16644_vm7, 0, %v952_v29  ;;  %v1041_v28 = vsel %vm16644_vm7, 0, %v1040_v8  ;;  %v16088_v24 = vld [vmem:[%s20349_s1 + $0xeb8] sm:$0xff]  }
 0x277   :  { %14689 = vmatpush3.bf16.msra.mxu0 %v16070_v13  ;;  %7911 = vmatprep.mubr.bf16.mxu0 %v12795_v39  ;;  %v7999_v48 = vld [vmem:[#allocation2 + $0x2fc] sm:$0xff]  ;;  %954 = vst [vmem:[#allocation2 + $0x2f4] sm:$0x1] %v953_v20  ;;  %v1037_v39 = vld [vmem:[#allocation2 + $0x324] sm:$0x1] }
 0x278   :  { %14729 = vmatpush3.bf16.msra.mxu1 %v16071_v14  ;;  %14690 = vmatprep.subr.bf16.mxu0 %v16074_v1  ;;  %v5632_v6 = vadd.f32 %v14311_v44, %v19017_v55  ;;  %v19159_v18 = vadd.f32 %v5694_v58, %v18731_v0  ;;  %v16083_v0 = vld [vmem:[%s20349_s1 + $0xe40] sm:$0xff]   ;;  %1042 = vst [vmem:[#allocation2 + $0x348] sm:$0x1] %v1041_v28 }
 0x279   :  { %14730 = vmatprep.subr.bf16.mxu1 %v16075_v36  ;;  %v16084_v55 = vld [vmem:[%s20349_s1 + $0xd80] sm:$0xff]   ;;  %v1038_v36 = vsel %vm16644_vm7, 0, %v1037_v39  ;;  %v13015_v45 = vcombine.low %v18895_v60, %v7999_v48 }
 0x27a   :  { %v5697_v63 = vadd.f32 %v15287_v41, %v5632_v6  ;;  %v932_v41 = vsel %vm16633_vm4, %v16750_v53, %v931_v15  ;;  %v1005_v13 = vld [vmem:[#allocation2 + $0x320] sm:$0x8]  ;;  %v1008_v53 = vld [vmem:[#allocation2 + $0x344] sm:$0x8]  ;;  %1039 = vst [vmem:[#allocation2 + $0x324] sm:$0x1] %v1038_v36 }
 0x27b   :  { %14691 = vmatpush3.bf16.msra.mxu0 %v16076_v22  ;;  %933 = vst [vmem:[#allocation2 + $0x318] sm:$0xf] %v932_v41  ;;  %v1006_v1 = vsel %vm16702_vm15, 0, %v1005_v13  ;;  %v1009_v3 = vsel %vm16702_vm15, 0, %v1008_v53  ;;  %v16099_v15 = vld [vmem:[%s20349_s1 + $0xee8] sm:$0xff]   ;;  %v16104_v41 = vld [vmem:[%s20349_s1 + $0xf60] sm:$0xff]  }
 0x27c   :  { %14731 = vmatpush3.bf16.msra.mxu1 %v16077_v54  ;;  %14692 = vmatprep.subr.bf16.mxu0 %v16078_v32  ;;  %v19175_v9 = vadd.f32 %v5697_v63, %v18759_v10  ;;  %v13016_v10 = vcombine.high %v18895_v60, %v7999_v48  ;;  %1007 = vst [vmem:[#allocation2 + $0x320] sm:$0x8] %v1006_v1  ;;  %1010 = vst [vmem:[#allocation2 + $0x344] sm:$0x8] %v1009_v3  ;;  %v16091_v54 = vld [vmem:[%s20349_s1 + $0xf70] sm:$0xff]  }
 0x27d   :  { %v14312_v56 = vpop.f32.mrf.mxu0  ;;  %14732 = vmatprep.subr.bf16.mxu1 %v16079_v61  ;;  %v16092_v63 = vld [vmem:[%s20349_s1 + $0xeb0] sm:$0xff]   ;;  %v940_v13 = vld [vmem:[#allocation2 + $0x384] sm:$0xf] }
 0x27e   :  { %7912 = vmatmul.mubr.bf16.gmra.mxu0 %v12794_v33  ;;  %8891 = vmatprep.mubr.bf16.mxu1 %v13016_v10  ;;  %v7998_v32 = vld [vmem:[#allocation2 + $0x2f4] sm:$0xff]  ;;  %v958_v33 = vld [vmem:[#allocation2 + $0x33c] sm:$0x1]  ;;  %v1014_v10 = vld [vmem:[#allocation2 + $0x38c] sm:$0x8] }
 0x27f   :  { %v14313_v17 = vpop.f32.mrf.mxu0  ;;  %14693 = vmatpush3.bf16.msra.mxu0 %v16080_v2  ;;  %v13013_v44 = vcombine.low %v18895_v60, %v7998_v32  ;;  %v16093_v2 = vld [vmem:[%s20349_s1 + $0xf30] sm:$0xff]  }
 0x280   :  { %v14314_v14 = vadd.f32 %v14313_v17, %v14312_v56  ;;  %14733 = vmatpush3.bf16.msra.mxu1 %v16081_v12  ;;  %14694 = vmatprep.subr.bf16.mxu0 %v16082_v37  ;;  %v959_v12 = vsel %vm16644_vm7, 0, %v958_v33  ;;  %v16102_v17 = vld [vmem:[%s20349_s1 + $0xf28] sm:$0xff]   ;;  %v1046_v3 = vld [vmem:[#allocation2 + $0x390] sm:$0x1] }
 0x281   :  { %v14315_v11 = vpop.f32.mrf.mxu0  ;;  %14734 = vmatprep.subr.bf16.mxu1 %v16083_v0  ;;  %960 = vst [vmem:[#allocation2 + $0x33c] sm:$0x1] %v959_v12  ;;  %v16098_v56 = vld [vmem:[#allocation2 + $0x324] ss:$36 sps:$4 sm:$0xff]   ;;  %v20395_v1 = vld [vmem:[#allocation12_spill] sm:$0xff]  ;;  %v16113_v12 = vld [vmem:[%s20349_s1 + $0xf58] sm:$0xff]  }
 0x282   :  { %v5637_v19 = vadd.f32 %v14314_v14, %v19033_v16  ;;  %v16089_v16 = vld [vmem:[%s20349_s1 + $0xf38] sm:$0xff]   ;;  %v16100_v0 = vld [vmem:[%s20349_s1 + $0xf68] sm:$0xff]   ;;  %v941_v53 = vsel %vm16633_vm4, %v20395_v1, %v940_v13 }
 0x283   :  { %v14316_v22 = vpop.f32.mrf.mxu0  ;;  %14695 = vmatpush3.bf16.msra.mxu0 %v16084_v55  ;;  %v955_v23 = vld [vmem:[#allocation2 + $0x318] sm:$0x1]  ;;  %v16096_v29 = vld [vmem:[#allocation2 + $0x320] ss:$36 sps:$4 sm:$0xff]   ;;  %v1011_v14 = vld [vmem:[#allocation2 + $0x368] sm:$0x8] }
 0x284   :  { %v14317_v62 = vadd.f32 %v14316_v22, %v14315_v11  ;;  %14735 = vmatpush3.bf16.msra.mxu1 %v16085_v59  ;;  %14760 = vmatprep.subr.bf16.mxu0 %v16086_v38  ;;  %v956_v6 = vsel %vm16644_vm7, 0, %v955_v23  ;;  %v937_v59 = vld [vmem:[#allocation2 + $0x360] sm:$0xf]  ;;  %v1012_v39 = vsel %vm16702_vm15, 0, %v1011_v14  ;;  %v1015_v11 = vsel %vm16702_vm15, 0, %v1014_v10 }
 0x285   :  { %14800 = vmatprep.subr.bf16.mxu1 %v16087_v30  ;;  %957 = vst [vmem:[#allocation2 + $0x318] sm:$0x1] %v956_v6  ;;  %v938_v25 = vsel %vm16633_vm4, %v16908_v35, %v937_v59  ;;  %v1043_v35 = vld [vmem:[#allocation2 + $0x36c] sm:$0x1]  ;;  %942 = vst [vmem:[#allocation2 + $0x384] sm:$0xf] %v941_v53 }
 0x286   :  { %v19209_v40 = vadd.f32 %v14317_v62, %v19050_v4  ;;  %v19221_v4 = vld [vmem:[#allocation2] sm:$0xff]  ;;  %939 = vst [vmem:[#allocation2 + $0x360] sm:$0xf] %v938_v25  ;;  %1013 = vst [vmem:[#allocation2 + $0x368] sm:$0x8] %v1012_v39 }
 0x287   :  { %v14318_v58 = vpop.f32.mrf.mxu0  ;;  %v13014_v61 = vcombine.high %v19221_v4, %v7998_v32  ;;  %8892 = vmatmul.mubr.bf16.vlgmr.msra.gmra.mxu1 %v13015_v45  ;;  %1016 = vst [vmem:[#allocation2 + $0x38c] sm:$0x8] %v1015_v11  ;;  %v943_v53 = vld [vmem:[#allocation2 + $0x3a8] sm:$0xf]  ;;  %v946_v39 = vld [vmem:[#allocation2 + $0x3cc] sm:$0xf] }
 0x288   :  { %14801 = vmatpush3.bf16.msra.mxu1 %v16089_v16  ;;  %v15290_v37 = vpop.f32.mrf.mxu1  ;;  %8899 = vmatprep.mubr.bf16.mxu1 %v16098_v56  ;;  %v1017_v11 = vld [vmem:[#allocation2 + $0x3b0] sm:$0x8] }
 0x289   :  { %v14319_v60 = vpop.f32.mrf.mxu0  ;;  %8826 = vmatprep.mubr.bf16.mxu0 %v13014_v61  ;;  %14802 = vmatprep.subr.bf16.mxu1 %v16091_v54 }
 0x28a   :  { %v14320_v55 = vadd.f32 %v14319_v60, %v14318_v58  ;;  %8827 = vmatmul.mubr.bf16.vlgmr.msra.gmra.mxu0 %v13013_v44  ;;  %v5701_v20 = vpop.f32.mrf.mxu1 }
 0x28b   :  { %v14321_v48 = vpop.f32.mrf.mxu0  ;;  %14761 = vmatpush3.bf16.msra.mxu0 %v16088_v24  ;;  %v5702_v38 = vadd.f32 %v5701_v20, %v5637_v19  ;;  %v1047_v19 = vsel %vm16644_vm7, 0, %v1046_v3  ;;  %v16101_v24 = vld [vmem:[%s20349_s1 + $0xea8] sm:$0xff]  }
 0x28c   :  { %v5645_v26 = vadd.f32 %v14320_v55, %v19067_v46  ;;  %14762 = vmatprep.subr.bf16.mxu0 %v16090_v50  ;;  %14803 = vmatpush3.bf16.msra.mxu1 %v16093_v2  ;;  %v15291_v36 = vpop.f32.mrf.mxu1  ;;  %v1044_v46 = vsel %vm16644_vm7, 0, %v1043_v35  ;;  %1048 = vst [vmem:[#allocation2 + $0x390] sm:$0x1] %v1047_v19  ;;  %v19264_v16 = vld [vmem:[#allocation2 + $0x318] sm:$0xff]  ;;  %v16103_v50 = vld [vmem:[%s20349_s1 + $0xee0] sm:$0xff]  }
 0x28d   :  { %v14322_v8 = vpop.f32.mrf.mxu0  ;;  %14804 = vmatprep.subr.bf16.mxu1 %v16100_v0  ;;  %v19262_v30 = vadd.f32 %v5702_v38, %v18786_v34  ;;  %1045 = vst [vmem:[#allocation2 + $0x36c] sm:$0x1] %v1044_v46  ;;  %v8008_v34 = vld [vmem:[#allocation2 + $0x33c] sm:$0xff]  ;;  %v964_v55 = vld [vmem:[#allocation2 + $0x384] sm:$0x1]  ;;  %v20396_v46 = vld [vmem:[#allocation13_spill] sm:$0xff] }
 0x28e   :  { %v5710_v28 = vadd.f32 %v15290_v37, %v5645_v26  ;;  %v5704_v22 = vpop.f32.mrf.mxu1  ;;  %v14323_v62 = vadd.f32 %v14322_v8, %v14321_v48  ;;  %v13022_v61 = vcombine.low %v19264_v16, %v8008_v34  ;;  %v13023_v2 = vcombine.high %v19264_v16, %v8008_v34  ;;  %v961_v56 = vld [vmem:[#allocation2 + $0x360] sm:$0x1]  ;;  %v16109_v48 = vld [vmem:[#allocation2 + $0x368] ss:$36 sps:$4 sm:$0xff]   ;;  %v16117_v26 = vld [vmem:[%s20349_s1 + $0xf50] sm:$0xff]  }
 0x28f   :  { %v14352_v45 = vpop.f32.mrf.mxu0  ;;  %14763 = vmatpush3.bf16.msra.mxu0 %v16092_v63  ;;  %8900 = vmatmul.mubr.bf16.gmra.mxu1 %v16096_v29  ;;  %v5705_v54 = vadd.f32 %v5704_v22, %v19209_v40  ;;  %v16106_v40 = vld [vmem:[%s20349_s1 + $0xf20] sm:$0xff]   ;;  %v16115_v29 = vld [vmem:[%s20349_s1 + $0xf18] sm:$0xff]   ;;  %v965_v20 = vsel %vm16644_vm7, 0, %v964_v55  ;;  %v16119_v8 = vld [vmem:[%s20349_s1 + $0xf10] sm:$0xff]   ;;  %v944_v19 = vsel %vm16633_vm4, %v20396_v46, %v943_v53 }
 0x290   :  { %v19271_v32 = vadd.f32 %v5710_v28, %v18779_v5  ;;  %14764 = vmatprep.subr.bf16.mxu0 %v16099_v15  ;;  %14805 = vmatpush3.bf16.msra.mxu1 %v16102_v17  ;;  %v5648_v23 = vadd.f32 %v14323_v62, %v19081_v43  ;;  %v14392_v58 = vpop.f32.mrf.mxu1  ;;  %v16105_v5 = vld [vmem:[%s20349_s1 + $0xea0] sm:$0xff]   ;;  %v16112_v43 = vld [vmem:[%s20349_s1 + $0xed8] sm:$0xff]   ;;  %966 = vst [vmem:[#allocation2 + $0x384] sm:$0x1] %v965_v20  ;;  %v1018_v62 = vsel %vm16702_vm15, 0, %v1017_v11 }
 0x291   :  { %v14353_v44 = vpop.f32.mrf.mxu0  ;;  %14806 = vmatprep.subr.bf16.mxu1 %v16104_v41  ;;  %v19286_v6 = vadd.f32 %v5705_v54, %v18812_v49  ;;  %8834 = vmatprep.mubr.bf16.mxu0 %v13023_v2  ;;  %v962_v49 = vsel %vm16644_vm7, 0, %v961_v56  ;;  %v16114_v41 = vld [vmem:[%s20349_s1 + $0xe98] sm:$0xff]   ;;  %945 = vst [vmem:[#allocation2 + $0x3a8] sm:$0xf] %v944_v19  ;;  %1019 = vst [vmem:[#allocation2 + $0x3b0] sm:$0x8] %v1018_v62 }
 0x292   :  { %v14354_v33 = vadd.f32 %v14353_v44, %v14352_v45  ;;  %v5713_v37 = vadd.f32 %v15291_v36, %v5648_v23  ;;  %v14393_v60 = vpop.f32.mrf.mxu1  ;;  %8835 = vmatmul.mubr.bf16.gmra.mxu0 %v13022_v61  ;;  %963 = vst [vmem:[#allocation2 + $0x360] sm:$0x1] %v962_v49  ;;  %v16118_v36 = vld [vmem:[%s20349_s1 + $0xe90] sm:$0xff]   ;;  %v20397_v28 = vld [vmem:[#allocation18_spill] sm:$0xff]  ;;  %v1052_v23 = vld [vmem:[#allocation2 + $0x3d8] sm:$0x1] }
 0x293   :  { %v14355_v63 = vpop.f32.mrf.mxu0  ;;  %14765 = vmatpush3.bf16.msra.mxu0 %v16101_v24  ;;  %v14394_v0 = vadd.f32 %v14393_v60, %v14392_v58  ;;  %v947_v22 = vsel %vm16633_vm4, %v20397_v28, %v946_v39  ;;  %v1020_v45 = vld [vmem:[#allocation2 + $0x3d4] sm:$0x8]  ;;  %v1049_v24 = vld [vmem:[#allocation2 + $0x3b4] sm:$0x1]  ;;  %v16125_v58 = vld [vmem:[%s20349_s1 + $0xec8] sm:$0xff]  }
 0x294   :  { %14766 = vmatprep.subr.bf16.mxu0 %v16103_v50  ;;  %v14395_v15 = vpop.f32.mrf.mxu1  ;;  %v19300_v59 = vadd.f32 %v5713_v37, %v18799_v42  ;;  %14807 = vmatpush3.bf16.msra.mxu1 %v16106_v40  ;;  %v16111_v14 = vld [vmem:[#allocation2 + $0x36c] ss:$36 sps:$4 sm:$0xff]   ;;  %948 = vst [vmem:[#allocation2 + $0x3cc] sm:$0xf] %v947_v22  ;;  %v1021_v34 = vsel %vm16702_vm15, 0, %v1020_v45  ;;  %v1050_v50 = vsel %vm16644_vm7, 0, %v1049_v24 }
 0x295   :  { %v14356_v17 = vpop.f32.mrf.mxu0  ;;  %v19307_v25 = vadd.f32 %v14394_v0, %v14354_v33  ;;  %14808 = vmatprep.subr.bf16.mxu1 %v16113_v12  ;;  %v16116_v42 = vld [vmem:[%s20349_s1 + $0xed0] sm:$0xff]   ;;  %8907 = vmatprep.mubr.bf16.mxu1 %v16111_v14  ;;  %1022 = vst [vmem:[#allocation2 + $0x3d4] sm:$0x8] %v1021_v34  ;;  %1051 = vst [vmem:[#allocation2 + $0x3b4] sm:$0x1] %v1050_v50  ;;  %v16126_v40 = vld [vmem:[%s20349_s1 + $0xf48] sm:$0xff]  }
 0x296   :  { %v14357_v13 = vadd.f32 %v14356_v17, %v14355_v63  ;;  %v14396_v10 = vpop.f32.mrf.mxu1  ;;  %v16127_v63 = vld [vmem:[%s20349_s1 + $0xe88] sm:$0xff]   ;;  %v16129_v20 = vld [vmem:[%s20349_s1 + $0xec0] sm:$0xff]  }
 0x297   :  { %v14358_v38 = vpop.f32.mrf.mxu0  ;;  %14767 = vmatpush3.bf16.msra.mxu0 %v16105_v5  ;;  %v14397_v1 = vadd.f32 %v14396_v10, %v14395_v15  ;;  %8908 = vmatmul.mubr.bf16.gmra.mxu1 %v16109_v48  ;;  %v1053_v5 = vsel %vm16644_vm7, 0, %v1052_v23  ;;  %v8018_v60 = vld [vmem:[#allocation2 + $0x384] sm:$0xff]  ;;  %v1113_v62 = vld [vmem:[#allocation2 + $0x30c] sm:$0x1]  ;;  %v16133_v23 = vld [vmem:[%s20349_s1 + $0xfb8] sm:$0xff]  }
 0x298   :  { %14768 = vmatprep.subr.bf16.mxu0 %v16112_v43  ;;  %v14398_v35 = vpop.f32.mrf.mxu1  ;;  %14809 = vmatpush3.bf16.msra.mxu1 %v16115_v29  ;;  %1054 = vst [vmem:[#allocation2 + $0x3d8] sm:$0x1] %v1053_v5  ;;  %v16128_v29 = vld [vmem:[%s20349_s1 + $0xf08] sm:$0xff]   ;;  %v16131_v39 = vld [vmem:[%s20349_s1 + $0xe80] sm:$0xff]   ;;  %v1114_v50 = vsel %vm16644_vm7, 0, %v1113_v62 }
 0x299   :  { %v14359_v3 = vpop.f32.mrf.mxu0  ;;  %v19329_v54 = vadd.f32 %v14397_v1, %v14357_v13  ;;  %14810 = vmatprep.subr.bf16.mxu1 %v16117_v26  ;;  %v19343_v43 = vld [vmem:[#allocation2 + $0x360] sm:$0xff]  ;;  %v1081_v22 = vld [vmem:[#allocation2 + $0x308] sm:$0x8]  ;;  %1115 = vst [vmem:[#allocation2 + $0x30c] sm:$0x1] %v1114_v50 }
 0x29a   :  { %v14360_v44 = vadd.f32 %v14359_v3, %v14358_v38  ;;  %v14399_v61 = vpop.f32.mrf.mxu1  ;;  %v13031_v49 = vcombine.low %v19343_v43, %v8018_v60  ;;  %v13032_v55 = vcombine.high %v19343_v43, %v8018_v60  ;;  %v16132_v46 = vld [vmem:[%s20349_s1 + $0xf00] sm:$0xff]   ;;  %v1082_v34 = vsel %vm16702_vm15, 0, %v1081_v22  ;;  %v1087_v60 = vld [vmem:[#allocation2 + $0x350] sm:$0x8]  ;;  %v16143_v62 = vld [vmem:[#allocation2 + $0x334] ss:$36 sps:$4 sm:$0xff]  }
 0x29b   :  { %v14361_v2 = vpop.f32.mrf.mxu0  ;;  %14769 = vmatpush3.bf16.msra.mxu0 %v16114_v41  ;;  %v14400_v33 = vadd.f32 %v14399_v61, %v14398_v35  ;;  %v16130_v41 = vld [vmem:[%s20349_s1 + $0xf40] sm:$0xff]   ;;  %v970_v10 = vld [vmem:[#allocation2 + $0x3cc] sm:$0x1]  ;;  %1083 = vst [vmem:[#allocation2 + $0x308] sm:$0x8] %v1082_v34 }
 0x29c   :  { %14770 = vmatprep.subr.bf16.mxu0 %v16116_v42  ;;  %v14401_v12 = vpop.f32.mrf.mxu1  ;;  %14811 = vmatpush3.bf16.msra.mxu1 %v16119_v8  ;;  %v967_v42 = vld [vmem:[#allocation2 + $0x3a8] sm:$0x1]  ;;  %v971_v53 = vsel %vm16644_vm7, 0, %v970_v10  ;;  %v16122_v3 = vld [vmem:[#allocation2 + $0x3b0] ss:$36 sps:$4 sm:$0xff]  }
 0x29d   :  { %v14362_v37 = vpop.f32.mrf.mxu0  ;;  %v19348_v56 = vadd.f32 %v14400_v33, %v14360_v44  ;;  %14812 = vmatprep.subr.bf16.mxu1 %v16126_v40  ;;  %8842 = vmatprep.mubr.bf16.mxu0 %v13032_v55  ;;  %v968_v1 = vsel %vm16644_vm7, 0, %v967_v42  ;;  %972 = vst [vmem:[#allocation2 + $0x3cc] sm:$0x1] %v971_v53  ;;  %v1119_v55 = vld [vmem:[#allocation2 + $0x354] sm:$0x1]  ;;  %v16145_v53 = vld [vmem:[%s20349_s1 + $0x1028] sm:$0xff]  }
 0x29e   :  { %v14363_v0 = vadd.f32 %v14362_v37, %v14361_v2  ;;  %v14402_v15 = vpop.f32.mrf.mxu1  ;;  %8843 = vmatmul.mubr.bf16.gmra.mxu0 %v13031_v49  ;;  %969 = vst [vmem:[#allocation2 + $0x3a8] sm:$0x1] %v968_v1  ;;  %v1084_v37 = vld [vmem:[#allocation2 + $0x32c] sm:$0x8]  ;;  %v1116_v49 = vld [vmem:[#allocation2 + $0x330] sm:$0x1] }
 0x29f   :  { %v14364_v17 = vpop.f32.mrf.mxu0  ;;  %14771 = vmatpush3.bf16.msra.mxu0 %v16118_v36  ;;  %v14403_v48 = vadd.f32 %v14402_v15, %v14401_v12  ;;  %v16124_v36 = vld [vmem:[#allocation2 + $0x3b4] ss:$36 sps:$4 sm:$0xff]   ;;  %v1125_v34 = vld [vmem:[#allocation2 + $0x39c] sm:$0x1] }
 0x2a0   :  { %14772 = vmatprep.subr.bf16.mxu0 %v16125_v58  ;;  %v14404_v13 = vpop.f32.mrf.mxu1  ;;  %14813 = vmatpush3.bf16.msra.mxu1 %v16128_v29  ;;  %v16134_v58 = vld [vmem:[%s20349_s1 + $0x1038] sm:$0xff]   ;;  %v8001_v15 = vld [vmem:[#allocation2 + $0x30c] sm:$0xff] }
 0x2a1   :  { %v14365_v14 = vpop.f32.mrf.mxu0  ;;  %v19361_v38 = vadd.f32 %v14403_v48, %v14363_v0  ;;  %14814 = vmatprep.subr.bf16.mxu1 %v16130_v41  ;;  %8915 = vmatprep.mubr.bf16.mxu1 %v16124_v36  ;;  %v1088_v0 = vsel %vm16702_vm15, 0, %v1087_v60  ;;  %v13019_v41 = vcombine.low %v19221_v4, %v8001_v15  ;;  %v16137_v42 = vld [vmem:[%s20349_s1 + $0x1030] sm:$0xff]   ;;  %v1093_v36 = vld [vmem:[#allocation2 + $0x398] sm:$0x8] }
 0x2a2   :  { %v14366_v26 = vadd.f32 %v14365_v14, %v14364_v17  ;;  %v14405_v11 = vpop.f32.mrf.mxu1  ;;  %8916 = vmatmul.mubr.bf16.gmra.mxu1 %v16122_v3  ;;  %v8000_v29 = vld [vmem:[#allocation2 + $0x304] sm:$0xff]  ;;  %1089 = vst [vmem:[#allocation2 + $0x350] sm:$0x8] %v1088_v0  ;;  %v1117_v17 = vsel %vm16644_vm7, 0, %v1116_v49  ;;  %v16135_v14 = vld [vmem:[%s20349_s1 + $0xff8] sm:$0xff]   ;;  %v16138_v1 = vld [vmem:[%s20349_s1 + $0xff0] sm:$0xff]  }
 0x2a3   :  { %v14367_v35 = vpop.f32.mrf.mxu0  ;;  %14773 = vmatpush3.bf16.msra.mxu0 %v16127_v63  ;;  %v14406_v8 = vadd.f32 %v14405_v11, %v14404_v13  ;;  %v1085_v63 = vsel %vm16702_vm15, 0, %v1084_v37  ;;  %v13018_v48 = vcombine.high %v19221_v4, %v8000_v29  ;;  %v13020_v13 = vcombine.high %v19221_v4, %v8001_v15  ;;  %1118 = vst [vmem:[#allocation2 + $0x330] sm:$0x1] %v1117_v17  ;;  %v16155_v37 = vld [vmem:[%s20349_s1 + $0xf98] sm:$0xff]   ;;  %v1099_v49 = vld [vmem:[#allocation2 + $0x3e0] sm:$0x8] }
 0x2a4   :  { %14774 = vmatprep.subr.bf16.mxu0 %v16129_v20  ;;  %v14407_v19 = vpop.f32.mrf.mxu1  ;;  %14815 = vmatpush3.bf16.msra.mxu1 %v16132_v46  ;;  %v8028_v40 = vld [vmem:[#allocation2 + $0x3cc] sm:$0xff]  ;;  %1086 = vst [vmem:[#allocation2 + $0x32c] sm:$0x8] %v1085_v63  ;;  %v1120_v20 = vsel %vm16644_vm7, 0, %v1119_v55  ;;  %v13017_v10 = vcombine.low %v19221_v4, %v8000_v29  ;;  %v1094_v22 = vsel %vm16702_vm15, 0, %v1093_v36 }
 0x2a5   :  { %v14368_v28 = vpop.f32.mrf.mxu0  ;;  %v19373_v45 = vadd.f32 %v14406_v8, %v14366_v26  ;;  %14852 = vmatprep.subr.bf16.mxu1 %v16134_v58  ;;  %v19387_v5 = vld [vmem:[#allocation2 + $0x3a8] sm:$0xff]  ;;  %1121 = vst [vmem:[#allocation2 + $0x354] sm:$0x1] %v1120_v20  ;;  %9021 = vmatprep.mubr.bf16.mxu1 %v13020_v13  ;;  %v16136_v26 = vld [vmem:[%s20349_s1 + $0xfb0] sm:$0xff]   ;;  %1095 = vst [vmem:[#allocation2 + $0x398] sm:$0x8] %v1094_v22 }
 0x2a6   :  { %v14369_v24 = vadd.f32 %v14368_v28, %v14367_v35  ;;  %v14408_v44 = vpop.f32.mrf.mxu1  ;;  %v13040_v33 = vcombine.low %v19387_v5, %v8028_v40  ;;  %v13041_v12 = vcombine.high %v19387_v5, %v8028_v40  ;;  %v16146_v4 = vld [vmem:[%s20349_s1 + $0xfe8] sm:$0xff]   ;;  %v16148_v28 = vld [vmem:[%s20349_s1 + $0x1020] sm:$0xff]   ;;  %v1126_v58 = vsel %vm16644_vm7, 0, %v1125_v34  ;;  %v16156_v40 = vld [vmem:[%s20349_s1 + $0x1018] sm:$0xff]  }
 0x2a7   :  { %14775 = vmatpush3.bf16.msra.mxu0 %v16131_v39  ;;  %v14409_v61 = vadd.f32 %v14408_v44, %v14407_v19  ;;  %v1090_v39 = vld [vmem:[#allocation2 + $0x374] sm:$0x8]  ;;  %v16144_v19 = vld [vmem:[%s20349_s1 + $0xfa8] sm:$0xff]   ;;  %1127 = vst [vmem:[#allocation2 + $0x39c] sm:$0x1] %v1126_v58  ;;  %v1100_v20 = vsel %vm16702_vm15, 0, %v1099_v49 }
 0x2a8   :  { %15340 = vmatprep.subr.bf16.mxu0 %v16133_v23  ;;  %8850 = vmatprep.mubr.bf16.mxu0 %v13041_v12  ;;  %v1091_v3 = vsel %vm16702_vm15, 0, %v1090_v39  ;;  %v1096_v0 = vld [vmem:[#allocation2 + $0x3bc] sm:$0x8]  ;;  %v1128_v29 = vld [vmem:[#allocation2 + $0x3c0] sm:$0x1]  ;;  %v16158_v36 = vld [vmem:[%s20349_s1 + $0xf90] sm:$0xff]  }
 0x2a9   :  { %v19385_v2 = vadd.f32 %v14409_v61, %v14369_v24  ;;  %8851 = vmatmul.mubr.bf16.gmra.mxu0 %v13040_v33  ;;  %v8010_v35 = vld [vmem:[#allocation2 + $0x34c] sm:$0xff]  ;;  %1092 = vst [vmem:[#allocation2 + $0x374] sm:$0x8] %v1091_v3  ;;  %v1122_v24 = vld [vmem:[#allocation2 + $0x378] sm:$0x1]  ;;  %v16149_v61 = vld [vmem:[%s20349_s1 + $0xfe0] sm:$0xff]  }
 0x2aa   :  { %8956 = vmatprep.mubr.bf16.mxu0 %v13018_v48  ;;  %9022 = vmatmul.mubr.bf16.vlgmr.msra.gmra.mxu1 %v13019_v41  ;;  %v1123_v50 = vsel %vm16644_vm7, 0, %v1122_v24  ;;  %v1097_v17 = vsel %vm16702_vm15, 0, %v1096_v0  ;;  %v16154_v41 = vld [vmem:[#allocation2 + $0x37c] ss:$36 sps:$4 sm:$0xff]   ;;  %1101 = vst [vmem:[#allocation2 + $0x3e0] sm:$0x8] %v1100_v20 }
 0x2ab   :  { %14853 = vmatpush3.bf16.msra.mxu1 %v16135_v14  ;;  %v19418_v11 = vld [vmem:[#allocation2 + $0x328] sm:$0xff]  ;;  %9029 = vmatprep.mubr.bf16.mxu1 %v16143_v62  ;;  %1124 = vst [vmem:[#allocation2 + $0x378] sm:$0x1] %v1123_v50  ;;  %v16157_v13 = vld [vmem:[%s20349_s1 + $0xfd8] sm:$0xff]   ;;  %1098 = vst [vmem:[#allocation2 + $0x3bc] sm:$0x8] %v1097_v17 }
 0x2ac   :  { %14854 = vmatprep.subr.bf16.mxu1 %v16137_v42  ;;  %v13027_v8 = vcombine.high %v19418_v11, %v8010_v35  ;;  %v16141_v46 = vld [vmem:[#allocation2 + $0x330] ss:$36 sps:$4 sm:$0xff]   ;;  %v13026_v44 = vcombine.low %v19418_v11, %v8010_v35  ;;  %v1129_v14 = vsel %vm16644_vm7, 0, %v1128_v29  ;;  %v1131_v42 = vld [vmem:[#allocation2 + $0x3e4] sm:$0x1]  ;;  %v16167_v62 = vld [vmem:[%s20349_s1 + $0x1008] sm:$0xff]  }
 0x2ad   :  { %v8020_v12 = vld [vmem:[#allocation2 + $0x394] sm:$0xff]  ;;  %1130 = vst [vmem:[#allocation2 + $0x3c0] sm:$0x1] %v1129_v14  ;;  %v1132_v39 = vsel %vm16644_vm7, 0, %v1131_v42  ;;  %v16166_v50 = vld [vmem:[%s20349_s1 + $0xf88] sm:$0xff]   ;;  %v16170_v49 = vld [vmem:[%s20349_s1 + $0x1000] sm:$0xff]  }
 0x2ae   :  { %1133 = vst [vmem:[#allocation2 + $0x3e4] sm:$0x1] %v1132_v39  ;;  %v1156_v58 = vld [vmem:[#allocation2 + $0x314] sm:$0xf] }
 0x2af   :  { %14855 = vmatpush3.bf16.msra.mxu1 %v16138_v1  ;;  %v9127_v42 = vld [vmem:[#allocation2 + $0x2f4] sm:$0xff] }
 0x2b0   :  { %14856 = vmatprep.subr.bf16.mxu1 %v16145_v53  ;;  %v19448_v33 = vld [vmem:[#allocation2 + $0x370] sm:$0xff] }
 0x2b1   :  { %8957 = vmatmul.mubr.bf16.vlgmr.msra.gmra.mxu0 %v13017_v10  ;;  %v13036_v63 = vcombine.high %v19448_v33, %v8020_v12  ;;  %v13035_v1 = vcombine.low %v19448_v33, %v8020_v12  ;;  %v16159_v53 = vld [vmem:[%s20349_s1 + $0x1010] sm:$0xff]  }
 0x2b2   :  { %15341 = vmatpush3.bf16.msra.mxu0 %v16133_v23  ;;  %8964 = vmatprep.mubr.bf16.mxu0 %v13027_v8  ;;  %v16147_v23 = vld [vmem:[%s20349_s1 + $0xfa0] sm:$0xff]   ;;  %v16152_v15 = vld [vmem:[#allocation2 + $0x378] ss:$36 sps:$4 sm:$0xff]  }
 0x2b3   :  { %15342 = vmatprep.subr.bf16.mxu0 %v16136_v26  ;;  %9030 = vmatmul.mubr.bf16.gmra.mxu1 %v16141_v46 }
 0x2b4   :  { %14857 = vmatpush3.bf16.msra.mxu1 %v16146_v4  ;;  %9037 = vmatprep.mubr.bf16.mxu1 %v16154_v41 }
 0x2b5   :  { %14858 = vmatprep.subr.bf16.mxu1 %v16148_v28  ;;  %v16163_v20 = vld [vmem:[#allocation2 + $0x3c0] ss:$36 sps:$4 sm:$0xff]  }
 0x2b6   :  { %15343 = vmatpush3.bf16.msra.mxu0 %v16136_v26 }
 0x2b7   :  { %15344 = vmatprep.subr.bf16.mxu0 %v16144_v19 }
 0x2b8   :  { %14859 = vmatpush3.bf16.msra.mxu1 %v16149_v61  ;;  %v8030_v61 = vld [vmem:[#allocation2 + $0x3dc] sm:$0xff] }
 0x2b9   :  { %8965 = vmatmul.mubr.bf16.gmra.mxu0 %v13026_v44  ;;  %14860 = vmatprep.subr.bf16.mxu1 %v16156_v40  ;;  %v16168_v40 = vld [vmem:[%s20349_s1 + $0xfc8] sm:$0xff]  }
 0x2ba   :  { %v14370_v60 = vpop.f32.mrf.mxu0  ;;  %15345 = vmatpush3.bf16.msra.mxu0 %v16144_v19  ;;  %v14410_v55 = vpop.f32.mrf.mxu1  ;;  %8972 = vmatprep.mubr.bf16.mxu0 %v13036_v63  ;;  %v16160_v19 = vld [vmem:[%s20349_s1 + $0xfd0] sm:$0xff]  }
 0x2bb   :  { %15346 = vmatprep.subr.bf16.mxu0 %v16147_v23  ;;  %9038 = vmatmul.mubr.bf16.gmra.mxu1 %v16152_v15 }
 0x2bc   :  { %v14371_v48 = vpop.f32.mrf.mxu0  ;;  %v14411_v26 = vpop.f32.mrf.mxu1  ;;  %14861 = vmatpush3.bf16.msra.mxu1 %v16157_v13 }
 0x2bd   :  { %v14372_v10 = vadd.f32 %v14371_v48, %v14370_v60  ;;  %v14412_v35 = vadd.f32 %v14411_v26, %v14410_v55  ;;  %14862 = vmatprep.subr.bf16.mxu1 %v16159_v53  ;;  %v20398_v60 = vld [vmem:[#allocation14_spill] sm:$0xff]  ;;  %v1183_v55 = vld [vmem:[#allocation2 + $0x338] sm:$0x8]  ;;  %v16165_v48 = vld [vmem:[#allocation2 + $0x3c4] ss:$36 sps:$4 sm:$0xff]   ;;  %v13266_v53 = vcombine.high %v9127_v42, %v19264_v16 }
 0x2be   :  { %v14373_v4 = vpop.f32.mrf.mxu0  ;;  %15347 = vmatpush3.bf16.msra.mxu0 %v16147_v23  ;;  %v14413_v3 = vpop.f32.mrf.mxu1  ;;  %v19483_v23 = vld [vmem:[#allocation2 + $0x3b8] sm:$0xff]  ;;  %v1184_v41 = vsel %vm16702_vm15, 0, %v1183_v55  ;;  %9045 = vmatprep.mubr.bf16.mxu1 %v16165_v48  ;;  %v1168_v55 = vld [vmem:[#allocation2 + $0x3a4] sm:$0xf] }
 0x2bf   :  { %15348 = vmatprep.subr.bf16.mxu0 %v16155_v37  ;;  %v19472_v8 = vadd.f32 %v14412_v35, %v14372_v10  ;;  %v13045_v0 = vcombine.high %v19483_v23, %v8030_v61  ;;  %v13044_v17 = vcombine.low %v19483_v23, %v8030_v61  ;;  %1185 = vst [vmem:[#allocation2 + $0x338] sm:$0x8] %v1184_v41  ;;  %v1171_v41 = vld [vmem:[#allocation2 + $0x3c8] sm:$0xf] }
 0x2c0   :  { %v14374_v46 = vpop.f32.mrf.mxu0  ;;  %v14414_v22 = vpop.f32.mrf.mxu1  ;;  %14863 = vmatpush3.bf16.msra.mxu1 %v16160_v19  ;;  %v16177_v19 = vld [vmem:[%s20349_s1 + $0x1138] sm:$0xff]  }
 0x2c1   :  { %v14375_v28 = vadd.f32 %v14374_v46, %v14373_v4  ;;  %8973 = vmatmul.mubr.bf16.gmra.mxu0 %v13035_v1  ;;  %v14415_v24 = vadd.f32 %v14414_v22, %v14413_v3  ;;  %14864 = vmatprep.subr.bf16.mxu1 %v16167_v62  ;;  %v16169_v1 = vld [vmem:[%s20349_s1 + $0xf80] sm:$0xff]  }
 0x2c2   :  { %v14432_v34 = vpop.f32.mrf.mxu0  ;;  %15349 = vmatpush3.bf16.msra.mxu0 %v16155_v37  ;;  %v14472_v44 = vpop.f32.mrf.mxu1  ;;  %v1157_v37 = vsel %vm16652_vm9, %v20398_v60, %v1156_v58  ;;  %8980 = vmatprep.mubr.bf16.mxu0 %v13045_v0 }
 0x2c3   :  { %15350 = vmatprep.subr.bf16.mxu0 %v16158_v36  ;;  %v19488_v12 = vadd.f32 %v14415_v24, %v14375_v28  ;;  %1158 = vst [vmem:[#allocation2 + $0x314] sm:$0xf] %v1157_v37  ;;  %9046 = vmatmul.mubr.bf16.gmra.mxu1 %v16163_v20  ;;  %v16176_v24 = vld [vmem:[%s20349_s1 + $0x10b8] sm:$0xff]   ;;  %v20400_v20 = vld [vmem:[#allocation16_spill] sm:$0xff] }
 0x2c4   :  { %v14433_v63 = vpop.f32.mrf.mxu0  ;;  %v14473_v15 = vpop.f32.mrf.mxu1  ;;  %14865 = vmatpush3.bf16.msra.mxu1 %v16168_v40  ;;  %9960 = vmatprep.mubr.bf16.mxu1 %v13266_v53  ;;  %v1169_v48 = vsel %vm16652_vm9, %v20400_v20, %v1168_v55 }
 0x2c5   :  { %v14434_v29 = vadd.f32 %v14433_v63, %v14432_v34  ;;  %v14474_v14 = vadd.f32 %v14473_v15, %v14472_v44  ;;  %14866 = vmatprep.subr.bf16.mxu1 %v16170_v49  ;;  %v16181_v63 = vld [vmem:[%s20349_s1 + $0x1130] sm:$0xff]   ;;  %v1165_v49 = vld [vmem:[#allocation2 + $0x380] sm:$0xf]  ;;  %v20399_v15 = vld [vmem:[#allocation15_spill] sm:$0xff]  ;;  %1170 = vst [vmem:[#allocation2 + $0x3a4] sm:$0xf] %v1169_v48 }
 0x2c6   :  { %v14435_v13 = vpop.f32.mrf.mxu0  ;;  %15351 = vmatpush3.bf16.msra.mxu0 %v16158_v36  ;;  %v14475_v26 = vpop.f32.mrf.mxu1 }
 0x2c7   :  { %v6690_v10 = vadd.f32 %v14434_v29, %v19307_v25  ;;  %15352 = vmatprep.subr.bf16.mxu0 %v16166_v50  ;;  %v16171_v25 = vld [vmem:[%s20349_s1 + $0xfc0] sm:$0xff]  }
 0x2c8   :  { %v14436_v39 = vpop.f32.mrf.mxu0  ;;  %v14476_v4 = vpop.f32.mrf.mxu1  ;;  %14867 = vmatpush3.bf16.msra.mxu1 %v16171_v25  ;;  %v16178_v25 = vld [vmem:[%s20349_s1 + $0x1078] sm:$0xff]  }
 0x2c9   :  { %v14437_v35 = vadd.f32 %v14436_v39, %v14435_v13  ;;  %v19505_v3 = vadd.f32 %v14474_v14, %v6690_v10  ;;  %8981 = vmatmul.mubr.bf16.gmra.mxu0 %v13044_v17  ;;  %v14477_v46 = vadd.f32 %v14476_v4, %v14475_v26  ;;  %14932 = vmatprep.subr.bf16.mxu1 %v16177_v19  ;;  %v1174_v13 = vld [vmem:[#allocation2 + $0x3ec] sm:$0xf]  ;;  %v9137_v14 = vld [vmem:[#allocation2 + $0x33c] sm:$0xff]  ;;  %v16183_v26 = vld [vmem:[%s20349_s1 + $0x10f0] sm:$0xff]  }
 0x2ca   :  { %v14438_v36 = vpop.f32.mrf.mxu0  ;;  %15353 = vmatpush3.bf16.msra.mxu0 %v16166_v50  ;;  %v14478_v22 = vpop.f32.mrf.mxu1  ;;  %v1180_v62 = vld [vmem:[#allocation2 + $0x314] sm:$0x8]  ;;  %v13265_v50 = vcombine.low %v9127_v42, %v19264_v16  ;;  %v1166_v17 = vsel %vm16652_vm9, %v20399_v15, %v1165_v49  ;;  %v1175_v39 = vsel %vm16652_vm9, %v18739_v51, %v1174_v13 }
 0x2cb   :  { %v6693_v28 = vadd.f32 %v14437_v35, %v19329_v54  ;;  %15354 = vmatprep.subr.bf16.mxu0 %v16169_v1  ;;  %v1181_v58 = vsel %vm16702_vm15, 0, %v1180_v62  ;;  %v16179_v54 = vld [vmem:[%s20349_s1 + $0x10f8] sm:$0xff]   ;;  %1167 = vst [vmem:[#allocation2 + $0x380] sm:$0xf] %v1166_v17  ;;  %v13275_v35 = vcombine.high %v9137_v14, %v19343_v43  ;;  %1176 = vst [vmem:[#allocation2 + $0x3ec] sm:$0xf] %v1175_v39 }
 0x2cc   :  { %v14439_v34 = vpop.f32.mrf.mxu0  ;;  %v14479_v61 = vpop.f32.mrf.mxu1  ;;  %1182 = vst [vmem:[#allocation2 + $0x314] sm:$0x8] %v1181_v58  ;;  %9961 = vmatmul.mubr.bf16.vlgmr.msra.gmra.mxu1 %v13265_v50  ;;  %v16180_v51 = vld [vmem:[%s20349_s1 + $0x10b0] sm:$0xff]   ;;  %v1192_v55 = vld [vmem:[#allocation2 + $0x3a4] sm:$0x8] }
 0x2cd   :  { %v14440_v44 = vadd.f32 %v14439_v34, %v14438_v36  ;;  %v19520_v40 = vadd.f32 %v14477_v46, %v6693_v28  ;;  %v14480_v37 = vadd.f32 %v14479_v61, %v14478_v22  ;;  %14933 = vmatpush3.bf16.msra.mxu1 %v16179_v54  ;;  %v16187_v36 = vld [vmem:[%s20349_s1 + $0x1128] sm:$0xff]   ;;  %v16173_v22 = vld [vmem:[#allocation2 + $0x338] ss:$36 sps:$4 sm:$0xff]   ;;  %9968 = vmatprep.mubr.bf16.mxu1 %v13275_v35  ;;  %v1193_v20 = vsel %vm16702_vm15, 0, %v1192_v55  ;;  %v16199_v55 = vld [vmem:[%s20349_s1 + $0x1110] sm:$0xff]  }
 0x2ce   :  { %v14441_v60 = vpop.f32.mrf.mxu0  ;;  %15355 = vmatpush3.bf16.msra.mxu0 %v16169_v1  ;;  %v14481_v0 = vpop.f32.mrf.mxu1  ;;  %v20401_v1 = vld [vmem:[#allocation17_spill] sm:$0xff]  ;;  %14934 = vmatprep.subr.bf16.mxu1 %v16181_v63  ;;  %v13274_v34 = vcombine.low %v9137_v14, %v19343_v43  ;;  %v16186_v63 = vld [vmem:[%s20349_s1 + $0x10a8] sm:$0xff]   ;;  %1194 = vst [vmem:[#allocation2 + $0x3a4] sm:$0x8] %v1193_v20 }
 0x2cf   :  { %v6698_v16 = vadd.f32 %v14440_v44, %v19348_v56  ;;  %14892 = vmatprep.subr.bf16.mxu0 %v16176_v24  ;;  %v1172_v53 = vsel %vm16652_vm9, %v20401_v1, %v1171_v41  ;;  %v16193_v1 = vld [vmem:[%s20349_s1 + $0x10e0] sm:$0xff]  }
 0x2d0   :  { %v14442_v29 = vpop.f32.mrf.mxu0  ;;  %v14482_v10 = vpop.f32.mrf.mxu1  ;;  %1173 = vst [vmem:[#allocation2 + $0x3c8] sm:$0xf] %v1172_v53  ;;  %v9147_v35 = vld [vmem:[#allocation2 + $0x384] sm:$0xff] }
 0x2d1   :  { %v14443_v42 = vadd.f32 %v14442_v29, %v14441_v60  ;;  %v19535_v56 = vadd.f32 %v14480_v37, %v6698_v16  ;;  %v14483_v19 = vadd.f32 %v14482_v10, %v14481_v0  ;;  %14935 = vmatpush3.bf16.msra.mxu1 %v16183_v26  ;;  %v16182_v60 = vld [vmem:[%s20349_s1 + $0x1070] sm:$0xff]   ;;  %v16191_v16 = vld [vmem:[%s20349_s1 + $0x1120] sm:$0xff]   ;;  %v16188_v26 = vld [vmem:[%s20349_s1 + $0x1068] sm:$0xff]  }
 0x2d2   :  { %14936 = vmatprep.subr.bf16.mxu1 %v16187_v36  ;;  %v1189_v49 = vld [vmem:[#allocation2 + $0x380] sm:$0x8]  ;;  %v1198_v41 = vld [vmem:[#allocation2 + $0x3ec] sm:$0x8]  ;;  %v13283_v36 = vcombine.low %v9147_v35, %v19387_v5 }
 0x2d3   :  { %v6701_v46 = vadd.f32 %v14443_v42, %v19361_v38  ;;  %v16172_v24 = vld [vmem:[#allocation2 + $0x2f0] ss:$36 sps:$4 sm:$0xff]   ;;  %v16189_v38 = vld [vmem:[%s20349_s1 + $0x10e8] sm:$0xff]   ;;  %v1199_v10 = vsel %vm16702_vm15, 0, %v1198_v41 }
 0x2d4   :  { %15356 = vmatprep.mubr.bf16.mxu0 %v16172_v24  ;;  %9969 = vmatmul.mubr.bf16.gmra.mxu1 %v13274_v34  ;;  %1200 = vst [vmem:[#allocation2 + $0x3ec] sm:$0x8] %v1199_v10  ;;  %v19628_v41 = vld [vmem:[%s20348_s0 + $0x48] sm:$0xf] }
 0x2d5   :  { %v19558_v44 = vadd.f32 %v14483_v19, %v6701_v46  ;;  %15357 = vmatmul.mubr.bf16.vlgmr.msra.gmra.mxu0 %v16173_v22  ;;  %14937 = vmatpush3.bf16.msra.mxu1 %v16189_v38  ;;  %v13284_v46 = vcombine.high %v9147_v35, %v19387_v5  ;;  %v16192_v5 = vld [vmem:[%s20349_s1 + $0x1060] sm:$0xff]   ;;  %v16194_v38 = vld [vmem:[%s20349_s1 + $0x1098] sm:$0xff]   ;;  %983 = vst [vmem:[#allocation2 + $0x3f4] sm:$0xf] %v19628_v41  ;;  %1033 = vst [vmem:[#allocation2 + $0x3fc] sm:$0xf] %v19628_v41 }
 0x2d6   :  { %v14444_v4 = vpop.f32.mrf.mxu0  ;;  %v14484_v28 = vpop.f32.mrf.mxu1  ;;  %14893 = vmatpush3.bf16.msra.mxu0 %v16178_v25  ;;  %14938 = vmatprep.subr.bf16.mxu1 %v16191_v16  ;;  %v16190_v25 = vld [vmem:[%s20349_s1 + $0x10a0] sm:$0xff]  }
 0x2d7   :  { %14894 = vmatprep.subr.bf16.mxu0 %v16180_v51  ;;  %v1195_v48 = vld [vmem:[#allocation2 + $0x3c8] sm:$0x8]  ;;  %9976 = vmatprep.mubr.bf16.mxu1 %v13284_v46 }
 0x2d8   :  { %v14445_v62 = vpop.f32.mrf.mxu0  ;;  %v14485_v50 = vpop.f32.mrf.mxu1  ;;  %v1196_v42 = vsel %vm16702_vm15, 0, %v1195_v48  ;;  %v16205_v46 = vld [vmem:[%s20349_s1 + $0x1088] sm:$0xff]  }
 0x2d9   :  { %v14446_v58 = vadd.f32 %v14445_v62, %v14444_v4  ;;  %v14486_v54 = vadd.f32 %v14485_v50, %v14484_v28  ;;  %1197 = vst [vmem:[#allocation2 + $0x3c8] sm:$0x8] %v1196_v42  ;;  %14939 = vmatpush3.bf16.msra.mxu1 %v16193_v1  ;;  %v19639_v42 = vshll.u32 %v19628_v41, 16 }
 0x2da   :  { %v14447_v61 = vpop.f32.mrf.mxu0  ;;  %v14487_v43 = vpop.f32.mrf.mxu1  ;;  %14895 = vmatpush3.bf16.msra.mxu0 %v16182_v60 }
 0x2db   :  { %v6706_v37 = vadd.f32 %v14446_v58, %v19373_v45  ;;  %v1190_v45 = vsel %vm16702_vm15, 0, %v1189_v49  ;;  %14896 = vmatprep.subr.bf16.mxu0 %v16186_v63  ;;  %v16197_v58 = vld [vmem:[%s20349_s1 + $0x10d8] sm:$0xff]  }
 0x2dc   :  { %v14448_v0 = vpop.f32.mrf.mxu0  ;;  %v14488_v15 = vpop.f32.mrf.mxu1  ;;  %1191 = vst [vmem:[#allocation2 + $0x380] sm:$0x8] %v1190_v45  ;;  %9977 = vmatmul.mubr.bf16.gmra.mxu1 %v13283_v36 }
 0x2dd   :  { %v14449_v29 = vadd.f32 %v14448_v0, %v14447_v61  ;;  %v19573_v17 = vadd.f32 %v14486_v54, %v6706_v37  ;;  %v14489_v14 = vadd.f32 %v14488_v15, %v14487_v43  ;;  %v16196_v15 = vld [vmem:[%s20349_s1 + $0x1058] sm:$0xff]  }
 0x2de   :  { %v14450_v13 = vpop.f32.mrf.mxu0  ;;  %v14490_v39 = vpop.f32.mrf.mxu1  ;;  %14897 = vmatpush3.bf16.msra.mxu0 %v16188_v26 }
 0x2df   :  { %v6709_v53 = vadd.f32 %v14449_v29, %v19385_v2  ;;  %v16195_v2 = vld [vmem:[%s20349_s1 + $0x1118] sm:$0xff]   ;;  %14898 = vmatprep.subr.bf16.mxu0 %v16190_v25  ;;  %v16206_v25 = vld [vmem:[%s20349_s1 + $0x1108] sm:$0xff]  }
 0x2e0   :  { %v14451_v4 = vpop.f32.mrf.mxu0  ;;  %v14491_v28 = vpop.f32.mrf.mxu1  ;;  %14940 = vmatprep.subr.bf16.mxu1 %v16195_v2  ;;  %v16185_v63 = vld [vmem:[#allocation2 + $0x3c8] ss:$36 sps:$4 sm:$0xff]  }
 0x2e1   :  { %v14452_v19 = vadd.f32 %v14451_v4, %v14450_v13  ;;  %v19595_v22 = vadd.f32 %v14489_v14, %v6709_v53  ;;  %v14492_v62 = vadd.f32 %v14491_v28, %v14490_v39  ;;  %14941 = vmatpush3.bf16.msra.mxu1 %v16197_v58  ;;  %v16200_v53 = vld [vmem:[%s20349_s1 + $0x1050] sm:$0xff]   ;;  %v16208_v2 = vld [vmem:[%s20349_s1 + $0x10c8] sm:$0xff]  }
 0x2e2   :  { %v14453_v51 = vpop.f32.mrf.mxu0  ;;  %v14493_v34 = vpop.f32.mrf.mxu1  ;;  %14899 = vmatpush3.bf16.msra.mxu0 %v16192_v5  ;;  %14942 = vmatprep.subr.bf16.mxu1 %v16199_v55  ;;  %v949_v39 = vld [vmem:[#allocation2 + $0x3f0] sm:$0xf]  ;;  %v16210_v5 = vld [vmem:[%s20349_s1 + $0x1100] sm:$0xff]  }
 0x2e3   :  { %v6714_v24 = vadd.f32 %v14452_v19, %v19472_v8  ;;  %v16184_v60 = vld [vmem:[#allocation2 + $0x380] ss:$36 sps:$4 sm:$0xff]   ;;  %14900 = vmatprep.subr.bf16.mxu0 %v16194_v38 }
 0x2e4   :  { %v14454_v50 = vpop.f32.mrf.mxu0  ;;  %v14494_v54 = vpop.f32.mrf.mxu1  ;;  %15360 = vmatprep.mubr.bf16.mxu0 %v16184_v60  ;;  %v16209_v38 = vld [vmem:[%s20349_s1 + $0x1080] sm:$0xff]  }
 0x2e5   :  { %v14455_v61 = vadd.f32 %v14454_v50, %v14453_v51  ;;  %v6779_v8 = vadd.f32 %v14492_v62, %v6714_v24  ;;  %v14495_v37 = vadd.f32 %v14494_v54, %v14493_v34  ;;  %15361 = vmatmul.mubr.bf16.gmra.mxu0 %v16185_v63  ;;  %v16207_v62 = vld [vmem:[%s20349_s1 + $0x1048] sm:$0xff]   ;;  %v16212_v54 = vld [vmem:[%s20349_s1 + $0x10c0] sm:$0xff]  }
 0x2e6   :  { %v15310_v43 = vpop.f32.mrf.mxu0  ;;  %v14524_v49 = vpop.f32.mrf.mxu1  ;;  %14901 = vmatpush3.bf16.msra.mxu0 %v16196_v15  ;;  %v16211_v63 = vld [vmem:[%s20349_s1 + $0x1040] sm:$0xff]  }
 0x2e7   :  { %v6717_v16 = vadd.f32 %v14455_v61, %v19488_v12  ;;  %v6828_v0 = vadd.f32 %v15310_v43, %v19535_v56  ;;  %v16201_v56 = vld [vmem:[%s20349_s1 + $0x10d0] sm:$0xff]  }
 0x2e8   :  { %v6819_v29 = vpop.f32.mrf.mxu0  ;;  %v14525_v12 = vpop.f32.mrf.mxu1  ;;  %14943 = vmatpush3.bf16.msra.mxu1 %v16201_v56 }
 0x2e9   :  { %v19619_v45 = vadd.f32 %v6828_v0, %v19159_v18  ;;  %v6820_v20 = vadd.f32 %v6819_v29, %v19505_v3  ;;  %v6782_v48 = vadd.f32 %v14495_v37, %v6717_v16  ;;  %v19630_v14 = vadd.f32 %v14525_v12, %v14524_v49  ;;  %v16198_v18 = vld [vmem:[%s20349_s1 + $0x1090] sm:$0xff]   ;;  %14944 = vmatprep.subr.bf16.mxu1 %v16206_v25  ;;  %v19697_v37 = vld [vmem:[#allocation2 + $0x320] sm:$0xff]  ;;  %v16217_v29 = vld [vmem:[%s20349_s1 + $0x11b8] sm:$0xff]  }
 0x2ea   :  { %v15311_v13 = vpop.f32.mrf.mxu0  ;;  %v19636_v3 = vshrl.u32 %v19628_v41, 16  ;;  %v19647_v1 = vpop.f32.mrf.mxu1  ;;  %14902 = vmatprep.subr.bf16.mxu0 %v16198_v18  ;;  %v19732_v18 = vld [vmem:[#allocation2 + $0x344] sm:$0xff] }
 0x2eb   :  { %v19644_v10 = vadd.f32 %v6820_v20, %v19119_v31  ;;  %v6831_v26 = vadd.f32 %v15311_v13, %v19558_v44  ;;  %14903 = vmatpush3.bf16.msra.mxu0 %v16200_v53  ;;  %v13519_v25 = vcombine.low %v19697_v37, %v19732_v18 }
 0x2ec   :  { %v6822_v35 = vpop.f32.mrf.mxu0  ;;  %v922_v4 = vrot.slane %v19636_v3, 7  ;;  %v19660_v36 = vpop.f32.mrf.mxu1  ;;  %14945 = vmatpush3.bf16.msra.mxu1 %v16208_v2  ;;  %14904 = vmatprep.subr.bf16.mxu0 %v16205_v46  ;;  %v16222_v46 = vld [vmem:[%s20349_s1 + $0x1170] sm:$0xff]  }
 0x2ed   :  { %v19657_v31 = vadd.f32 %v6831_v26, %v19175_v9  ;;  %v6823_v44 = vadd.f32 %v6822_v35, %v19520_v40  ;;  %14946 = vmatprep.subr.bf16.mxu1 %v16210_v5  ;;  %v19734_v26 = vld [vmem:[#allocation2 + $0x368] sm:$0xff] }
 0x2ee   :  { %v15314_v19 = vpop.f32.mrf.mxu0  ;;  %v925_v28 = vor.u32 %v19639_v42, %v922_v4  ;;  %v14530_v51 = vpop.f32.mrf.mxu1  ;;  %v19740_v35 = vld [vmem:[#allocation2 + $0x304] sm:$0xff]  ;;  %v13276_v2 = vcombine.low %v19732_v18, %v19734_v26 }
 0x2ef   :  { %v19670_v9 = vadd.f32 %v6823_v44, %v19140_v27  ;;  %v6844_v40 = vadd.f32 %v15314_v19, %v6779_v8  ;;  %14905 = vmatpush3.bf16.msra.mxu0 %v16207_v62  ;;  %v13520_v44 = vcombine.high %v19697_v37, %v19732_v18  ;;  %v16227_v19 = vld [vmem:[%s20349_s1 + $0x11a8] sm:$0xff]   ;;  %v13270_v5 = vcombine.high %v19740_v35, %v19418_v11 }
 0x2f0   :  { %v6835_v24 = vpop.f32.mrf.mxu0  ;;  %v950_v34 = vsel %vm16633_vm4, %v925_v28, %v949_v39  ;;  %v14531_v50 = vpop.f32.mrf.mxu1  ;;  %14947 = vmatpush3.bf16.msra.mxu1 %v16212_v54  ;;  %14906 = vmatprep.subr.bf16.mxu0 %v16209_v38  ;;  %v13277_v39 = vcombine.high %v19732_v18, %v19734_v26  ;;  %v16230_v38 = vld [vmem:[%s20349_s1 + $0x11a0] sm:$0xff]   ;;  %v9153_v54 = vld [vmem:[#allocation2 + $0x3b0] sm:$0xff] }
 0x2f1   :  { %v19681_v58 = vadd.f32 %v6844_v40, %v19271_v32  ;;  %v6836_v27 = vadd.f32 %v6835_v24, %v19573_v17  ;;  %951 = vst [vmem:[#allocation2 + $0x3f0] sm:$0xf] %v950_v34  ;;  %v19687_v47 = vadd.f32 %v14531_v50, %v14530_v51  ;;  %v9128_v32 = vld [vmem:[#allocation2 + $0x2fc] sm:$0xff]  ;;  %v16229_v40 = vld [vmem:[%s20349_s1 + $0x1168] sm:$0xff]   ;;  %v984_v51 = vrot.slane %v19636_v3, 4 }
 0x2f2   :  { %v15315_v61 = vpop.f32.mrf.mxu0  ;;  %v19695_v60 = vpop.f32.mrf.mxu1  ;;  %v13268_v16 = vcombine.high %v9128_v32, %v19697_v37  ;;  %v16204_v34 = vld [vmem:[#allocation2 + $0x3d0] ss:$36 sps:$4 sm:$0xff]  }
 0x2f3   :  { %v19693_v8 = vadd.f32 %v6836_v27, %v19262_v30  ;;  %v6847_v17 = vadd.f32 %v15315_v61, %v6782_v48  ;;  %v19708_v30 = vld [vmem:[%s20349_s1 + $0x11f8] sm:$0xff]   ;;  %v13267_v48 = vcombine.low %v9128_v32, %v19697_v37  ;;  %14907 = vmatpush3.bf16.msra.mxu0 %v16211_v63  ;;  %v985_v27 = vrot.slane %v19639_v42, 5  ;;  %v19768_v61 = vld [vmem:[#allocation2 + $0x38c] sm:$0xff]  ;;  %9984 = vmatprep.mubr.bf16.mxu1 %v16204_v34 }
 0x2f4   :  { %v6838_v43 = vpop.f32.mrf.mxu0  ;;  %v19703_v0 = vpop.f32.mrf.mxu1  ;;  %10025 = vmatprep.mubr.bf16.mxu0 %v13268_v16  ;;  %15364 = vmatprep.subr.bf16.mxu1 %v19708_v30  ;;  %v19773_v11 = vld [vmem:[#allocation2 + $0x34c] sm:$0xff]  ;;  %v13528_v63 = vcombine.low %v19734_v26, %v19768_v61  ;;  %v13529_v16 = vcombine.high %v19734_v26, %v19768_v61  ;;  %v16330_v26 = vld [vmem:[%s20349_s1 + $0x13d8] sm:$0xff]  }
 0x2f5   :  { %v19711_v49 = vadd.f32 %v6847_v17, %v19300_v59  ;;  %v6839_v55 = vadd.f32 %v6838_v43, %v19595_v22  ;;  %v16219_v22 = vld [vmem:[%s20349_s1 + $0x1178] sm:$0xff]   ;;  %14972 = vmatprep.subr.bf16.mxu0 %v16217_v29  ;;  %v13286_v17 = vcombine.high %v19768_v61, %v9153_v54  ;;  %v986_v29 = vor.u32 %v985_v27, %v984_v51  ;;  %v16240_v34 = vld [vmem:[%s20349_s1 + $0x1190] sm:$0xff]   ;;  %v16318_v37 = vld [vmem:[%s20349_s1 + $0x1328] sm:$0xff]  }
 0x2f6   :  { %v14536_v15 = vpop.f32.mrf.mxu1  ;;  %10026 = vmatmul.mubr.bf16.vlgmr.msra.gmra.mxu0 %v13267_v48  ;;  %v1055_v51 = vld [vmem:[#allocation2 + $0x3fc] sm:$0x1] }
 0x2f7   :  { %v19719_v20 = vadd.f32 %v6839_v55, %v19286_v6  ;;  %v16220_v6 = vld [vmem:[%s20349_s1 + $0x11b0] sm:$0xff]   ;;  %14973 = vmatpush3.bf16.msra.mxu0 %v16219_v22  ;;  %10033 = vmatprep.mubr.bf16.mxu0 %v13277_v39  ;;  %v16232_v55 = vld [vmem:[%s20349_s1 + $0x1160] sm:$0xff]   ;;  %v11500_v39 = vrot.slane %v19628_v41, 9  ;;  %v16239_v41 = vld [vmem:[%s20349_s1 + $0x1158] sm:$0xff]  }
 0x2f8   :  { %v973_v12 = vld [vmem:[#allocation2 + $0x3f0] sm:$0x1]  ;;  %v14537_v56 = vpop.f32.mrf.mxu1  ;;  %14974 = vmatprep.subr.bf16.mxu0 %v16220_v6  ;;  %v13285_v6 = vcombine.low %v19768_v61, %v9153_v54  ;;  %v16331_v61 = vld [vmem:[%s20349_s1 + $0x1318] sm:$0xff]  }
 0x2f9   :  { %v974_v59 = vsel %vm16644_vm7, 0, %v973_v12  ;;  %v19727_v13 = vadd.f32 %v14537_v56, %v14536_v15  ;;  %v16237_v12 = vld [vmem:[%s20349_s1 + $0x1198] sm:$0xff]  }
 0x2fa   :  { %975 = vst [vmem:[#allocation2 + $0x3f0] sm:$0x1] %v974_v59  ;;  %v19736_v53 = vpop.f32.mrf.mxu1  ;;  %v16383_v59 = vld [vmem:[#allocation2 + $0x328] sm:$0xff] }
 0x2fb   :  { %14975 = vmatpush3.bf16.msra.mxu0 %v16222_v46  ;;  %v13269_v22 = vcombine.low %v19740_v35, %v16383_v59  ;;  %v987_v35 = vrot.slane %v986_v29, 4  ;;  %v16228_v29 = vld [vmem:[%s20349_s1 + $0x11e8] sm:$0xff]  }
 0x2fc   :  { %v19742_v4 = vpop.f32.mrf.mxu1  ;;  %14976 = vmatprep.subr.bf16.mxu0 %v16227_v19 }
 0x2fe   :  { %v14542_v28 = vpop.f32.mrf.mxu1  ;;  %10034 = vmatmul.mubr.bf16.gmra.mxu0 %v13276_v2  ;;  %v13279_v2 = vcombine.high %v19773_v11, %v19448_v33 }
 0x2ff   :  { %14977 = vmatpush3.bf16.msra.mxu0 %v16229_v40  ;;  %10041 = vmatprep.mubr.bf16.mxu0 %v13286_v17  ;;  %v19798_v40 = vld [vmem:[%s20348_s0 + $0x4c] sm:$0x1] }
 0x300   :  { %v14543_v62 = vpop.f32.mrf.mxu1  ;;  %14978 = vmatprep.subr.bf16.mxu0 %v16230_v38  ;;  %v989_v33 = vshll.u32 %v19798_v40, 16  ;;  %v1070_v27 = vrot.slane %v19798_v40, 5 }
 0x301   :  { %v16202_v24 = vld [vmem:[#allocation2 + $0x3cc] ss:$36 sps:$4 sm:$0xff]   ;;  %v19763_v50 = vadd.f32 %v14543_v62, %v14542_v28 }
 0x302   :  { %v19770_v32 = vpop.f32.mrf.mxu1  ;;  %9985 = vmatmul.mubr.bf16.gmra.mxu1 %v16202_v24  ;;  %v16221_v28 = vld [vmem:[%s20349_s1 + $0x11f0] sm:$0xff]  }
 0x303   :  { %10090 = vmatprep.mubr.bf16.mxu1 %v13270_v5  ;;  %14979 = vmatpush3.bf16.msra.mxu0 %v16232_v55  ;;  %v1056_v5 = vsel %vm16644_vm7, 0, %v1055_v51  ;;  %v14529_v55 = vadd.f32 %v19660_v36, %v19647_v1 }
 0x304   :  { %v19775_v43 = vpop.f32.mrf.mxu1  ;;  %14980 = vmatprep.subr.bf16.mxu0 %v16237_v12  ;;  %1057 = vst [vmem:[#allocation2 + $0x3fc] sm:$0x1] %v1056_v5  ;;  %v991_v12 = vrot.slane %v989_v33, 5 }
 0x306   :  { %v14564_v15 = vpop.f32.mrf.mxu0  ;;  %v14604_v48 = vpop.f32.mrf.mxu1  ;;  %10042 = vmatmul.mubr.bf16.gmra.mxu0 %v13285_v6  ;;  %v16242_v6 = vld [vmem:[%s20349_s1 + $0x1150] sm:$0xff]  }
 0x307   :  { %14981 = vmatpush3.bf16.msra.mxu0 %v16239_v41 }
 0x308   :  { %v14565_v56 = vpop.f32.mrf.mxu0  ;;  %v14605_v19 = vpop.f32.mrf.mxu1  ;;  %14982 = vmatprep.subr.bf16.mxu0 %v16240_v34 }
 0x309   :  { %v14566_v46 = vadd.f32 %v14565_v56, %v14564_v15  ;;  %v14606_v24 = vadd.f32 %v14605_v19, %v14604_v48  ;;  %v19816_v15 = vld [vmem:[#allocation2 + $0x394] sm:$0xff]  ;;  %v1071_v56 = vsel %vm16684_vm13, %v11500_v39, %v1070_v27  ;;  %v992_v39 = vsel %vm16669_vm11, %v987_v35, %v991_v12  ;;  %v16231_v35 = vld [vmem:[%s20349_s1 + $0x11e0] sm:$0xff]  }
 0x30a   :  { %v14567_v62 = vpop.f32.mrf.mxu0  ;;  %v14607_v38 = vpop.f32.mrf.mxu1  ;;  %10091 = vmatmul.mubr.bf16.vlgmr.msra.gmra.mxu1 %v13269_v22  ;;  %1080 = vst [vmem:[#allocation2 + $0x404] sm:$0xf] %v1071_v56  ;;  %1144 = vst [vmem:[#allocation2 + $0x40c] sm:$0xf] %v1071_v56  ;;  %v13288_v34 = vcombine.high %v19816_v15, %v19483_v23  ;;  %v14535_v23 = vadd.f32 %v19703_v0, %v19695_v60 }
 0x30b   :  { %v7760_v54 = vadd.f32 %v14566_v46, %v19630_v14  ;;  %15365 = vmatpush3.bf16.msra.mxu1 %v19708_v30  ;;  %10098 = vmatprep.mubr.bf16.mxu1 %v13279_v2  ;;  %1001 = vst [vmem:[#allocation2 + $0x3f8] sm:$0xf] %v992_v39  ;;  %1065 = vst [vmem:[#allocation2 + $0x400] sm:$0xf] %v992_v39  ;;  %v16248_v30 = vld [vmem:[%s20349_s1 + $0x1188] sm:$0xff]  }
 0x30c   :  { %v14568_v17 = vpop.f32.mrf.mxu0  ;;  %v14608_v14 = vpop.f32.mrf.mxu1  ;;  %15366 = vmatprep.subr.bf16.mxu1 %v16221_v28  ;;  %1112 = vst [vmem:[#allocation2 + $0x408] sm:$0xf] %v992_v39  ;;  %14983 = vmatpush3.bf16.msra.mxu0 %v16242_v6 }
 0x30d   :  { %v14569_v59 = vadd.f32 %v14568_v17, %v14567_v62  ;;  %v19823_v1 = vadd.f32 %v14606_v24, %v7760_v54  ;;  %v14609_v22 = vadd.f32 %v14608_v14, %v14607_v38  ;;  %v16384_v62 = vld [vmem:[#allocation2 + $0x370] sm:$0xff]  ;;  %14984 = vmatprep.subr.bf16.mxu0 %v16248_v30  ;;  %v16385_v30 = vld [vmem:[#allocation2 + $0x3b8] sm:$0xff] }
 0x30e   :  { %v14570_v36 = vpop.f32.mrf.mxu0  ;;  %v14610_v51 = vpop.f32.mrf.mxu1  ;;  %v13278_v24 = vcombine.low %v19773_v11, %v16384_v62  ;;  %v16250_v11 = vld [vmem:[%s20349_s1 + $0x1148] sm:$0xff]  }
 0x30f   :  { %v7763_v19 = vadd.f32 %v14569_v59, %v14529_v55  ;;  %15367 = vmatpush3.bf16.msra.mxu1 %v16221_v28  ;;  %v16251_v28 = vld [vmem:[%s20349_s1 + $0x1180] sm:$0xff]  }
 0x310   :  { %v14571_v2 = vpop.f32.mrf.mxu0  ;;  %v14611_v27 = vpop.f32.mrf.mxu1  ;;  %15368 = vmatprep.subr.bf16.mxu1 %v16228_v29  ;;  %14985 = vmatpush3.bf16.msra.mxu0 %v16250_v11 }
 0x311   :  { %v19834_v41 = vadd.f32 %v14609_v22, %v7763_v19  ;;  %v14572_v5 = vadd.f32 %v14571_v2, %v14570_v36  ;;  %v14612_v54 = vadd.f32 %v14611_v27, %v14610_v51  ;;  %v1102_v48 = vld [vmem:[#allocation2 + $0x404] sm:$0x8]  ;;  %14986 = vmatprep.subr.bf16.mxu0 %v16251_v28  ;;  %v16257_v19 = vld [vmem:[%s20349_s1 + $0x1278] sm:$0xff]   ;;  %v13287_v2 = vcombine.low %v19816_v15, %v16385_v30  ;;  %v19877_v28 = vld [vmem:[#allocation2 + $0x330] sm:$0xff] }
 0x312   :  { %v14573_v38 = vpop.f32.mrf.mxu0  ;;  %v14613_v55 = vpop.f32.mrf.mxu1  ;;  %10099 = vmatmul.mubr.bf16.gmra.mxu1 %v13278_v24  ;;  %v1103_v36 = vsel %vm16702_vm15, 0, %v1102_v48  ;;  %v16253_v22 = vld [vmem:[%s20349_s1 + $0x1140] sm:$0xff]   ;;  %v1023_v0 = vld [vmem:[#allocation2 + $0x3f8] sm:$0x8] }
 0x313   :  { %v7768_v17 = vadd.f32 %v14572_v5, %v19687_v47  ;;  %15369 = vmatpush3.bf16.msra.mxu1 %v16228_v29  ;;  %10106 = vmatprep.mubr.bf16.mxu1 %v13288_v34  ;;  %v16238_v47 = vld [vmem:[%s20349_s1 + $0x11d8] sm:$0xff]   ;;  %1104 = vst [vmem:[#allocation2 + $0x404] sm:$0x8] %v1103_v36  ;;  %v1024_v39 = vsel %vm16702_vm15, 0, %v1023_v0  ;;  %v1146_v36 = vrot.slane %v19639_v42, 6  ;;  %v1152_v0 = vrot.slane %v989_v33, 6 }
 0x314   :  { %v14574_v12 = vpop.f32.mrf.mxu0  ;;  %v14614_v14 = vpop.f32.mrf.mxu1  ;;  %15370 = vmatprep.subr.bf16.mxu1 %v16231_v35  ;;  %1025 = vst [vmem:[#allocation2 + $0x3f8] sm:$0x8] %v1024_v39  ;;  %14987 = vmatpush3.bf16.msra.mxu0 %v16253_v22  ;;  %v16256_v33 = vld [vmem:[#allocation2 + $0x314] ss:$36 sps:$4 sm:$0xff]  }
 0x315   :  { %v19850_v56 = vadd.f32 %v14612_v54, %v7768_v17  ;;  %v14575_v59 = vadd.f32 %v14574_v12, %v14573_v38  ;;  %v14615_v60 = vadd.f32 %v14614_v14, %v14613_v55  ;;  %v16241_v38 = vld [vmem:[%s20349_s1 + $0x11d0] sm:$0xff]   ;;  %v1149_v17 = vshrl.u32 %v19798_v40, 16  ;;  %15024 = vmatprep.subr.bf16.mxu0 %v16257_v19  ;;  %v16245_v19 = vld [vmem:[#allocation2 + $0x3dc] ss:$36 sps:$4 sm:$0xff]  }
 0x316   :  { %v14576_v6 = vpop.f32.mrf.mxu0  ;;  %v14616_v29 = vpop.f32.mrf.mxu1  ;;  %v14541_v55 = vadd.f32 %v19742_v4, %v19736_v53  ;;  %v1145_v14 = vrot.slane %v19636_v3, 5  ;;  %v16249_v53 = vld [vmem:[%s20349_s1 + $0x11c8] sm:$0xff]  }
 0x317   :  { %v7771_v46 = vadd.f32 %v14575_v59, %v14535_v23  ;;  %15371 = vmatpush3.bf16.msra.mxu1 %v16231_v35  ;;  %v19875_v35 = vld [vmem:[#allocation2 + $0x30c] sm:$0xff]  ;;  %v19881_v59 = vld [vmem:[#allocation2 + $0x3d4] sm:$0xff] }
 0x318   :  { %v14577_v51 = vpop.f32.mrf.mxu0  ;;  %v14617_v5 = vpop.f32.mrf.mxu1  ;;  %15372 = vmatprep.subr.bf16.mxu1 %v16238_v47  ;;  %v13272_v3 = vcombine.high %v19875_v35, %v19877_v28 }
 0x319   :  { %v19866_v62 = vadd.f32 %v14615_v60, %v7771_v46  ;;  %v14578_v24 = vadd.f32 %v14577_v51, %v14576_v6  ;;  %v14618_v34 = vadd.f32 %v14617_v5, %v14616_v29  ;;  %v1151_v46 = vrot.slane %v1149_v17, 5 }
 0x31a   :  { %v14579_v27 = vpop.f32.mrf.mxu0  ;;  %v14619_v11 = vpop.f32.mrf.mxu1  ;;  %10107 = vmatmul.mubr.bf16.gmra.mxu1 %v13287_v2  ;;  %v1147_v2 = vor.u32 %v1146_v36, %v1145_v14  ;;  %v16259_v36 = vld [vmem:[#allocation2 + $0x35c] ss:$36 sps:$4 sm:$0xff]  }
 0x31b   :  { %v7776_v54 = vadd.f32 %v14578_v24, %v19727_v13  ;;  %15373 = vmatpush3.bf16.msra.mxu1 %v16238_v47  ;;  %v16247_v13 = vld [vmem:[#allocation2 + $0x3e0] ss:$36 sps:$4 sm:$0xff]   ;;  %v19890_v47 = vld [vmem:[#allocation2 + $0x3f8] sm:$0xff] }
 0x31c   :  { %v14580_v15 = vpop.f32.mrf.mxu0  ;;  %v14620_v48 = vpop.f32.mrf.mxu1  ;;  %15374 = vmatprep.subr.bf16.mxu1 %v16241_v38  ;;  %10114 = vmatprep.mubr.bf16.mxu1 %v16247_v13  ;;  %v13294_v29 = vcombine.low %v19881_v59, %v19890_v47  ;;  %v13295_v39 = vcombine.high %v19881_v59, %v19890_v47 }
 0x31d   :  { %v19879_v12 = vadd.f32 %v14618_v34, %v7776_v54  ;;  %v14581_v23 = vadd.f32 %v14580_v15, %v14579_v27  ;;  %v14621_v6 = vadd.f32 %v14620_v48, %v14619_v11  ;;  %v16252_v27 = vld [vmem:[%s20349_s1 + $0x11c0] sm:$0xff]   ;;  %v1148_v48 = vrot.slane %v1147_v2, 4 }
 0x31e   :  { %v14582_v22 = vpop.f32.mrf.mxu0  ;;  %v14622_v60 = vpop.f32.mrf.mxu1  ;;  %10049 = vmatprep.mubr.bf16.mxu0 %v13295_v39 }
 0x31f   :  { %v7779_v4 = vadd.f32 %v14581_v23, %v14541_v55  ;;  %15375 = vmatpush3.bf16.msra.mxu1 %v16241_v38  ;;  %10050 = vmatmul.mubr.bf16.gmra.mxu0 %v13294_v29  ;;  %v14547_v38 = vadd.f32 %v19775_v43, %v19770_v32  ;;  %v16258_v23 = vld [vmem:[%s20349_s1 + $0x12f8] sm:$0xff]  }
 0x320   :  { %v14583_v42 = vpop.f32.mrf.mxu0  ;;  %v14623_v40 = vpop.f32.mrf.mxu1  ;;  %15376 = vmatprep.subr.bf16.mxu1 %v16249_v53  ;;  %10155 = vmatprep.mubr.bf16.mxu0 %v13272_v3  ;;  %v16260_v32 = vld [vmem:[%s20349_s1 + $0x1238] sm:$0xff]  }
 0x321   :  { %v19898_v51 = vadd.f32 %v14621_v6, %v7779_v4  ;;  %v14584_v30 = vadd.f32 %v14583_v42, %v14582_v22  ;;  %v14624_v5 = vadd.f32 %v14623_v40, %v14622_v60  ;;  %v19914_v43 = vld [vmem:[#allocation2 + $0x378] sm:$0xff]  ;;  %v13271_v4 = vcombine.low %v19875_v35, %v19877_v28  ;;  %v16262_v42 = vld [vmem:[%s20349_s1 + $0x1270] sm:$0xff]  }
 0x322   :  { %v14585_v24 = vpop.f32.mrf.mxu0  ;;  %v14625_v54 = vpop.f32.mrf.mxu1  ;;  %10115 = vmatmul.mubr.bf16.gmra.mxu1 %v16245_v19  ;;  %v19916_v22 = vld [vmem:[#allocation2 + $0x39c] sm:$0xff]  ;;  %v16263_v35 = vld [vmem:[%s20349_s1 + $0x12f0] sm:$0xff]  }
 0x323   :  { %v7784_v34 = vadd.f32 %v14584_v30, %v19763_v50  ;;  %15377 = vmatpush3.bf16.msra.mxu1 %v16249_v53  ;;  %15380 = vmatprep.mubr.bf16.mxu1 %v16256_v33  ;;  %v1153_v50 = vor.u32 %v1152_v0, %v1151_v46  ;;  %v16261_v60 = vld [vmem:[%s20349_s1 + $0x12b8] sm:$0xff]   ;;  %v13532_v46 = vcombine.low %v19914_v43, %v19916_v22  ;;  %v16264_v33 = vld [vmem:[%s20349_s1 + $0x1230] sm:$0xff]  }
 0x324   :  { %v14586_v11 = vpop.f32.mrf.mxu0  ;;  %v14626_v55 = vpop.f32.mrf.mxu1  ;;  %15378 = vmatprep.subr.bf16.mxu1 %v16252_v27  ;;  %v19925_v0 = vld [vmem:[#allocation2 + $0x354] sm:$0xff] }
 0x325   :  { %v19906_v17 = vadd.f32 %v14624_v5, %v7784_v34  ;;  %v14587_v15 = vadd.f32 %v14586_v11, %v14585_v24  ;;  %v14627_v13 = vadd.f32 %v14626_v55, %v14625_v54  ;;  %v1154_v30 = vsel %vm17110_vm2, %v1148_v48, %v1153_v50  ;;  %v16282_v34 = vld [vmem:[#allocation2 + $0x3a4] ss:$36 sps:$4 sm:$0xff]   ;;  %v1177_v54 = vld [vmem:[#allocation2 + $0x410] sm:$0xf] }
 0x326   :  { %v14644_v14 = vpop.f32.mrf.mxu0  ;;  %v19918_v53 = vpop.f32.mrf.mxu1  ;;  %v13281_v2 = vcombine.high %v19925_v0, %v19914_v43 }
 0x327   :  { %v7787_v6 = vadd.f32 %v14587_v15, %v14547_v38  ;;  %15379 = vmatpush3.bf16.msra.mxu1 %v16252_v27  ;;  %10156 = vmatmul.mubr.bf16.vlgmr.msra.gmra.mxu0 %v13271_v4  ;;  %v16265_v27 = vld [vmem:[%s20349_s1 + $0x12b0] sm:$0xff]   ;;  %v1178_v38 = vsel %vm16652_vm9, %v1154_v30, %v1177_v54  ;;  %v16272_v4 = vld [vmem:[%s20349_s1 + $0x1260] sm:$0xff]  }
 0x328   :  { %v14645_v3 = vpop.f32.mrf.mxu0  ;;  %v7954_v19 = vpop.f32.mrf.mxu1  ;;  %15064 = vmatprep.subr.bf16.mxu1 %v16258_v23  ;;  %15025 = vmatpush3.bf16.msra.mxu0 %v16260_v32  ;;  %v19958_v23 = vld [vmem:[#allocation2 + $0x3c0] sm:$0xff]  ;;  %1179 = vst [vmem:[#allocation2 + $0x410] sm:$0xf] %v1178_v38  ;;  %v16271_v32 = vld [vmem:[%s20349_s1 + $0x12a8] sm:$0xff]   ;;  %v16279_v38 = vld [vmem:[%s20349_s1 + $0x12d8] sm:$0xff]  }
 0x329   :  { %v19932_v29 = vadd.f32 %v14627_v13, %v7787_v6  ;;  %v14646_v39 = vadd.f32 %v14645_v3, %v14644_v14  ;;  %15026 = vmatprep.subr.bf16.mxu0 %v16262_v42  ;;  %10163 = vmatprep.mubr.bf16.mxu0 %v13281_v2  ;;  %v16270_v13 = vld [vmem:[%s20349_s1 + $0x1228] sm:$0xff]  }
 0x32a   :  { %v14647_v40 = vpop.f32.mrf.mxu0  ;;  %v19945_v5 = vpop.f32.mrf.mxu1  ;;  %15381 = vmatmul.mubr.bf16.vlgmr.msra.gmra.mxu1 %v16259_v36  ;;  %v13280_v36 = vcombine.low %v19925_v0, %v19914_v43  ;;  %v19977_v3 = vld [vmem:[#allocation2 + $0x3e4] sm:$0xff] }
 0x32b   :  { %v7890_v24 = vadd.f32 %v14646_v39, %v19823_v1  ;;  %v16269_v1 = vld [vmem:[%s20349_s1 + $0x12e8] sm:$0xff]   ;;  %15065 = vmatpush3.bf16.msra.mxu1 %v16261_v60  ;;  %15384 = vmatprep.mubr.bf16.mxu1 %v16282_v34  ;;  %v16273_v39 = vld [vmem:[%s20349_s1 + $0x12e0] sm:$0xff]  }
 0x32c   :  { %v14648_v11 = vpop.f32.mrf.mxu0  ;;  %v7957_v50 = vpop.f32.mrf.mxu1  ;;  %15066 = vmatprep.subr.bf16.mxu1 %v16263_v35  ;;  %15027 = vmatpush3.bf16.msra.mxu0 %v16264_v33  ;;  %v1134_v60 = vld [vmem:[#allocation2 + $0x408] sm:$0x1]  ;;  %v16274_v33 = vld [vmem:[%s20349_s1 + $0x1220] sm:$0xff]  }
 0x32d   :  { %v7955_v15 = vadd.f32 %v7954_v19, %v7890_v24  ;;  %v14649_v55 = vadd.f32 %v14648_v11, %v14647_v40  ;;  %15028 = vmatprep.subr.bf16.mxu0 %v16268_v7  ;;  %v1135_v19 = vsel %vm16644_vm7, 0, %v1134_v60  ;;  %v13541_v40 = vcombine.low %v19958_v23, %v19977_v3  ;;  %v16287_v60 = vld [vmem:[%s20349_s1 + $0x1290] sm:$0xff]  }
 0x32e   :  { %v14650_v48 = vpop.f32.mrf.mxu0  ;;  %v19984_v30 = vpop.f32.mrf.mxu1  ;;  %1136 = vst [vmem:[#allocation2 + $0x408] sm:$0x1] %v1135_v19  ;;  %v16291_v19 = vld [vmem:[%s20349_s1 + $0x12c8] sm:$0xff]  }
 0x32f   :  { %v19964_v14 = vadd.f32 %v7955_v15, %v19644_v10  ;;  %v7893_v57 = vadd.f32 %v14649_v55, %v19834_v41  ;;  %v13290_v10 = vcombine.high %v19916_v22, %v19958_v23  ;;  %15067 = vmatpush3.bf16.msra.mxu1 %v16265_v27  ;;  %10164 = vmatmul.mubr.bf16.gmra.mxu0 %v13280_v36  ;;  %v1201_v7 = vld [vmem:[#allocation2 + $0x410] sm:$0x8] }
 0x330   :  { %v14651_v6 = vpop.f32.mrf.mxu0  ;;  %15068 = vmatprep.subr.bf16.mxu1 %v16269_v1  ;;  %15029 = vmatpush3.bf16.msra.mxu0 %v16270_v13  ;;  %v7970_v1 = vpop.f32.mrf.mxu1  ;;  %v13289_v55 = vcombine.low %v19916_v22, %v19958_v23 }
 0x331   :  { %v7958_v41 = vadd.f32 %v7957_v50, %v7893_v57  ;;  %v14652_v42 = vadd.f32 %v14651_v6, %v14650_v48  ;;  %10171 = vmatprep.mubr.bf16.mxu0 %v13290_v10  ;;  %15030 = vmatprep.subr.bf16.mxu0 %v16272_v4  ;;  %v16281_v50 = vld [vmem:[%s20349_s1 + $0x1298] sm:$0xff]   ;;  %v16285_v6 = vld [vmem:[%s20349_s1 + $0x12d0] sm:$0xff]  }
 0x332   :  { %v14653_v35 = vpop.f32.mrf.mxu0 }
 0x333   :  { %v19992_v2 = vadd.f32 %v7958_v41, %v19670_v9  ;;  %v7898_v24 = vadd.f32 %v14652_v42, %v19850_v56  ;;  %15069 = vmatpush3.bf16.msra.mxu1 %v16271_v32  ;;  %v16278_v9 = vld [vmem:[%s20349_s1 + $0x1258] sm:$0xff]   ;;  %v1202_v56 = vsel %vm16702_vm15, 0, %v1201_v7  ;;  %v20025_v32 = vpop.f32.mrf.mxu1  ;;  %v16290_v41 = vld [vmem:[%s20349_s1 + $0x1248] sm:$0xff]  }
 0x334   :  { %v14654_v27 = vpop.f32.mrf.mxu0  ;;  %15070 = vmatprep.subr.bf16.mxu1 %v16273_v39  ;;  %1203 = vst [vmem:[#allocation2 + $0x410] sm:$0x8] %v1202_v56  ;;  %15031 = vmatpush3.bf16.msra.mxu0 %v16274_v33  ;;  %v16300_v56 = vld [vmem:[#allocation2 + $0x31c] ss:$36 sps:$4 sm:$0xff]  }
 0x335   :  { %v7963_v34 = vadd.f32 %v19918_v53, %v7898_v24  ;;  %v14655_v54 = vadd.f32 %v14654_v27, %v14653_v35  ;;  %15032 = vmatprep.subr.bf16.mxu0 %v16278_v9  ;;  %v16292_v27 = vld [vmem:[%s20349_s1 + $0x1208] sm:$0xff]  }
 0x336   :  { %v14656_v11 = vpop.f32.mrf.mxu0 }
 0x337   :  { %v7901_v53 = vadd.f32 %v14655_v54, %v19866_v62  ;;  %v20009_v15 = vadd.f32 %v7963_v34, %v19619_v45  ;;  %15071 = vmatpush3.bf16.msra.mxu1 %v16275_v52  ;;  %v16284_v45 = vld [vmem:[%s20349_s1 + $0x1250] sm:$0xff]   ;;  %v20023_v62 = vld [vmem:[#allocation2 + $0x408] sm:$0xff]  ;;  %10172 = vmatmul.mubr.bf16.gmra.mxu0 %v13289_v55  ;;  %v7973_v52 = vpop.f32.mrf.mxu1 }
 0x338   :  { %v14657_v48 = vpop.f32.mrf.mxu0  ;;  %15072 = vmatprep.subr.bf16.mxu1 %v16279_v38  ;;  %v13299_v4 = vcombine.high %v19977_v3, %v20023_v62  ;;  %15033 = vmatpush3.bf16.msra.mxu0 %v16280_v21  ;;  %v13298_v34 = vcombine.low %v19977_v3, %v20023_v62  ;;  %v16293_v54 = vld [vmem:[%s20349_s1 + $0x1288] sm:$0xff]   ;;  %v16295_v38 = vld [vmem:[%s20349_s1 + $0x12c0] sm:$0xff]  }
 0x339   :  { %v7966_v13 = vadd.f32 %v19945_v5, %v7901_v53  ;;  %v14658_v57 = vadd.f32 %v14657_v48, %v14656_v11  ;;  %v16286_v5 = vld [vmem:[%s20349_s1 + $0x1210] sm:$0xff]   ;;  %15034 = vmatprep.subr.bf16.mxu0 %v16284_v45  ;;  %v16297_v48 = vld [vmem:[%s20349_s1 + $0x1280] sm:$0xff]   ;;  %v16305_v45 = vld [vmem:[%s20349_s1 + $0x1338] sm:$0xff]  }
 0x33a   :  { %v14659_v36 = vpop.f32.mrf.mxu0  ;;  %10179 = vmatprep.mubr.bf16.mxu0 %v13299_v4  ;;  %v16307_v4 = vld [vmem:[%s20349_s1 + $0x1370] sm:$0xff]  }
 0x33b   :  { %v7906_v10 = vadd.f32 %v14658_v57, %v19879_v12  ;;  %v20043_v39 = vadd.f32 %v7966_v13, %v19657_v31  ;;  %15073 = vmatpush3.bf16.msra.mxu1 %v16281_v50  ;;  %v16283_v33 = vld [vmem:[#allocation2 + $0x3ec] ss:$36 sps:$4 sm:$0xff]   ;;  %v16303_v50 = vld [vmem:[%s20349_s1 + $0x1378] sm:$0xff]  }
 0x33c   :  { %v14660_v42 = vpop.f32.mrf.mxu0  ;;  %15074 = vmatprep.subr.bf16.mxu1 %v16285_v6  ;;  %15385 = vmatmul.mubr.bf16.gmra.mxu1 %v16283_v33  ;;  %v16298_v13 = vld [vmem:[#allocation2 + $0x318] ss:$36 sps:$4 sm:$0xff]  }
 0x33d   :  { %v14661_v12 = vadd.f32 %v14660_v42, %v14659_v36  ;;  %v7971_v35 = vadd.f32 %v7970_v1, %v7906_v10  ;;  %15035 = vmatpush3.bf16.msra.mxu0 %v16286_v5  ;;  %11160 = vmatprep.mubr.bf16.mxu1 %v13520_v44  ;;  %v16296_v44 = vld [vmem:[%s20349_s1 + $0x1200] sm:$0xff]   ;;  %v16304_v57 = vld [vmem:[%s20349_s1 + $0x13f8] sm:$0xff]   ;;  %v16309_v42 = vld [vmem:[%s20349_s1 + $0x1330] sm:$0xff]  }
 0x33e   :  { %v14662_v24 = vpop.f32.mrf.mxu0  ;;  %15036 = vmatprep.subr.bf16.mxu0 %v16290_v41 }
 0x33f   :  { %v20052_v31 = vadd.f32 %v7971_v35, %v19693_v8  ;;  %v7909_v7 = vadd.f32 %v14661_v12, %v19898_v51  ;;  %15075 = vmatpush3.bf16.msra.mxu1 %v16287_v60  ;;  %v16294_v51 = vld [vmem:[%s20349_s1 + $0x1240] sm:$0xff]   ;;  %10180 = vmatmul.mubr.bf16.gmra.mxu0 %v13298_v34 }
 0x340   :  { %v14663_v9 = vpop.f32.mrf.mxu0  ;;  %15076 = vmatprep.subr.bf16.mxu1 %v16291_v19  ;;  %11095 = vmatprep.mubr.bf16.mxu0 %v16300_v56  ;;  %v16313_v19 = vld [vmem:[#allocation2 + $0x364] ss:$36 sps:$4 sm:$0xff]  }
 0x341   :  { %v14664_v11 = vadd.f32 %v14663_v9, %v14662_v24  ;;  %v7974_v8 = vadd.f32 %v7973_v52, %v7909_v7  ;;  %15037 = vmatpush3.bf16.msra.mxu0 %v16292_v27  ;;  %v16316_v24 = vld [vmem:[%s20349_s1 + $0x1368] sm:$0xff]  }
 0x342   :  { %v14665_v1 = vpop.f32.mrf.mxu0  ;;  %15038 = vmatprep.subr.bf16.mxu0 %v16294_v51  ;;  %v16317_v7 = vld [vmem:[%s20349_s1 + $0x13e8] sm:$0xff]  }
 0x343   :  { %v7914_v53 = vadd.f32 %v14664_v11, %v19906_v17  ;;  %v20071_v55 = vadd.f32 %v7974_v8, %v19719_v20  ;;  %15077 = vmatpush3.bf16.msra.mxu1 %v16293_v54  ;;  %v16319_v9 = vld [vmem:[%s20349_s1 + $0x13a8] sm:$0xff]   ;;  %v16320_v11 = vld [vmem:[%s20349_s1 + $0x1360] sm:$0xff]  }
 0x344   :  { %v14666_v21 = vpop.f32.mrf.mxu0  ;;  %15078 = vmatprep.subr.bf16.mxu1 %v16295_v38 }
 0x345   :  { %v7979_v17 = vadd.f32 %v19984_v30, %v7914_v53  ;;  %v14667_v20 = vadd.f32 %v14666_v21, %v14665_v1  ;;  %v16306_v30 = vld [vmem:[%s20349_s1 + $0x13b8] sm:$0xff]   ;;  %15039 = vmatpush3.bf16.msra.mxu0 %v16296_v44  ;;  %v16321_v1 = vld [vmem:[%s20349_s1 + $0x13e0] sm:$0xff]  }
 0x346   :  { %15104 = vmatprep.subr.bf16.mxu0 %v16303_v50  ;;  %v16322_v21 = vld [vmem:[%s20349_s1 + $0x1320] sm:$0xff]  }
 0x347   :  { %v7917_v36 = vadd.f32 %v14667_v20, %v19932_v29  ;;  %v14736_v6 = vpop.f32.mrf.mxu1  ;;  %v20091_v5 = vadd.f32 %v7979_v17, %v19681_v58  ;;  %15079 = vmatpush3.bf16.msra.mxu1 %v16297_v48  ;;  %v16308_v29 = vld [vmem:[%s20349_s1 + $0x13f0] sm:$0xff]   ;;  %v16323_v20 = vld [vmem:[%s20349_s1 + $0x13a0] sm:$0xff]  }
 0x348   :  { %15144 = vmatprep.subr.bf16.mxu1 %v16304_v57  ;;  %11096 = vmatmul.mubr.bf16.vlgmr.msra.gmra.mxu0 %v16298_v13  ;;  %v16386_v48 = vld [vmem:[#allocation2 + $0x3b0] sm:$0xff]  ;;  %v16324_v57 = vld [vmem:[#allocation2 + $0x3a8] ss:$36 sps:$4 sm:$0xff]  }
 0x349   :  { %v7982_v10 = vadd.f32 %v20025_v32, %v7917_v36  ;;  %v14737_v60 = vpop.f32.mrf.mxu1  ;;  %v16310_v32 = vld [vmem:[%s20349_s1 + $0x13b0] sm:$0xff]   ;;  %15105 = vmatpush3.bf16.msra.mxu0 %v16305_v45  ;;  %11103 = vmatprep.mubr.bf16.mxu0 %v16313_v19  ;;  %v13538_v50 = vcombine.high %v16386_v48, %v19881_v59  ;;  %v16329_v45 = vld [vmem:[%s20349_s1 + $0x1358] sm:$0xff]  }
 0x34a   :  { %v14696_v58 = vpop.f32.mrf.mxu0  ;;  %v14738_v41 = vadd.f32 %v14737_v60, %v14736_v6  ;;  %11161 = vmatmul.mubr.bf16.vlgmr.msra.gmra.mxu1 %v13519_v25  ;;  %15106 = vmatprep.subr.bf16.mxu0 %v16307_v4  ;;  %v16332_v60 = vld [vmem:[%s20349_s1 + $0x1398] sm:$0xff]   ;;  %v16334_v19 = vld [vmem:[%s20349_s1 + $0x13d0] sm:$0xff]  }
 0x34b   :  { %v14739_v12 = vpop.f32.mrf.mxu1  ;;  %v20107_v35 = vadd.f32 %v7982_v10, %v19711_v49  ;;  %15145 = vmatpush3.bf16.msra.mxu1 %v16306_v30  ;;  %v16311_v49 = vld [vmem:[#allocation2 + $0x360] ss:$36 sps:$4 sm:$0xff]   ;;  %11168 = vmatprep.mubr.bf16.mxu1 %v13529_v16  ;;  %v16326_v16 = vld [vmem:[#allocation2 + $0x3ac] ss:$36 sps:$4 sm:$0xff]   ;;  %v13537_v10 = vcombine.low %v16386_v48, %v19881_v59 }
 0x34c   :  { %v14697_v33 = vpop.f32.mrf.mxu0  ;;  %15146 = vmatprep.subr.bf16.mxu1 %v16308_v29  ;;  %v10292_v30 = vld [vmem:[#allocation2 + $0x3f0] sm:$0xff]  ;;  %v20171_v59 = vld [vmem:[#allocation2] sm:$0xff] }
 0x34d   :  { %v14698_v52 = vadd.f32 %v14697_v33, %v14696_v58  ;;  %v14740_v27 = vpop.f32.mrf.mxu1  ;;  %15107 = vmatpush3.bf16.msra.mxu0 %v16309_v42  ;;  %v16343_v48 = vld [vmem:[%s20349_s1 + $0x1300] sm:$0xff]  }
 0x34e   :  { %v14699_v34 = vpop.f32.mrf.mxu0  ;;  %v14741_v54 = vadd.f32 %v14740_v27, %v14739_v12  ;;  %15108 = vmatprep.subr.bf16.mxu0 %v16316_v24  ;;  %v13545_v12 = vcombine.high %v10292_v30, %v20171_v59  ;;  %v16335_v24 = vld [vmem:[%s20349_s1 + $0x1310] sm:$0xff]  }
 0x34f   :  { %v20124_v18 = vadd.f32 %v14738_v41, %v14698_v52  ;;  %v14742_v25 = vpop.f32.mrf.mxu1  ;;  %15147 = vmatpush3.bf16.msra.mxu1 %v16310_v32  ;;  %v16333_v41 = vld [vmem:[%s20349_s1 + $0x1350] sm:$0xff]   ;;  %v13547_v52 = vcombine.high %v19890_v47, %v20171_v59 }
 0x350   :  { %v14700_v56 = vpop.f32.mrf.mxu0  ;;  %15148 = vmatprep.subr.bf16.mxu1 %v16317_v7  ;;  %11104 = vmatmul.mubr.bf16.gmra.mxu0 %v16311_v49  ;;  %v16336_v49 = vld [vmem:[%s20349_s1 + $0x1390] sm:$0xff]  }
 0x351   :  { %v14701_v8 = vadd.f32 %v14700_v56, %v14699_v34  ;;  %v14743_v51 = vpop.f32.mrf.mxu1  ;;  %15109 = vmatpush3.bf16.msra.mxu0 %v16318_v37  ;;  %11111 = vmatprep.mubr.bf16.mxu0 %v16326_v16  ;;  %v16338_v37 = vld [vmem:[%s20349_s1 + $0x13c8] sm:$0xff]   ;;  %v16342_v16 = vld [vmem:[%s20349_s1 + $0x13c0] sm:$0xff]  }
 0x352   :  { %v14744_v38 = vadd.f32 %v14743_v51, %v14742_v25  ;;  %v14702_v17 = vpop.f32.mrf.mxu0  ;;  %11169 = vmatmul.mubr.bf16.gmra.mxu1 %v13528_v63  ;;  %15110 = vmatprep.subr.bf16.mxu0 %v16320_v11  ;;  %v16339_v56 = vld [vmem:[%s20349_s1 + $0x1308] sm:$0xff]   ;;  %v13546_v51 = vcombine.low %v19890_v47, %v20171_v59  ;;  %v13524_v47 = vcombine.high %v19877_v28, %v19925_v0 }
 0x353   :  { %v20138_v53 = vadd.f32 %v14741_v54, %v14701_v8  ;;  %v14745_v44 = vpop.f32.mrf.mxu1  ;;  %15149 = vmatpush3.bf16.msra.mxu1 %v16319_v9  ;;  %11176 = vmatprep.mubr.bf16.mxu1 %v13538_v50  ;;  %v16337_v54 = vld [vmem:[%s20349_s1 + $0x1348] sm:$0xff]   ;;  %v13544_v9 = vcombine.low %v10292_v30, %v20171_v59 }
 0x354   :  { %v14703_v36 = vpop.f32.mrf.mxu0  ;;  %15150 = vmatprep.subr.bf16.mxu1 %v16321_v1  ;;  %v16340_v11 = vld [vmem:[%s20349_s1 + $0x1388] sm:$0xff]   ;;  %v16341_v1 = vld [vmem:[%s20349_s1 + $0x1340] sm:$0xff]  }
 0x355   :  { %v14746_v13 = vpop.f32.mrf.mxu1  ;;  %v14704_v63 = vadd.f32 %v14703_v36, %v14702_v17  ;;  %15111 = vmatpush3.bf16.msra.mxu0 %v16322_v21  ;;  %v16344_v17 = vld [vmem:[%s20349_s1 + $0x1380] sm:$0xff]  }
 0x356   :  { %v14747_v6 = vadd.f32 %v14746_v13, %v14745_v44  ;;  %v14705_v4 = vpop.f32.mrf.mxu0  ;;  %15112 = vmatprep.subr.bf16.mxu0 %v16329_v45  ;;  %v16347_v44 = vld [vmem:[#allocation2 + $0x32c] ss:$36 sps:$4 sm:$0xff]   ;;  %v16350_v13 = vld [vmem:[%s20349_s1 + $0x1438] sm:$0xff]  }
 0x357   :  { %v20163_v29 = vadd.f32 %v14744_v38, %v14704_v63  ;;  %v14748_v58 = vpop.f32.mrf.mxu1  ;;  %15151 = vmatpush3.bf16.msra.mxu1 %v16323_v20  ;;  %v13523_v63 = vcombine.low %v19877_v28, %v19925_v0  ;;  %v16357_v0 = vld [vmem:[%s20349_s1 + $0x1428] sm:$0xff]  }
 0x358   :  { %v14706_v42 = vpop.f32.mrf.mxu0  ;;  %15152 = vmatprep.subr.bf16.mxu1 %v16330_v26  ;;  %11112 = vmatmul.mubr.bf16.gmra.mxu0 %v16324_v57 }
 0x359   :  { %v14707_v32 = vadd.f32 %v14706_v42, %v14705_v4  ;;  %v14749_v33 = vpop.f32.mrf.mxu1  ;;  %15113 = vmatpush3.bf16.msra.mxu0 %v16331_v61  ;;  %11119 = vmatprep.mubr.bf16.mxu0 %v13545_v12  ;;  %v16351_v4 = vld [vmem:[%s20349_s1 + $0x1430] sm:$0xff]  }
 0x35a   :  { %v14750_v27 = vadd.f32 %v14749_v33, %v14748_v58  ;;  %11177 = vmatmul.mubr.bf16.gmra.mxu1 %v13537_v10  ;;  %15114 = vmatprep.subr.bf16.mxu0 %v16333_v41  ;;  %v16354_v58 = vld [vmem:[#allocation2 + $0x374] ss:$36 sps:$4 sm:$0xff]   ;;  %v13533_v41 = vcombine.high %v19914_v43, %v19916_v22 }
 0x35b   :  { %v20182_v7 = vadd.f32 %v14747_v6, %v14707_v32  ;;  %v14751_v34 = vpop.f32.mrf.mxu1  ;;  %15153 = vmatpush3.bf16.msra.mxu1 %v16332_v60  ;;  %11184 = vmatprep.mubr.bf16.mxu1 %v13547_v52  ;;  %v16345_v6 = vld [vmem:[#allocation2 + $0x328] ss:$36 sps:$4 sm:$0xff]   ;;  %v16352_v12 = vld [vmem:[#allocation2 + $0x370] ss:$36 sps:$4 sm:$0xff]  }
 0x35c   :  { %15154 = vmatprep.subr.bf16.mxu1 %v16334_v19 }
 0x35d   :  { %v14752_v25 = vpop.f32.mrf.mxu1  ;;  %15115 = vmatpush3.bf16.msra.mxu0 %v16335_v24 }
 0x35e   :  { %v14753_v8 = vadd.f32 %v14752_v25, %v14751_v34  ;;  %v14708_v38 = vpop.f32.mrf.mxu0  ;;  %15116 = vmatprep.subr.bf16.mxu0 %v16337_v54 }
 0x35f   :  { %15155 = vmatpush3.bf16.msra.mxu1 %v16336_v49 }
 0x360   :  { %15156 = vmatprep.subr.bf16.mxu1 %v16338_v37  ;;  %v14709_v21 = vpop.f32.mrf.mxu0  ;;  %11120 = vmatmul.mubr.bf16.gmra.mxu0 %v13544_v9 }
 0x361   :  { %v14710_v50 = vadd.f32 %v14709_v21, %v14708_v38  ;;  %15117 = vmatpush3.bf16.msra.mxu0 %v16339_v56  ;;  %11225 = vmatprep.mubr.bf16.mxu0 %v16347_v44 }
 0x362   :  { %11185 = vmatmul.mubr.bf16.gmra.mxu1 %v13546_v51  ;;  %v14711_v20 = vpop.f32.mrf.mxu0  ;;  %15118 = vmatprep.subr.bf16.mxu0 %v16341_v1  ;;  %v14754_v45 = vpop.f32.mrf.mxu1 }
 0x363   :  { %15157 = vmatpush3.bf16.msra.mxu1 %v16340_v11  ;;  %v20216_v57 = vadd.f32 %v14750_v27, %v14710_v50  ;;  %11290 = vmatprep.mubr.bf16.mxu1 %v13524_v47 }
 0x364   :  { %15158 = vmatprep.subr.bf16.mxu1 %v16342_v16  ;;  %v14712_v36 = vpop.f32.mrf.mxu0  ;;  %v14755_v61 = vpop.f32.mrf.mxu1 }
 0x365   :  { %v14713_v26 = vadd.f32 %v14712_v36, %v14711_v20  ;;  %15119 = vmatpush3.bf16.msra.mxu0 %v16343_v48  ;;  %v14756_v30 = vadd.f32 %v14755_v61, %v14754_v45 }
 0x366   :  { %15388 = vmatprep.subr.bf16.mxu0 %v16350_v13  ;;  %v14757_v60 = vpop.f32.mrf.mxu1 }
 0x367   :  { %15159 = vmatpush3.bf16.msra.mxu1 %v16344_v17  ;;  %v20223_v10 = vadd.f32 %v14753_v8, %v14713_v26 }
 0x368   :  { %15412 = vmatprep.subr.bf16.mxu1 %v16350_v13  ;;  %11226 = vmatmul.mubr.bf16.vlgmr.msra.gmra.mxu0 %v16345_v6  ;;  %v14758_v42 = vpop.f32.mrf.mxu1 }
 0x369   :  { %15389 = vmatpush3.bf16.msra.mxu0 %v16350_v13  ;;  %v14759_v28 = vadd.f32 %v14758_v42, %v14757_v60  ;;  %v14714_v19 = vpop.f32.mrf.mxu0  ;;  %11233 = vmatprep.mubr.bf16.mxu0 %v16354_v58 }
 0x36a   :  { %11291 = vmatmul.mubr.bf16.vlgmr.msra.gmra.mxu1 %v13523_v63  ;;  %15390 = vmatprep.subr.bf16.mxu0 %v16351_v4 }
 0x36b   :  { %15420 = vmatpush3.bf16.msra.mxu1 %v16350_v13  ;;  %11298 = vmatprep.mubr.bf16.mxu1 %v13533_v41  ;;  %v14715_v32 = vpop.f32.mrf.mxu0 }
 0x36c   :  { %15413 = vmatprep.subr.bf16.mxu1 %v16351_v4 }
 0x36d   :  { %13 = vsyncpa [#allocation6], 0  ;;  %15391 = vmatpush3.bf16.msra.mxu0 %v16351_v4  ;;  %v14716_v33 = vadd.f32 %v14715_v32, %v14714_v19  ;;  %v16358_v24 = vld [vmem:[%s20349_s1 + $0x1420] sm:$0xff]   ;;  %v14717_v52 = vpop.f32.mrf.mxu0  ;;  %v14816_v27 = vpop.f32.mrf.mxu1  ;;  %v13542_v54 = vcombine.high %v19958_v23, %v19977_v3  ;;  %v16364_v11 = vld [vmem:[%s20349_s1 + $0x1418] sm:$0xff]   ;;  %v13551_v20 = vcombine.high %v20023_v62, %v20171_v59 }
 0x36e   :  { %15392 = vmatprep.subr.bf16.mxu0 %v16357_v0  ;;  %v16361_v49 = vld [vmem:[#allocation2 + $0x3bc] ss:$36 sps:$4 sm:$0xff]   ;;  %v16365_v21 = vld [vmem:[%s20349_s1 + $0x1410] sm:$0xff]   ;;  %v16369_v19 = vld [vmem:[#allocation2 + $0x3c8] ss:$36 sps:$4 sm:$0xff]  }
 0x36f   :  { %15421 = vmatpush3.bf16.msra.mxu1 %v16351_v4  ;;  %v20233_v34 = vadd.f32 %v14756_v30, %v14716_v33  ;;  %v14718_v37 = vpop.f32.mrf.mxu0  ;;  %v14817_v25 = vpop.f32.mrf.mxu1  ;;  %v16359_v38 = vld [vmem:[#allocation2 + $0x3b8] ss:$36 sps:$4 sm:$0xff]   ;;  %v10294_v16 = vld [vmem:[#allocation2 + $0x400] sm:$0xff]  ;;  %v13550_v4 = vcombine.low %v20023_v62, %v20171_v59 }
 0x370   :  { %15414 = vmatprep.subr.bf16.mxu1 %v16357_v0  ;;  %11234 = vmatmul.mubr.bf16.gmra.mxu0 %v16352_v12  ;;  %v14719_v9 = vadd.f32 %v14718_v37, %v14717_v52  ;;  %v14818_v56 = vadd.f32 %v14817_v25, %v14816_v27  ;;  %v13549_v50 = vcombine.high %v10294_v16, %v20171_v59  ;;  %v16367_v42 = vld [vmem:[%s20349_s1 + $0x1400] sm:$0xff]   ;;  %v16371_v37 = vld [vmem:[#allocation2 + $0x410] ss:$36 sps:$4 sm:$0xff]  }
 0x371   :  { %15393 = vmatpush3.bf16.msra.mxu0 %v16357_v0  ;;  %v14776_v8 = vpop.f32.mrf.mxu0  ;;  %v14819_v51 = vpop.f32.mrf.mxu1  ;;  %11241 = vmatprep.mubr.bf16.mxu0 %v16361_v49  ;;  %v13548_v23 = vcombine.low %v10294_v16, %v20171_v59  ;;  %v16370_v49 = vld [vmem:[#allocation2 + $0x380] ss:$36 sps:$4 sm:$0xff]  }
 0x372   :  { %11299 = vmatmul.mubr.bf16.gmra.mxu1 %v13532_v46  ;;  %15394 = vmatprep.subr.bf16.mxu0 %v16358_v24  ;;  %v20243_v1 = vadd.f32 %v14759_v28, %v14719_v9  ;;  %v16368_v28 = vld [vmem:[#allocation2 + $0x338] ss:$36 sps:$4 sm:$0xff]  }
 0x373   :  { %15422 = vmatpush3.bf16.msra.mxu1 %v16357_v0  ;;  %11306 = vmatprep.mubr.bf16.mxu1 %v13542_v54  ;;  %v14777_v43 = vpop.f32.mrf.mxu0  ;;  %v14820_v22 = vpop.f32.mrf.mxu1 }
 0x374   :  { %15415 = vmatprep.subr.bf16.mxu1 %v16358_v24  ;;  %v14778_v46 = vadd.f32 %v14777_v43, %v14776_v8  ;;  %v14821_v44 = vadd.f32 %v14820_v22, %v14819_v51 }
 0x375   :  { %15395 = vmatpush3.bf16.msra.mxu0 %v16358_v24  ;;  %v14779_v48 = vpop.f32.mrf.mxu0  ;;  %v14822_v47 = vpop.f32.mrf.mxu1 }
 0x376   :  { %15396 = vmatprep.subr.bf16.mxu0 %v16364_v11  ;;  %v8959_v17 = vadd.f32 %v14778_v46, %v20124_v18  ;;  %v16366_v18 = vld [vmem:[%s20349_s1 + $0x1408] sm:$0xff]   ;;  %s16453_s1 = smov [#allocation3]  }
 0x377   :  { %15423 = vmatpush3.bf16.msra.mxu1 %v16358_v24  ;;  %v14780_v13 = vpop.f32.mrf.mxu0  ;;  %v14823_v45 = vpop.f32.mrf.mxu1  ;;  %s11453_s3 = sshll.u32 %s16453_s1, 4  ;;  %s11454_s3 = int_to_ptr.vmem [resolvable:$true] %s11453_s3 }
 0x378   :  { %15416 = vmatprep.subr.bf16.mxu1 %v16364_v11  ;;  %11242 = vmatmul.mubr.bf16.gmra.mxu0 %v16359_v38  ;;  %v14781_v36 = vadd.f32 %v14780_v13, %v14779_v48  ;;  %v14824_v6 = vadd.f32 %v14823_v45, %v14822_v47  ;;  %v20255_v26 = vadd.f32 %v14818_v56, %v8959_v17  ;;  %s16388_s25 = scalar_lea.vmem %s11454_s3, 512  ;;  %p16393_p1 = scmp.lt.s32.totalorder %s11454_s3, %s11454_s3 }
 0x379   :  { %15397 = vmatpush3.bf16.msra.mxu0 %v16364_v11  ;;  %v14782_v61 = vpop.f32.mrf.mxu0  ;;  %v14825_v63 = vpop.f32.mrf.mxu1  ;;  %11249 = vmatprep.mubr.bf16.mxu0 %v13549_v50  ;;  %p16389_p0 = scmp.ne.s32.totalorder %s11454_s3, %s16388_s25  ;;  %p16394_p2 = scmp.lt.s32.totalorder %s16388_s25, %s16388_s25 }
 0x37a   :  { %11307 = vmatmul.mubr.bf16.gmra.mxu1 %v13541_v40  ;;  %15398 = vmatprep.subr.bf16.mxu0 %v16365_v21  ;;  %v8962_v30 = vadd.f32 %v14781_v36, %v20138_v53 }
 0x37b   :  { %15424 = vmatpush3.bf16.msra.mxu1 %v16364_v11  ;;  %11314 = vmatprep.mubr.bf16.mxu1 %v13551_v20  ;;  %v14783_v3 = vpop.f32.mrf.mxu0  ;;  %v14826_v40 = vpop.f32.mrf.mxu1  ;;  %p16395_p3 = por %p16394_p2, %p16393_p1 }
 0x37c   :  { %15417 = vmatprep.subr.bf16.mxu1 %v16365_v21  ;;  %v14784_v60 = vadd.f32 %v14783_v3, %v14782_v61  ;;  %v14827_v58 = vadd.f32 %v14826_v40, %v14825_v63  ;;  %v20264_v41 = vadd.f32 %v14821_v44, %v8962_v30 }
 0x37d   :  { %15399 = vmatpush3.bf16.msra.mxu0 %v16365_v21  ;;  %v14785_v53 = vpop.f32.mrf.mxu0  ;;  %v14828_v32 = vpop.f32.mrf.mxu1  ;;  %p16396_p4 = pnand %p16395_p3, %p16389_p0 }
 0x37e   :  { %15400 = vmatprep.subr.bf16.mxu0 %v16366_v18  ;;  %v8967_v0 = vadd.f32 %v14784_v60, %v20163_v29 }
 0x37f   :  { %15425 = vmatpush3.bf16.msra.mxu1 %v16365_v21  ;;  %v14786_v12 = vpop.f32.mrf.mxu0  ;;  %v14829_v24 = vpop.f32.mrf.mxu1 }
 0x380   :  { %15418 = vmatprep.subr.bf16.mxu1 %v16366_v18  ;;  %11250 = vmatmul.mubr.bf16.gmra.mxu0 %v13548_v23  ;;  %v14787_v62 = vadd.f32 %v14786_v12, %v14785_v53  ;;  %v9032_v59 = vadd.f32 %v14824_v6, %v8967_v0  ;;  %v14830_v27 = vadd.f32 %v14829_v24, %v14828_v32 }
 0x381   :  { %15401 = vmatpush3.bf16.msra.mxu0 %v16366_v18  ;;  %v14788_v33 = vpop.f32.mrf.mxu0  ;;  %15404 = vmatprep.mubr.bf16.mxu0 %v16368_v28  ;;  %v14831_v54 = vpop.f32.mrf.mxu1 }
 0x382   :  { %11315 = vmatmul.mubr.bf16.gmra.mxu1 %v13550_v4  ;;  %15402 = vmatprep.subr.bf16.mxu0 %v16367_v42  ;;  %v8970_v52 = vadd.f32 %v14787_v62, %v20182_v7 }
 0x383   :  { %15426 = vmatpush3.bf16.msra.mxu1 %v16366_v18  ;;  %15408 = vmatprep.mubr.bf16.mxu1 %v16369_v19  ;;  %v14789_v29 = vpop.f32.mrf.mxu0  ;;  %v14832_v11 = vpop.f32.mrf.mxu1 }
 0x384   :  { %15419 = vmatprep.subr.bf16.mxu1 %v16367_v42  ;;  %v14790_v25 = vadd.f32 %v14789_v29, %v14788_v33  ;;  %v9035_v9 = vadd.f32 %v14827_v58, %v8970_v52  ;;  %v14833_v51 = vadd.f32 %v14832_v11, %v14831_v54 }
 0x385   :  { %15403 = vmatpush3.bf16.msra.mxu0 %v16367_v42  ;;  %v14791_v56 = vpop.f32.mrf.mxu0  ;;  %v14834_v7 = vpop.f32.mrf.mxu1 }
 0x386   :  { %v8975_v8 = vadd.f32 %v14790_v25, %v20216_v57 }
 0x387   :  { %15427 = vmatpush3.bf16.msra.mxu1 %v16367_v42  ;;  %v14792_v38 = vpop.f32.mrf.mxu0  ;;  %v14835_v44 = vpop.f32.mrf.mxu1 }
 0x388   :  { %15405 = vmatmul.mubr.bf16.vlgmr.msra.gmra.mxu0 %v16370_v49  ;;  %v14793_v16 = vadd.f32 %v14792_v38, %v14791_v56  ;;  %v9040_v43 = vadd.f32 %v14830_v27, %v8975_v8  ;;  %v14836_v48 = vadd.f32 %v14835_v44, %v14834_v7 }
 0x389   :  { %v14794_v22 = vpop.f32.mrf.mxu0  ;;  %v14837_v50 = vpop.f32.mrf.mxu1 }
 0x38a   :  { %15409 = vmatmul.mubr.bf16.vlgmr.msra.gmra.mxu1 %v16371_v37  ;;  %v8978_v46 = vadd.f32 %v14793_v16, %v20223_v10 }
 0x38b   :  { %v14795_v21 = vpop.f32.mrf.mxu0  ;;  %v14838_v57 = vpop.f32.mrf.mxu1 }
 0x38c   :  { %v14796_v47 = vadd.f32 %v14795_v21, %v14794_v22  ;;  %v9043_v17 = vadd.f32 %v14833_v51, %v8978_v46  ;;  %v14839_v36 = vadd.f32 %v14838_v57, %v14837_v50 }
 0x38d   :  { %v14797_v20 = vpop.f32.mrf.mxu0  ;;  %v14868_v18 = vpop.f32.mrf.mxu1 }
 0x38e   :  { %v8983_v13 = vadd.f32 %v14796_v47, %v20233_v34 }
 0x38f   :  { %v14798_v45 = vpop.f32.mrf.mxu0  ;;  %v14869_v30 = vpop.f32.mrf.mxu1 }
 0x390   :  { %v14799_v6 = vadd.f32 %v14798_v45, %v14797_v20  ;;  %v9048_v61 = vadd.f32 %v14836_v48, %v8983_v13  ;;  %v14870_v23 = vadd.f32 %v14869_v30, %v14868_v18 }
 0x391   :  { %v14871_v10 = vpop.f32.mrf.mxu1 }
 0x392   :  { %v8986_v63 = vadd.f32 %v14799_v6, %v20243_v1 }
 0x393   :  { %v14872_v40 = vpop.f32.mrf.mxu1 }
 0x394   :  { %v9051_v3 = vadd.f32 %v14839_v36, %v8986_v63  ;;  %v14873_v60 = vadd.f32 %v14872_v40, %v14871_v10 }
 0x395   :  { %v15358_v4 = vpop.f32.mrf.mxu0  ;;  %v14874_v42 = vpop.f32.mrf.mxu1 }
 0x396   :  { %v9097_v58 = vadd.f32 %v15358_v4, %v9032_v59 }
 0x397   :  { %v9088_v53 = vpop.f32.mrf.mxu0  ;;  %v14875_v0 = vpop.f32.mrf.mxu1 }
 0x398   :  { %v20276_v34 = vadd.f32 %v9097_v58, %v20009_v15  ;;  %v9089_v28 = vadd.f32 %v9088_v53, %v20255_v26  ;;  %v14876_v12 = vadd.f32 %v14875_v0, %v14874_v42 }
 0x399   :  { %v15359_v19 = vpop.f32.mrf.mxu0  ;;  %v14877_v62 = vpop.f32.mrf.mxu1 }
 0x39a   :  { %v20280_v1 = vadd.f32 %v9089_v28, %v19964_v14  ;;  %v9100_v32 = vadd.f32 %v15359_v19, %v9035_v9 }
 0x39b   :  { %v9091_v33 = vpop.f32.mrf.mxu0  ;;  %v14878_v52 = vpop.f32.mrf.mxu1 }
 0x39c   :  { %v20283_v24 = vadd.f32 %v9100_v32, %v20043_v39  ;;  %v9092_v59 = vadd.f32 %v9091_v33, %v20264_v41  ;;  %v14879_v27 = vadd.f32 %v14878_v52, %v14877_v62 }
 0x39d   :  { %v14880_v26 = vpop.f32.mrf.mxu1 }
 0x39e   :  { %v20287_v15 = vadd.f32 %v9092_v59, %v19992_v2 }
 0x39f   :  { %v14881_v49 = vpop.f32.mrf.mxu1 }
 0x3a0   :  { %v14882_v29 = vadd.f32 %v14881_v49, %v14880_v26 }
 0x3a1   :  { %v14883_v37 = vpop.f32.mrf.mxu1 }
 0x3a3   :  { %v14884_v9 = vpop.f32.mrf.mxu1 }
 0x3a4   :  { %v14885_v11 = vadd.f32 %v14884_v9, %v14883_v37 }
 0x3a5   :  { %v15362_v54 = vpop.f32.mrf.mxu0 }
 0x3a6   :  { %v9113_v14 = vadd.f32 %v15362_v54, %v9048_v61 }
 0x3a7   :  { %v9104_v25 = vpop.f32.mrf.mxu0 }
 0x3a8   :  { %v20290_v56 = vadd.f32 %v9113_v14, %v20091_v5  ;;  %v9105_v39 = vadd.f32 %v9104_v25, %v9040_v43 }
 0x3a9   :  { %v15363_v8 = vpop.f32.mrf.mxu0 }
 0x3aa   :  { %v20293_v41 = vadd.f32 %v9105_v39, %v20052_v31  ;;  %v9116_v51 = vadd.f32 %v15363_v8, %v9051_v3 }
 0x3ab   :  { %v9107_v2 = vpop.f32.mrf.mxu0 }
 0x3ac   :  { %v20296_v38 = vadd.f32 %v9116_v51, %v20107_v35  ;;  %v9108_v16 = vadd.f32 %v9107_v2, %v9043_v17 }
 0x3ae   :  { %v20299_v7 = vadd.f32 %v9108_v16, %v20071_v55 }
 0x3b6   :  { %v14908_v22 = vpop.f32.mrf.mxu0 }
 0x3b8   :  { %v14909_v46 = vpop.f32.mrf.mxu0 }
 0x3b9   :  { %v14910_v44 = vadd.f32 %v14909_v46, %v14908_v22 }
 0x3ba   :  { %v14911_v5 = vpop.f32.mrf.mxu0 }
 0x3bb   :  { %v10028_v21 = vadd.f32 %v14910_v44, %v14870_v23 }
 0x3bc   :  { %v14912_v43 = vpop.f32.mrf.mxu0 }
 0x3bd   :  { %v14913_v48 = vadd.f32 %v14912_v43, %v14911_v5 }
 0x3be   :  { %v14914_v50 = vpop.f32.mrf.mxu0 }
 0x3bf   :  { %v10031_v31 = vadd.f32 %v14913_v48, %v14873_v60 }
 0x3c0   :  { %v14915_v13 = vpop.f32.mrf.mxu0 }
 0x3c1   :  { %v14916_v45 = vadd.f32 %v14915_v13, %v14914_v50 }
 0x3c2   :  { %v14886_v47 = vpop.f32.mrf.mxu1  ;;  %v14917_v36 = vpop.f32.mrf.mxu0 }
 0x3c3   :  { %v10036_v17 = vadd.f32 %v14916_v45, %v14876_v12 }
 0x3c4   :  { %v14887_v20 = vpop.f32.mrf.mxu1  ;;  %v14918_v55 = vpop.f32.mrf.mxu0 }
 0x3c5   :  { %v14888_v57 = vadd.f32 %v14887_v20, %v14886_v47  ;;  %v14919_v61 = vadd.f32 %v14918_v55, %v14917_v36 }
 0x3c6   :  { %v14889_v35 = vpop.f32.mrf.mxu1  ;;  %v14920_v30 = vpop.f32.mrf.mxu0 }
 0x3c7   :  { %v10039_v10 = vadd.f32 %v14919_v61, %v14879_v27 }
 0x3c8   :  { %v14890_v6 = vpop.f32.mrf.mxu1  ;;  %v14921_v3 = vpop.f32.mrf.mxu0 }
 0x3c9   :  { %v14891_v18 = vadd.f32 %v14890_v6, %v14889_v35  ;;  %v14922_v4 = vadd.f32 %v14921_v3, %v14920_v30 }
 0x3ca   :  { %v14948_v63 = vpop.f32.mrf.mxu1  ;;  %v14923_v60 = vpop.f32.mrf.mxu0 }
 0x3cb   :  { %v10044_v53 = vadd.f32 %v14922_v4, %v14882_v29 }
 0x3cc   :  { %v14949_v23 = vpop.f32.mrf.mxu1  ;;  %v14924_v0 = vpop.f32.mrf.mxu0 }
 0x3cd   :  { %v14950_v40 = vadd.f32 %v14949_v23, %v14948_v63  ;;  %v14925_v32 = vadd.f32 %v14924_v0, %v14923_v60 }
 0x3ce   :  { %v14951_v58 = vpop.f32.mrf.mxu1 }
 0x3cf   :  { %v10093_v42 = vadd.f32 %v14950_v40, %v10028_v21  ;;  %v10047_v33 = vadd.f32 %v14925_v32, %v14885_v11 }
 0x3d0   :  { %v14952_v28 = vpop.f32.mrf.mxu1 }
 0x3d1   :  { %v14953_v19 = vadd.f32 %v14952_v28, %v14951_v58 }
 0x3d2   :  { %v14954_v12 = vpop.f32.mrf.mxu1 }
 0x3d3   :  { %v10096_v62 = vadd.f32 %v14953_v19, %v10031_v31 }
 0x3d4   :  { %v14955_v59 = vpop.f32.mrf.mxu1 }
 0x3d5   :  { %v14956_v52 = vadd.f32 %v14955_v59, %v14954_v12 }
 0x3d6   :  { %v14957_v26 = vpop.f32.mrf.mxu1 }
 0x3d7   :  { %v10101_v49 = vadd.f32 %v14956_v52, %v10036_v17 }
 0x3d8   :  { %v14958_v27 = vpop.f32.mrf.mxu1 }
 0x3d9   :  { %v14959_v54 = vadd.f32 %v14958_v27, %v14957_v26 }
 0x3da   :  { %v14960_v37 = vpop.f32.mrf.mxu1 }
 0x3db   :  { %v10104_v14 = vadd.f32 %v14959_v54, %v10039_v10 }
 0x3dc   :  { %v14961_v25 = vpop.f32.mrf.mxu1 }
 0x3dd   :  { %v14962_v9 = vadd.f32 %v14961_v25, %v14960_v37 }
 0x3de   :  { %v14963_v39 = vpop.f32.mrf.mxu1 }
 0x3df   :  { %v10109_v8 = vadd.f32 %v14962_v9, %v10044_v53  ;;  %v14926_v51 = vpop.f32.mrf.mxu0 }
 0x3e0   :  { %v14964_v29 = vpop.f32.mrf.mxu1 }
 0x3e1   :  { %v14965_v2 = vadd.f32 %v14964_v29, %v14963_v39  ;;  %v14927_v46 = vpop.f32.mrf.mxu0 }
 0x3e2   :  { %v14966_v16 = vpop.f32.mrf.mxu1  ;;  %v14928_v44 = vadd.f32 %v14927_v46, %v14926_v51 }
 0x3e3   :  { %v10112_v22 = vadd.f32 %v14965_v2, %v10047_v33  ;;  %v14929_v5 = vpop.f32.mrf.mxu0 }
 0x3e4   :  { %v14967_v11 = vpop.f32.mrf.mxu1  ;;  %v10052_v43 = vadd.f32 %v14928_v44, %v14888_v57 }
 0x3e5   :  { %v14968_v21 = vadd.f32 %v14967_v11, %v14966_v16  ;;  %v14930_v47 = vpop.f32.mrf.mxu0 }
 0x3e6   :  { %v14969_v48 = vpop.f32.mrf.mxu1  ;;  %v14931_v31 = vadd.f32 %v14930_v47, %v14929_v5 }
 0x3e7   :  { %v10117_v50 = vadd.f32 %v14968_v21, %v10052_v43  ;;  %v14988_v45 = vpop.f32.mrf.mxu0 }
 0x3e8   :  { %v14970_v20 = vpop.f32.mrf.mxu1  ;;  %v10055_v35 = vadd.f32 %v14931_v31, %v14891_v18 }
 0x3e9   :  { %v14971_v13 = vadd.f32 %v14970_v20, %v14969_v48  ;;  %v14989_v17 = vpop.f32.mrf.mxu0 }
 0x3ea   :  { %v15382_v36 = vpop.f32.mrf.mxu1  ;;  %v14990_v55 = vadd.f32 %v14989_v17, %v14988_v45 }
 0x3eb   :  { %v10120_v6 = vadd.f32 %v14971_v13, %v10055_v35  ;;  %v14991_v63 = vpop.f32.mrf.mxu0 }
 0x3ec   :  { %v10222_v61 = vpop.f32.mrf.mxu1  ;;  %v10158_v30 = vadd.f32 %v14990_v55, %v10093_v42 }
 0x3ed   :  { %v14992_v23 = vpop.f32.mrf.mxu0 }
 0x3ee   :  { %v15383_v10 = vpop.f32.mrf.mxu1  ;;  %v10223_v3 = vadd.f32 %v10222_v61, %v10158_v30  ;;  %v14993_v40 = vadd.f32 %v14992_v23, %v14991_v63 }
 0x3ef   :  { %v14994_v57 = vpop.f32.mrf.mxu0 }
 0x3f0   :  { %v10225_v4 = vpop.f32.mrf.mxu1  ;;  %v20302_v58 = vadd.f32 %v10223_v3, %v20280_v1  ;;  %v10161_v60 = vadd.f32 %v14993_v40, %v10096_v62 }
 0x3f1   :  { %v14995_v53 = vpop.f32.mrf.mxu0 }
 0x3f2   :  { %20404 = vst [vmem:[#allocation12_spill] sm:$0xff] %v20302_v58  ;;  %v10226_v28 = vadd.f32 %v10225_v4, %v10161_v60  ;;  %v14996_v18 = vadd.f32 %v14995_v53, %v14994_v57 }
 0x3f3   :  { %v14997_v0 = vpop.f32.mrf.mxu0 }
 0x3f4   :  { %v20305_v19 = vadd.f32 %v10226_v28, %v20287_v15  ;;  %v10166_v32 = vadd.f32 %v14996_v18, %v10101_v49 }
 0x3f5   :  { %v14998_v12 = vpop.f32.mrf.mxu0 }
 0x3f6   :  { %20405 = vst [vmem:[#allocation13_spill] sm:$0xff] %v20305_v19  ;;  %v10231_v42 = vadd.f32 %v15382_v36, %v10166_v32  ;;  %v14999_v33 = vadd.f32 %v14998_v12, %v14997_v0 }
 0x3f7   :  { %v15000_v59 = vpop.f32.mrf.mxu0 }
 0x3f8   :  { %v10169_v52 = vadd.f32 %v14999_v33, %v10104_v14  ;;  %v20308_v26 = vadd.f32 %v10231_v42, %v20276_v34 }
 0x3f9   :  { %v15001_v27 = vpop.f32.mrf.mxu0 }
 0x3fa   :  { %20406 = vst [vmem:[#allocation18_spill] sm:$0xff] %v20308_v26  ;;  %v10234_v1 = vadd.f32 %v15383_v10, %v10169_v52  ;;  %v15002_v54 = vadd.f32 %v15001_v27, %v15000_v59 }
 0x3fb   :  { %v15003_v62 = vpop.f32.mrf.mxu0 }
 0x3fc   :  { %v15386_v37 = vpop.f32.mrf.mxu1  ;;  %v10174_v25 = vadd.f32 %v15002_v54, %v10109_v8  ;;  %v20311_v9 = vadd.f32 %v10234_v1, %v20283_v24 }
 0x3fd   :  { %v15004_v15 = vpop.f32.mrf.mxu0 }
 0x3fe   :  { %20407 = vst [vmem:[#allocation14_spill] sm:$0xff] %v20311_v9  ;;  %v10238_v39 = vpop.f32.mrf.mxu1  ;;  %v15005_v49 = vadd.f32 %v15004_v15, %v15003_v62 }
 0x3ff   :  { %v10239_v29 = vadd.f32 %v10238_v39, %v10174_v25  ;;  %v15006_v51 = vpop.f32.mrf.mxu0 }
 0x400   :  { %v15387_v2 = vpop.f32.mrf.mxu1  ;;  %v10177_v34 = vadd.f32 %v15005_v49, %v10112_v22 }
 0x401   :  { %v20314_v14 = vadd.f32 %v10239_v29, %v20293_v41  ;;  %v15007_v16 = vpop.f32.mrf.mxu0 }
 0x402   :  { %v10241_v46 = vpop.f32.mrf.mxu1  ;;  %v15008_v44 = vadd.f32 %v15007_v16, %v15006_v51 }
 0x403   :  { %20408 = vst [vmem:[#allocation15_spill] sm:$0xff] %v20314_v14  ;;  %v10242_v11 = vadd.f32 %v10241_v46, %v10177_v34  ;;  %v15009_v5 = vpop.f32.mrf.mxu0 }
 0x404   :  { %v10182_v21 = vadd.f32 %v15008_v44, %v10117_v50 }
 0x405   :  { %v20317_v8 = vadd.f32 %v10242_v11, %v20299_v7  ;;  %v15010_v24 = vpop.f32.mrf.mxu0 }
 0x406   :  { %v10247_v43 = vadd.f32 %v15386_v37, %v10182_v21  ;;  %v15011_v48 = vadd.f32 %v15010_v24, %v15009_v5 }
 0x407   :  { %20409 = vst [vmem:[#allocation16_spill] sm:$0xff] %v20317_v8 }
 0x408   :  { %v15040_v47 = vpop.f32.mrf.mxu0  ;;  %v10185_v31 = vadd.f32 %v15011_v48, %v10120_v6  ;;  %v20320_v13 = vadd.f32 %v10247_v43, %v20290_v56 }
 0x40a   :  { %v15080_v20 = vpop.f32.mrf.mxu1  ;;  %20410 = vst [vmem:[#allocation17_spill] sm:$0xff] %v20320_v13  ;;  %v15041_v41 = vpop.f32.mrf.mxu0  ;;  %v10250_v22 = vadd.f32 %v15387_v2, %v10185_v31 }
 0x40b   :  { %v15042_v24 = vadd.f32 %v15041_v41, %v15040_v47 }
 0x40c   :  { %v15081_v45 = vpop.f32.mrf.mxu1  ;;  %v15043_v35 = vpop.f32.mrf.mxu0  ;;  %v20323_v17 = vadd.f32 %v10250_v22, %v20296_v38 }
 0x40d   :  { %v15082_v43 = vadd.f32 %v15081_v45, %v15080_v20 }
 0x40e   :  { %v15083_v36 = vpop.f32.mrf.mxu1  ;;  %20411 = vst [vmem:[#allocation11_spill] sm:$0xff] %v20323_v17  ;;  %v15044_v50 = vpop.f32.mrf.mxu0 }
 0x40f   :  { %v11163_v9 = vadd.f32 %v15082_v43, %v15042_v24  ;;  %v15045_v58 = vadd.f32 %v15044_v50, %v15043_v35 }
 0x410   :  { %v15084_v7 = vpop.f32.mrf.mxu1  ;;  %v15046_v55 = vpop.f32.mrf.mxu0 }
 0x412   :  { %v15086_v61 = vpop.f32.mrf.mxu1  ;;  %v15047_v63 = vpop.f32.mrf.mxu0 }
 0x413   :  { %v15048_v31 = vadd.f32 %v15047_v63, %v15046_v55 }
 0x414   :  { %v15087_v30 = vpop.f32.mrf.mxu1  ;;  %v15049_v10 = vpop.f32.mrf.mxu0 }
 0x415   :  { %v15088_v22 = vadd.f32 %v15087_v30, %v15086_v61 }
 0x416   :  { %v15089_v6 = vpop.f32.mrf.mxu1  ;;  %v15050_v23 = vpop.f32.mrf.mxu0 }
 0x417   :  { %v11171_v41 = vadd.f32 %v15088_v22, %v15048_v31  ;;  %v15051_v47 = vadd.f32 %v15050_v23, %v15049_v10 }
 0x418   :  { %v15090_v3 = vpop.f32.mrf.mxu1  ;;  %v15052_v56 = vpop.f32.mrf.mxu0 }
 0x419   :  { %v15091_v20 = vadd.f32 %v15090_v3, %v15089_v6 }
 0x41a   :  { %v15092_v40 = vpop.f32.mrf.mxu1  ;;  %v15053_v57 = vpop.f32.mrf.mxu0 }
 0x41b   :  { %v15054_v55 = vadd.f32 %v15053_v57, %v15052_v56  ;;  %v11174_v31 = vadd.f32 %v15091_v20, %v15051_v47 }
 0x41c   :  { %v15093_v4 = vpop.f32.mrf.mxu1  ;;  %v15055_v60 = vpop.f32.mrf.mxu0 }
 0x41d   :  { %v15094_v63 = vadd.f32 %v15093_v4, %v15092_v40 }
 0x41e   :  { %v15095_v53 = vpop.f32.mrf.mxu1  ;;  %v15056_v28 = vpop.f32.mrf.mxu0 }
 0x41f   :  { %v15057_v30 = vadd.f32 %v15056_v28, %v15055_v60  ;;  %v11179_v60 = vadd.f32 %v15094_v63, %v15054_v55 }
 0x420   :  { %v15096_v18 = vpop.f32.mrf.mxu1  ;;  %v15058_v38 = vpop.f32.mrf.mxu0 }
 0x422   :  { %v15098_v0 = vpop.f32.mrf.mxu1  ;;  %v15059_v32 = vpop.f32.mrf.mxu0 }
 0x423   :  { %v15060_v19 = vadd.f32 %v15059_v32, %v15058_v38  ;;  %v15097_v38 = vadd.f32 %v15096_v18, %v15095_v53 }
 0x424   :  { %v15099_v12 = vpop.f32.mrf.mxu1  ;;  %v15061_v42 = vpop.f32.mrf.mxu0 }
 0x425   :  { %v15100_v17 = vadd.f32 %v15099_v12, %v15098_v0 }
 0x426   :  { %v15101_v33 = vpop.f32.mrf.mxu1  ;;  %v15062_v59 = vpop.f32.mrf.mxu0 }
 0x427   :  { %v11187_v0 = vadd.f32 %v15100_v17, %v15060_v19  ;;  %v15063_v12 = vadd.f32 %v15062_v59, %v15061_v42  ;;  %v11182_v19 = vadd.f32 %v15097_v38, %v15057_v30  ;;  %v20417_v38 = vld [vmem:[#allocation12_spill] sm:$0xff] }
 0x428   :  { %v15102_v52 = vpop.f32.mrf.mxu1  ;;  %v15120_v27 = vpop.f32.mrf.mxu0 }
 0x429   :  { %v15103_v24 = vadd.f32 %v15102_v52, %v15101_v33 }
 0x42a   :  { %v15160_v1 = vpop.f32.mrf.mxu1  ;;  %v15121_v54 = vpop.f32.mrf.mxu0 }
 0x42b   :  { %v15122_v26 = vadd.f32 %v15121_v54, %v15120_v27  ;;  %v11190_v17 = vadd.f32 %v15103_v24, %v15063_v12 }
 0x42c   :  { %v15161_v62 = vpop.f32.mrf.mxu1  ;;  %v15123_v37 = vpop.f32.mrf.mxu0 }
 0x42d   :  { %v11228_v35 = vadd.f32 %v15122_v26, %v11163_v9  ;;  %v15162_v50 = vadd.f32 %v15161_v62, %v15160_v1 }
 0x42e   :  { %v20325_v25 = vpop.f32.mrf.mxu1  ;;  %v15124_v15 = vpop.f32.mrf.mxu0 }
 0x42f   :  { %20412 = vst [vmem:[#allocation10_spill] sm:$0xff] %v20325_v25  ;;  %v15085_v25 = vadd.f32 %v15084_v7, %v15083_v36  ;;  %v15125_v3 = vadd.f32 %v15124_v15, %v15123_v37  ;;  %v11293_v33 = vadd.f32 %v15162_v50, %v11228_v35  ;;  %v20420_v50 = vld [vmem:[#allocation11_spill] sm:$0xff] }
 0x430   :  { %v20327_v39 = vpop.f32.mrf.mxu1  ;;  %v15126_v49 = vpop.f32.mrf.mxu0 }
 0x431   :  { %20413 = vst [vmem:[#allocation19_spill] sm:$0xff] %v20327_v39  ;;  %v11166_v36 = vadd.f32 %v15085_v25, %v15045_v58 }
 0x432   :  { %v15166_v29 = vpop.f32.mrf.mxu1  ;;  %v15127_v51 = vpop.f32.mrf.mxu0 }
 0x433   :  { %v15128_v61 = vadd.f32 %v15127_v51, %v15126_v49  ;;  %v11231_v37 = vadd.f32 %v15125_v3, %v11166_v36  ;;  %v20421_v36 = vld [vmem:[#allocation13_spill] sm:$0xff]  ;;  %v20423_v3 = vld [vmem:[#allocation16_spill] sm:$0xff] }
 0x434   :  { %v15167_v2 = vpop.f32.mrf.mxu1  ;;  %v15129_v34 = vpop.f32.mrf.mxu0 }
 0x435   :  { %v11236_v56 = vadd.f32 %v15128_v61, %v11171_v41  ;;  %v15168_v40 = vadd.f32 %v15167_v2, %v15166_v29  ;;  %v20416_v61 = vld [vmem:[#allocation18_spill] sm:$0xff] }
 0x436   :  { %v15169_v16 = vpop.f32.mrf.mxu1  ;;  %v15130_v46 = vpop.f32.mrf.mxu0  ;;  %v20414_v25 = vld [vmem:[#allocation10_spill] sm:$0xff] }
 0x437   :  { %v15131_v27 = vadd.f32 %v15130_v46, %v15129_v34  ;;  %v11301_v51 = vadd.f32 %v15168_v40, %v11236_v56 }
 0x438   :  { %v15170_v44 = vpop.f32.mrf.mxu1  ;;  %v15132_v11 = vpop.f32.mrf.mxu0  ;;  %v20415_v15 = vld [vmem:[#allocation19_spill] sm:$0xff] }
 0x439   :  { %v11239_v26 = vadd.f32 %v15131_v27, %v11174_v31  ;;  %v15171_v9 = vadd.f32 %v15170_v44, %v15169_v16  ;;  %v15165_v49 = vadd.f32 %v20415_v15, %v20414_v25 }
 0x43a   :  { %v15172_v5 = vpop.f32.mrf.mxu1  ;;  %v15133_v21 = vpop.f32.mrf.mxu0 }
 0x43b   :  { %v15134_v10 = vadd.f32 %v15133_v21, %v15132_v11  ;;  %v11304_v11 = vadd.f32 %v15171_v9, %v11239_v26  ;;  %v11296_v20 = vadd.f32 %v15165_v49, %v11231_v37 }
 0x43c   :  { %v15173_v48 = vpop.f32.mrf.mxu1  ;;  %v15135_v8 = vpop.f32.mrf.mxu0 }
 0x43d   :  { %v11244_v58 = vadd.f32 %v15134_v10, %v11179_v60  ;;  %v15174_v59 = vadd.f32 %v15173_v48, %v15172_v5  ;;  %v20422_v10 = vld [vmem:[#allocation15_spill] sm:$0xff] }
 0x43e   :  { %v15175_v14 = vpop.f32.mrf.mxu1  ;;  %v15136_v13 = vpop.f32.mrf.mxu0 }
 0x43f   :  { %v15137_v53 = vadd.f32 %v15136_v13, %v15135_v8  ;;  %v11309_v5 = vadd.f32 %v15174_v59, %v11244_v58 }
 0x440   :  { %v15176_v39 = vpop.f32.mrf.mxu1  ;;  %v15138_v45 = vpop.f32.mrf.mxu0 }
 0x441   :  { %v11247_v34 = vadd.f32 %v15137_v53, %v11182_v19  ;;  %v15177_v8 = vadd.f32 %v15176_v39, %v15175_v14  ;;  %v20418_v39 = vld [vmem:[#allocation14_spill] sm:$0xff] }
 0x442   :  { %v15178_v32 = vpop.f32.mrf.mxu1  ;;  %v15139_v43 = vpop.f32.mrf.mxu0 }
 0x443   :  { %v15140_v54 = vadd.f32 %v15139_v43, %v15138_v45  ;;  %v11312_v30 = vadd.f32 %v15177_v8, %v11247_v34  ;;  %v20419_v43 = vld [vmem:[#allocation17_spill] sm:$0xff] }
 0x444   :  { %v15179_v7 = vpop.f32.mrf.mxu1  ;;  %v15141_v23 = vpop.f32.mrf.mxu0 }
 0x445   :  { %v15180_v6 = vadd.f32 %v15179_v7, %v15178_v32  ;;  %v11252_v57 = vadd.f32 %v15140_v54, %v11187_v0 }
 0x446   :  { %v15181_v4 = vpop.f32.mrf.mxu1  ;;  %v15142_v28 = vpop.f32.mrf.mxu0 }
 0x447   :  { %v15143_v18 = vadd.f32 %v15142_v28, %v15141_v23  ;;  %v11317_v62 = vadd.f32 %v15180_v6, %v11252_v57 }
 0x448   :  { %v15182_v42 = vpop.f32.mrf.mxu1  ;;  %v15406_v1 = vpop.f32.mrf.mxu0 }
 0x449   :  { %v15183_v52 = vadd.f32 %v15182_v42, %v15181_v4  ;;  %v11255_v29 = vadd.f32 %v15143_v18, %v11190_v17  ;;  %v11366_v46 = vadd.f32 %v15406_v1, %v11301_v51 }
 0x44a   :  { %v15410_v2 = vpop.f32.mrf.mxu1  ;;  %v11357_v13 = vpop.f32.mrf.mxu0 }
 0x44b   :  { %v11358_v16 = vadd.f32 %v11357_v13, %v11293_v33  ;;  %v11320_v21 = vadd.f32 %v15183_v52, %v11255_v29  ;;  %v11382_v22 = vadd.f32 %v15410_v2, %v11317_v62  ;;  %v11390_v32 = vadd.f32 %v11366_v46, %v20416_v61 }
 0x44c   :  { %v11373_v44 = vpop.f32.mrf.mxu1  ;;  %v15407_v48 = vpop.f32.mrf.mxu0 }
 0x44d   :  { %v11369_v41 = vadd.f32 %v15407_v48, %v11304_v11  ;;  %v11374_v45 = vadd.f32 %v11373_v44, %v11309_v5  ;;  %v11388_v14 = vadd.f32 %v11358_v16, %v20417_v38  ;;  %v11394_v35 = vadd.f32 %v11382_v22, %v20419_v43 }
 0x44e   :  { %v15411_v47 = vpop.f32.mrf.mxu1  ;;  %v11360_v63 = vpop.f32.mrf.mxu0  ;;  %v11412_v17 = vmul.f32 %v11390_v32, %v11390_v32 }
 0x44f   :  { %v11385_v55 = vadd.f32 %v15411_v47, %v11320_v21  ;;  %v11391_v0 = vadd.f32 %v11369_v41, %v20418_v39  ;;  %v11361_v12 = vadd.f32 %v11360_v63, %v11296_v20  ;;  %v11392_v6 = vadd.f32 %v11374_v45, %v20422_v10 }
 0x450   :  { %v11376_v24 = vpop.f32.mrf.mxu1  ;;  %v11410_v40 = vmul.f32 %v11388_v14, %v11388_v14 }
 0x451   :  { %v11395_v27 = vadd.f32 %v11385_v55, %v20420_v50  ;;  %v11377_v54 = vadd.f32 %v11376_v24, %v11312_v30  ;;  %v13633_v7 = vpack.c.bf16 %v11391_v0, %v11390_v32  ;;  %v11389_v31 = vadd.f32 %v11361_v12, %v20421_v36 }
 0x452   :  { %v11413_v26 = vmul.f32 %v11391_v0, %v11391_v0 }
 0x453   :  { %v13643_v23 = vpack.c.bf16 %v11395_v27, %v11394_v35  ;;  %v11393_v56 = vadd.f32 %v11377_v54, %v20423_v3  ;;  %13645 = vst [vmem:[#allocation3 + $0x8] sm:$0xff] %v13633_v7   ;;  %v11396_v57 = vadd.f32 %v11389_v31, %v11388_v14  ;;  %v11411_v4 = vmul.f32 %v11389_v31, %v11389_v31 }
 0x454   :  { %v13628_v60 = vpack.c.bf16 %v11389_v31, %v11388_v14 }
 0x455   :  { %13647 = vst [vmem:[#allocation3 + $0x18] sm:$0xff] %v13643_v23   ;;  %v13638_v19 = vpack.c.bf16 %v11393_v56, %v11392_v6  ;;  %v11397_v53 = vadd.f32 %v11396_v57, %v11390_v32  ;;  %v11418_v28 = vadd.f32 %v11411_v4, %v11410_v40 }
 0x456   :  { %13629 = vst [vmem:[#allocation3] sm:$0xff] %v13628_v60  }
 0x457   :  { %13646 = vst [vmem:[#allocation3 + $0x10] sm:$0xff] %v13638_v19   ;;  %v11419_v9 = vadd.f32 %v11418_v28, %v11412_v17  ;;  %v11398_v18 = vadd.f32 %v11397_v53, %v11391_v0 }
 0x458   :  { %16399 = shalt.err (!%p16396_p4)
}
 0x459   :  { %s16454_s26 = smov 64   ;;  %s16455_s27 = smov 4   ;;  %v11414_v42 = vmul.f32 %v11392_v6, %v11392_v6  ;;  %v11399_v33 = vadd.f32 %v11398_v18, %v11392_v6  ;;  %v11420_v58 = vadd.f32 %v11419_v9, %v11413_v26  ;;  %v11415_v52 = vmul.f32 %v11393_v56, %v11393_v56 }
 0x45a   :  { %11459 = dma.vmem_to_hbm [thread:$0]  %s11454_s3, 512, %s20352_s4, [#allocation4], %s16454_s26, %s16454_s26, %s16455_s27   ;;  %v11416_v62 = vmul.f32 %v11394_v35, %v11394_v35  ;;  %v11417_v15 = vmul.f32 %v11395_v27, %v11395_v27 }
 0x45b   :  { %v11400_v59 = vadd.f32 %v11399_v33, %v11393_v56  ;;  %v11421_v1 = vadd.f32 %v11420_v58, %v11414_v42  ;;  %s16456_s4 = smov [#allocation5]   ;;  %s16457_s7 = smov [#allocation7]  }
 0x45c   :  { %s11466_s30 = sshll.u32 %s16456_s4, 4  ;;  %s11476_s8 = sshll.u32 %s16457_s7, 4  ;;  %s11467_s30 = int_to_ptr.vmem [resolvable:$true] %s11466_s30  ;;  %s11477_s8 = int_to_ptr.vmem [resolvable:$true] %s11476_s8 }
 0x45d   :  { %v11401_v37 = vadd.f32 %v11400_v59, %v11394_v35  ;;  %v11422_v25 = vadd.f32 %v11421_v1, %v11415_v52  ;;  %s16408_s9 = scalar_lea.vmem %s11467_s30, 16  ;;  %s16412_s10 = scalar_lea.vmem %s11467_s30, 32 }
 0x45e   :  { %p16409_p5 = scmp.ne.s32.totalorder %s11467_s30, %s16408_s9  ;;  %p16413_p6 = scmp.lt.s32.totalorder %s11467_s30, %s11467_s30 }
 0x45f   :  { %v11402_v49 = vadd.f32 %v11401_v37, %v11395_v27  ;;  %v11423_v29 = vadd.f32 %v11422_v25, %v11416_v62  ;;  %p16414_p7 = scmp.lt.s32.totalorder %s16412_s10, %s16408_s9 }
 0x461   :  { %v11403_v51 = vrot.slane %v11402_v49, 4  ;;  %v11424_v2 = vadd.f32 %v11423_v29, %v11417_v15  ;;  %p16415_p8 = por %p16414_p7, %p16413_p6 }
 0x463   :  { %v11404_v34 = vadd.f32 %v11403_v51, %v11402_v49  ;;  %v11425_v8 = vrot.slane %v11424_v2, 4  ;;  %p16416_p9 = pnand %p16415_p8, %p16409_p5 }
 0x465   :  { %v11405_v13 = vrot.slane %v11404_v34, 2  ;;  %v11426_v46 = vadd.f32 %v11425_v8, %v11424_v2 }
 0x467   :  { %v11406_v16 = vadd.f32 %v11405_v13, %v11404_v34  ;;  %v11427_v44 = vrot.slane %v11426_v46, 2 }
 0x469   :  { %v11407_v11 = vrot.slane %v11406_v16, 1  ;;  %v11428_v21 = vadd.f32 %v11427_v44, %v11426_v46 }
 0x46b   :  { %v11408_v22 = vadd.f32 %v11407_v11, %v11406_v16  ;;  %v11429_v5 = vrot.slane %v11428_v21, 1 }
 0x46d   :  { %11409 = vst [vmem:[#allocation5] sm:$0x1] %v11408_v22  ;;  %v11430_v48 = vadd.f32 %v11429_v5, %v11428_v21 }
 0x46e   :  { %16419 = shalt.err (!%p16416_p9)
}
 0x46f   :  { %11469 = dma.vmem_to_hbm [thread:$0]  %s11467_s30, 16, %s20353_s5, [#allocation6]   ;;  %11431 = vst [vmem:[#allocation7] sm:$0x1] %v11430_v48 }
 0x470   :  { %s16428_s13 = scalar_lea.vmem %s11477_s8, 16  ;;  %s16432_s14 = scalar_lea.vmem %s11477_s8, 32 }
 0x471   :  { %p16429_p10 = scmp.ne.s32.totalorder %s11477_s8, %s16428_s13  ;;  %p16433_p11 = scmp.lt.s32.totalorder %s11477_s8, %s11477_s8 }
 0x472   :  { %p16434_p12 = scmp.lt.s32.totalorder %s16432_s14, %s16428_s13 }
 0x474   :  { %p16435_p13 = por %p16434_p12, %p16433_p11 }
 0x476   :  { %p16436_p0 = pnand %p16435_p13, %p16429_p10 }
 0x478   :  { %16439 = shalt.err (!%p16436_p0)
}
 0x479   :  { %11479 = dma.vmem_to_hbm [thread:$0]  %s11477_s8, 16, %s20354_s6, [#allocation6]  }
 0x47a   :  { %16448 = dma.done.wait [#allocation4], 512  }
 0x47b   :  { %16449 = vsyncadd [#allocation4], 4294966784 }
 0x47c   :  { %16450 = dma.done.wait [#allocation6], 32  }
 0x47d   :  { %16451 = vsyncadd [#allocation6], 4294967264 }
 0x47e   :  { %11489 = vsyncpa [#allocation4], 1 }
 0x47f   :  { %11490 = vsyncpa [#allocation6], 1 }

</bundles_post_ra>
